<compile_context>
chip_gen: v7x
topology: tpu7x:2x2x1
jax: 0.10.0
libtpu: 0.0.40
codegen_flags: <defaults>
</compile_context>

<pallas_src>
import jax
import jax.numpy as jnp
from jax.experimental import pallas as pl
from jax.experimental.pallas import tpu as pltpu

_RP = 8     # sublane-aligned top halo offset inside the padded scratch window
_LP = 128   # lane-aligned left halo offset inside the padded scratch window


def _fused_inpaint_kernel(img_ref, mask_ref, w_ref, b_ref, out_ref, xp_ref):
    """One batch element per grid step: masking + mask3 + 3x3 SAME conv in VMEM."""
    C, H, W = img_ref.shape
    Cin = 2 * C
    Cout = out_ref.shape[0]

    # ---- fused masking (no HBM round-trip for masked/mask3) -----------------
    #   masked = img * (1 - m) + m ; mask3 = 1 - m  (broadcast over C channels)
    xp_ref[...] = jnp.zeros_like(xp_ref)            # zero halo ring + body
    m = mask_ref[0]                                  # (H, W)
    inv = 1.0 - m
    for c in range(C):
        xp_ref[c, _RP:_RP + H, _LP:_LP + W] = img_ref[c] * inv + m   # masked image
        xp_ref[C + c, _RP:_RP + H, _LP:_LP + W] = inv                # masks3

    # ---- 3x3 SAME conv, spatial W on the lane axis ---------------------------
    # Channel counts are tiny (Cin=6, Cout=3) -> VPU tap accumulation with
    # scalar weights from SMEM; every tap is a static sub-slice of the single
    # resident padded window (no per-tap reshapes crossing (8,128) tiles).
    # TODO(synk): for very large H, add an H-row-tile grid axis (halo'd manual
    # DMA) and an im2col (Cout, 9*Cin) x (9*Cin, W_tile) MXU contraction.
    accs = [jnp.zeros((H, W), jnp.float32) for _ in range(Cout)]
    for dy in range(3):
        for dx in range(3):
            r0 = _RP - 1 + dy
            c0 = _LP - 1 + dx
            for ci in range(Cin):
                xt = xp_ref[ci, r0:r0 + H, c0:c0 + W]          # (H, W)
                base = ((dy * 3 + dx) * Cin + ci) * Cout
                for co in range(Cout):
                    accs[co] = accs[co] + w_ref[base + co] * xt
    for co in range(Cout):
        out_ref[co] = (accs[co] + b_ref[co]).astype(out_ref.dtype)


def inpainting_forward(images, edges, masks, gen_w, gen_b):
    """images (B,3,H,W) f32, masks (B,1,H,W) f32 -> outputs (B,3,H,W) f32.

    `edges` is accepted for signature parity with the PyTorch forward but is
    unused there (only masked_images and masks3 reach the generator).
    """
    del edges
    B, C, H, W = images.shape
    Cout = gen_w.shape[-1]
    w_flat = gen_w.reshape(-1).astype(jnp.float32)   # (3*3*2C*Cout,), (dy,dx,ci,co)
    b_flat = gen_b.reshape(-1).astype(jnp.float32)

    # Per-step VMEM budget: img/mask/out blocks (double-buffered) + scratch.
    elem = 4
    block_bytes = elem * H * W * (C + 1 + Cout)
    scratch_bytes = elem * (2 * C) * (H + 2 * _RP) * (W + 2 * _LP)
    vmem_limit = max(16 * 1024 * 1024,
                     min(4 * block_bytes + scratch_bytes + (4 << 20),
                         128 * 1024 * 1024))

    return pl.pallas_call(
        _fused_inpaint_kernel,
        out_shape=jax.ShapeDtypeStruct((B, Cout, H, W), jnp.float32),
        grid=(B,),
        in_specs=[
            pl.BlockSpec((None, C, H, W), lambda b: (b, 0, 0, 0)),   # images
            pl.BlockSpec((None, 1, H, W), lambda b: (b, 0, 0, 0)),   # masks (1ch)
            pl.BlockSpec(memory_space=pltpu.MemorySpace.SMEM),       # conv weights
            pl.BlockSpec(memory_space=pltpu.MemorySpace.SMEM),       # conv bias
        ],
        out_specs=pl.BlockSpec((None, Cout, H, W), lambda b: (b, 0, 0, 0)),
        scratch_shapes=[
            pltpu.VMEM((2 * C, H + 2 * _RP, W + 2 * _LP), jnp.float32),
        ],
        compiler_params=pltpu.CompilerParams(
            dimension_semantics=("parallel",),
            vmem_limit_bytes=int(vmem_limit),
        ),
    )(images, masks, w_flat, b_flat)


if __name__ == "__main__":
    key = jax.random.PRNGKey(0)
    k_img, k_msk, k_w, k_b = jax.random.split(key, 4)

    B, C, H, W = 2, 3, 16, 16
    images = jax.random.uniform(k_img, (B, C, H, W), jnp.float32)
    masks = (jax.random.uniform(k_msk, (B, 1, H, W)) > 0.5).astype(jnp.float32)
    edges = jnp.zeros((B, 1, H, W), jnp.float32)   # unused by forward (parity only)

    Cin, Cout = 2 * C, C                            # generator sees image ++ mask3
    gen_w = jax.random.normal(k_w, (3, 3, Cin, Cout), jnp.float32) * 0.1
    gen_b = jax.random.normal(k_b, (Cout,), jnp.float32) * 0.01

    outputs = inpainting_forward(images, edges, masks, gen_w, gen_b)
    jax.block_until_ready(outputs)
    assert outputs.shape == (B, Cout, H, W)

    # Pure-JAX reference check of the same semantics.
    mb = jnp.broadcast_to(masks, (B, C, H, W))
    masked_ref = images * (1.0 - mb) + mb
    mask3_ref = 1.0 - mb
    xin = jnp.concatenate([masked_ref, mask3_ref], axis=1)
    ref = jax.lax.conv_general_dilated(
        xin, jnp.transpose(gen_w, (3, 2, 0, 1)), (1, 1), "SAME",
        dimension_numbers=("NCHW", "OIHW", "NCHW"),
    ) + gen_b.reshape(1, Cout, 1, 1)
    err = float(jnp.max(jnp.abs(outputs - ref)))
    assert jnp.allclose(outputs, ref, atol=1e-4), err

    print("KERNEL_OK")
</pallas_src>

<mosaic_0001>
module attributes {stable_mosaic.version = 11 : i64} {
  func.func @_fused_inpaint_kernel(%arg0: i32, %arg1: memref<1x3x16x16xf32, #tpu.memory_space<vmem>>, %arg2: memref<1x1x16x16xf32, #tpu.memory_space<vmem>>, %arg3: memref<162xf32, #tpu.memory_space<smem>>, %arg4: memref<3xf32, #tpu.memory_space<smem>>, %arg5: memref<1x3x16x16xf32, #tpu.memory_space<vmem>>, %arg6: memref<6x32x272xf32, #tpu.memory_space<vmem>>) attributes {dimension_semantics = [#tpu.dimension_semantics<parallel>], iteration_bounds = array<i64: 2>, scalar_prefetch = 0 : i64, scratch_operands = 1 : i64, tpu.core_type = #tpu.core_type<tc>, window_params = [{transform_indices = @transform_0, window_bounds = array<i64: 1, 3, 16, 16>}, {transform_indices = @transform_1, window_bounds = array<i64: 1, 1, 16, 16>}, {transform_indices = @transform_2, window_bounds = array<i64: 162>}, {transform_indices = @transform_3, window_bounds = array<i64: 3>}, {transform_indices = @transform_4, window_bounds = array<i64: 1, 3, 16, 16>}]} {
    %cst = arith.constant 0.000000e+00 : f32
    %0 = vector.broadcast %cst : f32 to vector<6x32x272xf32>
    %c0 = arith.constant 0 : index
    %c0_0 = arith.constant 0 : index
    %c0_1 = arith.constant 0 : index
    %1 = vector.load %arg6[%c0, %c0_0, %c0_1] : memref<6x32x272xf32, #tpu.memory_space<vmem>>, vector<6x32x272xf32>
    tpu.vector_store %arg6[%c0, %c0_0, %c0_1], %0 {strides = array<i32>} : memref<6x32x272xf32, #tpu.memory_space<vmem>>, vector<6x32x272xf32>,
    %c0_2 = arith.constant 0 : index
    %c0_3 = arith.constant 0 : index
    %c0_4 = arith.constant 0 : index
    %c0_5 = arith.constant 0 : index
    %2 = vector.load %arg2[%c0_2, %c0_3, %c0_4, %c0_5] : memref<1x1x16x16xf32, #tpu.memory_space<vmem>>, vector<1x1x16x16xf32>
    %3 = vector.shape_cast %2 : vector<1x1x16x16xf32> to vector<16x16xf32>
    %cst_6 = arith.constant 1.000000e+00 : f32
    %4 = vector.broadcast %cst_6 : f32 to vector<16x16xf32>
    %5 = arith.subf %4, %3 : vector<16x16xf32>
    %c0_7 = arith.constant 0 : index
    %c0_8 = arith.constant 0 : index
    %c0_9 = arith.constant 0 : index
    %c0_10 = arith.constant 0 : index
    %6 = vector.load %arg1[%c0_7, %c0_8, %c0_9, %c0_10] : memref<1x3x16x16xf32, #tpu.memory_space<vmem>>, vector<1x1x16x16xf32>
    %7 = vector.shape_cast %6 : vector<1x1x16x16xf32> to vector<16x16xf32>
    %8 = arith.mulf %7, %5 : vector<16x16xf32>
    %9 = arith.addf %8, %3 : vector<16x16xf32>
    %c0_11 = arith.constant 0 : index
    %c8 = arith.constant 8 : index
    %c128 = arith.constant 128 : index
    %10 = vector.load %arg6[%c0_11, %c8, %c128] : memref<6x32x272xf32, #tpu.memory_space<vmem>>, vector<1x16x16xf32>
    %11 = vector.shape_cast %10 : vector<1x16x16xf32> to vector<16x16xf32>
    %12 = vector.shape_cast %9 : vector<16x16xf32> to vector<1x16x16xf32>
    tpu.vector_store %arg6[%c0_11, %c8, %c128], %12 {strides = array<i32>} : memref<6x32x272xf32, #tpu.memory_space<vmem>>, vector<1x16x16xf32>,
    %c3 = arith.constant 3 : index
    %c8_12 = arith.constant 8 : index
    %c128_13 = arith.constant 128 : index
    %13 = vector.load %arg6[%c3, %c8_12, %c128_13] : memref<6x32x272xf32, #tpu.memory_space<vmem>>, vector<1x16x16xf32>
    %14 = vector.shape_cast %13 : vector<1x16x16xf32> to vector<16x16xf32>
    %15 = vector.shape_cast %5 : vector<16x16xf32> to vector<1x16x16xf32>
    tpu.vector_store %arg6[%c3, %c8_12, %c128_13], %15 {strides = array<i32>} : memref<6x32x272xf32, #tpu.memory_space<vmem>>, vector<1x16x16xf32>,
    %c0_14 = arith.constant 0 : index
    %c1 = arith.constant 1 : index
    %c0_15 = arith.constant 0 : index
    %c0_16 = arith.constant 0 : index
    %16 = vector.load %arg1[%c0_14, %c1, %c0_15, %c0_16] : memref<1x3x16x16xf32, #tpu.memory_space<vmem>>, vector<1x1x16x16xf32>
    %17 = vector.shape_cast %16 : vector<1x1x16x16xf32> to vector<16x16xf32>
    %18 = arith.mulf %17, %5 : vector<16x16xf32>
    %19 = arith.addf %18, %3 : vector<16x16xf32>
    %c1_17 = arith.constant 1 : index
    %c8_18 = arith.constant 8 : index
    %c128_19 = arith.constant 128 : index
    %20 = vector.load %arg6[%c1_17, %c8_18, %c128_19] : memref<6x32x272xf32, #tpu.memory_space<vmem>>, vector<1x16x16xf32>
    %21 = vector.shape_cast %20 : vector<1x16x16xf32> to vector<16x16xf32>
    %22 = vector.shape_cast %19 : vector<16x16xf32> to vector<1x16x16xf32>
    tpu.vector_store %arg6[%c1_17, %c8_18, %c128_19], %22 {strides = array<i32>} : memref<6x32x272xf32, #tpu.memory_space<vmem>>, vector<1x16x16xf32>,
    %c4 = arith.constant 4 : index
    %c8_20 = arith.constant 8 : index
    %c128_21 = arith.constant 128 : index
    %23 = vector.load %arg6[%c4, %c8_20, %c128_21] : memref<6x32x272xf32, #tpu.memory_space<vmem>>, vector<1x16x16xf32>
    %24 = vector.shape_cast %23 : vector<1x16x16xf32> to vector<16x16xf32>
    %25 = vector.shape_cast %5 : vector<16x16xf32> to vector<1x16x16xf32>
    tpu.vector_store %arg6[%c4, %c8_20, %c128_21], %25 {strides = array<i32>} : memref<6x32x272xf32, #tpu.memory_space<vmem>>, vector<1x16x16xf32>,
    %c0_22 = arith.constant 0 : index
    %c2 = arith.constant 2 : index
    %c0_23 = arith.constant 0 : index
    %c0_24 = arith.constant 0 : index
    %26 = vector.load %arg1[%c0_22, %c2, %c0_23, %c0_24] : memref<1x3x16x16xf32, #tpu.memory_space<vmem>>, vector<1x1x16x16xf32>
    %27 = vector.shape_cast %26 : vector<1x1x16x16xf32> to vector<16x16xf32>
    %28 = arith.mulf %27, %5 : vector<16x16xf32>
    %29 = arith.addf %28, %3 : vector<16x16xf32>
    %c2_25 = arith.constant 2 : index
    %c8_26 = arith.constant 8 : index
    %c128_27 = arith.constant 128 : index
    %30 = vector.load %arg6[%c2_25, %c8_26, %c128_27] : memref<6x32x272xf32, #tpu.memory_space<vmem>>, vector<1x16x16xf32>
    %31 = vector.shape_cast %30 : vector<1x16x16xf32> to vector<16x16xf32>
    %32 = vector.shape_cast %29 : vector<16x16xf32> to vector<1x16x16xf32>
    tpu.vector_store %arg6[%c2_25, %c8_26, %c128_27], %32 {strides = array<i32>} : memref<6x32x272xf32, #tpu.memory_space<vmem>>, vector<1x16x16xf32>,
    %c5 = arith.constant 5 : index
    %c8_28 = arith.constant 8 : index
    %c128_29 = arith.constant 128 : index
    %33 = vector.load %arg6[%c5, %c8_28, %c128_29] : memref<6x32x272xf32, #tpu.memory_space<vmem>>, vector<1x16x16xf32>
    %34 = vector.shape_cast %33 : vector<1x16x16xf32> to vector<16x16xf32>
    %35 = vector.shape_cast %5 : vector<16x16xf32> to vector<1x16x16xf32>
    tpu.vector_store %arg6[%c5, %c8_28, %c128_29], %35 {strides = array<i32>} : memref<6x32x272xf32, #tpu.memory_space<vmem>>, vector<1x16x16xf32>,
    %cst_30 = arith.constant 0.000000e+00 : f32
    %36 = vector.broadcast %cst_30 : f32 to vector<16x16xf32>
    %cst_31 = arith.constant 0.000000e+00 : f32
    %37 = vector.broadcast %cst_31 : f32 to vector<16x16xf32>
    %cst_32 = arith.constant 0.000000e+00 : f32
    %38 = vector.broadcast %cst_32 : f32 to vector<16x16xf32>
    %c0_33 = arith.constant 0 : index
    %c7 = arith.constant 7 : index
    %c127 = arith.constant 127 : index
    %39 = vector.load %arg6[%c0_33, %c7, %c127] : memref<6x32x272xf32, #tpu.memory_space<vmem>>, vector<1x16x16xf32>
    %40 = vector.shape_cast %39 : vector<1x16x16xf32> to vector<16x16xf32>
    %c0_34 = arith.constant 0 : index
    %41 = memref.load %arg3[%c0_34] : memref<162xf32, #tpu.memory_space<smem>>
    %42 = vector.broadcast %41 : f32 to vector<16x16xf32>
    %43 = arith.mulf %42, %40 : vector<16x16xf32>
    %44 = arith.addf %36, %43 : vector<16x16xf32>
    %c1_35 = arith.constant 1 : index
    %45 = memref.load %arg3[%c1_35] : memref<162xf32, #tpu.memory_space<smem>>
    %46 = vector.broadcast %45 : f32 to vector<16x16xf32>
    %47 = arith.mulf %46, %40 : vector<16x16xf32>
    %48 = arith.addf %37, %47 : vector<16x16xf32>
    %c2_36 = arith.constant 2 : index
    %49 = memref.load %arg3[%c2_36] : memref<162xf32, #tpu.memory_space<smem>>
    %50 = vector.broadcast %49 : f32 to vector<16x16xf32>
    %51 = arith.mulf %50, %40 : vector<16x16xf32>
    %52 = arith.addf %38, %51 : vector<16x16xf32>
    %c1_37 = arith.constant 1 : index
    %c7_38 = arith.constant 7 : index
    %c127_39 = arith.constant 127 : index
    %53 = vector.load %arg6[%c1_37, %c7_38, %c127_39] : memref<6x32x272xf32, #tpu.memory_space<vmem>>, vector<1x16x16xf32>
    %54 = vector.shape_cast %53 : vector<1x16x16xf32> to vector<16x16xf32>
    %c3_40 = arith.constant 3 : index
    %55 = memref.load %arg3[%c3_40] : memref<162xf32, #tpu.memory_space<smem>>
    %56 = vector.broadcast %55 : f32 to vector<16x16xf32>
    %57 = arith.mulf %56, %54 : vector<16x16xf32>
    %58 = arith.addf %44, %57 : vector<16x16xf32>
    %c4_41 = arith.constant 4 : index
    %59 = memref.load %arg3[%c4_41] : memref<162xf32, #tpu.memory_space<smem>>
    %60 = vector.broadcast %59 : f32 to vector<16x16xf32>
    %61 = arith.mulf %60, %54 : vector<16x16xf32>
    %62 = arith.addf %48, %61 : vector<16x16xf32>
    %c5_42 = arith.constant 5 : index
    %63 = memref.load %arg3[%c5_42] : memref<162xf32, #tpu.memory_space<smem>>
    %64 = vector.broadcast %63 : f32 to vector<16x16xf32>
    %65 = arith.mulf %64, %54 : vector<16x16xf32>
    %66 = arith.addf %52, %65 : vector<16x16xf32>
    %c2_43 = arith.constant 2 : index
    %c7_44 = arith.constant 7 : index
    %c127_45 = arith.constant 127 : index
    %67 = vector.load %arg6[%c2_43, %c7_44, %c127_45] : memref<6x32x272xf32, #tpu.memory_space<vmem>>, vector<1x16x16xf32>
    %68 = vector.shape_cast %67 : vector<1x16x16xf32> to vector<16x16xf32>
    %c6 = arith.constant 6 : index
    %69 = memref.load %arg3[%c6] : memref<162xf32, #tpu.memory_space<smem>>
    %70 = vector.broadcast %69 : f32 to vector<16x16xf32>
    %71 = arith.mulf %70, %68 : vector<16x16xf32>
    %72 = arith.addf %58, %71 : vector<16x16xf32>
    %c7_46 = arith.constant 7 : index
    %73 = memref.load %arg3[%c7_46] : memref<162xf32, #tpu.memory_space<smem>>
    %74 = vector.broadcast %73 : f32 to vector<16x16xf32>
    %75 = arith.mulf %74, %68 : vector<16x16xf32>
    %76 = arith.addf %62, %75 : vector<16x16xf32>
    %c8_47 = arith.constant 8 : index
    %77 = memref.load %arg3[%c8_47] : memref<162xf32, #tpu.memory_space<smem>>
    %78 = vector.broadcast %77 : f32 to vector<16x16xf32>
    %79 = arith.mulf %78, %68 : vector<16x16xf32>
    %80 = arith.addf %66, %79 : vector<16x16xf32>
    %c3_48 = arith.constant 3 : index
    %c7_49 = arith.constant 7 : index
    %c127_50 = arith.constant 127 : index
    %81 = vector.load %arg6[%c3_48, %c7_49, %c127_50] : memref<6x32x272xf32, #tpu.memory_space<vmem>>, vector<1x16x16xf32>
    %82 = vector.shape_cast %81 : vector<1x16x16xf32> to vector<16x16xf32>
    %c9 = arith.constant 9 : index
    %83 = memref.load %arg3[%c9] : memref<162xf32, #tpu.memory_space<smem>>
    %84 = vector.broadcast %83 : f32 to vector<16x16xf32>
    %85 = arith.mulf %84, %82 : vector<16x16xf32>
    %86 = arith.addf %72, %85 : vector<16x16xf32>
    %c10 = arith.constant 10 : index
    %87 = memref.load %arg3[%c10] : memref<162xf32, #tpu.memory_space<smem>>
    %88 = vector.broadcast %87 : f32 to vector<16x16xf32>
    %89 = arith.mulf %88, %82 : vector<16x16xf32>
    %90 = arith.addf %76, %89 : vector<16x16xf32>
    %c11 = arith.constant 11 : index
    %91 = memref.load %arg3[%c11] : memref<162xf32, #tpu.memory_space<smem>>
    %92 = vector.broadcast %91 : f32 to vector<16x16xf32>
    %93 = arith.mulf %92, %82 : vector<16x16xf32>
    %94 = arith.addf %80, %93 : vector<16x16xf32>
    %c4_51 = arith.constant 4 : index
    %c7_52 = arith.constant 7 : index
    %c127_53 = arith.constant 127 : index
    %95 = vector.load %arg6[%c4_51, %c7_52, %c127_53] : memref<6x32x272xf32, #tpu.memory_space<vmem>>, vector<1x16x16xf32>
    %96 = vector.shape_cast %95 : vector<1x16x16xf32> to vector<16x16xf32>
    %c12 = arith.constant 12 : index
    %97 = memref.load %arg3[%c12] : memref<162xf32, #tpu.memory_space<smem>>
    %98 = vector.broadcast %97 : f32 to vector<16x16xf32>
    %99 = arith.mulf %98, %96 : vector<16x16xf32>
    %100 = arith.addf %86, %99 : vector<16x16xf32>
    %c13 = arith.constant 13 : index
    %101 = memref.load %arg3[%c13] : memref<162xf32, #tpu.memory_space<smem>>
    %102 = vector.broadcast %101 : f32 to vector<16x16xf32>
    %103 = arith.mulf %102, %96 : vector<16x16xf32>
    %104 = arith.addf %90, %103 : vector<16x16xf32>
    %c14 = arith.constant 14 : index
    %105 = memref.load %arg3[%c14] : memref<162xf32, #tpu.memory_space<smem>>
    %106 = vector.broadcast %105 : f32 to vector<16x16xf32>
    %107 = arith.mulf %106, %96 : vector<16x16xf32>
    %108 = arith.addf %94, %107 : vector<16x16xf32>
    %c5_54 = arith.constant 5 : index
    %c7_55 = arith.constant 7 : index
    %c127_56 = arith.constant 127 : index
    %109 = vector.load %arg6[%c5_54, %c7_55, %c127_56] : memref<6x32x272xf32, #tpu.memory_space<vmem>>, vector<1x16x16xf32>
    %110 = vector.shape_cast %109 : vector<1x16x16xf32> to vector<16x16xf32>
    %c15 = arith.constant 15 : index
    %111 = memref.load %arg3[%c15] : memref<162xf32, #tpu.memory_space<smem>>
    %112 = vector.broadcast %111 : f32 to vector<16x16xf32>
    %113 = arith.mulf %112, %110 : vector<16x16xf32>
    %114 = arith.addf %100, %113 : vector<16x16xf32>
    %c16 = arith.constant 16 : index
    %115 = memref.load %arg3[%c16] : memref<162xf32, #tpu.memory_space<smem>>
    %116 = vector.broadcast %115 : f32 to vector<16x16xf32>
    %117 = arith.mulf %116, %110 : vector<16x16xf32>
    %118 = arith.addf %104, %117 : vector<16x16xf32>
    %c17 = arith.constant 17 : index
    %119 = memref.load %arg3[%c17] : memref<162xf32, #tpu.memory_space<smem>>
    %120 = vector.broadcast %119 : f32 to vector<16x16xf32>
    %121 = arith.mulf %120, %110 : vector<16x16xf32>
    %122 = arith.addf %108, %121 : vector<16x16xf32>
    %c0_57 = arith.constant 0 : index
    %c7_58 = arith.constant 7 : index
    %c128_59 = arith.constant 128 : index
    %123 = vector.load %arg6[%c0_57, %c7_58, %c128_59] : memref<6x32x272xf32, #tpu.memory_space<vmem>>, vector<1x16x16xf32>
    %124 = vector.shape_cast %123 : vector<1x16x16xf32> to vector<16x16xf32>
    %c18 = arith.constant 18 : index
    %125 = memref.load %arg3[%c18] : memref<162xf32, #tpu.memory_space<smem>>
    %126 = vector.broadcast %125 : f32 to vector<16x16xf32>
    %127 = arith.mulf %126, %124 : vector<16x16xf32>
    %128 = arith.addf %114, %127 : vector<16x16xf32>
    %c19 = arith.constant 19 : index
    %129 = memref.load %arg3[%c19] : memref<162xf32, #tpu.memory_space<smem>>
    %130 = vector.broadcast %129 : f32 to vector<16x16xf32>
    %131 = arith.mulf %130, %124 : vector<16x16xf32>
    %132 = arith.addf %118, %131 : vector<16x16xf32>
    %c20 = arith.constant 20 : index
    %133 = memref.load %arg3[%c20] : memref<162xf32, #tpu.memory_space<smem>>
    %134 = vector.broadcast %133 : f32 to vector<16x16xf32>
    %135 = arith.mulf %134, %124 : vector<16x16xf32>
    %136 = arith.addf %122, %135 : vector<16x16xf32>
    %c1_60 = arith.constant 1 : index
    %c7_61 = arith.constant 7 : index
    %c128_62 = arith.constant 128 : index
    %137 = vector.load %arg6[%c1_60, %c7_61, %c128_62] : memref<6x32x272xf32, #tpu.memory_space<vmem>>, vector<1x16x16xf32>
    %138 = vector.shape_cast %137 : vector<1x16x16xf32> to vector<16x16xf32>
    %c21 = arith.constant 21 : index
    %139 = memref.load %arg3[%c21] : memref<162xf32, #tpu.memory_space<smem>>
    %140 = vector.broadcast %139 : f32 to vector<16x16xf32>
    %141 = arith.mulf %140, %138 : vector<16x16xf32>
    %142 = arith.addf %128, %141 : vector<16x16xf32>
    %c22 = arith.constant 22 : index
    %143 = memref.load %arg3[%c22] : memref<162xf32, #tpu.memory_space<smem>>
    %144 = vector.broadcast %143 : f32 to vector<16x16xf32>
    %145 = arith.mulf %144, %138 : vector<16x16xf32>
    %146 = arith.addf %132, %145 : vector<16x16xf32>
    %c23 = arith.constant 23 : index
    %147 = memref.load %arg3[%c23] : memref<162xf32, #tpu.memory_space<smem>>
    %148 = vector.broadcast %147 : f32 to vector<16x16xf32>
    %149 = arith.mulf %148, %138 : vector<16x16xf32>
    %150 = arith.addf %136, %149 : vector<16x16xf32>
    %c2_63 = arith.constant 2 : index
    %c7_64 = arith.constant 7 : index
    %c128_65 = arith.constant 128 : index
    %151 = vector.load %arg6[%c2_63, %c7_64, %c128_65] : memref<6x32x272xf32, #tpu.memory_space<vmem>>, vector<1x16x16xf32>
    %152 = vector.shape_cast %151 : vector<1x16x16xf32> to vector<16x16xf32>
    %c24 = arith.constant 24 : index
    %153 = memref.load %arg3[%c24] : memref<162xf32, #tpu.memory_space<smem>>
    %154 = vector.broadcast %153 : f32 to vector<16x16xf32>
    %155 = arith.mulf %154, %152 : vector<16x16xf32>
    %156 = arith.addf %142, %155 : vector<16x16xf32>
    %c25 = arith.constant 25 : index
    %157 = memref.load %arg3[%c25] : memref<162xf32, #tpu.memory_space<smem>>
    %158 = vector.broadcast %157 : f32 to vector<16x16xf32>
    %159 = arith.mulf %158, %152 : vector<16x16xf32>
    %160 = arith.addf %146, %159 : vector<16x16xf32>
    %c26 = arith.constant 26 : index
    %161 = memref.load %arg3[%c26] : memref<162xf32, #tpu.memory_space<smem>>
    %162 = vector.broadcast %161 : f32 to vector<16x16xf32>
    %163 = arith.mulf %162, %152 : vector<16x16xf32>
    %164 = arith.addf %150, %163 : vector<16x16xf32>
    %c3_66 = arith.constant 3 : index
    %c7_67 = arith.constant 7 : index
    %c128_68 = arith.constant 128 : index
    %165 = vector.load %arg6[%c3_66, %c7_67, %c128_68] : memref<6x32x272xf32, #tpu.memory_space<vmem>>, vector<1x16x16xf32>
    %166 = vector.shape_cast %165 : vector<1x16x16xf32> to vector<16x16xf32>
    %c27 = arith.constant 27 : index
    %167 = memref.load %arg3[%c27] : memref<162xf32, #tpu.memory_space<smem>>
    %168 = vector.broadcast %167 : f32 to vector<16x16xf32>
    %169 = arith.mulf %168, %166 : vector<16x16xf32>
    %170 = arith.addf %156, %169 : vector<16x16xf32>
    %c28 = arith.constant 28 : index
    %171 = memref.load %arg3[%c28] : memref<162xf32, #tpu.memory_space<smem>>
    %172 = vector.broadcast %171 : f32 to vector<16x16xf32>
    %173 = arith.mulf %172, %166 : vector<16x16xf32>
    %174 = arith.addf %160, %173 : vector<16x16xf32>
    %c29 = arith.constant 29 : index
    %175 = memref.load %arg3[%c29] : memref<162xf32, #tpu.memory_space<smem>>
    %176 = vector.broadcast %175 : f32 to vector<16x16xf32>
    %177 = arith.mulf %176, %166 : vector<16x16xf32>
    %178 = arith.addf %164, %177 : vector<16x16xf32>
    %c4_69 = arith.constant 4 : index
    %c7_70 = arith.constant 7 : index
    %c128_71 = arith.constant 128 : index
    %179 = vector.load %arg6[%c4_69, %c7_70, %c128_71] : memref<6x32x272xf32, #tpu.memory_space<vmem>>, vector<1x16x16xf32>
    %180 = vector.shape_cast %179 : vector<1x16x16xf32> to vector<16x16xf32>
    %c30 = arith.constant 30 : index
    %181 = memref.load %arg3[%c30] : memref<162xf32, #tpu.memory_space<smem>>
    %182 = vector.broadcast %181 : f32 to vector<16x16xf32>
    %183 = arith.mulf %182, %180 : vector<16x16xf32>
    %184 = arith.addf %170, %183 : vector<16x16xf32>
    %c31 = arith.constant 31 : index
    %185 = memref.load %arg3[%c31] : memref<162xf32, #tpu.memory_space<smem>>
    %186 = vector.broadcast %185 : f32 to vector<16x16xf32>
    %187 = arith.mulf %186, %180 : vector<16x16xf32>
    %188 = arith.addf %174, %187 : vector<16x16xf32>
    %c32 = arith.constant 32 : index
    %189 = memref.load %arg3[%c32] : memref<162xf32, #tpu.memory_space<smem>>
    %190 = vector.broadcast %189 : f32 to vector<16x16xf32>
    %191 = arith.mulf %190, %180 : vector<16x16xf32>
    %192 = arith.addf %178, %191 : vector<16x16xf32>
    %c5_72 = arith.constant 5 : index
    %c7_73 = arith.constant 7 : index
    %c128_74 = arith.constant 128 : index
    %193 = vector.load %arg6[%c5_72, %c7_73, %c128_74] : memref<6x32x272xf32, #tpu.memory_space<vmem>>, vector<1x16x16xf32>
    %194 = vector.shape_cast %193 : vector<1x16x16xf32> to vector<16x16xf32>
    %c33 = arith.constant 33 : index
    %195 = memref.load %arg3[%c33] : memref<162xf32, #tpu.memory_space<smem>>
    %196 = vector.broadcast %195 : f32 to vector<16x16xf32>
    %197 = arith.mulf %196, %194 : vector<16x16xf32>
    %198 = arith.addf %184, %197 : vector<16x16xf32>
    %c34 = arith.constant 34 : index
    %199 = memref.load %arg3[%c34] : memref<162xf32, #tpu.memory_space<smem>>
    %200 = vector.broadcast %199 : f32 to vector<16x16xf32>
    %201 = arith.mulf %200, %194 : vector<16x16xf32>
    %202 = arith.addf %188, %201 : vector<16x16xf32>
    %c35 = arith.constant 35 : index
    %203 = memref.load %arg3[%c35] : memref<162xf32, #tpu.memory_space<smem>>
    %204 = vector.broadcast %203 : f32 to vector<16x16xf32>
    %205 = arith.mulf %204, %194 : vector<16x16xf32>
    %206 = arith.addf %192, %205 : vector<16x16xf32>
    %c0_75 = arith.constant 0 : index
    %c7_76 = arith.constant 7 : index
    %c129 = arith.constant 129 : index
    %207 = vector.load %arg6[%c0_75, %c7_76, %c129] : memref<6x32x272xf32, #tpu.memory_space<vmem>>, vector<1x16x16xf32>
    %208 = vector.shape_cast %207 : vector<1x16x16xf32> to vector<16x16xf32>
    %c36 = arith.constant 36 : index
    %209 = memref.load %arg3[%c36] : memref<162xf32, #tpu.memory_space<smem>>
    %210 = vector.broadcast %209 : f32 to vector<16x16xf32>
    %211 = arith.mulf %210, %208 : vector<16x16xf32>
    %212 = arith.addf %198, %211 : vector<16x16xf32>
    %c37 = arith.constant 37 : index
    %213 = memref.load %arg3[%c37] : memref<162xf32, #tpu.memory_space<smem>>
    %214 = vector.broadcast %213 : f32 to vector<16x16xf32>
    %215 = arith.mulf %214, %208 : vector<16x16xf32>
    %216 = arith.addf %202, %215 : vector<16x16xf32>
    %c38 = arith.constant 38 : index
    %217 = memref.load %arg3[%c38] : memref<162xf32, #tpu.memory_space<smem>>
    %218 = vector.broadcast %217 : f32 to vector<16x16xf32>
    %219 = arith.mulf %218, %208 : vector<16x16xf32>
    %220 = arith.addf %206, %219 : vector<16x16xf32>
    %c1_77 = arith.constant 1 : index
    %c7_78 = arith.constant 7 : index
    %c129_79 = arith.constant 129 : index
    %221 = vector.load %arg6[%c1_77, %c7_78, %c129_79] : memref<6x32x272xf32, #tpu.memory_space<vmem>>, vector<1x16x16xf32>
    %222 = vector.shape_cast %221 : vector<1x16x16xf32> to vector<16x16xf32>
    %c39 = arith.constant 39 : index
    %223 = memref.load %arg3[%c39] : memref<162xf32, #tpu.memory_space<smem>>
    %224 = vector.broadcast %223 : f32 to vector<16x16xf32>
    %225 = arith.mulf %224, %222 : vector<16x16xf32>
    %226 = arith.addf %212, %225 : vector<16x16xf32>
    %c40 = arith.constant 40 : index
    %227 = memref.load %arg3[%c40] : memref<162xf32, #tpu.memory_space<smem>>
    %228 = vector.broadcast %227 : f32 to vector<16x16xf32>
    %229 = arith.mulf %228, %222 : vector<16x16xf32>
    %230 = arith.addf %216, %229 : vector<16x16xf32>
    %c41 = arith.constant 41 : index
    %231 = memref.load %arg3[%c41] : memref<162xf32, #tpu.memory_space<smem>>
    %232 = vector.broadcast %231 : f32 to vector<16x16xf32>
    %233 = arith.mulf %232, %222 : vector<16x16xf32>
    %234 = arith.addf %220, %233 : vector<16x16xf32>
    %c2_80 = arith.constant 2 : index
    %c7_81 = arith.constant 7 : index
    %c129_82 = arith.constant 129 : index
    %235 = vector.load %arg6[%c2_80, %c7_81, %c129_82] : memref<6x32x272xf32, #tpu.memory_space<vmem>>, vector<1x16x16xf32>
    %236 = vector.shape_cast %235 : vector<1x16x16xf32> to vector<16x16xf32>
    %c42 = arith.constant 42 : index
    %237 = memref.load %arg3[%c42] : memref<162xf32, #tpu.memory_space<smem>>
    %238 = vector.broadcast %237 : f32 to vector<16x16xf32>
    %239 = arith.mulf %238, %236 : vector<16x16xf32>
    %240 = arith.addf %226, %239 : vector<16x16xf32>
    %c43 = arith.constant 43 : index
    %241 = memref.load %arg3[%c43] : memref<162xf32, #tpu.memory_space<smem>>
    %242 = vector.broadcast %241 : f32 to vector<16x16xf32>
    %243 = arith.mulf %242, %236 : vector<16x16xf32>
    %244 = arith.addf %230, %243 : vector<16x16xf32>
    %c44 = arith.constant 44 : index
    %245 = memref.load %arg3[%c44] : memref<162xf32, #tpu.memory_space<smem>>
    %246 = vector.broadcast %245 : f32 to vector<16x16xf32>
    %247 = arith.mulf %246, %236 : vector<16x16xf32>
    %248 = arith.addf %234, %247 : vector<16x16xf32>
    %c3_83 = arith.constant 3 : index
    %c7_84 = arith.constant 7 : index
    %c129_85 = arith.constant 129 : index
    %249 = vector.load %arg6[%c3_83, %c7_84, %c129_85] : memref<6x32x272xf32, #tpu.memory_space<vmem>>, vector<1x16x16xf32>
    %250 = vector.shape_cast %249 : vector<1x16x16xf32> to vector<16x16xf32>
    %c45 = arith.constant 45 : index
    %251 = memref.load %arg3[%c45] : memref<162xf32, #tpu.memory_space<smem>>
    %252 = vector.broadcast %251 : f32 to vector<16x16xf32>
    %253 = arith.mulf %252, %250 : vector<16x16xf32>
    %254 = arith.addf %240, %253 : vector<16x16xf32>
    %c46 = arith.constant 46 : index
    %255 = memref.load %arg3[%c46] : memref<162xf32, #tpu.memory_space<smem>>
    %256 = vector.broadcast %255 : f32 to vector<16x16xf32>
    %257 = arith.mulf %256, %250 : vector<16x16xf32>
    %258 = arith.addf %244, %257 : vector<16x16xf32>
    %c47 = arith.constant 47 : index
    %259 = memref.load %arg3[%c47] : memref<162xf32, #tpu.memory_space<smem>>
    %260 = vector.broadcast %259 : f32 to vector<16x16xf32>
    %261 = arith.mulf %260, %250 : vector<16x16xf32>
    %262 = arith.addf %248, %261 : vector<16x16xf32>
    %c4_86 = arith.constant 4 : index
    %c7_87 = arith.constant 7 : index
    %c129_88 = arith.constant 129 : index
    %263 = vector.load %arg6[%c4_86, %c7_87, %c129_88] : memref<6x32x272xf32, #tpu.memory_space<vmem>>, vector<1x16x16xf32>
    %264 = vector.shape_cast %263 : vector<1x16x16xf32> to vector<16x16xf32>
    %c48 = arith.constant 48 : index
    %265 = memref.load %arg3[%c48] : memref<162xf32, #tpu.memory_space<smem>>
    %266 = vector.broadcast %265 : f32 to vector<16x16xf32>
    %267 = arith.mulf %266, %264 : vector<16x16xf32>
    %268 = arith.addf %254, %267 : vector<16x16xf32>
    %c49 = arith.constant 49 : index
    %269 = memref.load %arg3[%c49] : memref<162xf32, #tpu.memory_space<smem>>
    %270 = vector.broadcast %269 : f32 to vector<16x16xf32>
    %271 = arith.mulf %270, %264 : vector<16x16xf32>
    %272 = arith.addf %258, %271 : vector<16x16xf32>
    %c50 = arith.constant 50 : index
    %273 = memref.load %arg3[%c50] : memref<162xf32, #tpu.memory_space<smem>>
    %274 = vector.broadcast %273 : f32 to vector<16x16xf32>
    %275 = arith.mulf %274, %264 : vector<16x16xf32>
    %276 = arith.addf %262, %275 : vector<16x16xf32>
    %c5_89 = arith.constant 5 : index
    %c7_90 = arith.constant 7 : index
    %c129_91 = arith.constant 129 : index
    %277 = vector.load %arg6[%c5_89, %c7_90, %c129_91] : memref<6x32x272xf32, #tpu.memory_space<vmem>>, vector<1x16x16xf32>
    %278 = vector.shape_cast %277 : vector<1x16x16xf32> to vector<16x16xf32>
    %c51 = arith.constant 51 : index
    %279 = memref.load %arg3[%c51] : memref<162xf32, #tpu.memory_space<smem>>
    %280 = vector.broadcast %279 : f32 to vector<16x16xf32>
    %281 = arith.mulf %280, %278 : vector<16x16xf32>
    %282 = arith.addf %268, %281 : vector<16x16xf32>
    %c52 = arith.constant 52 : index
    %283 = memref.load %arg3[%c52] : memref<162xf32, #tpu.memory_space<smem>>
    %284 = vector.broadcast %283 : f32 to vector<16x16xf32>
    %285 = arith.mulf %284, %278 : vector<16x16xf32>
    %286 = arith.addf %272, %285 : vector<16x16xf32>
    %c53 = arith.constant 53 : index
    %287 = memref.load %arg3[%c53] : memref<162xf32, #tpu.memory_space<smem>>
    %288 = vector.broadcast %287 : f32 to vector<16x16xf32>
    %289 = arith.mulf %288, %278 : vector<16x16xf32>
    %290 = arith.addf %276, %289 : vector<16x16xf32>
    %c0_92 = arith.constant 0 : index
    %c8_93 = arith.constant 8 : index
    %c127_94 = arith.constant 127 : index
    %291 = vector.load %arg6[%c0_92, %c8_93, %c127_94] : memref<6x32x272xf32, #tpu.memory_space<vmem>>, vector<1x16x16xf32>
    %292 = vector.shape_cast %291 : vector<1x16x16xf32> to vector<16x16xf32>
    %c54 = arith.constant 54 : index
    %293 = memref.load %arg3[%c54] : memref<162xf32, #tpu.memory_space<smem>>
    %294 = vector.broadcast %293 : f32 to vector<16x16xf32>
    %295 = arith.mulf %294, %292 : vector<16x16xf32>
    %296 = arith.addf %282, %295 : vector<16x16xf32>
    %c55 = arith.constant 55 : index
    %297 = memref.load %arg3[%c55] : memref<162xf32, #tpu.memory_space<smem>>
    %298 = vector.broadcast %297 : f32 to vector<16x16xf32>
    %299 = arith.mulf %298, %292 : vector<16x16xf32>
    %300 = arith.addf %286, %299 : vector<16x16xf32>
    %c56 = arith.constant 56 : index
    %301 = memref.load %arg3[%c56] : memref<162xf32, #tpu.memory_space<smem>>
    %302 = vector.broadcast %301 : f32 to vector<16x16xf32>
    %303 = arith.mulf %302, %292 : vector<16x16xf32>
    %304 = arith.addf %290, %303 : vector<16x16xf32>
    %c1_95 = arith.constant 1 : index
    %c8_96 = arith.constant 8 : index
    %c127_97 = arith.constant 127 : index
    %305 = vector.load %arg6[%c1_95, %c8_96, %c127_97] : memref<6x32x272xf32, #tpu.memory_space<vmem>>, vector<1x16x16xf32>
    %306 = vector.shape_cast %305 : vector<1x16x16xf32> to vector<16x16xf32>
    %c57 = arith.constant 57 : index
    %307 = memref.load %arg3[%c57] : memref<162xf32, #tpu.memory_space<smem>>
    %308 = vector.broadcast %307 : f32 to vector<16x16xf32>
    %309 = arith.mulf %308, %306 : vector<16x16xf32>
    %310 = arith.addf %296, %309 : vector<16x16xf32>
    %c58 = arith.constant 58 : index
    %311 = memref.load %arg3[%c58] : memref<162xf32, #tpu.memory_space<smem>>
    %312 = vector.broadcast %311 : f32 to vector<16x16xf32>
    %313 = arith.mulf %312, %306 : vector<16x16xf32>
    %314 = arith.addf %300, %313 : vector<16x16xf32>
    %c59 = arith.constant 59 : index
    %315 = memref.load %arg3[%c59] : memref<162xf32, #tpu.memory_space<smem>>
    %316 = vector.broadcast %315 : f32 to vector<16x16xf32>
    %317 = arith.mulf %316, %306 : vector<16x16xf32>
    %318 = arith.addf %304, %317 : vector<16x16xf32>
    %c2_98 = arith.constant 2 : index
    %c8_99 = arith.constant 8 : index
    %c127_100 = arith.constant 127 : index
    %319 = vector.load %arg6[%c2_98, %c8_99, %c127_100] : memref<6x32x272xf32, #tpu.memory_space<vmem>>, vector<1x16x16xf32>
    %320 = vector.shape_cast %319 : vector<1x16x16xf32> to vector<16x16xf32>
    %c60 = arith.constant 60 : index
    %321 = memref.load %arg3[%c60] : memref<162xf32, #tpu.memory_space<smem>>
    %322 = vector.broadcast %321 : f32 to vector<16x16xf32>
    %323 = arith.mulf %322, %320 : vector<16x16xf32>
    %324 = arith.addf %310, %323 : vector<16x16xf32>
    %c61 = arith.constant 61 : index
    %325 = memref.load %arg3[%c61] : memref<162xf32, #tpu.memory_space<smem>>
    %326 = vector.broadcast %325 : f32 to vector<16x16xf32>
    %327 = arith.mulf %326, %320 : vector<16x16xf32>
    %328 = arith.addf %314, %327 : vector<16x16xf32>
    %c62 = arith.constant 62 : index
    %329 = memref.load %arg3[%c62] : memref<162xf32, #tpu.memory_space<smem>>
    %330 = vector.broadcast %329 : f32 to vector<16x16xf32>
    %331 = arith.mulf %330, %320 : vector<16x16xf32>
    %332 = arith.addf %318, %331 : vector<16x16xf32>
    %c3_101 = arith.constant 3 : index
    %c8_102 = arith.constant 8 : index
    %c127_103 = arith.constant 127 : index
    %333 = vector.load %arg6[%c3_101, %c8_102, %c127_103] : memref<6x32x272xf32, #tpu.memory_space<vmem>>, vector<1x16x16xf32>
    %334 = vector.shape_cast %333 : vector<1x16x16xf32> to vector<16x16xf32>
    %c63 = arith.constant 63 : index
    %335 = memref.load %arg3[%c63] : memref<162xf32, #tpu.memory_space<smem>>
    %336 = vector.broadcast %335 : f32 to vector<16x16xf32>
    %337 = arith.mulf %336, %334 : vector<16x16xf32>
    %338 = arith.addf %324, %337 : vector<16x16xf32>
    %c64 = arith.constant 64 : index
    %339 = memref.load %arg3[%c64] : memref<162xf32, #tpu.memory_space<smem>>
    %340 = vector.broadcast %339 : f32 to vector<16x16xf32>
    %341 = arith.mulf %340, %334 : vector<16x16xf32>
    %342 = arith.addf %328, %341 : vector<16x16xf32>
    %c65 = arith.constant 65 : index
    %343 = memref.load %arg3[%c65] : memref<162xf32, #tpu.memory_space<smem>>
    %344 = vector.broadcast %343 : f32 to vector<16x16xf32>
    %345 = arith.mulf %344, %334 : vector<16x16xf32>
    %346 = arith.addf %332, %345 : vector<16x16xf32>
    %c4_104 = arith.constant 4 : index
    %c8_105 = arith.constant 8 : index
    %c127_106 = arith.constant 127 : index
    %347 = vector.load %arg6[%c4_104, %c8_105, %c127_106] : memref<6x32x272xf32, #tpu.memory_space<vmem>>, vector<1x16x16xf32>
    %348 = vector.shape_cast %347 : vector<1x16x16xf32> to vector<16x16xf32>
    %c66 = arith.constant 66 : index
    %349 = memref.load %arg3[%c66] : memref<162xf32, #tpu.memory_space<smem>>
    %350 = vector.broadcast %349 : f32 to vector<16x16xf32>
    %351 = arith.mulf %350, %348 : vector<16x16xf32>
    %352 = arith.addf %338, %351 : vector<16x16xf32>
    %c67 = arith.constant 67 : index
    %353 = memref.load %arg3[%c67] : memref<162xf32, #tpu.memory_space<smem>>
    %354 = vector.broadcast %353 : f32 to vector<16x16xf32>
    %355 = arith.mulf %354, %348 : vector<16x16xf32>
    %356 = arith.addf %342, %355 : vector<16x16xf32>
    %c68 = arith.constant 68 : index
    %357 = memref.load %arg3[%c68] : memref<162xf32, #tpu.memory_space<smem>>
    %358 = vector.broadcast %357 : f32 to vector<16x16xf32>
    %359 = arith.mulf %358, %348 : vector<16x16xf32>
    %360 = arith.addf %346, %359 : vector<16x16xf32>
    %c5_107 = arith.constant 5 : index
    %c8_108 = arith.constant 8 : index
    %c127_109 = arith.constant 127 : index
    %361 = vector.load %arg6[%c5_107, %c8_108, %c127_109] : memref<6x32x272xf32, #tpu.memory_space<vmem>>, vector<1x16x16xf32>
    %362 = vector.shape_cast %361 : vector<1x16x16xf32> to vector<16x16xf32>
    %c69 = arith.constant 69 : index
    %363 = memref.load %arg3[%c69] : memref<162xf32, #tpu.memory_space<smem>>
    %364 = vector.broadcast %363 : f32 to vector<16x16xf32>
    %365 = arith.mulf %364, %362 : vector<16x16xf32>
    %366 = arith.addf %352, %365 : vector<16x16xf32>
    %c70 = arith.constant 70 : index
    %367 = memref.load %arg3[%c70] : memref<162xf32, #tpu.memory_space<smem>>
    %368 = vector.broadcast %367 : f32 to vector<16x16xf32>
    %369 = arith.mulf %368, %362 : vector<16x16xf32>
    %370 = arith.addf %356, %369 : vector<16x16xf32>
    %c71 = arith.constant 71 : index
    %371 = memref.load %arg3[%c71] : memref<162xf32, #tpu.memory_space<smem>>
    %372 = vector.broadcast %371 : f32 to vector<16x16xf32>
    %373 = arith.mulf %372, %362 : vector<16x16xf32>
    %374 = arith.addf %360, %373 : vector<16x16xf32>
    %c0_110 = arith.constant 0 : index
    %c8_111 = arith.constant 8 : index
    %c128_112 = arith.constant 128 : index
    %375 = vector.load %arg6[%c0_110, %c8_111, %c128_112] : memref<6x32x272xf32, #tpu.memory_space<vmem>>, vector<1x16x16xf32>
    %376 = vector.shape_cast %375 : vector<1x16x16xf32> to vector<16x16xf32>
    %c72 = arith.constant 72 : index
    %377 = memref.load %arg3[%c72] : memref<162xf32, #tpu.memory_space<smem>>
    %378 = vector.broadcast %377 : f32 to vector<16x16xf32>
    %379 = arith.mulf %378, %376 : vector<16x16xf32>
    %380 = arith.addf %366, %379 : vector<16x16xf32>
    %c73 = arith.constant 73 : index
    %381 = memref.load %arg3[%c73] : memref<162xf32, #tpu.memory_space<smem>>
    %382 = vector.broadcast %381 : f32 to vector<16x16xf32>
    %383 = arith.mulf %382, %376 : vector<16x16xf32>
    %384 = arith.addf %370, %383 : vector<16x16xf32>
    %c74 = arith.constant 74 : index
    %385 = memref.load %arg3[%c74] : memref<162xf32, #tpu.memory_space<smem>>
    %386 = vector.broadcast %385 : f32 to vector<16x16xf32>
    %387 = arith.mulf %386, %376 : vector<16x16xf32>
    %388 = arith.addf %374, %387 : vector<16x16xf32>
    %c1_113 = arith.constant 1 : index
    %c8_114 = arith.constant 8 : index
    %c128_115 = arith.constant 128 : index
    %389 = vector.load %arg6[%c1_113, %c8_114, %c128_115] : memref<6x32x272xf32, #tpu.memory_space<vmem>>, vector<1x16x16xf32>
    %390 = vector.shape_cast %389 : vector<1x16x16xf32> to vector<16x16xf32>
    %c75 = arith.constant 75 : index
    %391 = memref.load %arg3[%c75] : memref<162xf32, #tpu.memory_space<smem>>
    %392 = vector.broadcast %391 : f32 to vector<16x16xf32>
    %393 = arith.mulf %392, %390 : vector<16x16xf32>
    %394 = arith.addf %380, %393 : vector<16x16xf32>
    %c76 = arith.constant 76 : index
    %395 = memref.load %arg3[%c76] : memref<162xf32, #tpu.memory_space<smem>>
    %396 = vector.broadcast %395 : f32 to vector<16x16xf32>
    %397 = arith.mulf %396, %390 : vector<16x16xf32>
    %398 = arith.addf %384, %397 : vector<16x16xf32>
    %c77 = arith.constant 77 : index
    %399 = memref.load %arg3[%c77] : memref<162xf32, #tpu.memory_space<smem>>
    %400 = vector.broadcast %399 : f32 to vector<16x16xf32>
    %401 = arith.mulf %400, %390 : vector<16x16xf32>
    %402 = arith.addf %388, %401 : vector<16x16xf32>
    %c2_116 = arith.constant 2 : index
    %c8_117 = arith.constant 8 : index
    %c128_118 = arith.constant 128 : index
    %403 = vector.load %arg6[%c2_116, %c8_117, %c128_118] : memref<6x32x272xf32, #tpu.memory_space<vmem>>, vector<1x16x16xf32>
    %404 = vector.shape_cast %403 : vector<1x16x16xf32> to vector<16x16xf32>
    %c78 = arith.constant 78 : index
    %405 = memref.load %arg3[%c78] : memref<162xf32, #tpu.memory_space<smem>>
    %406 = vector.broadcast %405 : f32 to vector<16x16xf32>
    %407 = arith.mulf %406, %404 : vector<16x16xf32>
    %408 = arith.addf %394, %407 : vector<16x16xf32>
    %c79 = arith.constant 79 : index
    %409 = memref.load %arg3[%c79] : memref<162xf32, #tpu.memory_space<smem>>
    %410 = vector.broadcast %409 : f32 to vector<16x16xf32>
    %411 = arith.mulf %410, %404 : vector<16x16xf32>
    %412 = arith.addf %398, %411 : vector<16x16xf32>
    %c80 = arith.constant 80 : index
    %413 = memref.load %arg3[%c80] : memref<162xf32, #tpu.memory_space<smem>>
    %414 = vector.broadcast %413 : f32 to vector<16x16xf32>
    %415 = arith.mulf %414, %404 : vector<16x16xf32>
    %416 = arith.addf %402, %415 : vector<16x16xf32>
    %c3_119 = arith.constant 3 : index
    %c8_120 = arith.constant 8 : index
    %c128_121 = arith.constant 128 : index
    %417 = vector.load %arg6[%c3_119, %c8_120, %c128_121] : memref<6x32x272xf32, #tpu.memory_space<vmem>>, vector<1x16x16xf32>
    %418 = vector.shape_cast %417 : vector<1x16x16xf32> to vector<16x16xf32>
    %c81 = arith.constant 81 : index
    %419 = memref.load %arg3[%c81] : memref<162xf32, #tpu.memory_space<smem>>
    %420 = vector.broadcast %419 : f32 to vector<16x16xf32>
    %421 = arith.mulf %420, %418 : vector<16x16xf32>
    %422 = arith.addf %408, %421 : vector<16x16xf32>
    %c82 = arith.constant 82 : index
    %423 = memref.load %arg3[%c82] : memref<162xf32, #tpu.memory_space<smem>>
    %424 = vector.broadcast %423 : f32 to vector<16x16xf32>
    %425 = arith.mulf %424, %418 : vector<16x16xf32>
    %426 = arith.addf %412, %425 : vector<16x16xf32>
    %c83 = arith.constant 83 : index
    %427 = memref.load %arg3[%c83] : memref<162xf32, #tpu.memory_space<smem>>
    %428 = vector.broadcast %427 : f32 to vector<16x16xf32>
    %429 = arith.mulf %428, %418 : vector<16x16xf32>
    %430 = arith.addf %416, %429 : vector<16x16xf32>
    %c4_122 = arith.constant 4 : index
    %c8_123 = arith.constant 8 : index
    %c128_124 = arith.constant 128 : index
    %431 = vector.load %arg6[%c4_122, %c8_123, %c128_124] : memref<6x32x272xf32, #tpu.memory_space<vmem>>, vector<1x16x16xf32>
    %432 = vector.shape_cast %431 : vector<1x16x16xf32> to vector<16x16xf32>
    %c84 = arith.constant 84 : index
    %433 = memref.load %arg3[%c84] : memref<162xf32, #tpu.memory_space<smem>>
    %434 = vector.broadcast %433 : f32 to vector<16x16xf32>
    %435 = arith.mulf %434, %432 : vector<16x16xf32>
    %436 = arith.addf %422, %435 : vector<16x16xf32>
    %c85 = arith.constant 85 : index
    %437 = memref.load %arg3[%c85] : memref<162xf32, #tpu.memory_space<smem>>
    %438 = vector.broadcast %437 : f32 to vector<16x16xf32>
    %439 = arith.mulf %438, %432 : vector<16x16xf32>
    %440 = arith.addf %426, %439 : vector<16x16xf32>
    %c86 = arith.constant 86 : index
    %441 = memref.load %arg3[%c86] : memref<162xf32, #tpu.memory_space<smem>>
    %442 = vector.broadcast %441 : f32 to vector<16x16xf32>
    %443 = arith.mulf %442, %432 : vector<16x16xf32>
    %444 = arith.addf %430, %443 : vector<16x16xf32>
    %c5_125 = arith.constant 5 : index
    %c8_126 = arith.constant 8 : index
    %c128_127 = arith.constant 128 : index
    %445 = vector.load %arg6[%c5_125, %c8_126, %c128_127] : memref<6x32x272xf32, #tpu.memory_space<vmem>>, vector<1x16x16xf32>
    %446 = vector.shape_cast %445 : vector<1x16x16xf32> to vector<16x16xf32>
    %c87 = arith.constant 87 : index
    %447 = memref.load %arg3[%c87] : memref<162xf32, #tpu.memory_space<smem>>
    %448 = vector.broadcast %447 : f32 to vector<16x16xf32>
    %449 = arith.mulf %448, %446 : vector<16x16xf32>
    %450 = arith.addf %436, %449 : vector<16x16xf32>
    %c88 = arith.constant 88 : index
    %451 = memref.load %arg3[%c88] : memref<162xf32, #tpu.memory_space<smem>>
    %452 = vector.broadcast %451 : f32 to vector<16x16xf32>
    %453 = arith.mulf %452, %446 : vector<16x16xf32>
    %454 = arith.addf %440, %453 : vector<16x16xf32>
    %c89 = arith.constant 89 : index
    %455 = memref.load %arg3[%c89] : memref<162xf32, #tpu.memory_space<smem>>
    %456 = vector.broadcast %455 : f32 to vector<16x16xf32>
    %457 = arith.mulf %456, %446 : vector<16x16xf32>
    %458 = arith.addf %444, %457 : vector<16x16xf32>
    %c0_128 = arith.constant 0 : index
    %c8_129 = arith.constant 8 : index
    %c129_130 = arith.constant 129 : index
    %459 = vector.load %arg6[%c0_128, %c8_129, %c129_130] : memref<6x32x272xf32, #tpu.memory_space<vmem>>, vector<1x16x16xf32>
    %460 = vector.shape_cast %459 : vector<1x16x16xf32> to vector<16x16xf32>
    %c90 = arith.constant 90 : index
    %461 = memref.load %arg3[%c90] : memref<162xf32, #tpu.memory_space<smem>>
    %462 = vector.broadcast %461 : f32 to vector<16x16xf32>
    %463 = arith.mulf %462, %460 : vector<16x16xf32>
    %464 = arith.addf %450, %463 : vector<16x16xf32>
    %c91 = arith.constant 91 : index
    %465 = memref.load %arg3[%c91] : memref<162xf32, #tpu.memory_space<smem>>
    %466 = vector.broadcast %465 : f32 to vector<16x16xf32>
    %467 = arith.mulf %466, %460 : vector<16x16xf32>
    %468 = arith.addf %454, %467 : vector<16x16xf32>
    %c92 = arith.constant 92 : index
    %469 = memref.load %arg3[%c92] : memref<162xf32, #tpu.memory_space<smem>>
    %470 = vector.broadcast %469 : f32 to vector<16x16xf32>
    %471 = arith.mulf %470, %460 : vector<16x16xf32>
    %472 = arith.addf %458, %471 : vector<16x16xf32>
    %c1_131 = arith.constant 1 : index
    %c8_132 = arith.constant 8 : index
    %c129_133 = arith.constant 129 : index
    %473 = vector.load %arg6[%c1_131, %c8_132, %c129_133] : memref<6x32x272xf32, #tpu.memory_space<vmem>>, vector<1x16x16xf32>
    %474 = vector.shape_cast %473 : vector<1x16x16xf32> to vector<16x16xf32>
    %c93 = arith.constant 93 : index
    %475 = memref.load %arg3[%c93] : memref<162xf32, #tpu.memory_space<smem>>
    %476 = vector.broadcast %475 : f32 to vector<16x16xf32>
    %477 = arith.mulf %476, %474 : vector<16x16xf32>
    %478 = arith.addf %464, %477 : vector<16x16xf32>
    %c94 = arith.constant 94 : index
    %479 = memref.load %arg3[%c94] : memref<162xf32, #tpu.memory_space<smem>>
    %480 = vector.broadcast %479 : f32 to vector<16x16xf32>
    %481 = arith.mulf %480, %474 : vector<16x16xf32>
    %482 = arith.addf %468, %481 : vector<16x16xf32>
    %c95 = arith.constant 95 : index
    %483 = memref.load %arg3[%c95] : memref<162xf32, #tpu.memory_space<smem>>
    %484 = vector.broadcast %483 : f32 to vector<16x16xf32>
    %485 = arith.mulf %484, %474 : vector<16x16xf32>
    %486 = arith.addf %472, %485 : vector<16x16xf32>
    %c2_134 = arith.constant 2 : index
    %c8_135 = arith.constant 8 : index
    %c129_136 = arith.constant 129 : index
    %487 = vector.load %arg6[%c2_134, %c8_135, %c129_136] : memref<6x32x272xf32, #tpu.memory_space<vmem>>, vector<1x16x16xf32>
    %488 = vector.shape_cast %487 : vector<1x16x16xf32> to vector<16x16xf32>
    %c96 = arith.constant 96 : index
    %489 = memref.load %arg3[%c96] : memref<162xf32, #tpu.memory_space<smem>>
    %490 = vector.broadcast %489 : f32 to vector<16x16xf32>
    %491 = arith.mulf %490, %488 : vector<16x16xf32>
    %492 = arith.addf %478, %491 : vector<16x16xf32>
    %c97 = arith.constant 97 : index
    %493 = memref.load %arg3[%c97] : memref<162xf32, #tpu.memory_space<smem>>
    %494 = vector.broadcast %493 : f32 to vector<16x16xf32>
    %495 = arith.mulf %494, %488 : vector<16x16xf32>
    %496 = arith.addf %482, %495 : vector<16x16xf32>
    %c98 = arith.constant 98 : index
    %497 = memref.load %arg3[%c98] : memref<162xf32, #tpu.memory_space<smem>>
    %498 = vector.broadcast %497 : f32 to vector<16x16xf32>
    %499 = arith.mulf %498, %488 : vector<16x16xf32>
    %500 = arith.addf %486, %499 : vector<16x16xf32>
    %c3_137 = arith.constant 3 : index
    %c8_138 = arith.constant 8 : index
    %c129_139 = arith.constant 129 : index
    %501 = vector.load %arg6[%c3_137, %c8_138, %c129_139] : memref<6x32x272xf32, #tpu.memory_space<vmem>>, vector<1x16x16xf32>
    %502 = vector.shape_cast %501 : vector<1x16x16xf32> to vector<16x16xf32>
    %c99 = arith.constant 99 : index
    %503 = memref.load %arg3[%c99] : memref<162xf32, #tpu.memory_space<smem>>
    %504 = vector.broadcast %503 : f32 to vector<16x16xf32>
    %505 = arith.mulf %504, %502 : vector<16x16xf32>
    %506 = arith.addf %492, %505 : vector<16x16xf32>
    %c100 = arith.constant 100 : index
    %507 = memref.load %arg3[%c100] : memref<162xf32, #tpu.memory_space<smem>>
    %508 = vector.broadcast %507 : f32 to vector<16x16xf32>
    %509 = arith.mulf %508, %502 : vector<16x16xf32>
    %510 = arith.addf %496, %509 : vector<16x16xf32>
    %c101 = arith.constant 101 : index
    %511 = memref.load %arg3[%c101] : memref<162xf32, #tpu.memory_space<smem>>
    %512 = vector.broadcast %511 : f32 to vector<16x16xf32>
    %513 = arith.mulf %512, %502 : vector<16x16xf32>
    %514 = arith.addf %500, %513 : vector<16x16xf32>
    %c4_140 = arith.constant 4 : index
    %c8_141 = arith.constant 8 : index
    %c129_142 = arith.constant 129 : index
    %515 = vector.load %arg6[%c4_140, %c8_141, %c129_142] : memref<6x32x272xf32, #tpu.memory_space<vmem>>, vector<1x16x16xf32>
    %516 = vector.shape_cast %515 : vector<1x16x16xf32> to vector<16x16xf32>
    %c102 = arith.constant 102 : index
    %517 = memref.load %arg3[%c102] : memref<162xf32, #tpu.memory_space<smem>>
    %518 = vector.broadcast %517 : f32 to vector<16x16xf32>
    %519 = arith.mulf %518, %516 : vector<16x16xf32>
    %520 = arith.addf %506, %519 : vector<16x16xf32>
    %c103 = arith.constant 103 : index
    %521 = memref.load %arg3[%c103] : memref<162xf32, #tpu.memory_space<smem>>
    %522 = vector.broadcast %521 : f32 to vector<16x16xf32>
    %523 = arith.mulf %522, %516 : vector<16x16xf32>
    %524 = arith.addf %510, %523 : vector<16x16xf32>
    %c104 = arith.constant 104 : index
    %525 = memref.load %arg3[%c104] : memref<162xf32, #tpu.memory_space<smem>>
    %526 = vector.broadcast %525 : f32 to vector<16x16xf32>
    %527 = arith.mulf %526, %516 : vector<16x16xf32>
    %528 = arith.addf %514, %527 : vector<16x16xf32>
    %c5_143 = arith.constant 5 : index
    %c8_144 = arith.constant 8 : index
    %c129_145 = arith.constant 129 : index
    %529 = vector.load %arg6[%c5_143, %c8_144, %c129_145] : memref<6x32x272xf32, #tpu.memory_space<vmem>>, vector<1x16x16xf32>
    %530 = vector.shape_cast %529 : vector<1x16x16xf32> to vector<16x16xf32>
    %c105 = arith.constant 105 : index
    %531 = memref.load %arg3[%c105] : memref<162xf32, #tpu.memory_space<smem>>
    %532 = vector.broadcast %531 : f32 to vector<16x16xf32>
    %533 = arith.mulf %532, %530 : vector<16x16xf32>
    %534 = arith.addf %520, %533 : vector<16x16xf32>
    %c106 = arith.constant 106 : index
    %535 = memref.load %arg3[%c106] : memref<162xf32, #tpu.memory_space<smem>>
    %536 = vector.broadcast %535 : f32 to vector<16x16xf32>
    %537 = arith.mulf %536, %530 : vector<16x16xf32>
    %538 = arith.addf %524, %537 : vector<16x16xf32>
    %c107 = arith.constant 107 : index
    %539 = memref.load %arg3[%c107] : memref<162xf32, #tpu.memory_space<smem>>
    %540 = vector.broadcast %539 : f32 to vector<16x16xf32>
    %541 = arith.mulf %540, %530 : vector<16x16xf32>
    %542 = arith.addf %528, %541 : vector<16x16xf32>
    %c0_146 = arith.constant 0 : index
    %c9_147 = arith.constant 9 : index
    %c127_148 = arith.constant 127 : index
    %543 = vector.load %arg6[%c0_146, %c9_147, %c127_148] : memref<6x32x272xf32, #tpu.memory_space<vmem>>, vector<1x16x16xf32>
    %544 = vector.shape_cast %543 : vector<1x16x16xf32> to vector<16x16xf32>
    %c108 = arith.constant 108 : index
    %545 = memref.load %arg3[%c108] : memref<162xf32, #tpu.memory_space<smem>>
    %546 = vector.broadcast %545 : f32 to vector<16x16xf32>
    %547 = arith.mulf %546, %544 : vector<16x16xf32>
    %548 = arith.addf %534, %547 : vector<16x16xf32>
    %c109 = arith.constant 109 : index
    %549 = memref.load %arg3[%c109] : memref<162xf32, #tpu.memory_space<smem>>
    %550 = vector.broadcast %549 : f32 to vector<16x16xf32>
    %551 = arith.mulf %550, %544 : vector<16x16xf32>
    %552 = arith.addf %538, %551 : vector<16x16xf32>
    %c110 = arith.constant 110 : index
    %553 = memref.load %arg3[%c110] : memref<162xf32, #tpu.memory_space<smem>>
    %554 = vector.broadcast %553 : f32 to vector<16x16xf32>
    %555 = arith.mulf %554, %544 : vector<16x16xf32>
    %556 = arith.addf %542, %555 : vector<16x16xf32>
    %c1_149 = arith.constant 1 : index
    %c9_150 = arith.constant 9 : index
    %c127_151 = arith.constant 127 : index
    %557 = vector.load %arg6[%c1_149, %c9_150, %c127_151] : memref<6x32x272xf32, #tpu.memory_space<vmem>>, vector<1x16x16xf32>
    %558 = vector.shape_cast %557 : vector<1x16x16xf32> to vector<16x16xf32>
    %c111 = arith.constant 111 : index
    %559 = memref.load %arg3[%c111] : memref<162xf32, #tpu.memory_space<smem>>
    %560 = vector.broadcast %559 : f32 to vector<16x16xf32>
    %561 = arith.mulf %560, %558 : vector<16x16xf32>
    %562 = arith.addf %548, %561 : vector<16x16xf32>
    %c112 = arith.constant 112 : index
    %563 = memref.load %arg3[%c112] : memref<162xf32, #tpu.memory_space<smem>>
    %564 = vector.broadcast %563 : f32 to vector<16x16xf32>
    %565 = arith.mulf %564, %558 : vector<16x16xf32>
    %566 = arith.addf %552, %565 : vector<16x16xf32>
    %c113 = arith.constant 113 : index
    %567 = memref.load %arg3[%c113] : memref<162xf32, #tpu.memory_space<smem>>
    %568 = vector.broadcast %567 : f32 to vector<16x16xf32>
    %569 = arith.mulf %568, %558 : vector<16x16xf32>
    %570 = arith.addf %556, %569 : vector<16x16xf32>
    %c2_152 = arith.constant 2 : index
    %c9_153 = arith.constant 9 : index
    %c127_154 = arith.constant 127 : index
    %571 = vector.load %arg6[%c2_152, %c9_153, %c127_154] : memref<6x32x272xf32, #tpu.memory_space<vmem>>, vector<1x16x16xf32>
    %572 = vector.shape_cast %571 : vector<1x16x16xf32> to vector<16x16xf32>
    %c114 = arith.constant 114 : index
    %573 = memref.load %arg3[%c114] : memref<162xf32, #tpu.memory_space<smem>>
    %574 = vector.broadcast %573 : f32 to vector<16x16xf32>
    %575 = arith.mulf %574, %572 : vector<16x16xf32>
    %576 = arith.addf %562, %575 : vector<16x16xf32>
    %c115 = arith.constant 115 : index
    %577 = memref.load %arg3[%c115] : memref<162xf32, #tpu.memory_space<smem>>
    %578 = vector.broadcast %577 : f32 to vector<16x16xf32>
    %579 = arith.mulf %578, %572 : vector<16x16xf32>
    %580 = arith.addf %566, %579 : vector<16x16xf32>
    %c116 = arith.constant 116 : index
    %581 = memref.load %arg3[%c116] : memref<162xf32, #tpu.memory_space<smem>>
    %582 = vector.broadcast %581 : f32 to vector<16x16xf32>
    %583 = arith.mulf %582, %572 : vector<16x16xf32>
    %584 = arith.addf %570, %583 : vector<16x16xf32>
    %c3_155 = arith.constant 3 : index
    %c9_156 = arith.constant 9 : index
    %c127_157 = arith.constant 127 : index
    %585 = vector.load %arg6[%c3_155, %c9_156, %c127_157] : memref<6x32x272xf32, #tpu.memory_space<vmem>>, vector<1x16x16xf32>
    %586 = vector.shape_cast %585 : vector<1x16x16xf32> to vector<16x16xf32>
    %c117 = arith.constant 117 : index
    %587 = memref.load %arg3[%c117] : memref<162xf32, #tpu.memory_space<smem>>
    %588 = vector.broadcast %587 : f32 to vector<16x16xf32>
    %589 = arith.mulf %588, %586 : vector<16x16xf32>
    %590 = arith.addf %576, %589 : vector<16x16xf32>
    %c118 = arith.constant 118 : index
    %591 = memref.load %arg3[%c118] : memref<162xf32, #tpu.memory_space<smem>>
    %592 = vector.broadcast %591 : f32 to vector<16x16xf32>
    %593 = arith.mulf %592, %586 : vector<16x16xf32>
    %594 = arith.addf %580, %593 : vector<16x16xf32>
    %c119 = arith.constant 119 : index
    %595 = memref.load %arg3[%c119] : memref<162xf32, #tpu.memory_space<smem>>
    %596 = vector.broadcast %595 : f32 to vector<16x16xf32>
    %597 = arith.mulf %596, %586 : vector<16x16xf32>
    %598 = arith.addf %584, %597 : vector<16x16xf32>
    %c4_158 = arith.constant 4 : index
    %c9_159 = arith.constant 9 : index
    %c127_160 = arith.constant 127 : index
    %599 = vector.load %arg6[%c4_158, %c9_159, %c127_160] : memref<6x32x272xf32, #tpu.memory_space<vmem>>, vector<1x16x16xf32>
    %600 = vector.shape_cast %599 : vector<1x16x16xf32> to vector<16x16xf32>
    %c120 = arith.constant 120 : index
    %601 = memref.load %arg3[%c120] : memref<162xf32, #tpu.memory_space<smem>>
    %602 = vector.broadcast %601 : f32 to vector<16x16xf32>
    %603 = arith.mulf %602, %600 : vector<16x16xf32>
    %604 = arith.addf %590, %603 : vector<16x16xf32>
    %c121 = arith.constant 121 : index
    %605 = memref.load %arg3[%c121] : memref<162xf32, #tpu.memory_space<smem>>
    %606 = vector.broadcast %605 : f32 to vector<16x16xf32>
    %607 = arith.mulf %606, %600 : vector<16x16xf32>
    %608 = arith.addf %594, %607 : vector<16x16xf32>
    %c122 = arith.constant 122 : index
    %609 = memref.load %arg3[%c122] : memref<162xf32, #tpu.memory_space<smem>>
    %610 = vector.broadcast %609 : f32 to vector<16x16xf32>
    %611 = arith.mulf %610, %600 : vector<16x16xf32>
    %612 = arith.addf %598, %611 : vector<16x16xf32>
    %c5_161 = arith.constant 5 : index
    %c9_162 = arith.constant 9 : index
    %c127_163 = arith.constant 127 : index
    %613 = vector.load %arg6[%c5_161, %c9_162, %c127_163] : memref<6x32x272xf32, #tpu.memory_space<vmem>>, vector<1x16x16xf32>
    %614 = vector.shape_cast %613 : vector<1x16x16xf32> to vector<16x16xf32>
    %c123 = arith.constant 123 : index
    %615 = memref.load %arg3[%c123] : memref<162xf32, #tpu.memory_space<smem>>
    %616 = vector.broadcast %615 : f32 to vector<16x16xf32>
    %617 = arith.mulf %616, %614 : vector<16x16xf32>
    %618 = arith.addf %604, %617 : vector<16x16xf32>
    %c124 = arith.constant 124 : index
    %619 = memref.load %arg3[%c124] : memref<162xf32, #tpu.memory_space<smem>>
    %620 = vector.broadcast %619 : f32 to vector<16x16xf32>
    %621 = arith.mulf %620, %614 : vector<16x16xf32>
    %622 = arith.addf %608, %621 : vector<16x16xf32>
    %c125 = arith.constant 125 : index
    %623 = memref.load %arg3[%c125] : memref<162xf32, #tpu.memory_space<smem>>
    %624 = vector.broadcast %623 : f32 to vector<16x16xf32>
    %625 = arith.mulf %624, %614 : vector<16x16xf32>
    %626 = arith.addf %612, %625 : vector<16x16xf32>
    %c0_164 = arith.constant 0 : index
    %c9_165 = arith.constant 9 : index
    %c128_166 = arith.constant 128 : index
    %627 = vector.load %arg6[%c0_164, %c9_165, %c128_166] : memref<6x32x272xf32, #tpu.memory_space<vmem>>, vector<1x16x16xf32>
    %628 = vector.shape_cast %627 : vector<1x16x16xf32> to vector<16x16xf32>
    %c126 = arith.constant 126 : index
    %629 = memref.load %arg3[%c126] : memref<162xf32, #tpu.memory_space<smem>>
    %630 = vector.broadcast %629 : f32 to vector<16x16xf32>
    %631 = arith.mulf %630, %628 : vector<16x16xf32>
    %632 = arith.addf %618, %631 : vector<16x16xf32>
    %c127_167 = arith.constant 127 : index
    %633 = memref.load %arg3[%c127_167] : memref<162xf32, #tpu.memory_space<smem>>
    %634 = vector.broadcast %633 : f32 to vector<16x16xf32>
    %635 = arith.mulf %634, %628 : vector<16x16xf32>
    %636 = arith.addf %622, %635 : vector<16x16xf32>
    %c128_168 = arith.constant 128 : index
    %637 = memref.load %arg3[%c128_168] : memref<162xf32, #tpu.memory_space<smem>>
    %638 = vector.broadcast %637 : f32 to vector<16x16xf32>
    %639 = arith.mulf %638, %628 : vector<16x16xf32>
    %640 = arith.addf %626, %639 : vector<16x16xf32>
    %c1_169 = arith.constant 1 : index
    %c9_170 = arith.constant 9 : index
    %c128_171 = arith.constant 128 : index
    %641 = vector.load %arg6[%c1_169, %c9_170, %c128_171] : memref<6x32x272xf32, #tpu.memory_space<vmem>>, vector<1x16x16xf32>
    %642 = vector.shape_cast %641 : vector<1x16x16xf32> to vector<16x16xf32>
    %c129_172 = arith.constant 129 : index
    %643 = memref.load %arg3[%c129_172] : memref<162xf32, #tpu.memory_space<smem>>
    %644 = vector.broadcast %643 : f32 to vector<16x16xf32>
    %645 = arith.mulf %644, %642 : vector<16x16xf32>
    %646 = arith.addf %632, %645 : vector<16x16xf32>
    %c130 = arith.constant 130 : index
    %647 = memref.load %arg3[%c130] : memref<162xf32, #tpu.memory_space<smem>>
    %648 = vector.broadcast %647 : f32 to vector<16x16xf32>
    %649 = arith.mulf %648, %642 : vector<16x16xf32>
    %650 = arith.addf %636, %649 : vector<16x16xf32>
    %c131 = arith.constant 131 : index
    %651 = memref.load %arg3[%c131] : memref<162xf32, #tpu.memory_space<smem>>
    %652 = vector.broadcast %651 : f32 to vector<16x16xf32>
    %653 = arith.mulf %652, %642 : vector<16x16xf32>
    %654 = arith.addf %640, %653 : vector<16x16xf32>
    %c2_173 = arith.constant 2 : index
    %c9_174 = arith.constant 9 : index
    %c128_175 = arith.constant 128 : index
    %655 = vector.load %arg6[%c2_173, %c9_174, %c128_175] : memref<6x32x272xf32, #tpu.memory_space<vmem>>, vector<1x16x16xf32>
    %656 = vector.shape_cast %655 : vector<1x16x16xf32> to vector<16x16xf32>
    %c132 = arith.constant 132 : index
    %657 = memref.load %arg3[%c132] : memref<162xf32, #tpu.memory_space<smem>>
    %658 = vector.broadcast %657 : f32 to vector<16x16xf32>
    %659 = arith.mulf %658, %656 : vector<16x16xf32>
    %660 = arith.addf %646, %659 : vector<16x16xf32>
    %c133 = arith.constant 133 : index
    %661 = memref.load %arg3[%c133] : memref<162xf32, #tpu.memory_space<smem>>
    %662 = vector.broadcast %661 : f32 to vector<16x16xf32>
    %663 = arith.mulf %662, %656 : vector<16x16xf32>
    %664 = arith.addf %650, %663 : vector<16x16xf32>
    %c134 = arith.constant 134 : index
    %665 = memref.load %arg3[%c134] : memref<162xf32, #tpu.memory_space<smem>>
    %666 = vector.broadcast %665 : f32 to vector<16x16xf32>
    %667 = arith.mulf %666, %656 : vector<16x16xf32>
    %668 = arith.addf %654, %667 : vector<16x16xf32>
    %c3_176 = arith.constant 3 : index
    %c9_177 = arith.constant 9 : index
    %c128_178 = arith.constant 128 : index
    %669 = vector.load %arg6[%c3_176, %c9_177, %c128_178] : memref<6x32x272xf32, #tpu.memory_space<vmem>>, vector<1x16x16xf32>
    %670 = vector.shape_cast %669 : vector<1x16x16xf32> to vector<16x16xf32>
    %c135 = arith.constant 135 : index
    %671 = memref.load %arg3[%c135] : memref<162xf32, #tpu.memory_space<smem>>
    %672 = vector.broadcast %671 : f32 to vector<16x16xf32>
    %673 = arith.mulf %672, %670 : vector<16x16xf32>
    %674 = arith.addf %660, %673 : vector<16x16xf32>
    %c136 = arith.constant 136 : index
    %675 = memref.load %arg3[%c136] : memref<162xf32, #tpu.memory_space<smem>>
    %676 = vector.broadcast %675 : f32 to vector<16x16xf32>
    %677 = arith.mulf %676, %670 : vector<16x16xf32>
    %678 = arith.addf %664, %677 : vector<16x16xf32>
    %c137 = arith.constant 137 : index
    %679 = memref.load %arg3[%c137] : memref<162xf32, #tpu.memory_space<smem>>
    %680 = vector.broadcast %679 : f32 to vector<16x16xf32>
    %681 = arith.mulf %680, %670 : vector<16x16xf32>
    %682 = arith.addf %668, %681 : vector<16x16xf32>
    %c4_179 = arith.constant 4 : index
    %c9_180 = arith.constant 9 : index
    %c128_181 = arith.constant 128 : index
    %683 = vector.load %arg6[%c4_179, %c9_180, %c128_181] : memref<6x32x272xf32, #tpu.memory_space<vmem>>, vector<1x16x16xf32>
    %684 = vector.shape_cast %683 : vector<1x16x16xf32> to vector<16x16xf32>
    %c138 = arith.constant 138 : index
    %685 = memref.load %arg3[%c138] : memref<162xf32, #tpu.memory_space<smem>>
    %686 = vector.broadcast %685 : f32 to vector<16x16xf32>
    %687 = arith.mulf %686, %684 : vector<16x16xf32>
    %688 = arith.addf %674, %687 : vector<16x16xf32>
    %c139 = arith.constant 139 : index
    %689 = memref.load %arg3[%c139] : memref<162xf32, #tpu.memory_space<smem>>
    %690 = vector.broadcast %689 : f32 to vector<16x16xf32>
    %691 = arith.mulf %690, %684 : vector<16x16xf32>
    %692 = arith.addf %678, %691 : vector<16x16xf32>
    %c140 = arith.constant 140 : index
    %693 = memref.load %arg3[%c140] : memref<162xf32, #tpu.memory_space<smem>>
    %694 = vector.broadcast %693 : f32 to vector<16x16xf32>
    %695 = arith.mulf %694, %684 : vector<16x16xf32>
    %696 = arith.addf %682, %695 : vector<16x16xf32>
    %c5_182 = arith.constant 5 : index
    %c9_183 = arith.constant 9 : index
    %c128_184 = arith.constant 128 : index
    %697 = vector.load %arg6[%c5_182, %c9_183, %c128_184] : memref<6x32x272xf32, #tpu.memory_space<vmem>>, vector<1x16x16xf32>
    %698 = vector.shape_cast %697 : vector<1x16x16xf32> to vector<16x16xf32>
    %c141 = arith.constant 141 : index
    %699 = memref.load %arg3[%c141] : memref<162xf32, #tpu.memory_space<smem>>
    %700 = vector.broadcast %699 : f32 to vector<16x16xf32>
    %701 = arith.mulf %700, %698 : vector<16x16xf32>
    %702 = arith.addf %688, %701 : vector<16x16xf32>
    %c142 = arith.constant 142 : index
    %703 = memref.load %arg3[%c142] : memref<162xf32, #tpu.memory_space<smem>>
    %704 = vector.broadcast %703 : f32 to vector<16x16xf32>
    %705 = arith.mulf %704, %698 : vector<16x16xf32>
    %706 = arith.addf %692, %705 : vector<16x16xf32>
    %c143 = arith.constant 143 : index
    %707 = memref.load %arg3[%c143] : memref<162xf32, #tpu.memory_space<smem>>
    %708 = vector.broadcast %707 : f32 to vector<16x16xf32>
    %709 = arith.mulf %708, %698 : vector<16x16xf32>
    %710 = arith.addf %696, %709 : vector<16x16xf32>
    %c0_185 = arith.constant 0 : index
    %c9_186 = arith.constant 9 : index
    %c129_187 = arith.constant 129 : index
    %711 = vector.load %arg6[%c0_185, %c9_186, %c129_187] : memref<6x32x272xf32, #tpu.memory_space<vmem>>, vector<1x16x16xf32>
    %712 = vector.shape_cast %711 : vector<1x16x16xf32> to vector<16x16xf32>
    %c144 = arith.constant 144 : index
    %713 = memref.load %arg3[%c144] : memref<162xf32, #tpu.memory_space<smem>>
    %714 = vector.broadcast %713 : f32 to vector<16x16xf32>
    %715 = arith.mulf %714, %712 : vector<16x16xf32>
    %716 = arith.addf %702, %715 : vector<16x16xf32>
    %c145 = arith.constant 145 : index
    %717 = memref.load %arg3[%c145] : memref<162xf32, #tpu.memory_space<smem>>
    %718 = vector.broadcast %717 : f32 to vector<16x16xf32>
    %719 = arith.mulf %718, %712 : vector<16x16xf32>
    %720 = arith.addf %706, %719 : vector<16x16xf32>
    %c146 = arith.constant 146 : index
    %721 = memref.load %arg3[%c146] : memref<162xf32, #tpu.memory_space<smem>>
    %722 = vector.broadcast %721 : f32 to vector<16x16xf32>
    %723 = arith.mulf %722, %712 : vector<16x16xf32>
    %724 = arith.addf %710, %723 : vector<16x16xf32>
    %c1_188 = arith.constant 1 : index
    %c9_189 = arith.constant 9 : index
    %c129_190 = arith.constant 129 : index
    %725 = vector.load %arg6[%c1_188, %c9_189, %c129_190] : memref<6x32x272xf32, #tpu.memory_space<vmem>>, vector<1x16x16xf32>
    %726 = vector.shape_cast %725 : vector<1x16x16xf32> to vector<16x16xf32>
    %c147 = arith.constant 147 : index
    %727 = memref.load %arg3[%c147] : memref<162xf32, #tpu.memory_space<smem>>
    %728 = vector.broadcast %727 : f32 to vector<16x16xf32>
    %729 = arith.mulf %728, %726 : vector<16x16xf32>
    %730 = arith.addf %716, %729 : vector<16x16xf32>
    %c148 = arith.constant 148 : index
    %731 = memref.load %arg3[%c148] : memref<162xf32, #tpu.memory_space<smem>>
    %732 = vector.broadcast %731 : f32 to vector<16x16xf32>
    %733 = arith.mulf %732, %726 : vector<16x16xf32>
    %734 = arith.addf %720, %733 : vector<16x16xf32>
    %c149 = arith.constant 149 : index
    %735 = memref.load %arg3[%c149] : memref<162xf32, #tpu.memory_space<smem>>
    %736 = vector.broadcast %735 : f32 to vector<16x16xf32>
    %737 = arith.mulf %736, %726 : vector<16x16xf32>
    %738 = arith.addf %724, %737 : vector<16x16xf32>
    %c2_191 = arith.constant 2 : index
    %c9_192 = arith.constant 9 : index
    %c129_193 = arith.constant 129 : index
    %739 = vector.load %arg6[%c2_191, %c9_192, %c129_193] : memref<6x32x272xf32, #tpu.memory_space<vmem>>, vector<1x16x16xf32>
    %740 = vector.shape_cast %739 : vector<1x16x16xf32> to vector<16x16xf32>
    %c150 = arith.constant 150 : index
    %741 = memref.load %arg3[%c150] : memref<162xf32, #tpu.memory_space<smem>>
    %742 = vector.broadcast %741 : f32 to vector<16x16xf32>
    %743 = arith.mulf %742, %740 : vector<16x16xf32>
    %744 = arith.addf %730, %743 : vector<16x16xf32>
    %c151 = arith.constant 151 : index
    %745 = memref.load %arg3[%c151] : memref<162xf32, #tpu.memory_space<smem>>
    %746 = vector.broadcast %745 : f32 to vector<16x16xf32>
    %747 = arith.mulf %746, %740 : vector<16x16xf32>
    %748 = arith.addf %734, %747 : vector<16x16xf32>
    %c152 = arith.constant 152 : index
    %749 = memref.load %arg3[%c152] : memref<162xf32, #tpu.memory_space<smem>>
    %750 = vector.broadcast %749 : f32 to vector<16x16xf32>
    %751 = arith.mulf %750, %740 : vector<16x16xf32>
    %752 = arith.addf %738, %751 : vector<16x16xf32>
    %c3_194 = arith.constant 3 : index
    %c9_195 = arith.constant 9 : index
    %c129_196 = arith.constant 129 : index
    %753 = vector.load %arg6[%c3_194, %c9_195, %c129_196] : memref<6x32x272xf32, #tpu.memory_space<vmem>>, vector<1x16x16xf32>
    %754 = vector.shape_cast %753 : vector<1x16x16xf32> to vector<16x16xf32>
    %c153 = arith.constant 153 : index
    %755 = memref.load %arg3[%c153] : memref<162xf32, #tpu.memory_space<smem>>
    %756 = vector.broadcast %755 : f32 to vector<16x16xf32>
    %757 = arith.mulf %756, %754 : vector<16x16xf32>
    %758 = arith.addf %744, %757 : vector<16x16xf32>
    %c154 = arith.constant 154 : index
    %759 = memref.load %arg3[%c154] : memref<162xf32, #tpu.memory_space<smem>>
    %760 = vector.broadcast %759 : f32 to vector<16x16xf32>
    %761 = arith.mulf %760, %754 : vector<16x16xf32>
    %762 = arith.addf %748, %761 : vector<16x16xf32>
    %c155 = arith.constant 155 : index
    %763 = memref.load %arg3[%c155] : memref<162xf32, #tpu.memory_space<smem>>
    %764 = vector.broadcast %763 : f32 to vector<16x16xf32>
    %765 = arith.mulf %764, %754 : vector<16x16xf32>
    %766 = arith.addf %752, %765 : vector<16x16xf32>
    %c4_197 = arith.constant 4 : index
    %c9_198 = arith.constant 9 : index
    %c129_199 = arith.constant 129 : index
    %767 = vector.load %arg6[%c4_197, %c9_198, %c129_199] : memref<6x32x272xf32, #tpu.memory_space<vmem>>, vector<1x16x16xf32>
    %768 = vector.shape_cast %767 : vector<1x16x16xf32> to vector<16x16xf32>
    %c156 = arith.constant 156 : index
    %769 = memref.load %arg3[%c156] : memref<162xf32, #tpu.memory_space<smem>>
    %770 = vector.broadcast %769 : f32 to vector<16x16xf32>
    %771 = arith.mulf %770, %768 : vector<16x16xf32>
    %772 = arith.addf %758, %771 : vector<16x16xf32>
    %c157 = arith.constant 157 : index
    %773 = memref.load %arg3[%c157] : memref<162xf32, #tpu.memory_space<smem>>
    %774 = vector.broadcast %773 : f32 to vector<16x16xf32>
    %775 = arith.mulf %774, %768 : vector<16x16xf32>
    %776 = arith.addf %762, %775 : vector<16x16xf32>
    %c158 = arith.constant 158 : index
    %777 = memref.load %arg3[%c158] : memref<162xf32, #tpu.memory_space<smem>>
    %778 = vector.broadcast %777 : f32 to vector<16x16xf32>
    %779 = arith.mulf %778, %768 : vector<16x16xf32>
    %780 = arith.addf %766, %779 : vector<16x16xf32>
    %c5_200 = arith.constant 5 : index
    %c9_201 = arith.constant 9 : index
    %c129_202 = arith.constant 129 : index
    %781 = vector.load %arg6[%c5_200, %c9_201, %c129_202] : memref<6x32x272xf32, #tpu.memory_space<vmem>>, vector<1x16x16xf32>
    %782 = vector.shape_cast %781 : vector<1x16x16xf32> to vector<16x16xf32>
    %c159 = arith.constant 159 : index
    %783 = memref.load %arg3[%c159] : memref<162xf32, #tpu.memory_space<smem>>
    %784 = vector.broadcast %783 : f32 to vector<16x16xf32>
    %785 = arith.mulf %784, %782 : vector<16x16xf32>
    %786 = arith.addf %772, %785 : vector<16x16xf32>
    %c160 = arith.constant 160 : index
    %787 = memref.load %arg3[%c160] : memref<162xf32, #tpu.memory_space<smem>>
    %788 = vector.broadcast %787 : f32 to vector<16x16xf32>
    %789 = arith.mulf %788, %782 : vector<16x16xf32>
    %790 = arith.addf %776, %789 : vector<16x16xf32>
    %c161 = arith.constant 161 : index
    %791 = memref.load %arg3[%c161] : memref<162xf32, #tpu.memory_space<smem>>
    %792 = vector.broadcast %791 : f32 to vector<16x16xf32>
    %793 = arith.mulf %792, %782 : vector<16x16xf32>
    %794 = arith.addf %780, %793 : vector<16x16xf32>
    %c0_203 = arith.constant 0 : index
    %795 = memref.load %arg4[%c0_203] : memref<3xf32, #tpu.memory_space<smem>>
    %796 = vector.broadcast %795 : f32 to vector<16x16xf32>
    %797 = arith.addf %786, %796 : vector<16x16xf32>
    %c0_204 = arith.constant 0 : index
    %c0_205 = arith.constant 0 : index
    %c0_206 = arith.constant 0 : index
    %c0_207 = arith.constant 0 : index
    %798 = vector.load %arg5[%c0_204, %c0_205, %c0_206, %c0_207] : memref<1x3x16x16xf32, #tpu.memory_space<vmem>>, vector<1x1x16x16xf32>
    %799 = vector.shape_cast %798 : vector<1x1x16x16xf32> to vector<16x16xf32>
    %800 = vector.shape_cast %797 : vector<16x16xf32> to vector<1x1x16x16xf32>
    tpu.vector_store %arg5[%c0_204, %c0_205, %c0_206, %c0_207], %800 {strides = array<i32>} : memref<1x3x16x16xf32, #tpu.memory_space<vmem>>, vector<1x1x16x16xf32>,
    %c1_208 = arith.constant 1 : index
    %801 = memref.load %arg4[%c1_208] : memref<3xf32, #tpu.memory_space<smem>>
    %802 = vector.broadcast %801 : f32 to vector<16x16xf32>
    %803 = arith.addf %790, %802 : vector<16x16xf32>
    %c0_209 = arith.constant 0 : index
    %c1_210 = arith.constant 1 : index
    %c0_211 = arith.constant 0 : index
    %c0_212 = arith.constant 0 : index
    %804 = vector.load %arg5[%c0_209, %c1_210, %c0_211, %c0_212] : memref<1x3x16x16xf32, #tpu.memory_space<vmem>>, vector<1x1x16x16xf32>
    %805 = vector.shape_cast %804 : vector<1x1x16x16xf32> to vector<16x16xf32>
    %806 = vector.shape_cast %803 : vector<16x16xf32> to vector<1x1x16x16xf32>
    tpu.vector_store %arg5[%c0_209, %c1_210, %c0_211, %c0_212], %806 {strides = array<i32>} : memref<1x3x16x16xf32, #tpu.memory_space<vmem>>, vector<1x1x16x16xf32>,
    %c2_213 = arith.constant 2 : index
    %807 = memref.load %arg4[%c2_213] : memref<3xf32, #tpu.memory_space<smem>>
    %808 = vector.broadcast %807 : f32 to vector<16x16xf32>
    %809 = arith.addf %794, %808 : vector<16x16xf32>
    %c0_214 = arith.constant 0 : index
    %c2_215 = arith.constant 2 : index
    %c0_216 = arith.constant 0 : index
    %c0_217 = arith.constant 0 : index
    %810 = vector.load %arg5[%c0_214, %c2_215, %c0_216, %c0_217] : memref<1x3x16x16xf32, #tpu.memory_space<vmem>>, vector<1x1x16x16xf32>
    %811 = vector.shape_cast %810 : vector<1x1x16x16xf32> to vector<16x16xf32>
    %812 = vector.shape_cast %809 : vector<16x16xf32> to vector<1x1x16x16xf32>
    tpu.vector_store %arg5[%c0_214, %c2_215, %c0_216, %c0_217], %812 {strides = array<i32>} : memref<1x3x16x16xf32, #tpu.memory_space<vmem>>, vector<1x1x16x16xf32>,
    return
  }
  func.func @transform_0(%arg0: i32) -> (i32, i32, i32, i32) {
    %c0_i32 = arith.constant 0 : i32
    %c0_i32_0 = arith.constant 0 : i32
    %c0_i32_1 = arith.constant 0 : i32
    %c0_i32_2 = arith.constant 0 : i32
    return %arg0, %c0_i32, %c0_i32_0, %c0_i32_1 : i32, i32, i32, i32
  }
  func.func @transform_1(%arg0: i32) -> (i32, i32, i32, i32) {
    %c0_i32 = arith.constant 0 : i32
    %c0_i32_0 = arith.constant 0 : i32
    %c0_i32_1 = arith.constant 0 : i32
    %c0_i32_2 = arith.constant 0 : i32
    return %arg0, %c0_i32, %c0_i32_0, %c0_i32_1 : i32, i32, i32, i32
  }
  func.func @transform_2(%arg0: i32) -> i32 {
    %c0_i32 = arith.constant 0 : i32
    %c0_i32_0 = arith.constant 0 : i32
    return %c0_i32 : i32
  }
  func.func @transform_3(%arg0: i32) -> i32 {
    %c0_i32 = arith.constant 0 : i32
    %c0_i32_0 = arith.constant 0 : i32
    return %c0_i32 : i32
  }
  func.func @transform_4(%arg0: i32) -> (i32, i32, i32, i32) {
    %c0_i32 = arith.constant 0 : i32
    %c0_i32_0 = arith.constant 0 : i32
    %c0_i32_1 = arith.constant 0 : i32
    %c0_i32_2 = arith.constant 0 : i32
    return %arg0, %c0_i32, %c0_i32_0, %c0_i32_1 : i32, i32, i32, i32
  }
}

</mosaic_0001>

<bundles_post_ra>
// kernel: tpu_custom_call.1
= control target key start
LH: loop header
LB: loop body
LE: loop exit
PB: predicated region body
PF: predicated region fallthrough
CT: control target
= control target key end

     0   :  { %s11752_s0 = inlined_call_operand.hbm [shape: f32[2,3,16,16], index: 0, kind: input, shape index: {}]   ;;  %s11753_s1 = inlined_call_operand.hbm [shape: f32[2,1,16,16], index: 1, kind: input, shape index: {}]   ;;  %s11754_s2 = inlined_call_operand.vmem [shape: f32[162], index: 2, kind: input, shape index: {}]   ;;  %s11755_s3 = inlined_call_operand.vmem [shape: f32[3], index: 3, kind: input, shape index: {}]   ;;  %s11756_s4 = inlined_call_operand.hbm [shape: f32[2,3,16,16], index: 4, kind: output, shape index: {}]  }
   0x1   :  { %12098 = sst [smem:[#allocation136_spill]] %s11752_s0 }
   0x2   :  { %9 = vsyncpa [#allocation4], 0 }
   0x3   :  { %11 = vsyncpa [#allocation4 + $0x1], 0 }
   0x4   :  { %12 = vsyncpa [#allocation8], 0 }
   0x5   :  { %14 = vsyncpa [#allocation8 + $0x1], 0 }
   0x6   :  { %15 = vsyncpa [#allocation6], 0 }
   0x7   :  { %16 = vsyncpa [#allocation11], 0 }
   0x8   :  { %17 = vsyncpa [#allocation5], 0 }
   0x9   :  { %19 = vsyncpa [#allocation5 + $0x1], 0  ;;  %s5353_s15 = smov 0   ;;  %s5355_s16 = smov 0  }
   0xa   :  { %s5357_s17 = smov 0   ;;  %s5359_s18 = smov 0  }
   0xb LB: > { %s5374_s19 = sadd.s32 4294967295, %s5313_s18   ;;  %s4829_s20 = sadd.s32 4294967294, %s5313_s18   ;;  %s5313_s18 = sphi %s5359_s18, %s13395_s18   ;;  %s5309_s17 = sphi %s5357_s17, %s13394_s17   ;;  %s5305_s16 = sphi %s5355_s16, %s13393_s16   ;;  %s5301_s15 = sphi %s5353_s15, %s13392_s15  }
   0xc   : > { %s5378_s21 = sadd.s32 1, %s5313_s18   ;;  %s32_s22 = sadd.s32 1, %s5309_s17 }
   0xd   : > { %s29_s23 = ssub.s32 %s5313_s18, %s5378_s21  ;;  %p39_p0 = scmp.ne.s32.totalorder %s5309_s17, %s5305_s16 }
   0xe   : > { %p30_p1 = scmp.eq.s32.totalorder %s29_s23, 0  ;;  %p40_p2 = scmp.eq.s32.totalorder %s5313_s18, 0 }
   0xf   : > { %p45_p3 = scmp.ne.s32.totalorder %s5305_s16, %s5301_s15  ;;  %p11757_p4 = scmp.eq.s32.totalorder %s5374_s19, 0 }
  0x10   : > { %s5390_s24 = scalar_select %p30_p1, %s5309_s17, %s32_s22  }
  0x11   : > { %p5392_p5 = por %p40_p2, %p39_p0  ;;  %p5398_p6 = por %p11757_p4, %p45_p3 }
  0x12   : > { %p137_p7 = scmp.eq.s32.totalorder %s5374_s19, 1  ;;  %p143_p8 = scmp.eq.s32.totalorder %s4829_s20, 1 }
  0x13   : > { %s12100_s26 = scalar_select %p5398_p6, 1, 0 }
  0x14   : > { %p4830_p9 = scmp.ge.s32.totalorder %s5313_s18, 1  ;;  %p150_p10 = scmp.lt.s32.totalorder %s5313_s18, 3 }
  0x15   : > { %p5405_p11 = por %p137_p7, %p39_p0  ;;  %p5409_p12 = por %p143_p8, %p45_p3 }
  0x16   : > { %p5413_p13 = pnand %p4830_p9, %p150_p10  ;;  %s163_s6 = sshll.u32 %s11754_s2, 4  ;;  %s164_s6 = int_to_ptr.vmem [resolvable:$true] %s163_s6 }
  0x17   : > { %s12101_s27 = scalar_select %p5405_p11, 1, 0 }
  0x18   : > { %s12102_s28 = scalar_select %p5409_p12, 1, 0 }
  0x19   : > { %s12103_s29 = scalar_select %p5413_p13, 1, 0 }
  0x1a   : > { %p5037_p1 = pneg %p5413_p13  ;;  %p5057_p2 = scmp.lt.s32.totalorder %s5313_s18, 2 }
  0x1b   : > { %s174_s10 = sshll.u32 %s11755_s3, 4  ;;  %s5145_s12 = scalar_lea.vmem %s164_s6, 32  ;;  %s175_s10 = int_to_ptr.vmem [resolvable:$true] %s174_s10 }
  0x1c   : > { %p5426_p7 = pnand %p5037_p1, %p11757_p4  ;;  %p5435_p3 = pnand %p5057_p2, %p5392_p5 }
  0x1d   : > { %p5146_p8 = scmp.ne.s32.totalorder %s164_s6, %s5145_s12  ;;  %p5153_p0 = scmp.lt.s32.totalorder %s164_s6, %s164_s6 }
  0x1e   : > { %p5147_p9 = pneg %p5426_p7  ;;  %p5154_p4 = scmp.lt.s32.totalorder %s5145_s12, %s5145_s12 }
  0x20   : > { %p5148_p10 = pnand %p5147_p9, %p5146_p8  ;;  %p5155_p12 = por %p5154_p4, %p5153_p0 }
  0x22   : > { %p5149_p1 = pneg %p5148_p10 }
  0x24   : > { %p5156_p11 = pnand %p5155_p12, %p5149_p1 }
  0x26   : > { %5159 = shalt.err (!%p5156_p11)
}
  0x27   : > { %s5315_s13 = smov [#allocation9]   ;;  %s5447_s14 = sand.u32 1, %s5309_s17  }
  0x28   : > { %5040 = dma.vmem_to_smem (!%p5426_p7), %s164_s6, 32, %s5315_s13, [#allocation6]  }
  0x29   : > { %s5160_s20 = scalar_lea.vmem %s175_s10, 16  ;;  %p5168_p10 = scmp.lt.s32.totalorder %s175_s10, %s175_s10 }
  0x2a   : > { %p5161_p5 = scmp.ne.s32.totalorder %s175_s10, %s5160_s20  ;;  %p5169_p6 = scmp.lt.s32.totalorder %s5160_s20, %s5160_s20 }
  0x2c   : > { %p5163_p2 = pnand %p5161_p5, %p5147_p9  ;;  %p5170_p13 = por %p5169_p6, %p5168_p10 }
  0x2e   : > { %p5164_p8 = pneg %p5163_p2 }
  0x30   : > { %p5171_p4 = pnand %p5170_p13, %p5164_p8 }
  0x32   : > { %5174 = shalt.err (!%p5171_p4)
}
  0x33   : > { %s5316_s22 = smov [#allocation10]   ;;  %s5019_s23 = smul.u32 48, %s5447_s14 }
  0x34   : > { %5043 = dma.vmem_to_smem (!%p5426_p7), %s175_s10, 16, %s5316_s22, [#allocation11]  }
  0x35   : > { %s5020_s25 = smul.u32 768, %s5313_s18  ;;  %s12106_s0 = sld [smem:[#allocation136_spill]] }
  0x36   : > { %s189_s8 = scalar_lea.vmem [#allocation3], %s5019_s23  ;;  %s186_s7 = scalar_lea.sflag [#allocation4], %s5447_s14 }
  0x37   : > { %s196_s9 = sshll.u32 %s189_s8, 4  ;;  %p5177_p11 = pneg %p5435_p3  ;;  %s5461_s9 = int_to_ptr.vmem [resolvable:$true] %s196_s9 }
  0x3b   : > { %s5459_s6 = scalar_lea.hbm %s12106_s0, %s5020_s25  ;;  %s5180_s20 = scalar_lea.hbm %s12106_s0, 1536 }
  0x3c   : > { %s5175_s12 = scalar_lea.hbm %s5459_s6, 768  ;;  %p5181_p0 = scmp.lt.u32.totalorder %s5459_s6, %s12106_s0 }
  0x3d   : > { %p5176_p6 = scmp.ne.s32.totalorder %s5459_s6, %s5175_s12  ;;  %p5182_p7 = scmp.lt.u32.totalorder %s5180_s20, %s5175_s12 }
  0x3e   : > { %p5184_p1 = scmp.lt.u32.totalorder %s5175_s12, %s5459_s6 }
  0x3f   : > { %p5178_p12 = pnand %p5177_p11, %p5176_p6  ;;  %p5183_p9 = por %p5182_p7, %p5181_p0 }
  0x41   : > { %p5179_p13 = pneg %p5178_p12  ;;  %p5185_p5 = por %p5184_p1, %p5183_p9 }
  0x43   : > { %p5186_p2 = pnand %p5185_p5, %p5179_p13 }
  0x45   : > { %5189 = shalt.err (!%p5186_p2)
}
  0x46   : > { %s5190_s23 = scalar_lea.vmem %s5461_s9, 768  ;;  %s5317_s30 = smov [#allocation3]  }
  0x47   : > { %p5191_p8 = scmp.ne.s32.totalorder %s5461_s9, %s5190_s23  ;;  %s5195_s5 = sshll.u32 %s5317_s30, 4  ;;  %s5196_s5 = int_to_ptr.vmem [resolvable:$false] %s5195_s5 }
  0x48   : > { %s5197_s8 = scalar_lea.vmem %s5196_s5, 1536  ;;  %p5198_p6 = scmp.lt.s32.totalorder %s5461_s9, %s5196_s5 }
  0x49   : > { %p5193_p10 = pnand %p5191_p8, %p5177_p11  ;;  %p5199_p12 = scmp.lt.s32.totalorder %s5197_s8, %s5190_s23 }
  0x4b   : > { %p5194_p4 = pneg %p5193_p10  ;;  %p5200_p0 = por %p5199_p12, %p5198_p6 }
  0x4d   : > { %p5201_p7 = pnand %p5200_p0, %p5194_p4 }
  0x4f   : > { %5204 = shalt.err (!%p5201_p7)
}
  0x50   : > { %s5318_s12 = smov 128   ;;  %s5319_s10 = smov 8  }
  0x51   : > { %5047 = dma.hbm_to_vmem [thread:$0]  (!%p5435_p3), %s5459_s6, 768, %s5461_s9, %s186_s7, %s5318_s12, %s5318_s12, %s5319_s10  }
  0x52   : > { %s4835_s13 = sshll.u32 %s5447_s14, 4  ;;  %s5018_s20 = sshll.u32 %s5313_s18, 8 }
  0x53   : > { %s5499_s23 = scalar_lea.hbm %s11753_s1, %s5018_s20  ;;  %s210_s30 = scalar_lea.vmem [#allocation7], %s4835_s13 }
  0x54   : > { %s217_s5 = sshll.u32 %s210_s30, 4  ;;  %s207_s8 = scalar_lea.sflag [#allocation8], %s5447_s14  ;;  %s5501_s5 = int_to_ptr.vmem [resolvable:$true] %s217_s5 }
  0x55   : > { %s5205_s0 = scalar_lea.hbm %s5499_s23, 256  ;;  %s5210_s7 = scalar_lea.hbm %s11753_s1, 512 }
  0x56   : > { %p5206_p13 = scmp.ne.s32.totalorder %s5499_s23, %s5205_s0  ;;  %p5211_p5 = scmp.lt.u32.totalorder %s5499_s23, %s11753_s1 }
  0x57   : > { %p5212_p2 = scmp.lt.u32.totalorder %s5210_s7, %s5205_s0  ;;  %p5214_p10 = scmp.lt.u32.totalorder %s5205_s0, %s5499_s23 }
  0x58   : > { %p5208_p9 = pnand %p5206_p13, %p5177_p11 }
  0x59   : > { %p5213_p8 = por %p5212_p2, %p5211_p5 }
  0x5a   : > { %p5209_p1 = pneg %p5208_p9 }
  0x5b   : > { %p5215_p4 = por %p5214_p10, %p5213_p8 }
  0x5d   : > { %p5216_p6 = pnand %p5215_p4, %p5209_p1 }
  0x5f   : > { %5219 = shalt.err (!%p5216_p6)
}
  0x60   : > { %s5220_s13 = scalar_lea.vmem %s5501_s5, 256  ;;  %s5320_s25 = smov [#allocation7]  }
  0x61   : > { %p5221_p12 = scmp.ne.s32.totalorder %s5501_s5, %s5220_s13  ;;  %s5225_s30 = sshll.u32 %s5320_s25, 4  ;;  %s5226_s30 = int_to_ptr.vmem [resolvable:$false] %s5225_s30 }
  0x62   : > { %s5227_s6 = scalar_lea.vmem %s5226_s30, 512  ;;  %p5228_p13 = scmp.lt.s32.totalorder %s5501_s5, %s5226_s30 }
  0x63   : > { %p5223_p0 = pnand %p5221_p12, %p5177_p11  ;;  %p5229_p9 = scmp.lt.s32.totalorder %s5227_s6, %s5220_s13 }
  0x65   : > { %p5224_p7 = pneg %p5223_p0  ;;  %p5230_p5 = por %p5229_p9, %p5228_p13 }
  0x67   : > { %p5231_p2 = pnand %p5230_p5, %p5224_p7 }
  0x69   : > { %5234 = shalt.err (!%p5231_p2)
}
  0x6a   : > { %5050 = dma.hbm_to_vmem [thread:$0]  (!%p5435_p3), %s5499_s23, 256, %s5501_s5, %s207_s8, %s5318_s12, %s5318_s12, %s5319_s10  }
  0x6b   : > { %p12107_p11 = scmp.ne.s32.totalorder %s12103_s29, 0 }
  0x6d   : > { %229 = sbr.rel (%p12107_p11) target bundleno = 1133 (0x46d), region = 36 }
  0x74   : > { %s5535_s0 = sand.u32 1, %s5305_s16   ;;  %p12108_p1 = scmp.ne.s32.totalorder %s12100_s26, 0 }
  0x75   : > { %s5021_s9 = smul.u32 48, %s5535_s0  ;;  %s232_s11 = scalar_lea.sflag [#allocation4], %s5535_s0 }
  0x77   : > { %s5541_s7 = scalar_lea.vmem [#allocation3], %s5021_s9 }
  0x78   : > { %5280 = dma.done.wait (%p12108_p1), %s232_s11, 768  }
  0x79   : > { %5282 = vsyncadd (%p12108_p1), %s232_s11, 4294966528  ;;  %s4839_s29 = sshll.u32 %s5535_s0, 4  ;;  %s241_s14 = scalar_lea.sflag [#allocation8], %s5535_s0 }
  0x7a   : > { %s5549_s12 = scalar_lea.vmem [#allocation7], %s4839_s29 }
  0x7b   : > { %5284 = dma.done.wait (%p12108_p1), %s241_s14, 256  }
  0x7c   : > { %5286 = vsyncadd (%p12108_p1), %s241_s14, 4294967040  ;;  %p12109_p3 = scmp.eq.s32.totalorder %s5374_s19, 0 }
  0x7e   : > { %5288 = dma.done.wait (%p12109_p3), [#allocation6], 32   ;;  %p12110_p8 = pmov %p12109_p3 }
  0x7f   : > { %p12111_p10 = pmov %p12109_p3 }
  0x80   : > { %5290 = vsyncadd (%p12110_p8), [#allocation6], 4294967264 }
  0x81   : > { %5292 = dma.done.wait (%p12111_p10), [#allocation11], 16   ;;  %p12112_p4 = pmov %p12109_p3 }
  0x83   : > { %5294 = vsyncadd (%p12112_p4), [#allocation11], 4294967280 }
  0x84   : > { %257 = sfence }
  0x85   : > { %s5563_s10 = sld [smem:[#allocation9 + $0x13]]  ;;  %vm285_vm0 = vcmask 130048   ;;  %v5566_v0 = vld [vmem:[%s5549_s12 + $0x8] sm:$0xff]  ;;  %v5321_v1 = vmov 0.0   ;;  %s4863_s26 = sld [smem:[#allocation9 + $0x12]]  ;;  %v356_v4 = vld [vmem:[%s5549_s12] sm:$0xff] }
  0x86   : > { %284 = vst [vmem:[#allocation2 + $0x8] sm:$0xff] %v5321_v1  ;;  %283 = vst [vmem:[#allocation2] sm:$0xff] %v5321_v1  ;;  %s5568_s23 = sld [smem:[#allocation9 + $0x15]]  ;;  %v359_v2 = vsub.f32 1.0, %v5566_v0  ;;  %v361_v3 = vld [vmem:[%s5541_s7 + $0x8] sm:$0xff]  ;;  %s5572_s5 = sld [smem:[#allocation9 + $0x14]] }
  0x87   : > { %287 = vst [vmem:[#allocation2 + $0x18] sm:$0xff] %v5321_v1  ;;  %288 = vst [vmem:[#allocation2 + $0x20] sm:$0xff] %v5321_v1  ;;  %v360_v5 = vld [vmem:[%s5541_s7] sm:$0xff]  ;;  %v4843_v6 = vld [vmem:[%s5541_s7 + $0x18] sm:$0xff]  ;;  %v358_v8 = vsub.f32 1.0, %v356_v4  ;;  %s5322_s8 = smov 127  }
  0x88   : > { %290 = vst [vmem:[#allocation2 + $0x30] sm:$0xff] %v5321_v1  ;;  %291 = vst [vmem:[#allocation2 + $0x38] sm:$0xff] %v5321_v1  ;;  %v363_v7 = vmul.f32 %v361_v3, %v359_v2  ;;  %v375_v9 = vmul.f32 %v4843_v6, %v359_v2  ;;  %v4842_v10 = vld [vmem:[%s5541_s7 + $0x10] sm:$0xff]  ;;  %v4844_v11 = vld [vmem:[%s5541_s7 + $0x20] sm:$0xff]  ;;  %s4867_s20 = sld [smem:[#allocation9 + $0x16]]  ;;  %s4868_s22 = sld [smem:[#allocation9 + $0x17]] }
  0x89   : > { %293 = vst [vmem:[#allocation2 + $0x48] sm:$0xff] %v5321_v1  ;;  %294 = vst [vmem:[#allocation2 + $0x50] sm:$0xff] %v5321_v1  ;;  %v4845_v12 = vld [vmem:[%s5541_s7 + $0x28] sm:$0xff]  ;;  %v362_v14 = vmul.f32 %v360_v5, %v358_v8  ;;  %v374_v16 = vmul.f32 %v4842_v10, %v358_v8  ;;  %v387_v18 = vmul.f32 %v4844_v11, %v358_v8  ;;  %s4869_s13 = sld [smem:[#allocation9 + $0x18]]  ;;  %s4870_s25 = sld [smem:[#allocation9 + $0x19]]  ;;  %vm1525_vm1 = vcmask 1046528  }
  0x8a   : > { %296 = vst [vmem:[#allocation2 + $0x60] sm:$0xff] %v5321_v1  ;;  %297 = vst [vmem:[#allocation2 + $0x68] sm:$0xff] %v5321_v1  ;;  %v365_v13 = vadd.f32 %v363_v7, %v5566_v0  ;;  %v377_v15 = vadd.f32 %v375_v9, %v5566_v0  ;;  %v388_v19 = vmul.f32 %v4845_v12, %v359_v2  ;;  %s4871_s30 = sld [smem:[#allocation9 + $0x1a]]  ;;  %s4872_s6 = sld [smem:[#allocation9 + $0x1b]]  ;;  %vm2914_vm2 = vcmask 1045504  }
  0x8b   : > { %299 = vst [vmem:[#allocation2 + $0x78] sm:$0xff] %v5321_v1  ;;  %300 = vst [vmem:[#allocation2 + $0x80] sm:$0xff] %v5321_v1  ;;  %v709_v17 = vstv %s5563_s10  ;;  %v686_v20 = vstv %s4863_s26  ;;  %v364_v21 = vadd.f32 %v362_v14, %v356_v4  ;;  %v376_v22 = vadd.f32 %v374_v16, %v356_v4  ;;  %s4873_s11 = sld [smem:[#allocation9 + $0x1c]]  ;;  %s4874_s7 = sld [smem:[#allocation9 + $0x1d]] }
  0x8c   : > { %302 = vst [vmem:[#allocation2 + $0x90] sm:$0xff] %v5321_v1  ;;  %303 = vst [vmem:[#allocation2 + $0x98] sm:$0xff] %v5321_v1  ;;  %v755_v25 = vstv %s5568_s23  ;;  %v732_v26 = vstv %s5572_s5  ;;  %v389_v27 = vadd.f32 %v387_v18, %v356_v4  ;;  %v390_v28 = vadd.f32 %v388_v19, %v5566_v0  ;;  %s4875_s29 = sld [smem:[#allocation9 + $0x1e]]  ;;  %s4876_s14 = sld [smem:[#allocation9 + $0x1f]] }
  0x8d   : > { %305 = vst [vmem:[#allocation2 + $0xa8] sm:$0xff] %v5321_v1  ;;  %306 = vst [vmem:[#allocation2 + $0xb0] sm:$0xff] %v5321_v1  ;;  %v5591_v23 = vld [vmem:[#allocation2 + $0x8] sm:$0x80]  ;;  %s4877_s12 = sld [smem:[#allocation9 + $0x20]]  ;;  %s4878_s10 = sld [smem:[#allocation9 + $0x21]] }
  0x8e   : > { %308 = vst [vmem:[#allocation2 + $0xc0] sm:$0xff] %v5321_v1  ;;  %309 = vst [vmem:[#allocation2 + $0xc8] sm:$0xff] %v5321_v1  ;;  %v710_v29 = vmul.f32 %v709_v17, %v5591_v23  ;;  %v687_v30 = vmul.f32 %v686_v20, %v5591_v23  ;;  %v733_v32 = vmul.f32 %v732_v26, %v5591_v23  ;;  %v778_v45 = vstv %s4867_s20  ;;  %s4879_s26 = sld [smem:[#allocation9 + $0x22]]  ;;  %s4880_s23 = sld [smem:[#allocation9 + $0x23]] }
  0x8f   : > { %311 = vst [vmem:[#allocation2 + $0xd8] sm:$0xff] %v5321_v1  ;;  %312 = vst [vmem:[#allocation2 + $0xe0] sm:$0xff] %v5321_v1  ;;  %v801_v48 = vstv %s4868_s22  ;;  %v824_v54 = vstv %s4869_s13  ;;  %v847_v58 = vstv %s4870_s25  ;;  %s4881_s5 = sld [smem:[#allocation9 + $0x24]]  ;;  %s4882_s20 = sld [smem:[#allocation9 + $0x25]]  ;;  %vm4613_vm3 = vcmask 7168  }
  0x90   : > { %314 = vst [vmem:[#allocation2 + $0xf0] sm:$0xff] %v5321_v1  ;;  %315 = vst [vmem:[#allocation2 + $0xf8] sm:$0xff] %v5321_v1  ;;  %716 = vrot.lane.b32.xlu1 %v710_v29, %s5322_s8  ;;  %693 = vrot.lane.b32.xlu0 %v687_v30, %s5322_s8  ;;  %v870_v0 = vstv %s4871_s30  ;;  %v893_v4 = vstv %s4872_s6  ;;  %s4883_s22 = sld [smem:[#allocation9 + $0x26]]  ;;  %s5323_s13 = smov 126   ;;  %vm4620_vm4 = vcmask 130055   ;;  %vm4623_vm5 = vcmask 129024  }
  0x91   : > { %317 = vst [vmem:[#allocation2 + $0x108] sm:$0xff] %v5321_v1  ;;  %318 = vst [vmem:[#allocation2 + $0x110] sm:$0xff] %v5321_v1  ;;  %v5593_v24 = vld [vmem:[#allocation2 + $0x68] sm:$0x80]  ;;  %v916_v11 = vstv %s4873_s11  ;;  %v939_v14 = vstv %s4874_s7  ;;  %s4884_s25 = sld [smem:[#allocation9 + $0x27]]  ;;  %s4846_s30 = sld [smem:[#allocation9 + $0x1]] }
  0x92   : > { %320 = vst [vmem:[#allocation2 + $0x120] sm:$0xff] %v5321_v1  ;;  %321 = vst [vmem:[#allocation2 + $0x128] sm:$0xff] %v5321_v1  ;;  %v756_v31 = vmul.f32 %v755_v25, %v5593_v24  ;;  %v779_v47 = vmul.f32 %v778_v45, %v5593_v24  ;;  %v802_v49 = vmul.f32 %v801_v48, %v5593_v24  ;;  %s4849_s6 = sld [smem:[#allocation9 + $0x4]]  ;;  %s4852_s11 = sld [smem:[#allocation9 + $0x7]] }
  0x93   : > { %323 = vst [vmem:[#allocation2 + $0x138] sm:$0xff] %v5321_v1  ;;  %324 = vst [vmem:[#allocation2 + $0x140] sm:$0xff] %v5321_v1  ;;  %s4885_s7 = sld [smem:[#allocation9 + $0x28]]  ;;  %p13389_p12 = scmp.ne.s32.totalorder %s12101_s27, 0 }
  0x94   : > { %326 = vst [vmem:[#allocation2 + $0x150] sm:$0xff] %v5321_v1  ;;  %327 = vst [vmem:[#allocation2 + $0x158] sm:$0xff] %v5321_v1  ;;  %762 = vrot.lane.b32.xlu1 %v756_v31, %s5322_s8  ;;  %739 = vrot.lane.b32.xlu0 %v733_v32, %s5322_s8  ;;  %v1008_v32 = vstv %s4877_s12  ;;  %s5776_s12 = sld [smem:[#allocation9 + $0x3]] }
  0x95   : > { %329 = vst [vmem:[#allocation2 + $0x168] sm:$0xff] %v5321_v1  ;;  %330 = vst [vmem:[#allocation2 + $0x170] sm:$0xff] %v5321_v1  ;;  %v5646_v55 = vld [vmem:[#allocation2 + $0xc8] sm:$0x80] }
  0x96   : > { %332 = vst [vmem:[#allocation2 + $0x180] sm:$0xff] %v5321_v1  ;;  %333 = vst [vmem:[#allocation2 + $0x188] sm:$0xff] %v5321_v1  ;;  %v825_v57 = vmul.f32 %v824_v54, %v5646_v55  ;;  %v848_v60 = vmul.f32 %v847_v58, %v5646_v55 }
  0x97   : > { %335 = vst [vmem:[#allocation2 + $0x198] sm:$0xff] %v5321_v1  ;;  %336 = vst [vmem:[#allocation2 + $0x1a0] sm:$0xff] %v5321_v1 }
  0x98   : > { %338 = vst [vmem:[#allocation2 + $0x1b0] sm:$0xff] %v5321_v1  ;;  %339 = vst [vmem:[#allocation2 + $0x1b8] sm:$0xff] %v5321_v1 }
  0x99   : > { %341 = vst [vmem:[#allocation2 + $0x1c8] sm:$0xff] %v5321_v1  ;;  %342 = vst [vmem:[#allocation2 + $0x1d0] sm:$0xff] %v5321_v1  ;;  %v5666_v3 = vld [vmem:[#allocation2 + $0x128] sm:$0x80] }
  0x9a   : > { %344 = vst [vmem:[#allocation2 + $0x1e0] sm:$0xff] %v5321_v1  ;;  %345 = vst [vmem:[#allocation2 + $0x1e8] sm:$0xff] %v5321_v1  ;;  %v894_v5 = vmul.f32 %v893_v4, %v5666_v3 }
  0x9b   : > { %347 = vst [vmem:[#allocation2 + $0x1f8] sm:$0xff] %v5321_v1  ;;  %348 = vst [vmem:[#allocation2 + $0x200] sm:$0xff] %v5321_v1 }
  0x9c   : > { %350 = vst [vmem:[#allocation2 + $0x210] sm:$0xff] %v5321_v1  ;;  %351 = vst [vmem:[#allocation2 + $0x218] sm:$0xff] %v5321_v1 }
  0x9d   : > { %353 = vst [vmem:[#allocation2 + $0x228] sm:$0xff] %v5321_v1  ;;  %354 = vst [vmem:[#allocation2 + $0x230] sm:$0xff] %v5321_v1 }
  0x9e   : > { %370 = vst.msk [vmem:[#allocation2 + $0x158] sm:$0xff] %vm285_vm0, %v359_v2  ;;  %383 = vst.msk [vmem:[#allocation2 + $0x1b8] sm:$0xff] %vm285_vm0, %v359_v2 }
  0x9f   : > { %396 = vst.msk [vmem:[#allocation2 + $0x218] sm:$0xff] %vm285_vm0, %v359_v2  ;;  %369 = vst.msk [vmem:[#allocation2 + $0x140] sm:$0xff] %vm285_vm0, %v358_v8  ;;  %v871_v2 = vmul.f32 %v870_v0, %v5646_v55 }
  0xa0   : > { %382 = vst.msk [vmem:[#allocation2 + $0x1a0] sm:$0xff] %vm285_vm0, %v358_v8  ;;  %395 = vst.msk [vmem:[#allocation2 + $0x200] sm:$0xff] %vm285_vm0, %v358_v8 }
  0xa1   : > { %367 = vst.msk [vmem:[#allocation2 + $0x38] sm:$0xff] %vm285_vm0, %v365_v13  ;;  %380 = vst.msk [vmem:[#allocation2 + $0x98] sm:$0xff] %vm285_vm0, %v377_v15  ;;  %v917_v13 = vmul.f32 %v916_v11, %v5666_v3  ;;  %v940_v15 = vmul.f32 %v939_v14, %v5666_v3 }
  0xa2   : > { %366 = vst.msk [vmem:[#allocation2 + $0x20] sm:$0xff] %vm285_vm0, %v364_v21  ;;  %379 = vst.msk [vmem:[#allocation2 + $0x80] sm:$0xff] %vm285_vm0, %v376_v22  ;;  %v5694_v21 = vld [vmem:[#allocation2 + $0x188] sm:$0x80] }
  0xa3   : > { %392 = vst.msk [vmem:[#allocation2 + $0xe0] sm:$0xff] %vm285_vm0, %v389_v27  ;;  %393 = vst.msk [vmem:[#allocation2 + $0xf8] sm:$0xff] %vm285_vm0, %v390_v28 }
  0xa4   : > { %12113 = vst [vmem:[#allocation18_spill] sm:$0xff] %v5694_v21 }
  0xa5   : > { %v5672_v7 = vld [vmem:[#allocation2 + $0x158] sm:$0x7f] }
  0xa6   : > { %v5674_v8 = vld [vmem:[#allocation2 + $0x140] sm:$0xff]  ;;  %v896_v9 = vmul.f32 %v893_v4, %v5672_v7  ;;  %v919_v16 = vmul.f32 %v916_v11, %v5672_v7  ;;  %v5700_v27 = vld [vmem:[#allocation2 + $0x1b8] sm:$0x7f] }
  0xa7   : > { %v895_v10 = vmul.f32 %v893_v4, %v5674_v8  ;;  %v918_v12 = vmul.f32 %v916_v11, %v5674_v8  ;;  %v941_v18 = vmul.f32 %v939_v14, %v5674_v8  ;;  %v5692_v19 = vld [vmem:[#allocation2 + $0x1a0] sm:$0xff] }
  0xa8   : > { %v5608_v33 = vld [vmem:[#allocation2 + $0x38] sm:$0x7f] }
  0xa9   : > { %v689_v34 = vmul.f32 %v686_v20, %v5608_v33  ;;  %v5613_v35 = vld [vmem:[#allocation2 + $0x20] sm:$0xff]  ;;  %v712_v37 = vmul.f32 %v709_v17, %v5608_v33  ;;  %v735_v40 = vmul.f32 %v732_v26, %v5608_v33  ;;  %v5624_v41 = vld [vmem:[#allocation2 + $0x98] sm:$0x7f] }
  0xaa   : > { %v688_v36 = vmul.f32 %v686_v20, %v5613_v35  ;;  %v711_v38 = vmul.f32 %v709_v17, %v5613_v35  ;;  %v734_v39 = vmul.f32 %v732_v26, %v5613_v35  ;;  %v5626_v42 = vld [vmem:[#allocation2 + $0x80] sm:$0xff]  ;;  %v758_v43 = vmul.f32 %v755_v25, %v5624_v41  ;;  %v5652_v59 = vld [vmem:[#allocation2 + $0xf8] sm:$0x7f] }
  0xab   : > { %697 = vrot.lane.b32.xlu1 %v689_v34, %s5322_s8  ;;  %v757_v44 = vmul.f32 %v755_v25, %v5626_v42  ;;  %v780_v46 = vmul.f32 %v778_v45, %v5626_v42  ;;  %v781_v50 = vmul.f32 %v778_v45, %v5624_v41  ;;  %v804_v51 = vmul.f32 %v801_v48, %v5624_v41  ;;  %v5644_v53 = vld [vmem:[#allocation2 + $0xe0] sm:$0xff] }
  0xac   : > { %695 = vrot.lane.b32.xlu0 %v688_v36, %s5322_s8  ;;  %v803_v52 = vmul.f32 %v801_v48, %v5626_v42  ;;  %v826_v56 = vmul.f32 %v824_v54, %v5644_v53  ;;  %v827_v61 = vmul.f32 %v824_v54, %v5652_v59  ;;  %v850_v62 = vmul.f32 %v847_v58, %v5652_v59 }
  0xad   : > { %v849_v63 = vmul.f32 %v847_v58, %v5644_v53  ;;  %v872_v1 = vmul.f32 %v870_v0, %v5644_v53  ;;  %v873_v6 = vmul.f32 %v870_v0, %v5652_v59  ;;  %v942_v17 = vmul.f32 %v939_v14, %v5672_v7  ;;  %v5766_v14 = vld [vmem:[#allocation2 + $0x60] sm:$0x80] }
  0xae   : > { %v962_v20 = vstv %s4875_s29  ;;  %v985_v26 = vstv %s4876_s14  ;;  %v1010_v34 = vmul.f32 %v1008_v32, %v5692_v19  ;;  %v1009_v36 = vmul.f32 %v1008_v32, %v5694_v21  ;;  %s5770_s29 = sld [smem:[#allocation9 + $0xa]]  ;;  %s5774_s14 = sld [smem:[#allocation9]] }
  0xaf   : > { %720 = vrot.lane.b32.xlu1 %v712_v37, %s5322_s8  ;;  %v964_v22 = vmul.f32 %v962_v20, %v5692_v19  ;;  %v963_v25 = vmul.f32 %v962_v20, %v5694_v21  ;;  %v986_v28 = vmul.f32 %v985_v26, %v5694_v21  ;;  %v965_v29 = vmul.f32 %v962_v20, %v5700_v27  ;;  %v5714_v37 = vld [vmem:[#allocation2 + $0x1e8] sm:$0x80] }
  0xb0   : > { %718 = vrot.lane.b32.xlu0 %v711_v38, %s5322_s8  ;;  %v988_v30 = vmul.f32 %v985_v26, %v5700_v27  ;;  %v987_v31 = vmul.f32 %v985_v26, %v5692_v19  ;;  %v1031_v38 = vstv %s4878_s10  ;;  %s5782_s10 = sld [smem:[#allocation9 + $0x29]] }
  0xb3   : > { %741 = vrot.lane.b32.xlu1 %v734_v39, %s5322_s8  ;;  %v1032_v39 = vmul.f32 %v1031_v38, %v5714_v37 }
  0xb4   : > { %743 = vrot.lane.b32.xlu0 %v735_v40, %s5322_s8  ;;  %v1011_v40 = vmul.f32 %v1008_v32, %v5700_v27 }
  0xb7   : > { %766 = vrot.lane.b32.xlu1 %v758_v43, %s5322_s8  ;;  %v5720_v43 = vld [vmem:[#allocation2 + $0x218] sm:$0x7f] }
  0xb8   : > { %764 = vrot.lane.b32.xlu0 %v757_v44, %s5322_s8  ;;  %v5722_v44 = vld [vmem:[#allocation2 + $0x200] sm:$0xff]  ;;  %v1034_v45 = vmul.f32 %v1031_v38, %v5720_v43 }
  0xbb   : > { %787 = vrot.lane.b32.xlu1 %v780_v46, %s5322_s8  ;;  %v1033_v46 = vmul.f32 %v1031_v38, %v5722_v44 }
  0xbc   : > { %785 = vrot.lane.b32.xlu0 %v779_v47, %s5322_s8  ;;  %v1054_v47 = vstv %s4879_s26  ;;  %s5786_s26 = sld [smem:[#allocation9 + $0xd]] }
  0xbd   : > { %v1056_v48 = vmul.f32 %v1054_v47, %v5722_v44 }
  0xbf   : > { %808 = vrot.lane.b32.xlu1 %v802_v49, %s5322_s8  ;;  %v1055_v49 = vmul.f32 %v1054_v47, %v5714_v37 }
  0xc0   : > { %789 = vrot.lane.b32.xlu0 %v781_v50, %s5322_s8  ;;  %v1077_v50 = vstv %s4880_s23  ;;  %s5802_s23 = sld [smem:[#allocation9 + $0x10]] }
  0xc1   : > { %v1080_v54 = vmul.f32 %v1077_v50, %v5720_v43 }
  0xc3   : > { %812 = vrot.lane.b32.xlu1 %v804_v51, %s5322_s8  ;;  %v1078_v51 = vmul.f32 %v1077_v50, %v5714_v37 }
  0xc4   : > { %810 = vrot.lane.b32.xlu0 %v803_v52, %s5322_s8  ;;  %v1057_v52 = vmul.f32 %v1054_v47, %v5720_v43  ;;  %v5820_v47 = vld [vmem:[#allocation2 + $0x120] sm:$0x80] }
  0xc7   : > { %833 = vrot.lane.b32.xlu1 %v826_v56, %s5322_s8  ;;  %v1079_v56 = vmul.f32 %v1077_v50, %v5722_v44  ;;  %v5826_v50 = vstv %s5774_s14  ;;  %s5903_s14 = sld [smem:[#allocation9 + $0xb]] }
  0xc8   : > { %831 = vrot.lane.b32.xlu0 %v825_v57, %s5322_s8  ;;  %v1100_v57 = vstv %s4881_s5  ;;  %s5804_s5 = sld [smem:[#allocation9 + $0x6]] }
  0xc9   : > { %v1102_v58 = vmul.f32 %v1100_v57, %v5613_v35 }
  0xcb   : > { %854 = vrot.lane.b32.xlu1 %v848_v60, %s5322_s8  ;;  %v1101_v60 = vmul.f32 %v1100_v57, %v5591_v23 }
  0xcc   : > { %835 = vrot.lane.b32.xlu0 %v827_v61, %s5322_s8  ;;  %v1123_v61 = vstv %s4882_s20  ;;  %s5812_s20 = sld [smem:[#allocation9 + $0x9]] }
  0xcd   : > { %v1126_v0 = vmul.f32 %v1123_v61, %v5608_v33 }
  0xcf   : > { %858 = vrot.lane.b32.xlu1 %v850_v62, %s5322_s8  ;;  %v1124_v62 = vmul.f32 %v1123_v61, %v5591_v23 }
  0xd0   : > { %856 = vrot.lane.b32.xlu0 %v849_v63, %s5322_s8  ;;  %v1103_v63 = vmul.f32 %v1100_v57, %v5608_v33 }
  0xd3   : > { %879 = vrot.lane.b32.xlu1 %v872_v1, %s5322_s8  ;;  %v1125_v1 = vmul.f32 %v1123_v61, %v5613_v35 }
  0xd4   : > { %877 = vrot.lane.b32.xlu0 %v871_v2, %s5322_s8  ;;  %v1146_v2 = vstv %s4883_s22  ;;  %s5831_s22 = sld [smem:[#allocation9 + $0xc]] }
  0xd7   : > { %900 = vrot.lane.b32.xlu1 %v894_v5, %s5322_s8 }
  0xd8   : > { %881 = vrot.lane.b32.xlu0 %v873_v6, %s5322_s8  ;;  %v1148_v6 = vmul.f32 %v1146_v2, %v5613_v35 }
  0xdb   : > { %904 = vrot.lane.b32.xlu1 %v896_v9, %s5322_s8  ;;  %v1147_v9 = vmul.f32 %v1146_v2, %v5591_v23 }
  0xdc   : > { %902 = vrot.lane.b32.xlu0 %v895_v10, %s5322_s8  ;;  %v1169_v10 = vstv %s4884_s25  ;;  %s5838_s25 = sld [smem:[#allocation9 + $0x2a]] }
  0xdd   : > { %v1172_v32 = vmul.f32 %v1169_v10, %v5624_v41 }
  0xdf   : > { %925 = vrot.lane.b32.xlu1 %v918_v12, %s5322_s8 }
  0xe0   : > { %923 = vrot.lane.b32.xlu0 %v917_v13, %s5322_s8  ;;  %v5764_v13 = vstv %s4846_s30  ;;  %s5845_s30 = sld [smem:[#allocation9 + $0x2]] }
  0xe3   : > { %946 = vrot.lane.b32.xlu1 %v940_v15, %s5322_s8  ;;  %v5768_v15 = vstv %s4849_s6  ;;  %s5847_s6 = sld [smem:[#allocation9 + $0x5]] }
  0xe4   : > { %927 = vrot.lane.b32.xlu0 %v919_v16, %s5322_s8  ;;  %v5772_v16 = vld [vmem:[#allocation2] sm:$0x80]  ;;  %v467_v20 = vmul.f32 %v5768_v15, %v5766_v14 }
  0xe7   : > { %950 = vrot.lane.b32.xlu1 %v942_v17, %s5322_s8  ;;  %v1170_v17 = vmul.f32 %v1169_v10, %v5593_v24 }
  0xe8   : > { %948 = vrot.lane.b32.xlu0 %v941_v18, %s5322_s8  ;;  %v1149_v18 = vmul.f32 %v1146_v2, %v5608_v33 }
  0xeb   : > { %971 = vrot.lane.b32.xlu1 %v964_v22, %s5322_s8  ;;  %v419_v22 = vmul.f32 %v5764_v13, %v5772_v16 }
  0xec   : > { %969 = vrot.lane.b32.xlu0 %v963_v25, %s5322_s8 }
  0xef   : > { %992 = vrot.lane.b32.xlu1 %v986_v28, %s5322_s8  ;;  %v468_v28 = vmul.f32 %v5768_v15, %v5593_v24 }
  0xf0   : > { %973 = vrot.lane.b32.xlu0 %v965_v29, %s5322_s8  ;;  %v5796_v29 = vld [vmem:[#allocation2 + $0xc0] sm:$0x80] }
  0xf3   : > { %996 = vrot.lane.b32.xlu1 %v988_v30, %s5322_s8  ;;  %v5798_v30 = vstv %s4852_s11  ;;  %s5859_s11 = sld [smem:[#allocation9 + $0xf]] }
  0xf4   : > { %994 = vrot.lane.b32.xlu0 %v987_v31, %s5322_s8  ;;  %v420_v31 = vmul.f32 %v5764_v13, %v5591_v23  ;;  %v515_v38 = vmul.f32 %v5798_v30, %v5796_v29 }
  0xf7   : > { %1017 = vrot.lane.b32.xlu1 %v1010_v34, %s5322_s8  ;;  %v1171_v34 = vmul.f32 %v1169_v10, %v5626_v42  ;;  %v5866_v10 = vstv %s5802_s23  ;;  %s5992_s23 = sld [smem:[#allocation9 + $0x2d]] }
  0xf8   : > { %1015 = vrot.lane.b32.xlu0 %v1009_v36, %s5322_s8  ;;  %v1192_v36 = vstv %s4885_s7  ;;  %s5871_s7 = sld [smem:[#allocation9 + $0x8]] }
  0xfb   : > { %1038 = vrot.lane.b32.xlu1 %v1032_v39, %s5322_s8  ;;  %v473_v39 = vadd.f32 %v467_v20, %v419_v22  ;;  %v1195_v20 = vmul.f32 %v1192_v36, %v5624_v41 }
  0xfc   : > { %1019 = vrot.lane.b32.xlu0 %v1011_v40, %s5322_s8 }
  0xff   : > { %1042 = vrot.lane.b32.xlu1 %v1034_v45, %s5322_s8 }
 0x100   : > { %1040 = vrot.lane.b32.xlu0 %v1033_v46, %s5322_s8  ;;  %v516_v46 = vmul.f32 %v5798_v30, %v5646_v55 }
 0x102   : > { %v5752_v4 = vpop.permute.xlu1 %716  ;;  %v5754_v5 = vpop.permute.xlu0 %693 }
 0x103   : > { %1063 = vrot.lane.b32.xlu1 %v1056_v48, %s5322_s8  ;;  %12114 = vst [vmem:[#allocation19_spill] sm:$0xff] %v5752_v4  ;;  %12115 = vst [vmem:[#allocation20_spill] sm:$0xff] %v5754_v5  ;;  %v5823_v48 = vstv %s5770_s29  ;;  %s5881_s29 = sld [smem:[#allocation9 + $0x2b]]  ;;  %v5975_v5 = vld [vmem:[#allocation2 + $0x90] sm:$0x7f]  ;;  %v5978_v4 = vstv %s5903_s14  ;;  %s6293_s14 = sld [smem:[#allocation9 + $0x49]] }
 0x104   : > { %1061 = vrot.lane.b32.xlu0 %v1055_v49, %s5322_s8  ;;  %v474_v49 = vadd.f32 %v468_v28, %v420_v31  ;;  %v563_v57 = vmul.f32 %v5823_v48, %v5820_v47  ;;  %v406_v28 = vmul.f32 %v5826_v50, %v5591_v23  ;;  %12134 = vst [vmem:[#allocation39_spill] sm:$0xff] %v5978_v4 }
 0x106   : > { %v5760_v11 = vpop.permute.xlu1 %762  ;;  %v5762_v12 = vpop.permute.xlu0 %739 }
 0x107   : > { %1084 = vrot.lane.b32.xlu1 %v1078_v51, %s5322_s8  ;;  %12116 = vst [vmem:[#allocation21_spill] sm:$0xff] %v5760_v11  ;;  %12117 = vst [vmem:[#allocation22_spill] sm:$0xff] %v5762_v12  ;;  %v5829_v51 = vstv %s5776_s12  ;;  %s5905_s12 = sld [smem:[#allocation9 + $0xe]]  ;;  %v5973_v11 = vld [vmem:[#allocation2 + $0x30] sm:$0x7f] }
 0x108   : > { %1065 = vrot.lane.b32.xlu0 %v1057_v52, %s5322_s8  ;;  %v1194_v52 = vmul.f32 %v1192_v36, %v5626_v42  ;;  %v453_v2 = vmul.f32 %v5829_v51, %v5766_v14  ;;  %v454_v22 = vmul.f32 %v5829_v51, %v5593_v24 }
 0x10b   : > { %1088 = vrot.lane.b32.xlu1 %v1080_v54, %s5322_s8  ;;  %v1193_v54 = vmul.f32 %v1192_v36, %v5593_v24 }
 0x10c   : > { %1086 = vrot.lane.b32.xlu0 %v1079_v56, %s5322_s8  ;;  %v1215_v56 = vstv %s5782_s10  ;;  %s5915_s10 = sld [smem:[#allocation9 + $0x11]] }
 0x10f   : > { %1109 = vrot.lane.b32.xlu1 %v1102_v58, %s5323_s13  ;;  %v5843_v58 = vstv %s5786_s26  ;;  %s5951_s26 = sld [smem:[#allocation9 + $0x2c]] }
 0x110   : > { %1107 = vrot.lane.b32.xlu0 %v1101_v60, %s5323_s13  ;;  %v521_v60 = vadd.f32 %v515_v38, %v473_v39  ;;  %v5888_v38 = vstv %s5812_s20  ;;  %s6081_s20 = sld [smem:[#allocation9 + $0x2f]] }
 0x113   : > { %1130 = vrot.lane.b32.xlu1 %v1124_v62, %s5323_s13 }
 0x114   : > { %1111 = vrot.lane.b32.xlu0 %v1103_v63, %s5323_s13  ;;  %v564_v63 = vmul.f32 %v5823_v48, %v5666_v3 }
 0x117   : > { %1134 = vrot.lane.b32.xlu1 %v1126_v0, %s5323_s13  ;;  %v5855_v0 = vld [vmem:[#allocation2 + $0x180] sm:$0x80] }
 0x118   : > { %1132 = vrot.lane.b32.xlu0 %v1125_v1, %s5323_s13  ;;  %v522_v1 = vadd.f32 %v516_v46, %v474_v49  ;;  %v611_v31 = vmul.f32 %v5843_v58, %v5855_v0 }
 0x11a   : > { %v570_v49 = vadd.f32 %v564_v63, %v522_v1  ;;  %v1217_v63 = vmul.f32 %v1215_v56, %v5626_v42 }
 0x11b   : > { %1155 = vrot.lane.b32.xlu1 %v1148_v6, %s5323_s13  ;;  %v405_v6 = vmul.f32 %v5826_v50, %v5772_v16 }
 0x11c   : > { %1153 = vrot.lane.b32.xlu0 %v1147_v9, %s5323_s13  ;;  %v5863_v9 = vld [vmem:[#allocation2 + $0x1e0] sm:$0x80] }
 0x11d   : > { %v5790_v25 = vpop.permute.xlu1 %697  ;;  %v659_v46 = vmul.f32 %v5866_v10, %v5863_v9 }
 0x11e   : > { %12118 = vst [vmem:[#allocation23_spill] sm:$0xff] %v5790_v25  ;;  %v5792_v26 = vpop.permute.xlu0 %695 }
 0x11f   : > { %12119 = vst [vmem:[#allocation24_spill] sm:$0xff] %v5792_v26  ;;  %1176 = vrot.lane.b32.xlu1 %v1170_v17, %s5323_s13  ;;  %v5869_v17 = vstv %s5804_s5  ;;  %s6053_s5 = sld [smem:[#allocation9 + $0x2e]] }
 0x120   : > { %1157 = vrot.lane.b32.xlu0 %v1149_v18, %s5323_s13  ;;  %v1216_v18 = vmul.f32 %v1215_v56, %v5593_v24  ;;  %v502_v1 = vmul.f32 %v5869_v17, %v5646_v55 }
 0x121   : > { %v5814_v40 = vpop.permute.xlu1 %720 }
 0x122   : > { %12120 = vst [vmem:[#allocation25_spill] sm:$0xff] %v5814_v40  ;;  %v5816_v45 = vpop.permute.xlu0 %718 }
 0x123   : > { %12121 = vst [vmem:[#allocation26_spill] sm:$0xff] %v5816_v45  ;;  %1180 = vrot.lane.b32.xlu1 %v1172_v32, %s5323_s13  ;;  %v612_v32 = vmul.f32 %v5843_v58, %v5694_v21 }
 0x124   : > { %1178 = vrot.lane.b32.xlu0 %v1171_v34, %s5323_s13  ;;  %v569_v34 = vadd.f32 %v563_v57, %v521_v60  ;;  %v5901_v57 = vstv %s5831_s22  ;;  %v1218_v60 = vmul.f32 %v1215_v56, %v5624_v41  ;;  %s6130_s22 = sld [smem:[#allocation9 + $0x30]] }
 0x125   : > { %v5849_v61 = vpop.permute.xlu1 %741  ;;  %v618_v40 = vadd.f32 %v612_v32, %v570_v49 }
 0x126   : > { %12122 = vst [vmem:[#allocation27_spill] sm:$0xff] %v5849_v61  ;;  %v5851_v62 = vpop.permute.xlu0 %743  ;;  %v5924_v61 = vstv %s5847_s6  ;;  %s6250_s6 = sld [smem:[#allocation9 + $0x33]] }
 0x127   : > { %12123 = vst [vmem:[#allocation28_spill] sm:$0xff] %v5851_v62  ;;  %1201 = vrot.lane.b32.xlu1 %v1194_v52, %s5323_s13  ;;  %v501_v52 = vmul.f32 %v5869_v17, %v5796_v29  ;;  %v660_v62 = vmul.f32 %v5866_v10, %v5714_v37  ;;  %12126 = vst [vmem:[#allocation31_spill] sm:$0xff] %v5924_v61 }
 0x128   : > { %1199 = vrot.lane.b32.xlu0 %v1193_v54, %s5323_s13  ;;  %v459_v54 = vadd.f32 %v453_v2, %v405_v6  ;;  %v549_v2 = vmul.f32 %v5888_v38, %v5820_v47  ;;  %v460_v6 = vadd.f32 %v454_v22, %v406_v28  ;;  %v597_v22 = vmul.f32 %v5901_v57, %v5855_v0 }
 0x129   : > { %v5890_v39 = vpop.permute.xlu1 %766  ;;  %v5933_v28 = vstv %s5859_s11  ;;  %s6273_s11 = sld [smem:[#allocation9 + $0x48]] }
 0x12a   : > { %12124 = vst [vmem:[#allocation29_spill] sm:$0xff] %v5890_v39  ;;  %v5892_v36 = vpop.permute.xlu0 %764  ;;  %v617_v39 = vadd.f32 %v611_v31, %v569_v34  ;;  %v507_v26 = vadd.f32 %v501_v52, %v459_v54  ;;  %v5937_v31 = vmul.f32 %v5901_v57, %v5694_v21  ;;  %v5940_v34 = vstv %s5871_s7  ;;  %s6285_s7 = sld [smem:[#allocation9 + $0x34]] }
 0x12b   : > { %12125 = vst [vmem:[#allocation30_spill] sm:$0xff] %v5892_v36  ;;  %1222 = vrot.lane.b32.xlu1 %v1216_v18, %s5323_s13  ;;  %v1238_v36 = vstv %s5838_s25  ;;  %v550_v18 = vmul.f32 %v5888_v38, %v5666_v3  ;;  %12129 = vst [vmem:[#allocation34_spill] sm:$0xff] %v5940_v34  ;;  %v508_v49 = vadd.f32 %v502_v1, %v460_v6  ;;  %v1261_v54 = vstv %s5881_s29  ;;  %s6166_s25 = sld [smem:[#allocation9 + $0x31]]  ;;  %s6287_s29 = sld [smem:[#allocation9 + $0x4a]] }
 0x12c   : > { %1203 = vrot.lane.b32.xlu0 %v1195_v20, %s5323_s13  ;;  %v5921_v20 = vstv %s5845_s30  ;;  %v1239_v32 = vmul.f32 %v1238_v36, %v5646_v55  ;;  %v5953_v25 = vadd.f32 %v659_v46, %v617_v39  ;;  %v5967_v6 = vadd.f32 %v660_v62, %v618_v40  ;;  %s6224_s30 = sld [smem:[#allocation9 + $0x32]] }
 0x12d   : > { %v5926_v56 = vpop.permute.xlu1 %787  ;;  %v433_v52 = vmul.f32 %v5921_v20, %v5772_v16  ;;  %v555_v12 = vadd.f32 %v549_v2, %v507_v26  ;;  %v529_v39 = vmul.f32 %v5940_v34, %v5796_v29  ;;  %v530_v46 = vmul.f32 %v5940_v34, %v5646_v55 }
 0x12e   : > { %12127 = vst [vmem:[#allocation32_spill] sm:$0xff] %v5926_v56  ;;  %v5928_v45 = vpop.permute.xlu0 %785  ;;  %v1240_v56 = vmul.f32 %v1238_v36, %v5644_v53  ;;  %12130 = vst [vmem:[#allocation35_spill] sm:$0xff] %v5953_v25  ;;  %v1262_v26 = vmul.f32 %v1261_v54, %v5646_v55  ;;  %v1241_v40 = vmul.f32 %v1238_v36, %v5652_v59  ;;  %v5988_v62 = vstv %s5915_s10  ;;  %v6012_v25 = vld [vmem:[#allocation2 + $0xf0] sm:$0x7f]  ;;  %s6301_s10 = sld [smem:[#allocation9 + $0x4b]] }
 0x12f   : > { %12128 = vst [vmem:[#allocation33_spill] sm:$0xff] %v5928_v45  ;;  %1226 = vrot.lane.b32.xlu1 %v1218_v60, %s5323_s13  ;;  %v481_v45 = vmul.f32 %v5924_v61, %v5766_v14  ;;  %v645_v60 = vmul.f32 %v5933_v28, %v5863_v9  ;;  %v482_v14 = vmul.f32 %v5924_v61, %v5593_v24  ;;  %12133 = vst [vmem:[#allocation38_spill] sm:$0xff] %v5967_v6 }
 0x130   : > { %1224 = vrot.lane.b32.xlu0 %v1217_v63, %s5323_s13  ;;  %v5959_v63 = vmul.f32 %v5933_v28, %v5714_v37  ;;  %v5981_v24 = vstv %s5905_s12  ;;  %v556_v29 = vadd.f32 %v550_v18, %v508_v49  ;;  %v434_v2 = vmul.f32 %v5921_v20, %v5591_v23  ;;  %s6295_s12 = sld [smem:[#allocation9 + $0x4c]] }
 0x131   : > { %v5963_v1 = vpop.permute.xlu1 %808  ;;  %12135 = vst [vmem:[#allocation40_spill] sm:$0xff] %v5981_v24  ;;  %v458_v36 = vmul.f32 %v5829_v51, %v5624_v41  ;;  %v603_v23 = vadd.f32 %v597_v22, %v555_v12  ;;  %v625_v6 = vmul.f32 %v5981_v24, %v5855_v0  ;;  %v6016_v34 = vmul.f32 %v5981_v24, %v5694_v21 }
 0x132   : > { %12131 = vst [vmem:[#allocation36_spill] sm:$0xff] %v5963_v1  ;;  %v5965_v16 = vpop.permute.xlu0 %789  ;;  %v409_v1 = vmul.f32 %v5826_v50, %v5973_v11  ;;  %v1264_v12 = vmul.f32 %v1261_v54, %v5652_v59  ;;  %v6024_v22 = vmul.f32 %v5988_v62, %v5863_v9  ;;  %v505_v24 = vmul.f32 %v5869_v17, %v6012_v25 }
 0x133   : > { %12132 = vst [vmem:[#allocation37_spill] sm:$0xff] %v5965_v16  ;;  %1247 = vrot.lane.b32.xlu1 %v1240_v56, %s5323_s13  ;;  %v487_v16 = vadd.f32 %v481_v45, %v433_v52  ;;  %v410_v56 = vmul.f32 %v5826_v50, %v5608_v33  ;;  %v577_v45 = vmul.f32 %v5978_v4, %v5820_v47  ;;  %v407_v9 = vmul.f32 0.0, %v5826_v50 }
 0x134   : > { %1245 = vrot.lane.b32.xlu0 %v1239_v32, %s5323_s13  ;;  %v457_v32 = vmul.f32 %v5829_v51, %v5975_v5  ;;  %v578_v52 = vmul.f32 %v5978_v4, %v5666_v3  ;;  %v1263_v47 = vmul.f32 %v1261_v54, %v5644_v53 }
 0x135   : > { %v6002_v18 = vpop.permute.xlu1 %812  ;;  %v535_v0 = vadd.f32 %v529_v39, %v487_v16  ;;  %v464_v61 = vadd.f32 %v458_v36, %v410_v56  ;;  %v456_v16 = vmul.f32 %v5829_v51, %v5626_v42  ;;  %v604_v39 = vadd.f32 %v5937_v31, %v556_v29 }
 0x136   : > { %12136 = vst [vmem:[#allocation41_spill] sm:$0xff] %v6002_v18  ;;  %v6004_v49 = vpop.permute.xlu0 %810  ;;  %v1284_v18 = vstv %s5951_s26  ;;  %v463_v4 = vadd.f32 %v457_v32, %v409_v1  ;;  %v455_v1 = vmul.f32 0.0, %v5829_v51  ;;  %v6048_v32 = vadd.f32 %v645_v60, %v603_v23  ;;  %v6063_v60 = vld [vmem:[#allocation2 + $0x210] sm:$0x7f]  ;;  %s6332_s26 = sld [smem:[#allocation9 + $0x35]] }
 0x137   : > { %12137 = vst [vmem:[#allocation42_spill] sm:$0xff] %v6004_v49  ;;  %1268 = vrot.lane.b32.xlu1 %v1262_v26, %s5323_s13  ;;  %v488_v49 = vadd.f32 %v482_v14, %v434_v2  ;;  %v506_v26 = vmul.f32 %v5869_v17, %v5652_v59  ;;  %v408_v14 = vmul.f32 %v5826_v50, %v5613_v35  ;;  %v503_v23 = vmul.f32 0.0, %v5869_v17 }
 0x138   : > { %1249 = vrot.lane.b32.xlu0 %v1241_v40, %s5323_s13  ;;  %v6031_v40 = vld [vmem:[#allocation2 + $0x150] sm:$0x7f]  ;;  %v1286_v2 = vmul.f32 %v1284_v18, %v5644_v53  ;;  %v1285_v56 = vmul.f32 %v1284_v18, %v5646_v55  ;;  %v583_v51 = vadd.f32 %v577_v45, %v535_v0  ;;  %v554_v29 = vmul.f32 %v5888_v38, %v5672_v7 }
 0x139   : > { %v6033_v21 = vpop.permute.xlu1 %833  ;;  %v536_v36 = vadd.f32 %v530_v46, %v488_v49  ;;  %v553_v50 = vmul.f32 %v5888_v38, %v6031_v40  ;;  %v512_v31 = vadd.f32 %v506_v26, %v464_v61  ;;  %v461_v46 = vadd.f32 %v455_v1, %v407_v9 }
 0x13a   : > { %12138 = vst [vmem:[#allocation43_spill] sm:$0xff] %v6033_v21  ;;  %v6035_v54 = vpop.permute.xlu0 %831  ;;  %v511_v21 = vadd.f32 %v505_v24, %v463_v4  ;;  %v462_v49 = vadd.f32 %v456_v16, %v408_v14  ;;  %v504_v45 = vmul.f32 %v5869_v17, %v5644_v53  ;;  %v674_v4 = vmul.f32 %v5988_v62, %v5714_v37 }
 0x13b   : > { %12139 = vst [vmem:[#allocation44_spill] sm:$0xff] %v6035_v54  ;;  %1272 = vrot.lane.b32.xlu1 %v1264_v12, %s5323_s13  ;;  %v1307_v54 = vstv %s5992_s23  ;;  %v6057_v12 = vld [vmem:[#allocation2 + $0x1b0] sm:$0x7f]  ;;  %v1287_v24 = vmul.f32 %v1284_v18, %v5652_v59  ;;  %v6075_v0 = vadd.f32 %v5959_v63, %v604_v39  ;;  %v584_v26 = vadd.f32 %v578_v52, %v536_v36  ;;  %s6334_s23 = sld [smem:[#allocation9 + $0x4d]] }
 0x13c   : > { %1270 = vrot.lane.b32.xlu0 %v1263_v47, %s5323_s13  ;;  %v1308_v61 = vmul.f32 %v1307_v54, %v5666_v3  ;;  %v601_v9 = vmul.f32 %v5901_v57, %v6057_v12  ;;  %v602_v17 = vmul.f32 %v5901_v57, %v5700_v27  ;;  %v631_v14 = vadd.f32 %v625_v6, %v583_v51 }
 0x13d   : > { %v6059_v47 = vpop.permute.xlu1 %854  ;;  %v559_v1 = vadd.f32 %v553_v50, %v511_v21  ;;  %v560_v16 = vadd.f32 %v554_v29, %v512_v31  ;;  %v509_v52 = vadd.f32 %v503_v23, %v461_v46  ;;  %v510_v39 = vadd.f32 %v504_v45, %v462_v49 }
 0x13e   : > { %12140 = vst [vmem:[#allocation45_spill] sm:$0xff] %v6059_v47  ;;  %v6061_v55 = vpop.permute.xlu0 %835  ;;  %v552_v36 = vmul.f32 %v5888_v38, %v5674_v8  ;;  %v650_v6 = vmul.f32 %v5933_v28, %v5720_v43  ;;  %v1310_v21 = vmul.f32 %v1307_v54, %v5672_v7  ;;  %v1309_v50 = vmul.f32 %v1307_v54, %v5674_v8  ;;  %v12154_v47 = vld [vmem:[#allocation18_spill] sm:$0xff] }
 0x13f   : > { %12141 = vst [vmem:[#allocation46_spill] sm:$0xff] %v6061_v55  ;;  %1293 = vrot.lane.b32.xlu1 %v1286_v2, %s5323_s13  ;;  %v649_v2 = vmul.f32 %v5933_v28, %v6063_v60  ;;  %v632_v51 = vadd.f32 %v6016_v34, %v584_v26  ;;  %v423_v31 = vmul.f32 %v5764_v13, %v5973_v11  ;;  %v6112_v26 = vld [vmem:[#allocation2 + $0x8] sm:$0xff]  ;;  %v12153_v55 = vld [vmem:[#allocation34_spill] sm:$0xff] }
 0x140   : > { %1291 = vrot.lane.b32.xlu0 %v1285_v56, %s5323_s13  ;;  %v551_v56 = vmul.f32 0.0, %v5888_v38  ;;  %v471_v29 = vmul.f32 %v5768_v15, %v5975_v5  ;;  %v1330_v38 = vstv %s6053_s5  ;;  %v607_v46 = vadd.f32 %v601_v9, %v559_v1  ;;  %s6349_s5 = sld [smem:[#allocation9 + $0x4e]] }
 0x141   : > { %v6085_v18 = vpop.permute.xlu1 %858  ;;  %v608_v49 = vadd.f32 %v602_v17, %v560_v16  ;;  %v424_v23 = vmul.f32 %v5764_v13, %v5608_v33  ;;  %v472_v45 = vmul.f32 %v5768_v15, %v5624_v41  ;;  %v600_v9 = vmul.f32 %v5901_v57, %v5692_v19 }
 0x142   : > { %12142 = vst [vmem:[#allocation47_spill] sm:$0xff] %v6085_v18  ;;  %v6087_v63 = vpop.permute.xlu0 %856  ;;  %v557_v34 = vadd.f32 %v551_v56, %v509_v52  ;;  %v6119_v17 = vadd.f32 %v6024_v22, %v631_v14  ;;  %v1332_v1 = vmul.f32 %v1330_v38, %v5674_v8  ;;  %v1331_v16 = vmul.f32 %v1330_v38, %v5666_v3 }
 0x143   : > { %12143 = vst [vmem:[#allocation48_spill] sm:$0xff] %v6087_v63  ;;  %1314 = vrot.lane.b32.xlu1 %v1308_v61, %s5323_s13  ;;  %v599_v63 = vmul.f32 %v6112_v26, %v5901_v57  ;;  %v6125_v52 = vadd.f32 %v674_v4, %v632_v51  ;;  %v519_v56 = vmul.f32 %v5798_v30, %v6012_v25 }
 0x144   : > { %1295 = vrot.lane.b32.xlu0 %v1287_v24, %s5323_s13  ;;  %v558_v24 = vadd.f32 %v552_v36, %v510_v39  ;;  %v477_v39 = vadd.f32 %v471_v29, %v423_v31  ;;  %v1353_v36 = vstv %s6081_s20  ;;  %v6132_v57 = vadd.f32 %v649_v2, %v607_v46  ;;  %s6409_s20 = sld [smem:[#allocation9 + $0x50]] }
 0x145   : > { %v6108_v61 = vpop.permute.xlu1 %879  ;;  %v6134_v22 = vadd.f32 %v650_v6, %v608_v49  ;;  %v478_v14 = vadd.f32 %v472_v45, %v424_v23  ;;  %v6142_v4 = vadd.f32 %v599_v63, %v557_v34  ;;  %v6148_v31 = vmul.f32 %v6112_v26, %v5933_v28 }
 0x146   : > { %12144 = vst [vmem:[#allocation49_spill] sm:$0xff] %v6108_v61  ;;  %v6110_v54 = vpop.permute.xlu0 %877  ;;  %v6144_v51 = vadd.f32 %v600_v9, %v558_v24  ;;  %v6152_v2 = vmul.f32 %v5933_v28, %v5722_v44  ;;  %v567_v6 = vmul.f32 %v5823_v48, %v6031_v40  ;;  %v1354_v63 = vmul.f32 %v1353_v36, %v5666_v3 }
 0x147   : > { %12145 = vst [vmem:[#allocation50_spill] sm:$0xff] %v6110_v54  ;;  %1318 = vrot.lane.b32.xlu1 %v1310_v21, %s5323_s13  ;;  %12146 = vst [vmem:[#allocation51_spill] sm:$0xff] %v6134_v22  ;;  %v520_v21 = vmul.f32 %v5798_v30, %v5652_v59  ;;  %v1333_v29 = vmul.f32 %v1330_v38, %v5672_v7  ;;  %v525_v46 = vadd.f32 %v519_v56, %v477_v39 }
 0x148   : > { %1316 = vrot.lane.b32.xlu0 %v1309_v50, %s5323_s13  ;;  %v568_v49 = vmul.f32 %v5823_v48, %v5672_v7  ;;  %v615_v23 = vmul.f32 %v5843_v58, %v6057_v12  ;;  %v616_v28 = vmul.f32 %v5843_v58, %v5700_v27  ;;  %v6170_v34 = vmul.f32 %v5866_v10, %v6063_v60 }
 0x149   : > { %v6138_v50 = vpop.permute.xlu1 %900  ;;  %v526_v45 = vadd.f32 %v520_v21, %v478_v14  ;;  %v6174_v3 = vmul.f32 %v5866_v10, %v5720_v43  ;;  %v421_v38 = vmul.f32 %v6112_v26, %v5764_v13  ;;  %v470_v39 = vmul.f32 %v5768_v15, %v5626_v42  ;;  %v12151_v14 = vld [vmem:[#allocation31_spill] sm:$0xff] }
 0x14a   : > { %12147 = vst [vmem:[#allocation52_spill] sm:$0xff] %v6138_v50  ;;  %v6140_v54 = vpop.permute.xlu0 %881  ;;  %v435_v56 = vmul.f32 %v6112_v26, %v5921_v20  ;;  %v483_v21 = vmul.f32 %v6112_v26, %v12151_v14  ;;  %v1376_v50 = vstv %s6130_s22  ;;  %v517_v18 = vmul.f32 %v6112_v26, %v5798_v30  ;;  %s6419_s22 = sld [smem:[#allocation9 + $0x4f]] }
 0x14b   : > { %12148 = vst [vmem:[#allocation53_spill] sm:$0xff] %v6140_v54  ;;  %1339 = vrot.lane.b32.xlu1 %v1332_v1, %s5323_s13  ;;  %v422_v1 = vmul.f32 %v5764_v13, %v5613_v35  ;;  %v1355_v13 = vmul.f32 %v1353_v36, %v5674_v8  ;;  %v436_v54 = vmul.f32 %v5921_v20, %v5613_v35 }
 0x14c   : > { %1337 = vrot.lane.b32.xlu0 %v1331_v16, %s5323_s13  ;;  %v469_v16 = vmul.f32 %v6112_v26, %v5768_v15  ;;  %v484_v15 = vmul.f32 %v12151_v14, %v5626_v42  ;;  %v574_v61 = vadd.f32 %v568_v49, %v526_v45  ;;  %v531_v42 = vmul.f32 %v6112_v26, %v12153_v55 }
 0x14d   : > { %v6178_v24 = vpop.permute.xlu1 %904  ;;  %v532_v49 = vmul.f32 %v12153_v55, %v5644_v53  ;;  %v489_v45 = vadd.f32 %v483_v21, %v435_v56  ;;  %v1377_v22 = vmul.f32 %v1376_v50, %v12154_v47 }
 0x14e   : > { %12149 = vst [vmem:[#allocation54_spill] sm:$0xff] %v6178_v24  ;;  %v6180_v9 = vpop.permute.xlu0 %902  ;;  %v573_v24 = vadd.f32 %v567_v6, %v525_v46  ;;  %v475_v35 = vadd.f32 %v469_v16, %v421_v38  ;;  %v476_v46 = vadd.f32 %v470_v39, %v422_v1  ;;  %v437_v38 = vmul.f32 %v5921_v20, %v5973_v11 }
 0x14f   : > { %12150 = vst [vmem:[#allocation55_spill] sm:$0xff] %v6180_v9  ;;  %1360 = vrot.lane.b32.xlu1 %v1354_v63, %s5323_s13  ;;  %v1356_v9 = vmul.f32 %v1353_v36, %v5672_v7  ;;  %v518_v63 = vmul.f32 %v5798_v30, %v5644_v53  ;;  %v1378_v30 = vmul.f32 %v1376_v50, %v5692_v19  ;;  %v1399_v16 = vstv %s6166_s25  ;;  %s6476_s25 = sld [smem:[#allocation9 + $0x51]] }
 0x150   : > { %1341 = vrot.lane.b32.xlu0 %v1333_v29, %s5323_s13  ;;  %v565_v29 = vmul.f32 %v6112_v26, %v5823_v48  ;;  %v485_v1 = vmul.f32 %v12151_v14, %v5975_v5  ;;  %v6226_v53 = vadd.f32 %v615_v23, %v573_v24  ;;  %v438_v39 = vmul.f32 %v5921_v20, %v5608_v33 }
 0x151   : > { %v6207_v36 = vpop.permute.xlu1 %925  ;;  %v6238_v21 = vadd.f32 %v616_v28, %v574_v61  ;;  %v523_v5 = vadd.f32 %v517_v18, %v475_v35  ;;  %v537_v24 = vadd.f32 %v531_v42, %v489_v45  ;;  %v1400_v33 = vmul.f32 %v1399_v16, %v12154_v47 }
 0x152   : > { %12152 = vst [vmem:[#allocation31_spill] sm:$0xff] %v6207_v36  ;;  %v6209_v6 = vpop.permute.xlu0 %923  ;;  %v490_v36 = vadd.f32 %v484_v15, %v436_v54  ;;  %v486_v54 = vmul.f32 %v12151_v14, %v5624_v41  ;;  %v12155_v15 = vld [vmem:[#allocation39_spill] sm:$0xff]  ;;  %v1379_v41 = vmul.f32 %v1376_v50, %v5700_v27  ;;  %v491_v61 = vadd.f32 %v485_v1, %v437_v38 }
 0x153   : > { %1364 = vrot.lane.b32.xlu1 %v1356_v9, %s5323_s13  ;;  %v566_v9 = vmul.f32 %v5823_v48, %v5674_v8  ;;  %v579_v23 = vmul.f32 %v6112_v26, %v12155_v15  ;;  %v580_v20 = vmul.f32 %v12155_v15, %v5674_v8  ;;  %v533_v18 = vmul.f32 %v12153_v55, %v6012_v25  ;;  %v12156_v25 = vld [vmem:[#allocation40_spill] sm:$0xff] }
 0x154   : > { %1362 = vrot.lane.b32.xlu0 %v1355_v13, %s5323_s13  ;;  %v524_v13 = vadd.f32 %v518_v63, %v476_v46  ;;  %v538_v48 = vadd.f32 %v532_v49, %v490_v36  ;;  %v613_v28 = vmul.f32 %v6112_v26, %v5843_v58  ;;  %v492_v14 = vadd.f32 %v486_v54, %v438_v39 }
 0x155   : > { %v6234_v56 = vpop.permute.xlu1 %946  ;;  %v534_v50 = vmul.f32 %v12153_v55, %v5652_v59  ;;  %v571_v36 = vadd.f32 %v565_v29, %v523_v5  ;;  %v627_v46 = vmul.f32 %v6112_v26, %v12156_v25  ;;  %v628_v42 = vmul.f32 %v12156_v25, %v5692_v19 }
 0x156   : > { %v6236_v11 = vpop.permute.xlu0 %927  ;;  %v572_v35 = vadd.f32 %v566_v9, %v524_v13  ;;  %v585_v49 = vadd.f32 %v579_v23, %v537_v24  ;;  %v1401_v59 = vmul.f32 %v1399_v16, %v5692_v19  ;;  %v586_v55 = vadd.f32 %v580_v20, %v538_v48 }
 0x157   : > { %1385 = vrot.lane.b32.xlu1 %v1378_v30, %s5323_s13  ;;  %v539_v45 = vadd.f32 %v533_v18, %v491_v61  ;;  %v581_v29 = vmul.f32 %v12155_v15, %v6031_v40  ;;  %v1422_v30 = vstv %s6224_s30  ;;  %v661_v38 = vmul.f32 %v6112_v26, %v5866_v10  ;;  %s6498_s30 = sld [smem:[#allocation9 + $0x52]] }
 0x158   : > { %1383 = vrot.lane.b32.xlu0 %v1377_v22, %s5323_s13  ;;  %v614_v22 = vmul.f32 %v5843_v58, %v5692_v19  ;;  %v1402_v58 = vmul.f32 %v1399_v16, %v5700_v27  ;;  %v662_v1 = vmul.f32 %v5866_v10, %v5722_v44  ;;  %v540_v9 = vadd.f32 %v534_v50, %v492_v14  ;;  %v6346_v14 = vld [vmem:[#allocation2 + $0x38] sm:$0xff] }
 0x159   : > { %v6258_v63 = vpop.permute.xlu1 %950  ;;  %v582_v39 = vmul.f32 %v12155_v15, %v5672_v7  ;;  %v619_v40 = vadd.f32 %v613_v28, %v571_v36  ;;  %v675_v13 = vmul.f32 %v6112_v26, %v5988_v62  ;;  %v676_v10 = vmul.f32 %v5988_v62, %v5722_v44 }
 0x15a   : > { %v6260_v8 = vpop.permute.xlu0 %948  ;;  %v620_v5 = vadd.f32 %v614_v22, %v572_v35  ;;  %v633_v7 = vadd.f32 %v627_v46, %v585_v49  ;;  %v1424_v15 = vmul.f32 %v1422_v30, %v5692_v19  ;;  %v1423_v23 = vmul.f32 %v1422_v30, %v12154_v47 }
 0x15b   : > { %1406 = vrot.lane.b32.xlu1 %v1400_v33, %s5323_s13  ;;  %v634_v24 = vadd.f32 %v628_v42, %v586_v55  ;;  %v587_v33 = vadd.f32 %v581_v29, %v539_v45  ;;  %v1445_v48 = vstv %s6250_s6  ;;  %v6308_v20 = vadd.f32 %v6148_v31, %v6142_v4  ;;  %v6359_v42 = vld [vmem:[#allocation2 + $0x98] sm:$0xff]  ;;  %s6561_s6 = sld [smem:[#allocation9 + $0x53]] }
 0x15c   : > { %1387 = vrot.lane.b32.xlu0 %v1379_v41, %s5323_s13  ;;  %v629_v41 = vmul.f32 %v12156_v25, %v6057_v12  ;;  %v6312_v61 = vadd.f32 %v6152_v2, %v6144_v51  ;;  %v588_v18 = vadd.f32 %v582_v39, %v540_v9  ;;  %v630_v19 = vmul.f32 %v12156_v25, %v5700_v27 }
 0x15d   : > { %v6281_v54 = vpop.permute.xlu1 %971  ;;  %v6322_v12 = vadd.f32 %v6170_v34, %v6226_v53  ;;  %v6326_v4 = vadd.f32 %v6174_v3, %v6238_v21  ;;  %v6328_v31 = vadd.f32 %v661_v38, %v619_v40  ;;  %v6330_v51 = vadd.f32 %v662_v1, %v620_v5 }
 0x15e   : > { %12157 = vst [vmem:[#allocation34_spill] sm:$0xff] %v6281_v54  ;;  %v6283_v16 = vpop.permute.xlu0 %969  ;;  %v677_v2 = vmul.f32 %v5988_v62, %v6063_v60  ;;  %v1446_v34 = vmul.f32 %v1445_v48, %v5714_v37  ;;  %v1425_v3 = vmul.f32 %v1422_v30, %v5700_v27  ;;  %v6342_v53 = vadd.f32 %v675_v13, %v633_v7 }
 0x15f   : > { %12158 = vst [vmem:[#allocation18_spill] sm:$0xff] %v6283_v16  ;;  %1410 = vrot.lane.b32.xlu1 %v1402_v58, %s5323_s13  ;;  %v6344_v21 = vadd.f32 %v676_v10, %v634_v24  ;;  %v635_v22 = vadd.f32 %v629_v41, %v587_v33  ;;  %v2031_v60 = vstv %s6273_s11  ;;  %v636_v50 = vadd.f32 %v630_v19, %v588_v18  ;;  %s6578_s11 = sld [smem:[#allocation9 + $0x54]] }
 0x160   : > { %1408 = vrot.lane.b32.xlu0 %v1401_v59, %s5323_s13  ;;  %v678_v36 = vmul.f32 %v5988_v62, %v5720_v43  ;;  %v1448_v25 = vmul.f32 %v1445_v48, %v5720_v43  ;;  %v2079_v46 = vstv %s6287_s29  ;;  %v1447_v49 = vmul.f32 %v1445_v48, %v5722_v44  ;;  %v6367_v62 = vld [vmem:[#allocation2 + $0x20] sm:$0xff]  ;;  %s6652_s29 = sld [smem:[#allocation9 + $0x56]] }
 0x161   : > { %v6316_v47 = vpop.permute.xlu1 %992  ;;  %v1468_v58 = vstv %s6285_s7  ;;  %v2055_v59 = vstv %s6293_s14  ;;  %v2127_v55 = vstv %s6295_s12  ;;  %v6370_v45 = vmul.f32 %v6367_v62, %v2031_v60  ;;  %s6644_s7 = sld [smem:[#allocation9 + $0x55]]  ;;  %s6722_s14 = sld [smem:[#allocation9 + $0x57]] }
 0x162   : > { %12159 = vst [vmem:[#allocation39_spill] sm:$0xff] %v6316_v47  ;;  %v6318_v28 = vpop.permute.xlu0 %973  ;;  %v6373_v29 = vmul.f32 %v2031_v60, %v6346_v14  ;;  %v6376_v30 = vmul.f32 %v2055_v59, %v6346_v14  ;;  %v2103_v38 = vstv %s6301_s10  ;;  %v6379_v1 = vadd.f32 %v677_v2, %v635_v22  ;;  %v12184_v47 = vld [vmem:[#allocation38_spill] sm:$0xff]  ;;  %s6734_s12 = sld [smem:[#allocation9 + $0x58]]  ;;  %s6764_s10 = sld [smem:[#allocation9 + $0x36]] }
 0x163   : > { %12160 = vst [vmem:[#allocation40_spill] sm:$0xff] %v6318_v28  ;;  %1431 = vrot.lane.b32.xlu1 %v1424_v15, %s5323_s13  ;;  %v6382_v9 = vmul.f32 %v6367_v62, %v2079_v46  ;;  %v6385_v39 = vmul.f32 %v2079_v46, %v6346_v14  ;;  %v6388_v40 = vmul.f32 %v2103_v38, %v6359_v42  ;;  %v6396_v15 = vld [vmem:[#allocation2 + $0x80] sm:$0xff]  ;;  %v1491_v33 = vstv %s6332_s26  ;;  %s6793_s26 = sld [smem:[#allocation9 + $0x39]] }
 0x164   : > { %1429 = vrot.lane.b32.xlu0 %v1423_v23, %s5323_s13  ;;  %v1470_v10 = vmul.f32 %v1468_v58, %v5722_v44  ;;  %v1469_v7 = vmul.f32 %v1468_v58, %v5714_v37  ;;  %v6399_v23 = vmul.f32 %v6396_v15, %v2127_v55  ;;  %v6402_v24 = vmul.f32 %v2127_v55, %v6359_v42 }
 0x165   : > { %v6353_v35 = vpop.permute.xlu1 %996  ;;  %v6406_v41 = vmul.f32 %v6367_v62, %v2055_v59  ;;  %v2151_v48 = vstv %s6334_s23  ;;  %v2175_v46 = vstv %s6349_s5  ;;  %v6439_v22 = vadd.f32 %v678_v36, %v636_v50  ;;  %s6816_s23 = sld [smem:[#allocation9 + $0x3c]]  ;;  %s6863_s5 = sld [smem:[#allocation9 + $0x59]] }
 0x166   : > { %12161 = vst [vmem:[#allocation56_spill] sm:$0xff] %v6353_v35  ;;  %v6355_v27 = vpop.permute.xlu0 %994  ;;  %v6434_v2 = vmul.f32 %v6396_v15, %v2151_v48  ;;  %v1492_v60 = vmul.f32 %v1491_v33, %v5714_v37  ;;  %v1471_v18 = vmul.f32 %v1468_v58, %v5720_v43  ;;  %v1494_v55 = vmul.f32 %v1491_v33, %v5720_v43 }
 0x167   : > { %12162 = vst [vmem:[#allocation57_spill] sm:$0xff] %v6355_v27  ;;  %1452 = vrot.lane.b32.xlu1 %v1446_v34, %s5323_s13  ;;  %v6417_v34 = vmul.f32 %v6396_v15, %v2103_v38  ;;  %v11804_v19 = vrot.slane %v6406_v41, 1  ;;  %v1493_v37 = vmul.f32 %v1491_v33, %v5722_v44  ;;  %v12170_v36 = vrot.slane %v6373_v29, 1 }
 0x168   : > { %1433 = vrot.lane.b32.xlu0 %v1425_v3, %s5323_s13  ;;  %v6437_v3 = vmul.f32 %v2151_v48, %v6359_v42  ;;  %v12171_v58 = vrot.slane %v6370_v45, 1  ;;  %v12172_v43 = vrot.slane %v6376_v30, 1  ;;  %v12173_v38 = vrot.slane %v6385_v39, 1 }
 0x169   : > { %v6390_v5 = vpop.permute.xlu1 %1017  ;;  %v2223_v28 = vstv %s6409_s20  ;;  %s6885_s20 = sld [smem:[#allocation9 + $0x37]] }
 0x16a   : > { %12163 = vst [vmem:[#allocation58_spill] sm:$0xff] %v6390_v5  ;;  %v6392_v13 = vpop.permute.xlu0 %1015  ;;  %12167 = vst [vmem:[#allocation62_spill] sm:$0xff] %v6437_v3  ;;  %v12182_v5 = vld [vmem:[#allocation19_spill] sm:$0xff] }
 0x16b   : > { %12164 = vst [vmem:[#allocation59_spill] sm:$0xff] %v6392_v13  ;;  %1456 = vrot.lane.b32.xlu1 %v1448_v25, %s5323_s13  ;;  %v6424_v25 = vld [vmem:[#allocation2 + $0xf8] sm:$0xff]  ;;  %v12180_v13 = vrot.slane %v6399_v23, 1 }
 0x16c   : > { %1454 = vrot.lane.b32.xlu0 %v1447_v49, %s5323_s13  ;;  %v6454_v50 = vmul.f32 %v2175_v46, %v6424_v25 }
 0x16d   : > { %v6427_v49 = vpop.permute.xlu1 %1038 }
 0x16e   : > { %12165 = vst [vmem:[#allocation60_spill] sm:$0xff] %v6427_v49  ;;  %v6429_v59 = vpop.permute.xlu0 %1019  ;;  %12169 = vst [vmem:[#allocation64_spill] sm:$0xff] %v6454_v50 }
 0x16f   : > { %12166 = vst [vmem:[#allocation61_spill] sm:$0xff] %v6429_v59  ;;  %1477 = vrot.lane.b32.xlu1 %v1470_v10, %s5323_s13  ;;  %v6448_v59 = vld [vmem:[#allocation2 + $0xe0] sm:$0xff]  ;;  %v2038_v10 = vsel %vm1525_vm1, %v12171_v58, %v12170_v36  ;;  %v12177_v36 = vrot.slane %v6388_v40, 1  ;;  %v12178_v58 = vrot.slane %v6417_v34, 1 }
 0x170   : > { %1475 = vrot.lane.b32.xlu0 %v1469_v7, %s5323_s13  ;;  %v6451_v48 = vmul.f32 %v6448_v59, %v2175_v46  ;;  %v6467_v7 = vsel %vm1525_vm1, %v11804_v19, %v12172_v43  ;;  %v12174_v46 = vrot.slane %v6382_v9, 1  ;;  %v12179_v19 = vrot.slane %v6402_v24, 1 }
 0x171   : > { %v6478_v44 = vpop.permute.xlu1 %1042  ;;  %v6487_v43 = vsel %vm1525_vm1, %v12178_v58, %v12177_v36  ;;  %v12183_v36 = vld [vmem:[#allocation20_spill] sm:$0xff] }
 0x172   : > { %12168 = vst [vmem:[#allocation63_spill] sm:$0xff] %v6451_v48  ;;  %v6474_v49 = vsel %vm1525_vm1, %v12174_v46, %v12173_v38  ;;  %12175 = vst [vmem:[#allocation65_spill] sm:$0xff] %v6478_v44  ;;  %v6480_v33 = vpop.permute.xlu0 %1040  ;;  %v6494_v38 = vsel %vm1525_vm1, %v12180_v13, %v12179_v19  ;;  %v702_v58 = vadd.f32 %v12183_v36, %v6048_v32  ;;  %v2199_v46 = vstv %s6419_s22  ;;  %v12185_v44 = vld [vmem:[#allocation21_spill] sm:$0xff]  ;;  %s6895_s22 = sld [smem:[#allocation9 + $0x3a]] }
 0x173   : > { %12176 = vst [vmem:[#allocation66_spill] sm:$0xff] %v6480_v33  ;;  %v12181_v33 = vld [vmem:[#allocation35_spill] sm:$0xff]  ;;  %v703_v35 = vadd.f32 %v12183_v36, %v6075_v0  ;;  %v6511_v13 = vadd.f32 %v12182_v5, %v12184_v47  ;;  %1498 = vrot.lane.b32.xlu1 %v1492_v60, %s5323_s13  ;;  %v12186_v0 = vld [vmem:[#allocation22_spill] sm:$0xff]  ;;  %v6529_v47 = vmul.f32 %v2199_v46, %v6424_v25 }
 0x174   : > { %v6502_v27 = vadd.f32 %v12182_v5, %v12181_v33  ;;  %1479 = vrot.lane.b32.xlu0 %v1471_v18, %s5323_s13  ;;  %v6519_v16 = vadd.f32 %v12185_v44, %v702_v58  ;;  %v6526_v36 = vadd.f32 %v12186_v0, %v6119_v17  ;;  %v6533_v5 = vadd.f32 %v12186_v0, %v6125_v52  ;;  %v12195_v52 = vld [vmem:[#allocation23_spill] sm:$0xff] }
 0x175   : > { %v6522_v32 = vadd.f32 %v12185_v44, %v703_v35  ;;  %12187 = vst [vmem:[#allocation35_spill] sm:$0xff] %v6529_v47  ;;  %v6535_v18 = vpop.permute.xlu1 %1063  ;;  %v12190_v58 = vrot.slane %v6437_v3, 1  ;;  %v12191_v35 = vrot.slane %v6434_v2, 1  ;;  %v6547_v17 = vmul.f32 %v6448_v59, %v2223_v28  ;;  %v12196_v33 = vld [vmem:[#allocation51_spill] sm:$0xff] }
 0x176   : > { %12188 = vst [vmem:[#allocation19_spill] sm:$0xff] %v6535_v18  ;;  %v6537_v60 = vpop.permute.xlu0 %1061  ;;  %v6550_v19 = vmul.f32 %v2223_v28, %v6424_v25  ;;  %v706_v0 = vadd.f32 %v12195_v52, %v6132_v57  ;;  %v12197_v18 = vld [vmem:[#allocation24_spill] sm:$0xff]  ;;  %v6559_v54 = vmul.f32 %v6448_v59, %v2199_v46  ;;  %v12199_v28 = vld [vmem:[#allocation25_spill] sm:$0xff]  ;;  %v12200_v57 = vrot.slane %v6454_v50, 1 }
 0x177   : > { %12189 = vst [vmem:[#allocation20_spill] sm:$0xff] %v6537_v60  ;;  %v6544_v44 = vsel %vm1525_vm1, %v12191_v35, %v12190_v58  ;;  %12193 = vst [vmem:[#allocation21_spill] sm:$0xff] %v6547_v17  ;;  %v707_v60 = vadd.f32 %v12195_v52, %v12196_v33  ;;  %v704_v3 = vadd.f32 %v12197_v18, %v6308_v20  ;;  %1502 = vrot.lane.b32.xlu1 %v1494_v55, %s5323_s13  ;;  %v6576_v33 = vld [vmem:[#allocation2 + $0x158] sm:$0xff] }
 0x178   : > { %12192 = vst [vmem:[#allocation38_spill] sm:$0xff] %v6544_v44  ;;  %12194 = vst [vmem:[#allocation22_spill] sm:$0xff] %v6550_v19  ;;  %v705_v58 = vadd.f32 %v12197_v18, %v6312_v61  ;;  %v729_v35 = vadd.f32 %v12199_v28, %v6322_v12  ;;  %1500 = vrot.lane.b32.xlu0 %v1493_v37, %s5323_s13  ;;  %v12201_v20 = vrot.slane %v6451_v48, 1  ;;  %v12204_v12 = vld [vmem:[#allocation26_spill] sm:$0xff]  ;;  %v2247_v37 = vstv %s6476_s25  ;;  %s6932_s25 = sld [smem:[#allocation9 + $0x3d]] }
 0x179   : > { %12198 = vst [vmem:[#allocation23_spill] sm:$0xff] %v6559_v54  ;;  %12203 = vst [vmem:[#allocation24_spill] sm:$0xff] %v6576_v33  ;;  %v730_v61 = vadd.f32 %v12199_v28, %v6326_v4  ;;  %v727_v18 = vadd.f32 %v12204_v12, %v6328_v31  ;;  %v728_v52 = vadd.f32 %v12204_v12, %v6330_v51  ;;  %v6588_v50 = vpop.permute.xlu1 %1084  ;;  %v12207_v4 = vld [vmem:[#allocation27_spill] sm:$0xff]  ;;  %v12208_v51 = vld [vmem:[#allocation28_spill] sm:$0xff]  ;;  %v12209_v48 = vrot.slane %v6370_v45, 1 }
 0x17a   : > { %v6574_v46 = vsel %vm1525_vm1, %v12201_v20, %v12200_v57  ;;  %12205 = vst [vmem:[#allocation25_spill] sm:$0xff] %v6588_v50  ;;  %v6590_v57 = vpop.permute.xlu0 %1065  ;;  %v750_v28 = vadd.f32 %v12207_v4, %v6342_v53  ;;  %v751_v31 = vadd.f32 %v12207_v4, %v6344_v21  ;;  %v6601_v44 = vmul.f32 %v2247_v37, %v6576_v33  ;;  %v6611_v53 = vld [vmem:[#allocation2 + $0x140] sm:$0xff]  ;;  %v12210_v4 = vld [vmem:[#allocation29_spill] sm:$0xff] }
 0x17b   : > { %12202 = vst [vmem:[#allocation51_spill] sm:$0xff] %v6574_v46  ;;  %12206 = vst [vmem:[#allocation26_spill] sm:$0xff] %v6590_v57  ;;  %v2271_v46 = vstv %s6498_s30  ;;  %v752_v12 = vadd.f32 %v12208_v51, %v6379_v1  ;;  %v753_v20 = vadd.f32 %v12208_v51, %v6439_v22  ;;  %2041 = vrot.lane.b32.xlu1 %v2038_v10, %s5322_s8  ;;  %v12211_v57 = vrot.slane %v6529_v47, 1  ;;  %v12216_v51 = vld [vmem:[#allocation30_spill] sm:$0xff]  ;;  %s7037_s30 = sld [smem:[#allocation9 + $0x38]] }
 0x17c   : > { %2039 = vrot.lane.b32.xlu0 %v12209_v48, %s5322_s8  ;;  %v6614_v21 = vmul.f32 %v6611_v53, %v2247_v37  ;;  %v775_v55 = vadd.f32 %v12210_v4, %v706_v0  ;;  %v12212_v1 = vrot.slane %v6559_v54, 1  ;;  %v6625_v10 = vmul.f32 %v6611_v53, %v2271_v46 }
 0x17d   : > { %v6628_v45 = vmul.f32 %v2271_v46, %v6576_v33  ;;  %v776_v48 = vadd.f32 %v12210_v4, %v707_v60  ;;  %v773_v37 = vadd.f32 %v12216_v51, %v704_v3  ;;  %v774_v50 = vadd.f32 %v12216_v51, %v705_v58  ;;  %v6633_v0 = vpop.permute.xlu1 %1088  ;;  %v12222_v46 = vld [vmem:[#allocation32_spill] sm:$0xff]  ;;  %v12223_v51 = vld [vmem:[#allocation33_spill] sm:$0xff] }
 0x17e   : > { %v6622_v22 = vsel %vm1525_vm1, %v12212_v1, %v12211_v57  ;;  %12214 = vst [vmem:[#allocation28_spill] sm:$0xff] %v6625_v10  ;;  %12217 = vst [vmem:[#allocation30_spill] sm:$0xff] %v6633_v0  ;;  %v6635_v47 = vpop.permute.xlu0 %1086  ;;  %v12219_v57 = vrot.slane %v6550_v19, 1  ;;  %v12220_v1 = vrot.slane %v6547_v17, 1  ;;  %v796_v60 = vadd.f32 %v12222_v46, %v727_v18  ;;  %v12226_v58 = vld [vmem:[#allocation36_spill] sm:$0xff] }
 0x17f   : > { %12213 = vst [vmem:[#allocation27_spill] sm:$0xff] %v6622_v22  ;;  %12215 = vst [vmem:[#allocation29_spill] sm:$0xff] %v6628_v45  ;;  %v6648_v3 = vadd.f32 %v12222_v46, %v728_v52  ;;  %v2295_v4 = vstv %s6561_s6  ;;  %v795_v0 = vadd.f32 %v12223_v51, %v6511_v13  ;;  %v12225_v18 = vrot.slane %v6373_v29, 1  ;;  %v12227_v29 = vld [vmem:[#allocation37_spill] sm:$0xff]  ;;  %s7064_s6 = sld [smem:[#allocation9 + $0x3b]] }
 0x180   : > { %12218 = vst [vmem:[#allocation67_spill] sm:$0xff] %v6635_v47  ;;  %v6642_v22 = vsel %vm1525_vm1, %v12220_v1, %v12219_v57  ;;  %v794_v47 = vadd.f32 %v12223_v51, %v6502_v27  ;;  %v12224_v57 = vrot.slane %v6406_v41, 1  ;;  %v6665_v1 = vld [vmem:[#allocation2 + $0x1b8] sm:$0xff]  ;;  %v2319_v46 = vstv %s6578_s11  ;;  %s7078_s11 = sld [smem:[#allocation9 + $0x3e]] }
 0x181   : > { %12221 = vst [vmem:[#allocation68_spill] sm:$0xff] %v6642_v22  ;;  %2043 = vrot.lane.b32.xlu0 %v12225_v18, %s5322_s8  ;;  %v817_v19 = vadd.f32 %v12226_v58, %v6526_v36  ;;  %v6673_v51 = vmul.f32 %v2295_v4, %v6576_v33  ;;  %v818_v41 = vadd.f32 %v12226_v58, %v6533_v5  ;;  %v6679_v52 = vpop.permute.xlu1 %1109  ;;  %v12230_v27 = vld [vmem:[#allocation41_spill] sm:$0xff]  ;;  %v12231_v13 = vrot.slane %v6601_v44, 1  ;;  %v6694_v5 = vld [vmem:[#allocation2 + $0x1a0] sm:$0xff] }
 0x182   : > { %2063 = vrot.lane.b32.xlu1 %v12224_v57, %s5322_s8  ;;  %v798_v57 = vadd.f32 %v12227_v29, %v729_v35  ;;  %v799_v18 = vadd.f32 %v12227_v29, %v730_v61  ;;  %12228 = vst [vmem:[#allocation32_spill] sm:$0xff] %v6679_v52  ;;  %v6681_v17 = vpop.permute.xlu0 %1107  ;;  %v6684_v36 = vmul.f32 %v6611_v53, %v2295_v4  ;;  %v12232_v33 = vrot.slane %v6614_v21, 1  ;;  %v12235_v4 = vld [vmem:[#allocation42_spill] sm:$0xff] }
 0x183   : > { %12229 = vst [vmem:[#allocation33_spill] sm:$0xff] %v6681_v17  ;;  %v821_v22 = vadd.f32 %v12230_v27, %v752_v12  ;;  %v6697_v35 = vmul.f32 %v6694_v5, %v2319_v46  ;;  %v6700_v61 = vmul.f32 %v2319_v46, %v6665_v1  ;;  %v822_v58 = vadd.f32 %v12230_v27, %v753_v20 }
 0x184   : > { %v6692_v54 = vsel %vm1525_vm1, %v12232_v33, %v12231_v13  ;;  %v819_v12 = vadd.f32 %v12235_v4, %v750_v28  ;;  %v820_v29 = vadd.f32 %v12235_v4, %v751_v31  ;;  %v12236_v17 = vrot.slane %v6376_v30, 1  ;;  %v12237_v33 = vld [vmem:[#allocation43_spill] sm:$0xff]  ;;  %v12240_v30 = vld [vmem:[#allocation44_spill] sm:$0xff]  ;;  %v12243_v31 = vld [vmem:[#allocation45_spill] sm:$0xff] }
 0x185   : > { %12233 = vst [vmem:[#allocation36_spill] sm:$0xff] %v6697_v35  ;;  %12234 = vst [vmem:[#allocation37_spill] sm:$0xff] %v6700_v61  ;;  %2065 = vrot.lane.b32.xlu0 %v6467_v7, %s5322_s8  ;;  %v842_v13 = vadd.f32 %v12237_v33, %v773_v37  ;;  %v6712_v46 = vadd.f32 %v12237_v33, %v774_v50  ;;  %v12238_v52 = vrot.slane %v6628_v45, 1  ;;  %v12239_v20 = vrot.slane %v6625_v10, 1  ;;  %v6728_v37 = vpop.permute.xlu1 %1130  ;;  %v12246_v33 = vld [vmem:[#allocation47_spill] sm:$0xff] }
 0x186   : > { %2067 = vrot.lane.b32.xlu1 %v12236_v17, %s5322_s8  ;;  %v840_v7 = vadd.f32 %v12240_v30, %v6519_v16  ;;  %v841_v17 = vadd.f32 %v12240_v30, %v6522_v32  ;;  %12241 = vst [vmem:[#allocation41_spill] sm:$0xff] %v6728_v37  ;;  %v6730_v50 = vpop.permute.xlu0 %1111  ;;  %v2343_v4 = vstv %s6644_s7  ;;  %v2367_v16 = vstv %s6652_s29  ;;  %v12244_v30 = vld [vmem:[#allocation46_spill] sm:$0xff]  ;;  %s7104_s7 = sld [smem:[#allocation9 + $0x5a]]  ;;  %s7183_s29 = sld [smem:[#allocation9 + $0x3f]] }
 0x187   : > { %v6719_v28 = vsel %vm1525_vm1, %v12239_v20, %v12238_v52  ;;  %12242 = vst [vmem:[#allocation42_spill] sm:$0xff] %v6730_v50  ;;  %v6739_v20 = vmul.f32 %v2343_v4, %v6665_v1  ;;  %v863_v45 = vadd.f32 %v12243_v31, %v794_v47  ;;  %v864_v32 = vadd.f32 %v12243_v31, %v795_v0 }
 0x188   : > { %v844_v37 = vadd.f32 %v12244_v30, %v775_v55  ;;  %v12245_v27 = vrot.slane %v6382_v9, 1  ;;  %v845_v52 = vadd.f32 %v12244_v30, %v776_v48  ;;  %v6752_v50 = vadd.f32 %v12246_v33, %v798_v57  ;;  %v12254_v30 = vld [vmem:[#allocation49_spill] sm:$0xff] }
 0x189   : > { %v12247_v10 = vrot.slane %v6673_v51, 1  ;;  %v12248_v47 = vrot.slane %v6684_v36, 1  ;;  %v6762_v55 = vmul.f32 %v6694_v5, %v2343_v4  ;;  %v6767_v9 = vadd.f32 %v12246_v33, %v799_v18  ;;  %v6770_v31 = vpop.permute.xlu1 %1134 }
 0x18a   : > { %2089 = vrot.lane.b32.xlu1 %v6474_v49, %s5322_s8  ;;  %2087 = vrot.lane.b32.xlu0 %v12245_v27, %s5322_s8  ;;  %v12249_v49 = vld [vmem:[#allocation48_spill] sm:$0xff]  ;;  %12250 = vst [vmem:[#allocation43_spill] sm:$0xff] %v6770_v31  ;;  %v6772_v57 = vpop.permute.xlu0 %1132  ;;  %v6775_v27 = vmul.f32 %v6694_v5, %v2367_v16  ;;  %v12255_v18 = vrot.slane %v6700_v61, 1  ;;  %v12258_v31 = vld [vmem:[#allocation50_spill] sm:$0xff] }
 0x18b   : > { %v6759_v0 = vsel %vm1525_vm1, %v12248_v47, %v12247_v10  ;;  %v865_v48 = vadd.f32 %v12249_v49, %v796_v60  ;;  %12251 = vst [vmem:[#allocation44_spill] sm:$0xff] %v6772_v57  ;;  %v6778_v10 = vmul.f32 %v2367_v16, %v6665_v1  ;;  %v866_v4 = vadd.f32 %v12249_v49, %v6648_v3  ;;  %v12261_v57 = vld [vmem:[#allocation52_spill] sm:$0xff] }
 0x18c   : > { %12252 = vst [vmem:[#allocation45_spill] sm:$0xff] %v6775_v27  ;;  %v6783_v47 = vadd.f32 %v12254_v30, %v819_v12  ;;  %v12256_v60 = vrot.slane %v6697_v35, 1  ;;  %v6796_v16 = vadd.f32 %v12254_v30, %v820_v29  ;;  %v886_v3 = vadd.f32 %v12258_v31, %v817_v19 }
 0x18d   : > { %12253 = vst [vmem:[#allocation46_spill] sm:$0xff] %v6778_v10  ;;  %v887_v12 = vadd.f32 %v12258_v31, %v818_v41  ;;  %v12259_v49 = vrot.slane %v6417_v34, 1  ;;  %v6809_v61 = vadd.f32 %v12261_v57, %v840_v7  ;;  %v6812_v29 = vadd.f32 %v12261_v57, %v841_v17  ;;  %v12262_v41 = vld [vmem:[#allocation53_spill] sm:$0xff]  ;;  %v6819_v31 = vpop.permute.xlu1 %1155  ;;  %v12265_v57 = vld [vmem:[#allocation54_spill] sm:$0xff]  ;;  %v12270_v7 = vld [vmem:[#allocation55_spill] sm:$0xff] }
 0x18e   : > { %v6790_v33 = vsel %vm1525_vm1, %v12256_v60, %v12255_v18  ;;  %v12260_v18 = vrot.slane %v6385_v39, 1  ;;  %v6806_v60 = vld [vmem:[#allocation2 + $0x218] sm:$0xff]  ;;  %v2391_v30 = vstv %s6722_s14  ;;  %v890_v34 = vadd.f32 %v12262_v41, %v821_v22  ;;  %12263 = vst [vmem:[#allocation48_spill] sm:$0xff] %v6819_v31  ;;  %v6821_v39 = vpop.permute.xlu0 %1153  ;;  %s7229_s14 = sld [smem:[#allocation9 + $0x5b]] }
 0x18f   : > { %12257 = vst [vmem:[#allocation47_spill] sm:$0xff] %v6790_v33  ;;  %2111 = vrot.lane.b32.xlu1 %v12259_v49, %s5322_s8  ;;  %12264 = vst [vmem:[#allocation49_spill] sm:$0xff] %v6821_v39  ;;  %v891_v17 = vadd.f32 %v12262_v41, %v822_v58  ;;  %v6828_v35 = vadd.f32 %v12265_v57, %v844_v37  ;;  %v12266_v19 = vrot.slane %v6739_v20, 1  ;;  %v12267_v33 = vrot.slane %v6762_v55, 1  ;;  %v6849_v37 = vld [vmem:[#allocation2 + $0x200] sm:$0xff] }
 0x190   : > { %2091 = vrot.lane.b32.xlu0 %v12260_v18, %s5322_s8  ;;  %v2415_v18 = vstv %s6734_s12  ;;  %v6838_v31 = vmul.f32 %v2391_v30, %v6806_v60  ;;  %v6841_v49 = vadd.f32 %v12265_v57, %v845_v52  ;;  %v911_v39 = vadd.f32 %v12270_v7, %v842_v13  ;;  %s7231_s12 = sld [smem:[#allocation9 + $0x42]] }
 0x191   : > { %v6835_v22 = vsel %vm1525_vm1, %v12267_v33, %v12266_v19  ;;  %v12271_v58 = vrot.slane %v6388_v40, 1  ;;  %v6852_v33 = vmul.f32 %v6849_v37, %v2391_v30  ;;  %v912_v19 = vadd.f32 %v12270_v7, %v6712_v46  ;;  %v12275_v40 = vld [vmem:[#allocation31_spill] sm:$0xff]  ;;  %v6874_v46 = vpop.permute.xlu1 %1176 }
 0x192   : > { %12268 = vst [vmem:[#allocation50_spill] sm:$0xff] %v6835_v22  ;;  %12269 = vst [vmem:[#allocation52_spill] sm:$0xff] %v6838_v31  ;;  %v1516_v52 = vstv %s6764_s10  ;;  %v6858_v41 = vmul.f32 %v6849_v37, %v2415_v18  ;;  %v6861_v13 = vmul.f32 %v2415_v18, %v6806_v60  ;;  %v6869_v57 = vadd.f32 %v12275_v40, %v866_v4  ;;  %v6876_v7 = vpop.permute.xlu0 %1157  ;;  %s7262_s10 = sld [smem:[#allocation9 + $0x45]] }
 0x193   : > { %2115 = vrot.lane.b32.xlu1 %v12271_v58, %s5322_s8  ;;  %12272 = vst [vmem:[#allocation53_spill] sm:$0xff] %v6852_v33  ;;  %v6872_v30 = vadd.f32 %v6209_v6, %v863_v45  ;;  %v12276_v58 = vrot.slane %v6778_v10, 1  ;;  %v12277_v18 = vrot.slane %v6775_v27, 1  ;;  %v6891_v45 = vadd.f32 %v6234_v56, %v886_v3 }
 0x194   : > { %2113 = vrot.lane.b32.xlu0 %v6487_v43, %s5322_s8  ;;  %12273 = vst [vmem:[#allocation54_spill] sm:$0xff] %v6858_v41  ;;  %12274 = vst [vmem:[#allocation55_spill] sm:$0xff] %v6861_v13  ;;  %v6866_v43 = vadd.f32 %v12275_v40, %v865_v48  ;;  %v6888_v48 = vadd.f32 %v6209_v6, %v864_v32  ;;  %v1603_v40 = vstv %s6793_s26  ;;  %s7342_s26 = sld [smem:[#allocation9 + $0x40]] }
 0x195   : > { %v6883_v22 = vsel %vm1525_vm1, %v12277_v18, %v12276_v58  ;;  %v6898_v10 = vadd.f32 %v6234_v56, %v887_v12  ;;  %v12278_v58 = vrot.slane %v6399_v23, 1  ;;  %v1517_v32 = vmul.f32 %v6112_v26, %v1516_v52 }
 0x196   : > { %v6908_v3 = vmul.f32 %v6367_v62, %v1516_v52  ;;  %v1689_v18 = vstv %s6816_s23  ;;  %v6914_v12 = vmul.f32 %v1516_v52, %v6346_v14  ;;  %v6922_v23 = vadd.f32 %v6236_v11, %v6767_v9  ;;  %v6926_v6 = vpop.permute.xlu0 %1178  ;;  %s7370_s23 = sld [smem:[#allocation9 + $0x43]] }
 0x197   : > { %2137 = vrot.lane.b32.xlu1 %v6494_v38, %s5322_s8  ;;  %v6918_v38 = vadd.f32 %v6236_v11, %v6752_v50  ;;  %12282 = vst [vmem:[#allocation71_spill] sm:$0xff] %v6926_v6  ;;  %v1604_v27 = vmul.f32 %v6112_v26, %v1603_v40  ;;  %v6930_v4 = vmul.f32 %v6396_v15, %v1603_v40  ;;  %v12284_v9 = vrot.slane %v6838_v31, 1 }
 0x198   : > { %2135 = vrot.lane.b32.xlu0 %v12278_v58, %s5322_s8  ;;  %12279 = vst [vmem:[#allocation31_spill] sm:$0xff] %v6908_v3  ;;  %12280 = vst [vmem:[#allocation69_spill] sm:$0xff] %v6914_v12  ;;  %v6924_v58 = vpop.permute.xlu1 %1180  ;;  %v6935_v52 = vadd.f32 %v6258_v63, %v890_v34  ;;  %v6938_v50 = vadd.f32 %v6258_v63, %v891_v17  ;;  %v6942_v11 = vadd.f32 %v6260_v8, %v6783_v47 }
 0x199   : > { %12281 = vst [vmem:[#allocation70_spill] sm:$0xff] %v6924_v58  ;;  %12283 = vst [vmem:[#allocation72_spill] sm:$0xff] %v6930_v4  ;;  %v12285_v56 = vrot.slane %v6852_v33, 1  ;;  %v6953_v58 = vadd.f32 %v6260_v8, %v6796_v16  ;;  %v12287_v63 = vrot.slane %v6434_v2, 1  ;;  %v12288_v47 = vrot.slane %v6402_v24, 1 }
 0x19a   : > { %v6961_v34 = vrot.slane %v1517_v32, 1  ;;  %v12291_v8 = vrot.slane %v6858_v41, 1  ;;  %v2439_v24 = vstv %s6863_s5  ;;  %v6981_v17 = vrot.slane %v1604_v27, 1  ;;  %v12300_v27 = vld [vmem:[#allocation18_spill] sm:$0xff]  ;;  %s7372_s5 = sld [smem:[#allocation9 + $0x46]] }
 0x19b   : > { %v6949_v6 = vsel %vm1525_vm1, %v12285_v56, %v12284_v9  ;;  %2159 = vrot.lane.b32.xlu1 %v12287_v63, %s5322_s8  ;;  %v1690_v56 = vmul.f32 %v6112_v26, %v1689_v18  ;;  %v12290_v9 = vrot.slane %v6861_v13, 1  ;;  %v6974_v63 = vmul.f32 %v1603_v40, %v6359_v42 }
 0x19c   : > { %12286 = vst [vmem:[#allocation73_spill] sm:$0xff] %v6949_v6  ;;  %2139 = vrot.lane.b32.xlu0 %v12288_v47, %s5322_s8  ;;  %12289 = vst [vmem:[#allocation74_spill] sm:$0xff] %v6961_v34  ;;  %v6977_v32 = vpop.permute.xlu1 %1201  ;;  %v6979_v47 = vpop.permute.xlu0 %1199  ;;  %v6985_v13 = vmul.f32 %v6448_v59, %v1689_v18  ;;  %v1545_v41 = vstv %s6885_s20  ;;  %v6995_v40 = vmul.f32 %v1689_v18, %v6424_v25  ;;  %s7385_s20 = sld [smem:[#allocation9 + $0x5c]] }
 0x19d   : > { %v6970_v16 = vsel %vm1525_vm1, %v12291_v8, %v12290_v9  ;;  %12293 = vst [vmem:[#allocation76_spill] sm:$0xff] %v6974_v63  ;;  %12294 = vst [vmem:[#allocation77_spill] sm:$0xff] %v6977_v32  ;;  %v12298_v9 = vld [vmem:[#allocation34_spill] sm:$0xff]  ;;  %v7004_v34 = vadd.f32 %v12300_v27, %v6812_v29  ;;  %v12305_v32 = vrot.slane %v6914_v12, 1  ;;  %v7022_v29 = vmul.f32 %v6849_v37, %v2439_v24 }
 0x19e   : > { %12292 = vst [vmem:[#allocation75_spill] sm:$0xff] %v6970_v16  ;;  %12295 = vst [vmem:[#allocation78_spill] sm:$0xff] %v6979_v47  ;;  %v6989_v8 = vadd.f32 %v12298_v9, %v911_v39  ;;  %v6992_v2 = vadd.f32 %v12298_v9, %v912_v19  ;;  %v1631_v16 = vstv %s6895_s22  ;;  %v12301_v47 = vld [vmem:[#allocation62_spill] sm:$0xff]  ;;  %v7011_v9 = vrot.slane %v1690_v56, 1  ;;  %s7487_s22 = sld [smem:[#allocation9 + $0x5d]] }
 0x19f   : > { %12296 = vst [vmem:[#allocation79_spill] sm:$0xff] %v6981_v17  ;;  %12297 = vst [vmem:[#allocation80_spill] sm:$0xff] %v6985_v13  ;;  %v7000_v17 = vadd.f32 %v12300_v27, %v6809_v61  ;;  %v12302_v39 = vrot.slane %v12301_v47, 1  ;;  %v12303_v19 = vld [vmem:[#allocation38_spill] sm:$0xff]  ;;  %v12306_v61 = vrot.slane %v6908_v3, 1  ;;  %v1546_v47 = vmul.f32 %v6112_v26, %v1545_v41  ;;  %v12313_v3 = vld [vmem:[#allocation40_spill] sm:$0xff] }
 0x1a0   : > { %12299 = vst [vmem:[#allocation34_spill] sm:$0xff] %v6995_v40  ;;  %2161 = vrot.lane.b32.xlu0 %v12303_v19, %s5322_s8  ;;  %12304 = vst [vmem:[#allocation18_spill] sm:$0xff] %v7011_v9  ;;  %v7025_v27 = vpop.permute.xlu1 %1222  ;;  %v7030_v56 = vmul.f32 %v6367_v62, %v1545_v41  ;;  %v7033_v19 = vmul.f32 %v1545_v41, %v6346_v14  ;;  %v1632_v18 = vmul.f32 %v6112_v26, %v1631_v16  ;;  %v12314_v41 = vld [vmem:[#allocation51_spill] sm:$0xff] }
 0x1a1   : > { %2163 = vrot.lane.b32.xlu1 %v12302_v39, %s5322_s8  ;;  %v7019_v6 = vsel %vm1525_vm1, %v12306_v61, %v12305_v32  ;;  %12308 = vst [vmem:[#allocation38_spill] sm:$0xff] %v7025_v27  ;;  %v7027_v39 = vpop.permute.xlu0 %1203  ;;  %v1717_v9 = vstv %s6932_s25  ;;  %v12312_v32 = vld [vmem:[#allocation39_spill] sm:$0xff]  ;;  %v7059_v33 = vmul.f32 %v6396_v15, %v1631_v16  ;;  %s7508_s25 = sld [smem:[#allocation9 + $0x41]] }
 0x1a2   : > { %12307 = vst [vmem:[#allocation62_spill] sm:$0xff] %v7019_v6  ;;  %12309 = vst [vmem:[#allocation81_spill] sm:$0xff] %v7027_v39  ;;  %v7041_v61 = vadd.f32 %v12312_v32, %v6872_v30  ;;  %v7045_v12 = vadd.f32 %v12312_v32, %v6888_v48  ;;  %v7050_v39 = vadd.f32 %v12313_v3, %v6828_v35  ;;  %v12315_v27 = vld [vmem:[#allocation63_spill] sm:$0xff]  ;;  %v12319_v32 = vrot.slane %v6974_v63, 1 }
 0x1a3   : > { %12310 = vst [vmem:[#allocation82_spill] sm:$0xff] %v7030_v56  ;;  %12311 = vst [vmem:[#allocation83_spill] sm:$0xff] %v7033_v19  ;;  %v12316_v31 = vrot.slane %v12315_v27, 1  ;;  %v7062_v48 = vmul.f32 %v1631_v16, %v6359_v42  ;;  %v7068_v35 = vadd.f32 %v12313_v3, %v6841_v49  ;;  %v1718_v27 = vmul.f32 %v6112_v26, %v1717_v9 }
 0x1a4   : > { %12317 = vst [vmem:[#allocation39_spill] sm:$0xff] %v7059_v33  ;;  %v7080_v30 = vpop.permute.xlu1 %1226  ;;  %v7084_v6 = vrot.slane %v1546_v47, 1  ;;  %v7088_v63 = vrot.slane %v1632_v18, 1  ;;  %v7102_v47 = vmul.f32 %v1717_v9, %v6424_v25  ;;  %v12329_v18 = vld [vmem:[#allocation56_spill] sm:$0xff] }
 0x1a5   : > { %2185 = vrot.lane.b32.xlu1 %v12314_v41, %s5322_s8  ;;  %2183 = vrot.lane.b32.xlu0 %v12316_v31, %s5322_s8  ;;  %12318 = vst [vmem:[#allocation40_spill] sm:$0xff] %v7062_v48  ;;  %v12320_v41 = vrot.slane %v6930_v4, 1  ;;  %v7082_v16 = vpop.permute.xlu0 %1224  ;;  %v12324_v4 = vrot.slane %v6995_v40, 1  ;;  %v7108_v49 = vadd.f32 %v12329_v18, %v6918_v38  ;;  %v7112_v3 = vadd.f32 %v12329_v18, %v6922_v23 }
 0x1a6   : > { %12322 = vst [vmem:[#allocation63_spill] sm:$0xff] %v7084_v6  ;;  %12323 = vst [vmem:[#allocation84_spill] sm:$0xff] %v7088_v63  ;;  %v12334_v63 = vld [vmem:[#allocation57_spill] sm:$0xff]  ;;  %v7130_v18 = vrot.slane %v1718_v27, 1 }
 0x1a7   : > { %v7075_v31 = vsel %vm1525_vm1, %v12320_v41, %v12319_v32  ;;  %v12325_v32 = vrot.slane %v6985_v13, 1  ;;  %12328 = vst [vmem:[#allocation87_spill] sm:$0xff] %v7102_v47  ;;  %v12332_v41 = vld [vmem:[#allocation64_spill] sm:$0xff]  ;;  %v7124_v38 = vadd.f32 %v12334_v63, %v6866_v43  ;;  %v7128_v23 = vadd.f32 %v12334_v63, %v6869_v57  ;;  %v12342_v63 = vld [vmem:[#allocation58_spill] sm:$0xff] }
 0x1a8   : > { %12321 = vst [vmem:[#allocation51_spill] sm:$0xff] %v7075_v31  ;;  %v7099_v31 = vmul.f32 %v6448_v59, %v1717_v9  ;;  %v12333_v40 = vrot.slane %v12332_v41, 1  ;;  %12335 = vst [vmem:[#allocation56_spill] sm:$0xff] %v7130_v18  ;;  %v7135_v41 = vpop.permute.xlu1 %1247  ;;  %v12340_v9 = vrot.slane %v7030_v56, 1  ;;  %v1573_v57 = vstv %s7037_s30  ;;  %s7530_s30 = sld [smem:[#allocation9 + $0x44]] }
 0x1a9   : > { %v7095_v26 = vsel %vm1525_vm1, %v12325_v32, %v12324_v4  ;;  %v12330_v4 = vld [vmem:[#allocation23_spill] sm:$0xff]  ;;  %12337 = vst [vmem:[#allocation64_spill] sm:$0xff] %v7135_v41  ;;  %v7149_v27 = vadd.f32 %v12342_v63, %v6942_v11  ;;  %v2463_v13 = vstv %s7104_s7  ;;  %s7668_s7 = sld [smem:[#allocation9 + $0x5f]] }
 0x1aa   : > { %12326 = vst [vmem:[#allocation85_spill] sm:$0xff] %v7095_v26  ;;  %12327 = vst [vmem:[#allocation86_spill] sm:$0xff] %v7099_v31  ;;  %v12331_v32 = vrot.slane %v12330_v4, 1  ;;  %2187 = vrot.lane.b32.xlu0 %v12333_v40, %s5322_s8  ;;  %v7133_v4 = vmul.f32 %v2439_v24, %v6806_v60  ;;  %v7137_v40 = vpop.permute.xlu0 %1245  ;;  %v7153_v24 = vadd.f32 %v12342_v63, %v6953_v58  ;;  %v12347_v58 = vrot.slane %v7062_v48, 1 }
 0x1ab   : > { %12338 = vst [vmem:[#allocation57_spill] sm:$0xff] %v7137_v40  ;;  %v12348_v63 = vrot.slane %v7059_v33, 1  ;;  %v7202_v33 = vmul.f32 %v6367_v62, %v1573_v57 }
 0x1ac   : > { %2207 = vrot.lane.b32.xlu1 %v12331_v32, %s5322_s8  ;;  %12336 = vst [vmem:[#allocation23_spill] sm:$0xff] %v7133_v4  ;;  %v12339_v32 = vrot.slane %v7033_v19, 1  ;;  %v12343_v19 = vld [vmem:[#allocation59_spill] sm:$0xff]  ;;  %v7197_v18 = vpop.permute.xlu1 %1268 }
 0x1ad   : > { %v7159_v56 = vadd.f32 %v12343_v19, %v6891_v45  ;;  %v7175_v26 = vsel %vm1525_vm1, %v12348_v63, %v12347_v58  ;;  %v1659_v45 = vstv %s7064_s6  ;;  %v12351_v58 = vld [vmem:[#allocation61_spill] sm:$0xff]  ;;  %12352 = vst [vmem:[#allocation59_spill] sm:$0xff] %v7197_v18  ;;  %v12358_v18 = vld [vmem:[#allocation68_spill] sm:$0xff]  ;;  %s7576_s6 = sld [smem:[#allocation9 + $0x47]] }
 0x1ae   : > { %v7144_v43 = vsel %vm1525_vm1, %v12340_v9, %v12339_v32  ;;  %v7163_v9 = vadd.f32 %v12343_v19, %v6898_v10  ;;  %v12344_v32 = vld [vmem:[#allocation35_spill] sm:$0xff]  ;;  %12349 = vst [vmem:[#allocation58_spill] sm:$0xff] %v7175_v26  ;;  %v7195_v63 = vadd.f32 %v12351_v58, %v6935_v52  ;;  %v7199_v26 = vpop.permute.xlu0 %1249  ;;  %v7206_v6 = vadd.f32 %v12351_v58, %v6938_v50 }
 0x1af   : > { %12341 = vst [vmem:[#allocation88_spill] sm:$0xff] %v7144_v43  ;;  %v12345_v11 = vrot.slane %v12344_v32, 1  ;;  %v12346_v43 = vld [vmem:[#allocation27_spill] sm:$0xff]  ;;  %v1745_v32 = vstv %s7078_s11  ;;  %12353 = vst [vmem:[#allocation35_spill] sm:$0xff] %v7199_v26  ;;  %v12359_v26 = vld [vmem:[#allocation21_spill] sm:$0xff]  ;;  %v7223_v50 = vmul.f32 %v6396_v15, %v1659_v45  ;;  %s7593_s11 = sld [smem:[#allocation9 + $0x5e]] }
 0x1b0   : > { %2209 = vrot.lane.b32.xlu0 %v12346_v43, %s5322_s8  ;;  %v7179_v10 = vld [vmem:[#allocation2 + $0x8] sm:$0xff]  ;;  %v12350_v43 = vld [vmem:[#allocation60_spill] sm:$0xff]  ;;  %12354 = vst [vmem:[#allocation27_spill] sm:$0xff] %v7202_v33  ;;  %v12360_v40 = vrot.slane %v12359_v26, 1  ;;  %v7241_v26 = vmul.f32 %v1573_v57, %v6346_v14 }
 0x1b1   : > { %2211 = vrot.lane.b32.xlu1 %v12345_v11, %s5322_s8  ;;  %v1574_v19 = vmul.f32 %v7179_v10, %v1573_v57  ;;  %v7187_v11 = vadd.f32 %v12350_v43, %v7000_v17  ;;  %v7191_v48 = vadd.f32 %v12350_v43, %v7004_v34  ;;  %v12355_v17 = vrot.slane %v7102_v47, 1  ;;  %12361 = vst [vmem:[#allocation61_spill] sm:$0xff] %v7223_v50 }
 0x1b2   : > { %v12356_v34 = vrot.slane %v7099_v31, 1  ;;  %v1660_v52 = vmul.f32 %v7179_v10, %v1659_v45  ;;  %v1746_v58 = vmul.f32 %v7179_v10, %v1745_v32  ;;  %v7227_v47 = vmul.f32 %v6448_v59, %v1745_v32  ;;  %12365 = vst [vmem:[#allocation21_spill] sm:$0xff] %v7241_v26  ;;  %v7251_v31 = vpop.permute.xlu0 %1270 }
 0x1b3   : > { %v7247_v59 = vmul.f32 %v1745_v32, %v6424_v25  ;;  %12368 = vst [vmem:[#allocation91_spill] sm:$0xff] %v7251_v31  ;;  %v7253_v41 = vrot.slane %v1574_v19, 1  ;;  %v7260_v57 = vmul.f32 %v2463_v13, %v6346_v14  ;;  %v12372_v19 = vld [vmem:[#allocation66_spill] sm:$0xff] }
 0x1b4   : > { %v7213_v43 = vsel %vm1525_vm1, %v12356_v34, %v12355_v17  ;;  %2231 = vrot.lane.b32.xlu0 %v12360_v40, %s5322_s8  ;;  %12362 = vst [vmem:[#allocation68_spill] sm:$0xff] %v7227_v47  ;;  %v12363_v17 = vrot.slane %v7133_v4, 1  ;;  %v7244_v40 = vmul.f32 %v1659_v45, %v6359_v42  ;;  %v12371_v42 = vld [vmem:[#allocation65_spill] sm:$0xff]  ;;  %v7274_v32 = vadd.f32 %v12372_v19, %v6989_v8  ;;  %v12374_v4 = vld [vmem:[#allocation22_spill] sm:$0xff] }
 0x1b5   : > { %12357 = vst [vmem:[#allocation60_spill] sm:$0xff] %v7213_v43  ;;  %2233 = vrot.lane.b32.xlu1 %v12358_v18, %s5322_s8  ;;  %v12364_v18 = vrot.slane %v7022_v29, 1  ;;  %12367 = vst [vmem:[#allocation90_spill] sm:$0xff] %v7247_v59  ;;  %v7249_v43 = vpop.permute.xlu1 %1272  ;;  %v7266_v25 = vadd.f32 %v12371_v42, %v7050_v39  ;;  %v7270_v45 = vadd.f32 %v12371_v42, %v7068_v35  ;;  %v12375_v39 = vrot.slane %v12374_v4, 1 }
 0x1b6   : > { %12366 = vst [vmem:[#allocation89_spill] sm:$0xff] %v7244_v40  ;;  %12369 = vst [vmem:[#allocation92_spill] sm:$0xff] %v7253_v41  ;;  %v7286_v41 = vrot.slane %v1660_v52, 1  ;;  %v7289_v42 = vrot.slane %v1746_v58, 1  ;;  %v7298_v4 = vpop.permute.xlu0 %1291  ;;  %v12380_v58 = vld [vmem:[#allocation19_spill] sm:$0xff]  ;;  %v2487_v52 = vstv %s7229_s14  ;;  %s7710_s14 = sld [smem:[#allocation9 + $0x62]] }
 0x1b7   : > { %v7238_v34 = vsel %vm1525_vm1, %v12364_v18, %v12363_v17  ;;  %v7257_v17 = vmul.f32 %v6367_v62, %v2463_v13  ;;  %12370 = vst [vmem:[#allocation93_spill] sm:$0xff] %v7260_v57  ;;  %v7278_v18 = vadd.f32 %v12372_v19, %v6992_v2  ;;  %v12373_v13 = vrot.slane %v6614_v21, 1  ;;  %12379 = vst [vmem:[#allocation94_spill] sm:$0xff] %v7298_v4  ;;  %v12381_v19 = vld [vmem:[#allocation20_spill] sm:$0xff] }
 0x1b8   : > { %2235 = vrot.lane.b32.xlu0 %v12375_v39, %s5322_s8  ;;  %12376 = vst [vmem:[#allocation65_spill] sm:$0xff] %v7286_v41  ;;  %12377 = vst [vmem:[#allocation66_spill] sm:$0xff] %v7289_v42  ;;  %v7304_v35 = vadd.f32 %v12380_v58, %v7124_v38  ;;  %v7308_v8 = vadd.f32 %v12380_v58, %v7128_v23  ;;  %v7312_v21 = vadd.f32 %v12381_v19, %v7041_v61  ;;  %v12383_v39 = vld [vmem:[#allocation24_spill] sm:$0xff] }
 0x1b9   : > { %2255 = vrot.lane.b32.xlu1 %v12373_v13, %s5322_s8  ;;  %v1775_v13 = vstv %s7183_s29  ;;  %v7296_v31 = vpop.permute.xlu1 %1293  ;;  %v12382_v2 = vrot.slane %v6601_v44, 1  ;;  %v1861_v23 = vstv %s7231_s12  ;;  %v7327_v58 = vadd.f32 %v12381_v19, %v7045_v12  ;;  %s7678_s29 = sld [smem:[#allocation9 + $0x60]]  ;;  %s7727_s12 = sld [smem:[#allocation9 + $0x61]] }
 0x1ba   : > { %12378 = vst [vmem:[#allocation22_spill] sm:$0xff] %v7296_v31  ;;  %v1776_v38 = vmul.f32 %v7179_v10, %v1775_v13  ;;  %v7322_v42 = vmul.f32 %v1775_v13, %v12383_v39  ;;  %v12385_v61 = vrot.slane %v7241_v26, 1  ;;  %v12386_v44 = vrot.slane %v7202_v33, 1  ;;  %v7346_v31 = vpop.permute.xlu0 %1295 }
 0x1bb   : > { %v7340_v41 = vmul.f32 %v1861_v23, %v6665_v1  ;;  %12390 = vst [vmem:[#allocation96_spill] sm:$0xff] %v7346_v31  ;;  %v12391_v12 = vrot.slane %v7260_v57, 1  ;;  %v12392_v19 = vrot.slane %v7257_v17, 1  ;;  %v12397_v33 = vrot.slane %v7227_v47, 1 }
 0x1bc   : > { %2257 = vrot.lane.b32.xlu0 %v6692_v54, %s5322_s8  ;;  %12384 = vst [vmem:[#allocation19_spill] sm:$0xff] %v7322_v42  ;;  %v7337_v54 = vmul.f32 %v6611_v53, %v1775_v13  ;;  %v12394_v13 = vrot.slane %v7223_v50, 1  ;;  %v1947_v57 = vstv %s7262_s10  ;;  %v7400_v47 = vrot.slane %v1776_v38, 1  ;;  %s7772_s10 = sld [smem:[#allocation9 + $0x63]] }
 0x1bd   : > { %2259 = vrot.lane.b32.xlu1 %v12382_v2, %s5322_s8  ;;  %v7334_v2 = vsel %vm1525_vm1, %v12386_v44, %v12385_v61  ;;  %12389 = vst [vmem:[#allocation95_spill] sm:$0xff] %v7340_v41  ;;  %v7344_v4 = vpop.permute.xlu1 %1314  ;;  %v7353_v26 = vsel %vm1525_vm1, %v12392_v19, %v12391_v12  ;;  %v12393_v61 = vrot.slane %v7244_v40, 1  ;;  %v12399_v12 = vld [vmem:[#allocation25_spill] sm:$0xff]  ;;  %v7379_v40 = vmul.f32 %v6367_v62, %v2487_v52 }
 0x1be   : > { %12387 = vst [vmem:[#allocation20_spill] sm:$0xff] %v7334_v2  ;;  %12388 = vst [vmem:[#allocation24_spill] sm:$0xff] %v7337_v54  ;;  %v12396_v2 = vrot.slane %v7247_v59, 1  ;;  %v7376_v19 = vadd.f32 %v12399_v12, %v7159_v56  ;;  %v12402_v56 = vld [vmem:[#allocation28_spill] sm:$0xff]  ;;  %v7419_v38 = vmul.f32 %v6849_v37, %v1947_v57 }
 0x1bf   : > { %v7360_v44 = vsel %vm1525_vm1, %v12394_v13, %v12393_v61  ;;  %v1862_v61 = vmul.f32 %v7179_v10, %v1861_v23  ;;  %v7383_v13 = vmul.f32 %v6694_v5, %v1861_v23  ;;  %v12403_v59 = vrot.slane %v12402_v56, 1  ;;  %v12409_v23 = vld [vmem:[#allocation67_spill] sm:$0xff] }
 0x1c0   : > { %12395 = vst [vmem:[#allocation97_spill] sm:$0xff] %v7360_v44  ;;  %v7367_v31 = vsel %vm1525_vm1, %v12397_v33, %v12396_v2  ;;  %v7389_v33 = vadd.f32 %v12399_v12, %v7163_v9  ;;  %v12401_v2 = vld [vmem:[#allocation26_spill] sm:$0xff]  ;;  %v1948_v12 = vmul.f32 %v7179_v10, %v1947_v57  ;;  %12406 = vst [vmem:[#allocation28_spill] sm:$0xff] %v7419_v38 }
 0x1c1   : > { %12398 = vst [vmem:[#allocation98_spill] sm:$0xff] %v7367_v31  ;;  %12400 = vst [vmem:[#allocation25_spill] sm:$0xff] %v7383_v13  ;;  %v7393_v31 = vadd.f32 %v12401_v2, %v7108_v49  ;;  %2281 = vrot.lane.b32.xlu1 %v6719_v28, %s5322_s8  ;;  %2279 = vrot.lane.b32.xlu0 %v12403_v59, %s5322_s8  ;;  %v7405_v44 = vadd.f32 %v12401_v2, %v7112_v3  ;;  %v12405_v28 = vld [vmem:[#allocation30_spill] sm:$0xff]  ;;  %v7414_v56 = vpop.permute.xlu1 %1318  ;;  %v7416_v59 = vpop.permute.xlu0 %1316  ;;  %v7428_v49 = vrot.slane %v1862_v61, 1  ;;  %v12411_v61 = vld [vmem:[#allocation29_spill] sm:$0xff] }
 0x1c2   : > { %12404 = vst [vmem:[#allocation26_spill] sm:$0xff] %v7400_v47  ;;  %v7412_v50 = vadd.f32 %v12405_v28, %v7195_v63  ;;  %v7422_v3 = vmul.f32 %v1947_v57, %v6806_v60  ;;  %v7426_v2 = vadd.f32 %v12405_v28, %v7206_v6  ;;  %v7432_v9 = vmul.f32 %v2487_v52, %v6346_v14 }
 0x1c3   : > { %12408 = vst [vmem:[#allocation99_spill] sm:$0xff] %v7428_v49  ;;  %v7436_v47 = vadd.f32 %v12409_v23, %v7149_v27  ;;  %v7440_v57 = vadd.f32 %v12409_v23, %v7153_v24  ;;  %v12410_v6 = vrot.slane %v6684_v36, 1  ;;  %v12412_v28 = vrot.slane %v12411_v61, 1 }
 0x1c4   : > { %12407 = vst [vmem:[#allocation30_spill] sm:$0xff] %v7422_v3  ;;  %v12413_v63 = vrot.slane %v7322_v42, 1  ;;  %v12414_v27 = vrot.slane %v7337_v54, 1  ;;  %v12416_v24 = vrot.slane %v7340_v41, 1  ;;  %v12417_v23 = vrot.slane %v7383_v13, 1 }
 0x1c5   : > { %2303 = vrot.lane.b32.xlu1 %v12410_v6, %s5322_s8  ;;  %2283 = vrot.lane.b32.xlu0 %v12412_v28, %s5322_s8  ;;  %v7463_v6 = vrot.slane %v1948_v12, 1  ;;  %v1803_v61 = vstv %s7342_s26  ;;  %v12420_v28 = vld [vmem:[#allocation32_spill] sm:$0xff]  ;;  %v7470_v42 = vpop.permute.xlu1 %1339  ;;  %v7472_v54 = vpop.permute.xlu0 %1337  ;;  %v1975_v41 = vstv %s7372_s5  ;;  %v12423_v12 = vld [vmem:[#allocation33_spill] sm:$0xff]  ;;  %s7774_s26 = sld [smem:[#allocation9 + $0x64]]  ;;  %s7857_s5 = sld [smem:[#allocation9 + $0x66]] }
 0x1c6   : > { %v7454_v49 = vsel %vm1525_vm1, %v12414_v27, %v12413_v63  ;;  %v7461_v36 = vsel %vm1525_vm1, %v12417_v23, %v12416_v24  ;;  %v7468_v52 = vadd.f32 %v12420_v28, %v7274_v32  ;;  %12421 = vst [vmem:[#allocation32_spill] sm:$0xff] %v7470_v42  ;;  %12422 = vst [vmem:[#allocation101_spill] sm:$0xff] %v7472_v54  ;;  %v1889_v27 = vstv %s7370_s23  ;;  %s7838_s23 = sld [smem:[#allocation9 + $0x65]] }
 0x1c7   : > { %12415 = vst [vmem:[#allocation67_spill] sm:$0xff] %v7454_v49  ;;  %12418 = vst [vmem:[#allocation29_spill] sm:$0xff] %v7461_v36  ;;  %v7479_v13 = vadd.f32 %v12420_v28, %v7278_v18  ;;  %v7483_v24 = vadd.f32 %v12423_v12, %v7187_v11  ;;  %v2511_v32 = vstv %s7385_s20  ;;  %v12424_v63 = vrot.slane %v6673_v51, 1  ;;  %s7900_s20 = sld [smem:[#allocation9 + $0x67]] }
 0x1c8   : > { %12419 = vst [vmem:[#allocation100_spill] sm:$0xff] %v7463_v6  ;;  %v7491_v6 = vadd.f32 %v12423_v12, %v7191_v48  ;;  %v11903_v18 = vrot.slane %v7419_v38, 1  ;;  %v1804_v11 = vmul.f32 %v7179_v10, %v1803_v61  ;;  %v7501_v28 = vmul.f32 %v6611_v53, %v1803_v61  ;;  %v12440_v38 = vld [vmem:[#allocation47_spill] sm:$0xff] }
 0x1c9   : > { %2307 = vrot.lane.b32.xlu1 %v12424_v63, %s5322_s8  ;;  %2305 = vrot.lane.b32.xlu0 %v6759_v0, %s5322_s8  ;;  %v1890_v23 = vmul.f32 %v7179_v10, %v1889_v27  ;;  %v7505_v36 = vmul.f32 %v6694_v5, %v1889_v27  ;;  %v1976_v48 = vmul.f32 %v7179_v10, %v1975_v41  ;;  %v7510_v51 = vpop.permute.xlu1 %1360  ;;  %v7512_v63 = vpop.permute.xlu0 %1341  ;;  %v12429_v0 = vrot.slane %v7422_v3, 1 }
 0x1ca   : > { %12425 = vst [vmem:[#allocation33_spill] sm:$0xff] %v7501_v28  ;;  %12427 = vst [vmem:[#allocation103_spill] sm:$0xff] %v7510_v51  ;;  %v7522_v49 = vmul.f32 %v6367_v62, %v2511_v32  ;;  %v7525_v54 = vmul.f32 %v2511_v32, %v6346_v14  ;;  %v7528_v42 = vmul.f32 %v1803_v61, %v12383_v39  ;;  %v12434_v3 = vrot.slane %v7432_v9, 1 }
 0x1cb   : > { %12426 = vst [vmem:[#allocation102_spill] sm:$0xff] %v7505_v36  ;;  %12428 = vst [vmem:[#allocation104_spill] sm:$0xff] %v7512_v63  ;;  %v7519_v12 = vsel %vm1525_vm1, %v11903_v18, %v12429_v0  ;;  %v12433_v63 = vld [vmem:[#allocation41_spill] sm:$0xff]  ;;  %v12435_v0 = vrot.slane %v7379_v40, 1  ;;  %v7544_v62 = vmul.f32 %v6849_v37, %v1975_v41  ;;  %v7547_v14 = vmul.f32 %v1889_v27, %v6665_v1 }
 0x1cc   : > { %12430 = vst [vmem:[#allocation105_spill] sm:$0xff] %v7519_v12  ;;  %12431 = vst [vmem:[#allocation106_spill] sm:$0xff] %v7525_v54  ;;  %v7534_v51 = vadd.f32 %v12433_v63, %v7312_v21  ;;  %v7551_v61 = vadd.f32 %v12433_v63, %v7327_v58  ;;  %v12439_v21 = vld [vmem:[#allocation42_spill] sm:$0xff]  ;;  %v7562_v12 = vrot.slane %v1804_v11, 1  ;;  %v7565_v27 = vmul.f32 %v1975_v41, %v6806_v60 }
 0x1cd   : > { %12432 = vst [vmem:[#allocation107_spill] sm:$0xff] %v7528_v42  ;;  %v7541_v18 = vsel %vm1525_vm1, %v12435_v0, %v12434_v3  ;;  %12437 = vst [vmem:[#allocation108_spill] sm:$0xff] %v7544_v62  ;;  %v7555_v32 = vadd.f32 %v12439_v21, %v7266_v25  ;;  %2329 = vrot.lane.b32.xlu1 %v12440_v38, %s5322_s8  ;;  %v12441_v3 = vld [vmem:[#allocation36_spill] sm:$0xff]  ;;  %v7569_v58 = vadd.f32 %v12439_v21, %v7270_v45  ;;  %v7578_v38 = vpop.permute.xlu1 %1364  ;;  %v7580_v11 = vpop.permute.xlu0 %1362  ;;  %v12450_v25 = vld [vmem:[#allocation37_spill] sm:$0xff] }
 0x1ce   : > { %12436 = vst [vmem:[#allocation41_spill] sm:$0xff] %v7541_v18  ;;  %12438 = vst [vmem:[#allocation109_spill] sm:$0xff] %v7547_v14  ;;  %v12442_v0 = vrot.slane %v12441_v3, 1  ;;  %v7572_v63 = vrot.slane %v1890_v23, 1  ;;  %v7574_v18 = vrot.slane %v1976_v48, 1  ;;  %v12447_v23 = vld [vmem:[#allocation43_spill] sm:$0xff] }
 0x1cf   : > { %12443 = vst [vmem:[#allocation42_spill] sm:$0xff] %v7562_v12  ;;  %12444 = vst [vmem:[#allocation47_spill] sm:$0xff] %v7565_v27  ;;  %v7597_v41 = vadd.f32 %v12447_v23, %v7405_v44  ;;  %v12448_v3 = vld [vmem:[#allocation44_spill] sm:$0xff]  ;;  %v12449_v48 = vrot.slane %v6762_v55, 1  ;;  %v12451_v21 = vrot.slane %v12450_v25, 1  ;;  %v1831_v44 = vstv %s7508_s25  ;;  %s8001_s25 = sld [smem:[#allocation9 + $0x69]] }
 0x1d0   : > { %2327 = vrot.lane.b32.xlu0 %v12442_v0, %s5322_s8  ;;  %12445 = vst [vmem:[#allocation36_spill] sm:$0xff] %v7572_v63  ;;  %12446 = vst [vmem:[#allocation110_spill] sm:$0xff] %v7574_v18  ;;  %v7588_v0 = vadd.f32 %v12447_v23, %v7393_v31  ;;  %v2535_v18 = vstv %s7487_s22  ;;  %v7601_v45 = vadd.f32 %v12448_v3, %v7304_v35  ;;  %v12453_v35 = vrot.slane %v7525_v54, 1  ;;  %s7937_s22 = sld [smem:[#allocation9 + $0x68]] }
 0x1d1   : > { %v7605_v31 = vadd.f32 %v12448_v3, %v7308_v8  ;;  %2351 = vrot.lane.b32.xlu1 %v12449_v48, %s5322_s8  ;;  %v7615_v23 = vpop.permute.xlu1 %1385  ;;  %v7617_v12 = vpop.permute.xlu0 %1383  ;;  %v12454_v8 = vrot.slane %v7522_v49, 1  ;;  %v12455_v55 = vrot.slane %v7528_v42, 1  ;;  %v12456_v48 = vrot.slane %v7501_v28, 1 }
 0x1d2   : > { %12452 = vst [vmem:[#allocation43_spill] sm:$0xff] %v7615_v23  ;;  %v1917_v63 = vstv %s7530_s30  ;;  %v12458_v23 = vld [vmem:[#allocation48_spill] sm:$0xff]  ;;  %v12460_v42 = vrot.slane %v7505_v36, 1  ;;  %s8013_s30 = sld [smem:[#allocation9 + $0x6a]] }
 0x1d3   : > { %v7624_v3 = vsel %vm1525_vm1, %v12454_v8, %v12453_v35  ;;  %v7631_v25 = vsel %vm1525_vm1, %v12456_v48, %v12455_v55  ;;  %v7639_v54 = vadd.f32 %v12458_v23, %v7436_v47  ;;  %v7643_v35 = vadd.f32 %v12458_v23, %v7440_v57  ;;  %v12465_v57 = vld [vmem:[#allocation50_spill] sm:$0xff] }
 0x1d4   : > { %2331 = vrot.lane.b32.xlu0 %v12451_v21, %s5322_s8  ;;  %12457 = vst [vmem:[#allocation44_spill] sm:$0xff] %v7631_v25  ;;  %v7634_v21 = vmul.f32 %v6396_v15, %v2535_v18  ;;  %v12459_v8 = vrot.slane %v7547_v14, 1  ;;  %v7653_v48 = vmul.f32 %v1831_v44, %v12383_v39  ;;  %v12463_v15 = vld [vmem:[#allocation49_spill] sm:$0xff]  ;;  %v12464_v47 = vrot.slane %v6739_v20, 1 }
 0x1d5   : > { %v7657_v25 = vadd.f32 %v12463_v15, %v7376_v19  ;;  %v1832_v23 = vmul.f32 %v7179_v10, %v1831_v44  ;;  %v7666_v14 = vmul.f32 %v6611_v53, %v1831_v44  ;;  %v7672_v39 = vmul.f32 %v6694_v5, %v1917_v63  ;;  %v7688_v44 = vpop.permute.xlu1 %1406 }
 0x1d6   : > { %v7650_v55 = vsel %vm1525_vm1, %v12460_v42, %v12459_v8  ;;  %12462 = vst [vmem:[#allocation48_spill] sm:$0xff] %v7653_v48  ;;  %2355 = vrot.lane.b32.xlu1 %v12464_v47, %s5322_s8  ;;  %v1918_v42 = vmul.f32 %v7179_v10, %v1917_v63  ;;  %v7675_v19 = vmul.f32 %v1917_v63, %v6665_v1  ;;  %v2003_v20 = vstv %s7576_s6  ;;  %v7690_v47 = vpop.permute.xlu0 %1387  ;;  %s8065_s6 = sld [smem:[#allocation9 + $0x6b]] }
 0x1d7   : > { %12461 = vst [vmem:[#allocation37_spill] sm:$0xff] %v7650_v55  ;;  %12466 = vst [vmem:[#allocation49_spill] sm:$0xff] %v7666_v14  ;;  %v7682_v8 = vadd.f32 %v12463_v15, %v7389_v33  ;;  %v7686_v53 = vadd.f32 %v6874_v46, %v7483_v24  ;;  %v12469_v5 = vrot.slane %v7565_v27, 1  ;;  %v12470_v1 = vrot.slane %v7544_v62, 1  ;;  %v5112_v15 = vld [vmem:[#allocation2 + $0x80] sm:$0xff] }
 0x1d8   : > { %2353 = vrot.lane.b32.xlu0 %v12465_v57, %s5322_s8  ;;  %12467 = vst [vmem:[#allocation50_spill] sm:$0xff] %v7672_v39  ;;  %12468 = vst [vmem:[#allocation111_spill] sm:$0xff] %v7675_v19  ;;  %v7702_v33 = vadd.f32 %v6874_v46, %v7491_v6  ;;  %v7706_v24 = vadd.f32 %v6876_v7, %v7412_v50  ;;  %v2559_v55 = vstv %s7593_s11  ;;  %v7721_v6 = vrot.slane %v1832_v23, 1  ;;  %s8100_s11 = sld [smem:[#allocation9 + $0x7e]] }
 0x1d9   : > { %v7697_v63 = vsel %vm1525_vm1, %v12470_v1, %v12469_v5  ;;  %v7714_v27 = vadd.f32 %v6876_v7, %v7426_v2  ;;  %v12472_v5 = vld [vmem:[#allocation45_spill] sm:$0xff]  ;;  %v2004_v50 = vmul.f32 %v7179_v10, %v2003_v20  ;;  %v7725_v1 = vmul.f32 %v2003_v20, %v6806_v60 }
 0x1da   : > { %12471 = vst [vmem:[#allocation112_spill] sm:$0xff] %v7697_v63  ;;  %2377 = vrot.lane.b32.xlu1 %v6883_v22, %s5322_s8  ;;  %v12473_v46 = vrot.slane %v12472_v5, 1  ;;  %12474 = vst [vmem:[#allocation45_spill] sm:$0xff] %v7721_v6  ;;  %v7730_v7 = vrot.slane %v1918_v42, 1  ;;  %v7734_v5 = vpop.permute.xlu1 %1410  ;;  %v7736_v23 = vpop.permute.xlu0 %1408  ;;  %v7739_v10 = vmul.f32 %v6849_v37, %v2003_v20  ;;  %v5111_v60 = vld [vmem:[#allocation2 + $0x98] sm:$0xff]  ;;  %v7743_v57 = vmul.f32 %v5112_v15, %v2559_v55  ;;  %v12480_v42 = vld [vmem:[#allocation70_spill] sm:$0xff] }
 0x1db   : > { %12475 = vst [vmem:[#allocation113_spill] sm:$0xff] %v7725_v1  ;;  %v7747_v2 = vadd.f32 %v12480_v42, %v7555_v32  ;;  %v12481_v22 = vrot.slane %v7653_v48, 1  ;;  %v12482_v63 = vrot.slane %v7666_v14, 1  ;;  %v7756_v37 = vmul.f32 %v5111_v60, %v2559_v55  ;;  %v12485_v20 = vld [vmem:[#allocation53_spill] sm:$0xff]  ;;  %v12487_v32 = vld [vmem:[#allocation46_spill] sm:$0xff] }
 0x1dc   : > { %2375 = vrot.lane.b32.xlu0 %v12473_v46, %s5322_s8  ;;  %12476 = vst [vmem:[#allocation114_spill] sm:$0xff] %v7730_v7  ;;  %12477 = vst [vmem:[#allocation115_spill] sm:$0xff] %v7739_v10  ;;  %v7741_v46 = vmul.f32 %v5111_v60, %v2535_v18  ;;  %v7760_v18 = vadd.f32 %v12480_v42, %v7569_v58  ;;  %v12486_v62 = vrot.slane %v12485_v20, 1  ;;  %v12488_v6 = vrot.slane %v12487_v32, 1  ;;  %v12490_v58 = vld [vmem:[#allocation71_spill] sm:$0xff] }
 0x1dd   : > { %12479 = vst [vmem:[#allocation117_spill] sm:$0xff] %v7743_v57  ;;  %v7754_v7 = vsel %vm1525_vm1, %v12482_v63, %v12481_v22  ;;  %12484 = vst [vmem:[#allocation118_spill] sm:$0xff] %v7756_v37  ;;  %v7768_v48 = vrot.slane %v2004_v50, 1  ;;  %v2583_v63 = vstv %s7668_s7  ;;  %v7778_v55 = vadd.f32 %v12490_v58, %v7468_v52  ;;  %s8163_s7 = sld [smem:[#allocation9 + $0x7f]] }
 0x1de   : > { %12478 = vst [vmem:[#allocation116_spill] sm:$0xff] %v7741_v46  ;;  %12483 = vst [vmem:[#allocation70_spill] sm:$0xff] %v7754_v7  ;;  %2399 = vrot.lane.b32.xlu1 %v12486_v62, %s5322_s8  ;;  %v7782_v62 = vadd.f32 %v12490_v58, %v7479_v13  ;;  %v12492_v50 = vrot.slane %v7672_v39, 1  ;;  %v2607_v42 = vstv %s7678_s29  ;;  %v7792_v20 = vpop.permute.xlu1 %1431  ;;  %v7794_v32 = vpop.permute.xlu0 %1429  ;;  %v12499_v52 = vrot.slane %v7725_v1, 1  ;;  %v5113_v58 = vld [vmem:[#allocation2 + $0xe0] sm:$0xff]  ;;  %s8485_s29 = sld [smem:[#allocation9 + $0x80]] }
 0x1df   : > { %12489 = vst [vmem:[#allocation53_spill] sm:$0xff] %v7768_v48  ;;  %12494 = vst [vmem:[#allocation71_spill] sm:$0xff] %v7794_v32  ;;  %v7802_v48 = vmul.f32 %v5111_v60, %v2583_v63  ;;  %v12500_v14 = vrot.slane %v7739_v10, 1  ;;  %v5114_v60 = vld [vmem:[#allocation2 + $0xf8] sm:$0xff]  ;;  %v2631_v7 = vstv %s7727_s12  ;;  %v12505_v1 = vld [vmem:[#allocation78_spill] sm:$0xff]  ;;  %v12514_v36 = vrot.slane %v7743_v57, 1 }
 0x1e0   : > { %2379 = vrot.lane.b32.xlu0 %v12488_v6, %s5322_s8  ;;  %v12491_v6 = vrot.slane %v7675_v19, 1  ;;  %v7800_v19 = vmul.f32 %v5112_v15, %v2583_v63  ;;  %v7817_v15 = vmul.f32 %v5113_v58, %v2607_v42  ;;  %v7819_v63 = vmul.f32 %v5114_v60, %v2607_v42  ;;  %v12517_v32 = vld [vmem:[#allocation75_spill] sm:$0xff]  ;;  %s8526_s12 = sld [smem:[#allocation9 + $0x82]] }
 0x1e1   : > { %12495 = vst [vmem:[#allocation119_spill] sm:$0xff] %v7802_v48  ;;  %v7815_v13 = vsel %vm1525_vm1, %v12500_v14, %v12499_v52  ;;  %v7832_v10 = vadd.f32 %v12505_v1, %v7534_v51  ;;  %v7836_v14 = vadd.f32 %v12505_v1, %v7551_v61  ;;  %v12507_v52 = vrot.slane %v7741_v46, 1 }
 0x1e2   : > { %v7789_v22 = vsel %vm1525_vm1, %v12492_v50, %v12491_v6  ;;  %v2655_v6 = vstv %s7710_s14  ;;  %v12496_v50 = vld [vmem:[#allocation52_spill] sm:$0xff]  ;;  %12503 = vst [vmem:[#allocation120_spill] sm:$0xff] %v7819_v63  ;;  %v7840_v42 = vpop.permute.xlu1 %1452  ;;  %v7851_v51 = vmul.f32 %v5114_v60, %v2631_v7  ;;  %v12513_v1 = vrot.slane %v7756_v37, 1  ;;  %s8503_s14 = sld [smem:[#allocation9 + $0x81]] }
 0x1e3   : > { %12493 = vst [vmem:[#allocation46_spill] sm:$0xff] %v7789_v22  ;;  %v12497_v39 = vrot.slane %v12496_v50, 1  ;;  %v12498_v22 = vld [vmem:[#allocation73_spill] sm:$0xff]  ;;  %12501 = vst [vmem:[#allocation52_spill] sm:$0xff] %v7815_v13  ;;  %v7853_v13 = vmul.f32 %v5113_v58, %v2655_v6  ;;  %v7855_v61 = vmul.f32 %v5114_v60, %v2655_v6  ;;  %v12518_v6 = vld [vmem:[#allocation54_spill] sm:$0xff] }
 0x1e4   : > { %2401 = vrot.lane.b32.xlu0 %v12498_v22, %s5322_s8  ;;  %12502 = vst [vmem:[#allocation73_spill] sm:$0xff] %v7817_v15  ;;  %v12504_v50 = vld [vmem:[#allocation77_spill] sm:$0xff]  ;;  %12510 = vst [vmem:[#allocation121_spill] sm:$0xff] %v7851_v51  ;;  %v7864_v28 = vsel %vm1525_vm1, %v12514_v36, %v12513_v1  ;;  %v12519_v60 = vrot.slane %v12518_v6, 1  ;;  %v2703_v36 = vstv %s7774_s26  ;;  %v12520_v1 = vld [vmem:[#allocation38_spill] sm:$0xff]  ;;  %s8591_s26 = sld [smem:[#allocation9 + $0x84]] }
 0x1e5   : > { %2403 = vrot.lane.b32.xlu1 %v12497_v39, %s5322_s8  ;;  %v7824_v39 = vadd.f32 %v12504_v50, %v7601_v45  ;;  %v7828_v22 = vadd.f32 %v12504_v50, %v7605_v31  ;;  %v7842_v45 = vpop.permute.xlu0 %1433  ;;  %v12508_v31 = vrot.slane %v7634_v21, 1  ;;  %12511 = vst [vmem:[#allocation122_spill] sm:$0xff] %v7853_v13  ;;  %12512 = vst [vmem:[#allocation123_spill] sm:$0xff] %v7855_v61 }
 0x1e6   : > { %12506 = vst [vmem:[#allocation77_spill] sm:$0xff] %v7842_v45  ;;  %12515 = vst [vmem:[#allocation124_spill] sm:$0xff] %v7864_v28  ;;  %v7881_v45 = vadd.f32 %v12520_v1, %v7657_v25  ;;  %v7893_v37 = vpop.permute.xlu1 %1456  ;;  %v7917_v28 = vadd.f32 %v7080_v30, %v7706_v24 }
 0x1e7   : > { %v7849_v50 = vsel %vm1525_vm1, %v12508_v31, %v12507_v52  ;;  %v7868_v31 = vmul.f32 %v5113_v58, %v2631_v7  ;;  %v7885_v7 = vadd.f32 %v12520_v1, %v7682_v8  ;;  %v5115_v52 = vld [vmem:[#allocation2 + $0x158] sm:$0xff]  ;;  %12523 = vst [vmem:[#allocation54_spill] sm:$0xff] %v7893_v37  ;;  %v12525_v1 = vrot.slane %v7800_v19, 1 }
 0x1e8   : > { %12509 = vst [vmem:[#allocation78_spill] sm:$0xff] %v7849_v50  ;;  %2423 = vrot.lane.b32.xlu0 %v12519_v60, %s5322_s8  ;;  %v2679_v50 = vstv %s7772_s10  ;;  %v7913_v25 = vmul.f32 %v5115_v52, %v2703_v36  ;;  %v7921_v8 = vadd.f32 %v7080_v30, %v7714_v27  ;;  %v1233_v30 = vadd.f32 %v7082_v16, %v7639_v54  ;;  %s8564_s10 = sld [smem:[#allocation9 + $0x83]] }
 0x1e9   : > { %12516 = vst [vmem:[#allocation125_spill] sm:$0xff] %v7868_v31  ;;  %2425 = vrot.lane.b32.xlu1 %v12517_v32, %s5322_s8  ;;  %v12521_v32 = vld [vmem:[#allocation81_spill] sm:$0xff]  ;;  %v7889_v6 = vmul.f32 %v5115_v52, %v2679_v50  ;;  %v7895_v57 = vpop.permute.xlu0 %1454  ;;  %v12538_v54 = vrot.slane %v7853_v13, 1  ;;  %v2751_v27 = vstv %s7857_s5  ;;  %s8655_s5 = sld [smem:[#allocation9 + $0x86]] }
 0x1ea   : > { %v1212_v58 = vadd.f32 %v12521_v32, %v7588_v0  ;;  %v1213_v60 = vadd.f32 %v12521_v32, %v7597_v41  ;;  %v12524_v0 = vrot.slane %v7802_v48, 1  ;;  %v5116_v41 = vld [vmem:[#allocation2 + $0x140] sm:$0xff]  ;;  %12529 = vst [vmem:[#allocation127_spill] sm:$0xff] %v7913_v25  ;;  %v11936_v48 = vrot.slane %v7868_v31, 1  ;;  %v12544_v31 = vld [vmem:[#allocation59_spill] sm:$0xff] }
 0x1eb   : > { %12522 = vst [vmem:[#allocation75_spill] sm:$0xff] %v7889_v6  ;;  %v7909_v32 = vmul.f32 %v5116_v41, %v2679_v50  ;;  %v7911_v37 = vmul.f32 %v5116_v41, %v2703_v36  ;;  %v12531_v50 = vld [vmem:[#allocation55_spill] sm:$0xff]  ;;  %v12533_v36 = vrot.slane %v7819_v63, 1  ;;  %v12537_v63 = vrot.slane %v7855_v61, 1  ;;  %v12541_v61 = vld [vmem:[#allocation57_spill] sm:$0xff] }
 0x1ec   : > { %v7907_v46 = vsel %vm1525_vm1, %v12525_v1, %v12524_v0  ;;  %v12530_v0 = vrot.slane %v7022_v29, 1  ;;  %v12532_v1 = vrot.slane %v12531_v50, 1  ;;  %v1234_v29 = vadd.f32 %v7082_v16, %v7643_v35  ;;  %v7945_v50 = vpop.permute.xlu1 %1477 }
 0x1ed   : > { %12526 = vst [vmem:[#allocation38_spill] sm:$0xff] %v7907_v46  ;;  %12527 = vst [vmem:[#allocation81_spill] sm:$0xff] %v7909_v32  ;;  %v12534_v46 = vrot.slane %v7817_v15, 1  ;;  %v7961_v16 = vsel %vm1525_vm1, %v12538_v54, %v12537_v63  ;;  %v12540_v15 = vld [vmem:[#allocation64_spill] sm:$0xff]  ;;  %v1254_v63 = vadd.f32 %v12541_v61, %v7686_v53  ;;  %v12542_v54 = vld [vmem:[#allocation23_spill] sm:$0xff] }
 0x1ee   : > { %12528 = vst [vmem:[#allocation126_spill] sm:$0xff] %v7911_v37  ;;  %2447 = vrot.lane.b32.xlu1 %v12530_v0, %s5322_s8  ;;  %2427 = vrot.lane.b32.xlu0 %v12532_v1, %s5322_s8  ;;  %v2727_v0 = vstv %s7838_s23  ;;  %v7947_v1 = vpop.permute.xlu0 %1475  ;;  %12539 = vst [vmem:[#allocation128_spill] sm:$0xff] %v7961_v16  ;;  %v12543_v13 = vrot.slane %v12542_v54, 1  ;;  %s8640_s23 = sld [smem:[#allocation9 + $0x85]] }
 0x1ef   : > { %v7934_v24 = vsel %vm1525_vm1, %v12534_v46, %v12533_v36  ;;  %v12536_v46 = vrot.slane %v7851_v51, 1  ;;  %v7963_v35 = vmul.f32 %v5115_v52, %v2727_v0  ;;  %v11939_v51 = vrot.slane %v7909_v32, 1 }
 0x1f0   : > { %12535 = vst [vmem:[#allocation55_spill] sm:$0xff] %v7934_v24  ;;  %v1256_v24 = vadd.f32 %v12540_v15, %v7778_v55  ;;  %v1255_v52 = vadd.f32 %v12541_v61, %v7702_v33  ;;  %v7982_v55 = vmul.f32 %v5116_v41, %v2727_v0  ;;  %v5117_v33 = vld [vmem:[#allocation2 + $0x1a0] sm:$0xff]  ;;  %v8007_v0 = vpop.permute.xlu1 %1498  ;;  %v1282_v32 = vadd.f32 %v7249_v43, %v1213_v60 }
 0x1f1   : > { %v7954_v36 = vsel %vm1525_vm1, %v11936_v48, %v12536_v46  ;;  %v7973_v48 = vadd.f32 %v12540_v15, %v7782_v62  ;;  %v7986_v46 = vadd.f32 %v12544_v31, %v7832_v10  ;;  %v12545_v62 = vrot.slane %v7889_v6, 1 }
 0x1f2   : > { %2451 = vrot.lane.b32.xlu1 %v12543_v13, %s5322_s8  ;;  %2449 = vrot.lane.b32.xlu0 %v7238_v34, %s5322_s8  ;;  %v7997_v15 = vmul.f32 %v5117_v33, %v2751_v27  ;;  %v5118_v13 = vld [vmem:[#allocation2 + $0x1b8] sm:$0xff]  ;;  %v1278_v10 = vadd.f32 %v12544_v31, %v7836_v14  ;;  %v12549_v34 = vld [vmem:[#allocation35_spill] sm:$0xff]  ;;  %v8009_v54 = vpop.permute.xlu0 %1479  ;;  %v12550_v6 = vrot.slane %v7913_v25, 1  ;;  %v12551_v14 = vrot.slane %v7911_v37, 1 }
 0x1f3   : > { %v7995_v53 = vsel %vm1525_vm1, %v11939_v51, %v12545_v62  ;;  %v7999_v61 = vmul.f32 %v5118_v13, %v2751_v27  ;;  %v1258_v41 = vadd.f32 %v12549_v34, %v7747_v2  ;;  %v2775_v51 = vstv %s7900_s20  ;;  %v12554_v62 = vld [vmem:[#allocation91_spill] sm:$0xff]  ;;  %s8709_s20 = sld [smem:[#allocation9 + $0x87]] }
 0x1f4   : > { %12546 = vst [vmem:[#allocation64_spill] sm:$0xff] %v7995_v53  ;;  %12547 = vst [vmem:[#allocation57_spill] sm:$0xff] %v7997_v15  ;;  %v1259_v27 = vadd.f32 %v12549_v34, %v7760_v18  ;;  %v1281_v53 = vadd.f32 %v7249_v43, %v1212_v58  ;;  %v8023_v2 = vsel %vm1525_vm1, %v12551_v14, %v12550_v6  ;;  %v2799_v58 = vstv %s7937_s22  ;;  %v12558_v18 = vld [vmem:[#allocation94_spill] sm:$0xff]  ;;  %v12564_v43 = vld [vmem:[#allocation96_spill] sm:$0xff]  ;;  %s8730_s22 = sld [smem:[#allocation9 + $0x88]] }
 0x1f5   : > { %12548 = vst [vmem:[#allocation23_spill] sm:$0xff] %v7999_v61  ;;  %12552 = vst [vmem:[#allocation59_spill] sm:$0xff] %v8023_v2  ;;  %v8025_v31 = vmul.f32 %v5118_v13, %v2775_v51  ;;  %v1279_v16 = vadd.f32 %v12554_v62, %v7824_v39  ;;  %v1280_v34 = vadd.f32 %v12554_v62, %v7828_v22  ;;  %v12555_v6 = vrot.slane %v7257_v17, 1  ;;  %v12557_v39 = vld [vmem:[#allocation22_spill] sm:$0xff]  ;;  %v8047_v2 = vpop.permute.xlu1 %1502 }
 0x1f6   : > { %2473 = vrot.lane.b32.xlu1 %v7353_v26, %s5323_s13  ;;  %v8041_v60 = vmul.f32 %v5117_v33, %v2775_v51  ;;  %v1302_v25 = vadd.f32 %v12557_v39, %v1233_v30  ;;  %v1303_v26 = vadd.f32 %v12557_v39, %v1234_v29  ;;  %v1300_v37 = vadd.f32 %v12558_v18, %v7881_v45  ;;  %v8049_v22 = vpop.permute.xlu0 %1500 }
 0x1f7   : > { %12553 = vst [vmem:[#allocation35_spill] sm:$0xff] %v8025_v31  ;;  %2471 = vrot.lane.b32.xlu0 %v12555_v6, %s5323_s13  ;;  %v12559_v17 = vrot.slane %v7963_v35, 1  ;;  %v12560_v62 = vrot.slane %v7982_v55, 1  ;;  %v1301_v51 = vadd.f32 %v12558_v18, %v7885_v7  ;;  %v11947_v30 = vrot.slane %v8025_v31, 1 }
 0x1f8   : > { %12556 = vst [vmem:[#allocation91_spill] sm:$0xff] %v8041_v60  ;;  %v8061_v29 = vmul.f32 %v5117_v33, %v2799_v58  ;;  %v8063_v45 = vmul.f32 %v5118_v13, %v2799_v58  ;;  %v1323_v39 = vadd.f32 %v7344_v4, %v1254_v63  ;;  %v1324_v14 = vadd.f32 %v7344_v4, %v1255_v52  ;;  %v12566_v13 = vld [vmem:[#allocation93_spill] sm:$0xff] }
 0x1f9   : > { %v8056_v6 = vsel %vm1525_vm1, %v12560_v62, %v12559_v17  ;;  %v1304_v17 = vadd.f32 %v12564_v43, %v7917_v28  ;;  %v1305_v62 = vadd.f32 %v12564_v43, %v7921_v8  ;;  %v12565_v7 = vrot.slane %v7379_v40, 1 }
 0x1fa   : > { %12561 = vst [vmem:[#allocation22_spill] sm:$0xff] %v8056_v6  ;;  %12562 = vst [vmem:[#allocation94_spill] sm:$0xff] %v8061_v29  ;;  %v8077_v33 = vadd.f32 %v7414_v56, %v1258_v41  ;;  %v12567_v18 = vrot.slane %v12566_v13, 1  ;;  %v12568_v63 = vrot.slane %v7999_v61, 1  ;;  %v12569_v4 = vrot.slane %v7997_v15, 1  ;;  %v8093_v41 = vpop.permute.xlu1 %2041  ;;  %v8095_v43 = vpop.permute.xlu0 %2039 }
 0x1fb   : > { %12563 = vst [vmem:[#allocation129_spill] sm:$0xff] %v8063_v45  ;;  %2495 = vrot.lane.b32.xlu1 %v12565_v7, %s5323_s13  ;;  %v11948_v8 = vrot.slane %v8041_v60, 1  ;;  %v2823_v52 = vstv %s8001_s25  ;;  %v1328_v40 = vadd.f32 %v7414_v56, %v1259_v27  ;;  %v1325_v58 = vadd.f32 %v7416_v59, %v1256_v24  ;;  %v5119_v7 = vld [vmem:[#allocation2 + $0x218] sm:$0xff]  ;;  %s8798_s25 = sld [smem:[#allocation9 + $0x89]] }
 0x1fc   : > { %2475 = vrot.lane.b32.xlu0 %v12567_v18, %s5323_s13  ;;  %v8087_v28 = vsel %vm1525_vm1, %v12569_v4, %v12568_v63  ;;  %v8097_v13 = vmul.f32 %v5119_v7, %v2823_v52  ;;  %v2847_v18 = vstv %s8013_s30  ;;  %v1326_v63 = vadd.f32 %v7416_v59, %v7973_v48  ;;  %v12573_v4 = vld [vmem:[#allocation32_spill] sm:$0xff]  ;;  %v5120_v48 = vld [vmem:[#allocation2 + $0x200] sm:$0xff]  ;;  %v12678_v60 = vld [vmem:[#allocation125_spill] sm:$0xff]  ;;  %s8805_s30 = sld [smem:[#allocation9 + $0x8a]] }
 0x1fd   : > { %12570 = vst [vmem:[#allocation96_spill] sm:$0xff] %v8087_v28  ;;  %v8109_v56 = vsel %vm1525_vm1, %v11948_v8, %v11947_v30  ;;  %v1348_v61 = vadd.f32 %v12573_v4, %v1279_v16  ;;  %v1349_v15 = vadd.f32 %v12573_v4, %v1280_v34  ;;  %v12574_v28 = vld [vmem:[#allocation101_spill] sm:$0xff]  ;;  %v12575_v59 = vrot.slane %v7432_v9, 1  ;;  %v12577_v8 = vld [vmem:[#allocation103_spill] sm:$0xff]  ;;  %v12581_v9 = vld [vmem:[#allocation104_spill] sm:$0xff] }
 0x1fe   : > { %12571 = vst [vmem:[#allocation93_spill] sm:$0xff] %v8097_v13  ;;  %12572 = vst [vmem:[#allocation130_spill] sm:$0xff] %v8109_v56  ;;  %v1346_v6 = vadd.f32 %v12574_v28, %v7986_v46  ;;  %v8120_v31 = vmul.f32 %v5120_v48, %v2823_v52  ;;  %v1347_v30 = vadd.f32 %v12574_v28, %v1278_v10  ;;  %v12578_v16 = vld [vmem:[#allocation41_spill] sm:$0xff]  ;;  %v8137_v27 = vpop.permute.xlu1 %2063  ;;  %v8139_v10 = vpop.permute.xlu0 %2043 }
 0x1ff   : > { %2499 = vrot.lane.b32.xlu1 %v12575_v59, %s5323_s13  ;;  %v8124_v24 = vadd.f32 %v12577_v8, %v1300_v37  ;;  %v8128_v34 = vmul.f32 %v5120_v48, %v2847_v18  ;;  %v8130_v4 = vmul.f32 %v5119_v7, %v2847_v18  ;;  %v8133_v46 = vadd.f32 %v12577_v8, %v1301_v51 }
 0x200   : > { %12576 = vst [vmem:[#allocation32_spill] sm:$0xff] %v8120_v31  ;;  %2497 = vrot.lane.b32.xlu0 %v12578_v16, %s5323_s13  ;;  %v1350_v59 = vadd.f32 %v12581_v9, %v1281_v53  ;;  %v1351_v52 = vadd.f32 %v12581_v9, %v1282_v32  ;;  %v8143_v28 = vadd.f32 %v7578_v38, %v1304_v17  ;;  %v12582_v18 = vrot.slane %v8063_v45, 1 }
 0x201   : > { %12579 = vst [vmem:[#allocation101_spill] sm:$0xff] %v8128_v34  ;;  %12580 = vst [vmem:[#allocation103_spill] sm:$0xff] %v8130_v4  ;;  %v8146_v16 = vadd.f32 %v7578_v38, %v1305_v62  ;;  %v12583_v51 = vrot.slane %v8061_v29, 1  ;;  %v2871_v32 = vstv %s8065_s6  ;;  %v1371_v8 = vadd.f32 %v7580_v11, %v1302_v25  ;;  %v8191_v25 = vld [vmem:[#allocation2 + $0x50] sm:$0x1]  ;;  %s8858_s6 = sld [smem:[#allocation9 + $0x8b]] }
 0x202   : > { %v1372_v9 = vadd.f32 %v7580_v11, %v1303_v26  ;;  %v8161_v38 = vmul.f32 %v5119_v7, %v2871_v32  ;;  %v1392_v62 = vadd.f32 %v7617_v12, %v1323_v39  ;;  %v8173_v37 = vpop.permute.xlu1 %2067  ;;  %v8175_v7 = vpop.permute.xlu0 %2065  ;;  %v12588_v17 = vrot.slane %v8097_v13, 1 }
 0x203   : > { %v8153_v53 = vsel %vm1525_vm1, %v12583_v51, %v12582_v18  ;;  %2521 = vrot.lane.b32.xlu1 %v7624_v3, %s5323_s13  ;;  %v1393_v18 = vadd.f32 %v7617_v12, %v1324_v14  ;;  %v12586_v51 = vrot.slane %v7522_v49, 1  ;;  %v12587_v3 = vld [vmem:[#allocation43_spill] sm:$0xff]  ;;  %v12589_v39 = vrot.slane %v8120_v31, 1  ;;  %v8186_v49 = vld [vmem:[#allocation2 + $0x20] sm:$0xfe] }
 0x204   : > { %12584 = vst [vmem:[#allocation41_spill] sm:$0xff] %v8153_v53  ;;  %12585 = vst [vmem:[#allocation104_spill] sm:$0xff] %v8161_v38  ;;  %v1394_v26 = vadd.f32 %v12587_v3, %v1325_v58  ;;  %v8184_v14 = vmul.f32 %v5120_v48, %v2871_v32  ;;  %v3580_v11 = vstv %s8100_s11  ;;  %v1395_v58 = vadd.f32 %v12587_v3, %v1326_v63  ;;  %v12593_v63 = vld [vmem:[#allocation106_spill] sm:$0xff]  ;;  %v12660_v53 = vld [vmem:[#allocation65_spill] sm:$0xff]  ;;  %s8893_s11 = sld [smem:[#allocation9 + $0x8c]] }
 0x205   : > { %2519 = vrot.lane.b32.xlu0 %v12586_v51, %s5323_s13  ;;  %v8182_v12 = vsel %vm1525_vm1, %v12589_v39, %v12588_v17  ;;  %v8188_v51 = vld [vmem:[#allocation2 + $0x38] sm:$0xff]  ;;  %v1415_v45 = vadd.f32 %v7688_v44, %v1346_v6  ;;  %v1461_v13 = vadd.f32 %v7840_v42, %v1392_v62  ;;  %v1462_v31 = vadd.f32 %v7840_v42, %v1393_v18 }
 0x206   : > { %12590 = vst [vmem:[#allocation43_spill] sm:$0xff] %v8182_v12  ;;  %12591 = vst [vmem:[#allocation131_spill] sm:$0xff] %v8184_v14  ;;  %v1416_v17 = vadd.f32 %v7688_v44, %v1347_v30  ;;  %v1396_v48 = vadd.f32 %v7690_v47, %v8077_v33  ;;  %v1397_v32 = vadd.f32 %v7690_v47, %v1328_v40  ;;  %v12592_v39 = vrot.slane %v7634_v21, 1  ;;  %v8223_v3 = vpop.permute.xlu1 %2089  ;;  %v12600_v12 = vld [vmem:[#allocation31_spill] sm:$0xff] }
 0x207   : > { %v12594_v6 = vrot.slane %v12593_v63, 1  ;;  %v12595_v62 = vrot.slane %v8130_v4, 1  ;;  %v12596_v42 = vrot.slane %v8128_v34, 1  ;;  %v8216_v30 = vmul.f32 %v3580_v11, %v8186_v49 }
 0x208   : > { %2543 = vrot.lane.b32.xlu1 %v12592_v39, %s5323_s13  ;;  %v3582_v47 = vmul.f32 %v3580_v11, %v8188_v51  ;;  %v3583_v21 = vmul.f32 %v3580_v11, %v8191_v25  ;;  %v1419_v33 = vadd.f32 %v7734_v5, %v1350_v59  ;;  %v1420_v40 = vadd.f32 %v7734_v5, %v1351_v52  ;;  %v8225_v39 = vpop.permute.xlu0 %2087 }
 0x209   : > { %2523 = vrot.lane.b32.xlu0 %v12594_v6, %s5323_s13  ;;  %v8213_v44 = vsel %vm1525_vm1, %v12596_v42, %v12595_v62  ;;  %12598 = vst [vmem:[#allocation132_spill] sm:$0xff] %v8216_v30  ;;  %v1417_v18 = vadd.f32 %v7736_v23, %v1348_v61  ;;  %v11956_v63 = vrot.slane %v8184_v14, 1  ;;  %v1418_v6 = vadd.f32 %v7736_v23, %v1349_v15  ;;  %v12599_v62 = vld [vmem:[#allocation74_spill] sm:$0xff]  ;;  %v12602_v61 = vld [vmem:[#allocation116_spill] sm:$0xff] }
 0x20a   : > { %12597 = vst [vmem:[#allocation106_spill] sm:$0xff] %v8213_v44  ;;  %v1538_v42 = vadd.f32 %v12599_v62, %v1461_v13  ;;  %v12601_v4 = vrot.slane %v12600_v12, 1  ;;  %v1440_v59 = vadd.f32 %v7792_v20, %v1371_v8  ;;  %v1463_v5 = vadd.f32 %v7895_v57, %v1394_v26  ;;  %v12606_v13 = vld [vmem:[#allocation78_spill] sm:$0xff] }
 0x20b   : > { %v12603_v52 = vrot.slane %v12602_v61, 1  ;;  %v12604_v11 = vrot.slane %v8161_v38, 1  ;;  %v8245_v15 = vstv %s8163_s7  ;;  %v3588_v8 = vrot.slane %v3582_v47, 2  ;;  %v12607_v61 = vld [vmem:[#allocation71_spill] sm:$0xff]  ;;  %v12608_v38 = vld [vmem:[#allocation54_spill] sm:$0xff]  ;;  %v12610_v47 = vld [vmem:[#allocation72_spill] sm:$0xff] }
 0x20c   : > { %v1539_v34 = vadd.f32 %v12601_v4, %v1462_v31  ;;  %v1464_v31 = vadd.f32 %v7895_v57, %v1395_v58  ;;  %v3590_v26 = vrot.slane %v3583_v21, 2  ;;  %v1441_v12 = vadd.f32 %v7792_v20, %v1372_v9  ;;  %v12609_v58 = vld [vmem:[#allocation79_spill] sm:$0xff]  ;;  %s8943_s7 = sld [smem:[#allocation9 + $0x8d]] }
 0x20d   : > { %2547 = vrot.lane.b32.xlu1 %v12603_v52, %s5323_s13  ;;  %v8242_v23 = vsel %vm1525_vm1, %v11956_v63, %v12604_v11  ;;  %2545 = vrot.lane.b32.xlu0 %v12606_v13, %s5323_s13  ;;  %v1438_v52 = vadd.f32 %v12607_v61, %v8124_v24  ;;  %v1465_v14 = vadd.f32 %v12608_v38, %v1396_v48  ;;  %v8256_v63 = vpop.permute.xlu1 %2111  ;;  %v12611_v21 = vrot.slane %v12610_v47, 1  ;;  %v12612_v24 = vld [vmem:[#allocation77_spill] sm:$0xff] }
 0x20e   : > { %12605 = vst [vmem:[#allocation74_spill] sm:$0xff] %v8242_v23  ;;  %v1466_v11 = vadd.f32 %v12608_v38, %v1397_v32  ;;  %v8258_v23 = vpop.permute.xlu0 %2091  ;;  %v1439_v57 = vadd.f32 %v12607_v61, %v8133_v46  ;;  %v1624_v13 = vadd.f32 %v12609_v58, %v1538_v42  ;;  %v8267_v20 = vmul.f32 %v8245_v15, %v8186_v49  ;;  %v12613_v46 = vld [vmem:[#allocation124_spill] sm:$0xff]  ;;  %v12614_v42 = vld [vmem:[#allocation62_spill] sm:$0xff]  ;;  %v12615_v47 = vld [vmem:[#allocation117_spill] sm:$0xff] }
 0x20f   : > { %v1625_v4 = vadd.f32 %v12611_v21, %v1539_v34  ;;  %v1442_v9 = vadd.f32 %v12612_v24, %v8143_v28  ;;  %v1443_v38 = vadd.f32 %v12612_v24, %v8146_v16  ;;  %v1540_v48 = vadd.f32 %v12599_v62, %v1463_v5  ;;  %v12620_v5 = vld [vmem:[#allocation69_spill] sm:$0xff] }
 0x210   : > { %v1484_v32 = vadd.f32 %v7947_v1, %v1415_v45  ;;  %v1541_v61 = vadd.f32 %v12614_v42, %v1464_v31  ;;  %v1485_v34 = vadd.f32 %v7947_v1, %v1416_v17  ;;  %v12616_v21 = vrot.slane %v12615_v47, 1  ;;  %v12622_v47 = vld [vmem:[#allocation18_spill] sm:$0xff] }
 0x211   : > { %2569 = vrot.lane.b32.xlu1 %v12613_v46, %s5323_s13  ;;  %v12617_v28 = vrot.slane %v8216_v30, 2  ;;  %v8288_v16 = vsel %vm2914_vm2, %v3588_v8, %v3590_v26  ;;  %v1542_v45 = vadd.f32 %v12599_v62, %v1465_v14  ;;  %v12621_v24 = vrot.slane %v12620_v5, 1  ;;  %v8295_v17 = vpop.permute.xlu1 %2115  ;;  %v12625_v26 = vld [vmem:[#allocation63_spill] sm:$0xff] }
 0x212   : > { %2567 = vrot.lane.b32.xlu0 %v12616_v21, %s5323_s13  ;;  %12619 = vst [vmem:[#allocation116_spill] sm:$0xff] %v8288_v16  ;;  %v1486_v31 = vadd.f32 %v7945_v50, %v1417_v18  ;;  %v1487_v1 = vadd.f32 %v7945_v50, %v1418_v6  ;;  %v8297_v42 = vpop.permute.xlu0 %2113  ;;  %v1710_v21 = vadd.f32 %v12622_v47, %v1624_v13  ;;  %v12626_v50 = vrot.slane %v7800_v19, 1  ;;  %v12627_v13 = vld [vmem:[#allocation51_spill] sm:$0xff]  ;;  %v12634_v16 = vld [vmem:[#allocation88_spill] sm:$0xff] }
 0x213   : > { %v8285_v44 = vsel %vm2914_vm2, %v12617_v28, %v3588_v8  ;;  %v1543_v46 = vadd.f32 %v12621_v24, %v1466_v11  ;;  %v12623_v28 = vld [vmem:[#allocation80_spill] sm:$0xff]  ;;  %v1488_v8 = vadd.f32 %v8009_v54, %v1419_v33  ;;  %v1626_v62 = vadd.f32 %v12609_v58, %v1540_v48 }
 0x214   : > { %12618 = vst [vmem:[#allocation31_spill] sm:$0xff] %v8285_v44  ;;  %v12624_v30 = vrot.slane %v12623_v28, 1  ;;  %v1566_v11 = vadd.f32 %v12625_v26, %v1484_v32  ;;  %v1489_v18 = vadd.f32 %v8009_v54, %v1420_v40  ;;  %v8312_v6 = vmul.f32 %v8245_v15, %v8188_v51  ;;  %v12630_v32 = vld [vmem:[#allocation118_spill] sm:$0xff]  ;;  %v12632_v40 = vld [vmem:[#allocation76_spill] sm:$0xff] }
 0x215   : > { %2591 = vrot.lane.b32.xlu1 %v12626_v50, %s5323_s13  ;;  %v1507_v24 = vadd.f32 %v8007_v0, %v1438_v52  ;;  %v1508_v48 = vadd.f32 %v8007_v0, %v1439_v57  ;;  %v12631_v54 = vrot.slane %v12630_v32, 1  ;;  %v1628_v19 = vadd.f32 %v12609_v58, %v1542_v45  ;;  %v12635_v45 = vld [vmem:[#allocation84_spill] sm:$0xff] }
 0x216   : > { %v1711_v44 = vadd.f32 %v12624_v30, %v1625_v4  ;;  %v1627_v30 = vadd.f32 %v12627_v13, %v1541_v61  ;;  %v12628_v4 = vld [vmem:[#allocation82_spill] sm:$0xff]  ;;  %v12633_v28 = vrot.slane %v12632_v40, 1  ;;  %v1568_v14 = vadd.f32 %v12625_v26, %v1486_v31  ;;  %v8327_v13 = vpop.permute.xlu1 %2137 }
 0x217   : > { %v12629_v33 = vrot.slane %v12628_v4, 1  ;;  %2571 = vrot.lane.b32.xlu0 %v12631_v54, %s5323_s13  ;;  %v1569_v61 = vadd.f32 %v12634_v16, %v1487_v1  ;;  %v1570_v52 = vadd.f32 %v12625_v26, %v1488_v8  ;;  %v1511_v0 = vadd.f32 %v8047_v2, %v1442_v9  ;;  %v12638_v1 = vld [vmem:[#allocation119_spill] sm:$0xff]  ;;  %v12640_v8 = vld [vmem:[#allocation85_spill] sm:$0xff] }
 0x218   : > { %v1629_v50 = vadd.f32 %v12633_v28, %v1543_v46  ;;  %v1512_v57 = vadd.f32 %v8047_v2, %v1443_v38  ;;  %v1509_v4 = vadd.f32 %v8049_v22, %v1440_v59  ;;  %v1712_v58 = vadd.f32 %v12622_v47, %v1626_v62  ;;  %v12641_v9 = vld [vmem:[#allocation39_spill] sm:$0xff]  ;;  %v12643_v38 = vld [vmem:[#allocation92_spill] sm:$0xff] }
 0x219   : > { %v1567_v5 = vadd.f32 %v12629_v33, %v1485_v34  ;;  %v8329_v34 = vpop.permute.xlu0 %2135  ;;  %v1652_v46 = vadd.f32 %v12635_v45, %v1566_v11  ;;  %v12636_v33 = vld [vmem:[#allocation83_spill] sm:$0xff]  ;;  %v1510_v16 = vadd.f32 %v8049_v22, %v1441_v12  ;;  %v12639_v54 = vrot.slane %v12638_v1, 1  ;;  %v12646_v11 = vld [vmem:[#allocation38_spill] sm:$0xff] }
 0x21a   : > { %v12637_v31 = vrot.slane %v12636_v33, 1  ;;  %v1713_v26 = vadd.f32 %v12640_v8, %v1627_v30  ;;  %v12642_v40 = vrot.slane %v12641_v9, 1  ;;  %v1594_v59 = vadd.f32 %v12643_v38, %v1507_v24  ;;  %v12644_v28 = vld [vmem:[#allocation27_spill] sm:$0xff]  ;;  %v12647_v22 = vld [vmem:[#allocation34_spill] sm:$0xff]  ;;  %v12650_v8 = vld [vmem:[#allocation21_spill] sm:$0xff] }
 0x21b   : > { %2595 = vrot.lane.b32.xlu1 %v12639_v54, %s5323_s13  ;;  %v12645_v62 = vrot.slane %v12644_v28, 1  ;;  %2593 = vrot.lane.b32.xlu0 %v12646_v11, %s5323_s13  ;;  %v12648_v12 = vrot.slane %v12647_v22, 1  ;;  %v12649_v1 = vld [vmem:[#allocation58_spill] sm:$0xff]  ;;  %v8356_v54 = vpop.permute.xlu1 %2159  ;;  %v1656_v24 = vadd.f32 %v12635_v45, %v1570_v52  ;;  %v12651_v9 = vrot.slane %v12650_v8, 1  ;;  %v12655_v11 = vld [vmem:[#allocation20_spill] sm:$0xff] }
 0x21c   : > { %v1571_v32 = vadd.f32 %v12637_v31, %v1489_v18  ;;  %v1653_v2 = vadd.f32 %v12642_v40, %v1567_v5  ;;  %v1714_v18 = vadd.f32 %v12622_v47, %v1628_v19  ;;  %v1654_v31 = vadd.f32 %v12635_v45, %v1568_v14  ;;  %v12652_v19 = vld [vmem:[#allocation56_spill] sm:$0xff]  ;;  %v12656_v22 = vld [vmem:[#allocation26_spill] sm:$0xff] }
 0x21d   : > { %v1595_v29 = vadd.f32 %v12645_v62, %v1508_v48  ;;  %v1715_v33 = vadd.f32 %v12648_v12, %v1629_v50  ;;  %v1655_v30 = vadd.f32 %v12649_v1, %v1569_v61  ;;  %v8358_v5 = vpop.permute.xlu0 %2139  ;;  %v1598_v48 = vadd.f32 %v12643_v38, %v1511_v0  ;;  %v12653_v50 = vld [vmem:[#allocation40_spill] sm:$0xff]  ;;  %v12657_v1 = vld [vmem:[#allocation55_spill] sm:$0xff]  ;;  %v12658_v52 = vld [vmem:[#allocation86_spill] sm:$0xff] }
 0x21e   : > { %v1599_v40 = vadd.f32 %v12651_v9, %v1512_v57  ;;  %v1596_v47 = vadd.f32 %v12643_v38, %v1509_v4  ;;  %v1738_v28 = vadd.f32 %v12652_v19, %v1652_v46  ;;  %v12654_v62 = vrot.slane %v12653_v50, 1  ;;  %v12661_v57 = vld [vmem:[#allocation61_spill] sm:$0xff]  ;;  %v12663_v38 = vld [vmem:[#allocation67_spill] sm:$0xff] }
 0x21f   : > { %v1597_v61 = vadd.f32 %v12655_v11, %v1510_v16  ;;  %v1798_v12 = vadd.f32 %v12656_v22, %v1712_v58  ;;  %2617 = vrot.lane.b32.xlu1 %v12657_v1, %s5323_s13  ;;  %v12659_v45 = vrot.slane %v12658_v52, 1  ;;  %v1680_v8 = vadd.f32 %v12660_v53, %v1594_v59  ;;  %v12664_v50 = vld [vmem:[#allocation73_spill] sm:$0xff]  ;;  %v12666_v58 = vld [vmem:[#allocation60_spill] sm:$0xff] }
 0x220   : > { %v1657_v14 = vadd.f32 %v12654_v62, %v1571_v32  ;;  %v12662_v9 = vrot.slane %v12661_v57, 1  ;;  %v1799_v46 = vadd.f32 %v12663_v38, %v1713_v26  ;;  %v12665_v32 = vrot.slane %v12664_v50, 1  ;;  %v12667_v1 = vld [vmem:[#allocation24_spill] sm:$0xff]  ;;  %v12671_v57 = vld [vmem:[#allocation89_spill] sm:$0xff]  ;;  %v12673_v50 = vld [vmem:[#allocation87_spill] sm:$0xff] }
 0x221   : > { %v1739_v0 = vadd.f32 %v12659_v45, %v1653_v2  ;;  %v1740_v16 = vadd.f32 %v12652_v19, %v1654_v31  ;;  %v1741_v62 = vadd.f32 %v12666_v58, %v1655_v30  ;;  %v1796_v11 = vadd.f32 %v12656_v22, %v1710_v21  ;;  %v8386_v45 = vpop.permute.xlu1 %2163  ;;  %v8388_v59 = vpop.permute.xlu0 %2161  ;;  %v12675_v21 = vld [vmem:[#allocation97_spill] sm:$0xff] }
 0x222   : > { %v1681_v4 = vadd.f32 %v12662_v9, %v1595_v29  ;;  %2615 = vrot.lane.b32.xlu0 %v12665_v32, %s5323_s13  ;;  %v12668_v52 = vrot.slane %v12667_v1, 1  ;;  %12669 = vst [vmem:[#allocation78_spill] sm:$0xff] %v8386_v45  ;;  %12670 = vst [vmem:[#allocation71_spill] sm:$0xff] %v8388_v59  ;;  %v1742_v29 = vadd.f32 %v12652_v19, %v1656_v24  ;;  %v12672_v9 = vrot.slane %v12671_v57, 1  ;;  %v12676_v1 = vld [vmem:[#allocation99_spill] sm:$0xff]  ;;  %v12680_v24 = vld [vmem:[#allocation66_spill] sm:$0xff] }
 0x223   : > { %v1684_v26 = vadd.f32 %v12660_v53, %v1598_v48  ;;  %v1682_v31 = vadd.f32 %v12660_v53, %v1596_v47  ;;  %v12674_v30 = vrot.slane %v12673_v50, 1  ;;  %v1683_v58 = vadd.f32 %v12675_v21, %v1597_v61  ;;  %v12681_v19 = vld [vmem:[#allocation68_spill] sm:$0xff]  ;;  %v12684_v47 = vld [vmem:[#allocation33_spill] sm:$0xff] }
 0x224   : > { %v1797_v2 = vadd.f32 %v12668_v52, %v1711_v44  ;;  %v1685_v38 = vadd.f32 %v12672_v9, %v1599_v40  ;;  %v1884_v44 = vadd.f32 %v12676_v1, %v1798_v12  ;;  %v12677_v52 = vld [vmem:[#allocation42_spill] sm:$0xff]  ;;  %v12679_v59 = vrot.slane %v12678_v60, 1  ;;  %v12683_v9 = vld [vmem:[#allocation29_spill] sm:$0xff]  ;;  %v12686_v61 = vld [vmem:[#allocation120_spill] sm:$0xff] }
 0x225   : > { %v1743_v32 = vadd.f32 %v12674_v30, %v1657_v14  ;;  %v1824_v56 = vadd.f32 %v12677_v52, %v1738_v28  ;;  %v1766_v48 = vadd.f32 %v12680_v24, %v1680_v8  ;;  %v12682_v57 = vrot.slane %v12681_v19, 1  ;;  %v12688_v12 = vld [vmem:[#allocation25_spill] sm:$0xff]  ;;  %v12690_v8 = vld [vmem:[#allocation19_spill] sm:$0xff] }
 0x226   : > { %2639 = vrot.lane.b32.xlu1 %v12679_v59, %s5323_s13  ;;  %v1885_v53 = vadd.f32 %v12683_v9, %v1799_v46  ;;  %v12685_v50 = vrot.slane %v12684_v47, 1  ;;  %v12687_v30 = vrot.slane %v12686_v61, 1  ;;  %v1882_v28 = vadd.f32 %v12676_v1, %v1796_v11  ;;  %v8420_v46 = vpop.permute.xlu0 %2183  ;;  %v12695_v61 = vld [vmem:[#allocation98_spill] sm:$0xff] }
 0x227   : > { %v1767_v40 = vadd.f32 %v12682_v57, %v1681_v4  ;;  %v12689_v21 = vrot.slane %v12688_v12, 1  ;;  %v1800_v59 = vadd.f32 %v12656_v22, %v1714_v18  ;;  %v12691_v45 = vrot.slane %v12690_v8, 1  ;;  %v8418_v4 = vpop.permute.xlu1 %2185  ;;  %12692 = vst [vmem:[#allocation54_spill] sm:$0xff] %v8420_v46  ;;  %v12693_v57 = vld [vmem:[#allocation90_spill] sm:$0xff]  ;;  %v12697_v22 = vld [vmem:[#allocation36_spill] sm:$0xff]  ;;  %v12700_v8 = vld [vmem:[#allocation121_spill] sm:$0xff] }
 0x228   : > { %v1825_v14 = vadd.f32 %v12685_v50, %v1739_v0  ;;  %2619 = vrot.lane.b32.xlu0 %v12687_v30, %s5323_s13  ;;  %v1770_v0 = vadd.f32 %v12680_v24, %v1684_v26  ;;  %v12694_v9 = vrot.slane %v12693_v57, 1  ;;  %v1768_v50 = vadd.f32 %v12680_v24, %v1682_v31  ;;  %v12696_v30 = vld [vmem:[#allocation100_spill] sm:$0xff]  ;;  %v12702_v26 = vld [vmem:[#allocation105_spill] sm:$0xff] }
 0x229   : > { %v1883_v60 = vadd.f32 %v12689_v21, %v1797_v2  ;;  %v1801_v19 = vadd.f32 %v12691_v45, %v1715_v33  ;;  %v1828_v11 = vadd.f32 %v12677_v52, %v1742_v29  ;;  %v1769_v2 = vadd.f32 %v12695_v61, %v1683_v58  ;;  %v12698_v33 = vld [vmem:[#allocation107_spill] sm:$0xff]  ;;  %v12705_v24 = vld [vmem:[#allocation44_spill] sm:$0xff] }
 0x22a   : > { %v1771_v47 = vadd.f32 %v12694_v9, %v1685_v38  ;;  %v1970_v18 = vadd.f32 %v12696_v30, %v1884_v44  ;;  %v1910_v12 = vadd.f32 %v12697_v22, %v1824_v56  ;;  %v12699_v45 = vrot.slane %v12698_v33, 1  ;;  %v12703_v38 = vld [vmem:[#allocation102_spill] sm:$0xff]  ;;  %v12706_v44 = vld [vmem:[#allocation28_spill] sm:$0xff] }
 0x22b   : > { %v12701_v46 = vrot.slane %v12700_v8, 1  ;;  %v1971_v57 = vadd.f32 %v12702_v26, %v1885_v53  ;;  %v12704_v9 = vrot.slane %v12703_v38, 1  ;;  %v1826_v29 = vadd.f32 %v12677_v52, %v1740_v16  ;;  %v8448_v8 = vpop.permute.xlu1 %2207  ;;  %v12710_v52 = vld [vmem:[#allocation45_spill] sm:$0xff] }
 0x22c   : > { %v1829_v21 = vadd.f32 %v12699_v45, %v1743_v32  ;;  %v1827_v58 = vadd.f32 %v12705_v24, %v1741_v62  ;;  %2641 = vrot.lane.b32.xlu0 %v7954_v36, %s5323_s13  ;;  %v1968_v56 = vadd.f32 %v12696_v30, %v1882_v28  ;;  %v12707_v32 = vrot.slane %v12706_v44, 1  ;;  %v12715_v44 = vld [vmem:[#allocation128_spill] sm:$0xff] }
 0x22d   : > { %2643 = vrot.lane.b32.xlu1 %v12701_v46, %s5323_s13  ;;  %v1911_v31 = vadd.f32 %v12704_v9, %v1825_v14  ;;  %v1886_v33 = vadd.f32 %v12676_v1, %v1800_v59  ;;  %v12708_v46 = vld [vmem:[#allocation95_spill] sm:$0xff]  ;;  %v8450_v14 = vpop.permute.xlu0 %2187  ;;  %v8453_v16 = vadd.f32 %v8093_v41, %v1970_v18  ;;  %v8456_v62 = vadd.f32 %v8093_v41, %v1971_v57  ;;  %v12712_v1 = vld [vmem:[#allocation109_spill] sm:$0xff]  ;;  %v12716_v18 = vld [vmem:[#allocation108_spill] sm:$0xff] }
 0x22e   : > { %v1969_v61 = vadd.f32 %v12707_v32, %v1883_v60  ;;  %v12709_v45 = vrot.slane %v12708_v46, 1  ;;  %v1914_v36 = vadd.f32 %v12697_v22, %v1828_v11  ;;  %v1854_v28 = vadd.f32 %v12710_v52, %v1768_v50  ;;  %v12711_v60 = vld [vmem:[#allocation110_spill] sm:$0xff]  ;;  %v12718_v11 = vld [vmem:[#allocation37_spill] sm:$0xff] }
 0x22f   : > { %v1996_v26 = vadd.f32 %v12711_v60, %v1910_v12  ;;  %v12713_v59 = vrot.slane %v12712_v1, 1  ;;  %v1852_v24 = vadd.f32 %v12710_v52, %v1766_v48  ;;  %v12717_v32 = vrot.slane %v12716_v18, 1  ;;  %v12719_v50 = vld [vmem:[#allocation49_spill] sm:$0xff]  ;;  %v12721_v1 = vld [vmem:[#allocation122_spill] sm:$0xff]  ;;  %v8481_v18 = vpop.permute.xlu1 %2211 }
 0x230   : > { %v1887_v53 = vadd.f32 %v12709_v45, %v1801_v19  ;;  %v12714_v19 = vld [vmem:[#allocation70_spill] sm:$0xff]  ;;  %v1912_v57 = vadd.f32 %v12697_v22, %v1826_v29  ;;  %v1913_v46 = vadd.f32 %v12718_v11, %v1827_v58  ;;  %v12720_v45 = vrot.slane %v12719_v50, 1 }
 0x231   : > { %v1915_v38 = vadd.f32 %v12713_v59, %v1829_v21  ;;  %v1855_v9 = vadd.f32 %v12714_v19, %v1769_v2  ;;  %2665 = vrot.lane.b32.xlu1 %v12715_v44, %s5323_s13  ;;  %v1997_v41 = vadd.f32 %v12717_v32, %v1911_v31  ;;  %v12722_v21 = vrot.slane %v12721_v1, 1  ;;  %v12723_v19 = vld [vmem:[#allocation30_spill] sm:$0xff]  ;;  %v8483_v22 = vpop.permute.xlu0 %2209 }
 0x232   : > { %v1853_v12 = vadd.f32 %v12720_v45, %v1767_v40  ;;  %v2048_v2 = vadd.f32 %v8095_v43, %v1968_v56  ;;  %v2049_v48 = vadd.f32 %v8095_v43, %v1969_v61  ;;  %v1972_v59 = vadd.f32 %v12696_v30, %v1886_v33  ;;  %v12725_v43 = vld [vmem:[#allocation114_spill] sm:$0xff]  ;;  %v12726_v30 = vld [vmem:[#allocation47_spill] sm:$0xff]  ;;  %v12729_v45 = vld [vmem:[#allocation81_spill] sm:$0xff] }
 0x233   : > { %2663 = vrot.lane.b32.xlu0 %v12722_v21, %s5323_s13  ;;  %v12724_v44 = vrot.slane %v12723_v19, 1  ;;  %v8488_v40 = vadd.f32 %v8137_v27, %v1996_v26  ;;  %v8491_v29 = vadd.f32 %v8137_v27, %v1997_v41  ;;  %v2000_v58 = vadd.f32 %v12711_v60, %v1914_v36  ;;  %v12731_v36 = vld [vmem:[#allocation112_spill] sm:$0xff] }
 0x234   : > { %v1940_v56 = vadd.f32 %v12725_v43, %v1854_v28  ;;  %v12727_v61 = vrot.slane %v12726_v30, 1  ;;  %v1938_v11 = vadd.f32 %v12725_v43, %v1852_v24  ;;  %v1856_v50 = vadd.f32 %v12710_v52, %v1770_v0  ;;  %v12732_v28 = vld [vmem:[#allocation50_spill] sm:$0xff]  ;;  %v12736_v24 = vld [vmem:[#allocation123_spill] sm:$0xff] }
 0x235   : > { %v1973_v31 = vadd.f32 %v12724_v44, %v1887_v53  ;;  %v12728_v53 = vld [vmem:[#allocation46_spill] sm:$0xff]  ;;  %v12730_v26 = vrot.slane %v12729_v45, 1  ;;  %v1998_v27 = vadd.f32 %v12711_v60, %v1912_v57  ;;  %v1999_v41 = vadd.f32 %v12731_v36, %v1913_v46  ;;  %v8522_v57 = vpop.permute.xlu1 %2233  ;;  %v8524_v46 = vpop.permute.xlu0 %2231  ;;  %v12740_v45 = vld [vmem:[#allocation75_spill] sm:$0xff] }
 0x236   : > { %v2001_v33 = vadd.f32 %v12727_v61, %v1915_v38  ;;  %v1941_v32 = vadd.f32 %v12728_v53, %v1855_v9  ;;  %v12733_v1 = vrot.slane %v12732_v28, 1  ;;  %v12734_v38 = vld [vmem:[#allocation48_spill] sm:$0xff]  ;;  %v12737_v44 = vrot.slane %v12736_v24, 1  ;;  %v12738_v61 = vld [vmem:[#allocation53_spill] sm:$0xff] }
 0x237   : > { %2687 = vrot.lane.b32.xlu1 %v12730_v26, %s5323_s13  ;;  %v12735_v19 = vrot.slane %v12734_v38, 1  ;;  %v2052_v0 = vadd.f32 %v8139_v10, %v1972_v59  ;;  %v2053_v52 = vadd.f32 %v8139_v10, %v1973_v31  ;;  %v8517_v30 = vadd.f32 %v8173_v37, %v2000_v58  ;;  %v12739_v31 = vld [vmem:[#allocation52_spill] sm:$0xff] }
 0x238   : > { %v1939_v21 = vadd.f32 %v12733_v1, %v1853_v12  ;;  %2667 = vrot.lane.b32.xlu0 %v12737_v44, %s5323_s13  ;;  %v8520_v60 = vadd.f32 %v8173_v37, %v2001_v33  ;;  %v2075_v12 = vadd.f32 %v8175_v7, %v1999_v41  ;;  %v2026_v59 = vadd.f32 %v12738_v61, %v1940_v56 }
 0x239   : > { %v1857_v9 = vadd.f32 %v12735_v19, %v1771_v47  ;;  %v2074_v47 = vadd.f32 %v8175_v7, %v1998_v27  ;;  %v3611_v10 = vmul.f32 %v8245_v15, %v8191_v25  ;;  %v2027_v58 = vadd.f32 %v12739_v31, %v1941_v32  ;;  %v12742_v7 = vld [vmem:[#allocation115_spill] sm:$0xff]  ;;  %v8559_v1 = vpop.permute.xlu1 %2255  ;;  %v8573_v19 = vld [vmem:[#allocation2 + $0x98] sm:$0xff]  ;;  %v12751_v31 = vld [vmem:[#allocation126_spill] sm:$0xff] }
 0x23a   : > { %v2024_v37 = vadd.f32 %v12738_v61, %v1938_v11  ;;  %v8536_v33 = vadd.f32 %v8256_v63, %v2048_v2  ;;  %v1942_v53 = vadd.f32 %v12725_v43, %v1856_v50  ;;  %v12741_v26 = vrot.slane %v12740_v45, 1  ;;  %v12744_v15 = vld [vmem:[#allocation111_spill] sm:$0xff]  ;;  %v12746_v11 = vld [vmem:[#allocation64_spill] sm:$0xff] }
 0x23b   : > { %v12743_v27 = vrot.slane %v12742_v7, 1  ;;  %v8545_v36 = vadd.f32 %v8256_v63, %v2049_v48  ;;  %v12745_v41 = vrot.slane %v12744_v15, 1  ;;  %v3616_v2 = vrot.slane %v8312_v6, 2  ;;  %v8561_v63 = vpop.permute.xlu0 %2235 }
 0x23c   : > { %2691 = vrot.lane.b32.xlu1 %v12741_v26, %s5323_s13  ;;  %2689 = vrot.lane.b32.xlu0 %v12746_v11, %s5323_s13  ;;  %v8553_v43 = vadd.f32 %v8223_v3, %v2026_v59  ;;  %v8556_v50 = vadd.f32 %v8223_v3, %v2027_v58  ;;  %v2096_v28 = vadd.f32 %v8225_v39, %v2024_v37  ;;  %v3636_v48 = vstv %s8485_s29  ;;  %v12749_v59 = vld [vmem:[#allocation113_spill] sm:$0xff]  ;;  %s9003_s29 = sld [smem:[#allocation9 + $0x6c]] }
 0x23d   : > { %v2025_v56 = vadd.f32 %v12743_v27, %v1939_v21  ;;  %v1943_v32 = vadd.f32 %v12745_v41, %v1857_v9  ;;  %v8568_v6 = vadd.f32 %v8295_v17, %v2052_v0  ;;  %v8571_v38 = vadd.f32 %v8295_v17, %v2053_v52  ;;  %v8575_v9 = vld [vmem:[#allocation2 + $0xb0] sm:$0x1]  ;;  %v12748_v0 = vld [vmem:[#allocation59_spill] sm:$0xff]  ;;  %v8588_v17 = vld [vmem:[#allocation2 + $0x80] sm:$0xfe] }
 0x23e   : > { %v3618_v3 = vrot.slane %v3611_v10, 2  ;;  %12747 = vst [vmem:[#allocation79_spill] sm:$0xff] %v8575_v9  ;;  %v2028_v24 = vadd.f32 %v12738_v61, %v1942_v53  ;;  %v8580_v44 = vadd.f32 %v8297_v42, %v8453_v16  ;;  %v3664_v52 = vstv %s8503_s14  ;;  %v8607_v53 = vpop.permute.xlu1 %2259  ;;  %s9017_s14 = sld [smem:[#allocation9 + $0x6f]] }
 0x23f   : > { %v2097_v21 = vadd.f32 %v8225_v39, %v2025_v56  ;;  %v8584_v39 = vadd.f32 %v8297_v42, %v8456_v62  ;;  %v12750_v10 = vrot.slane %v12749_v59, 1  ;;  %v12752_v16 = vrot.slane %v12751_v31, 1  ;;  %v8609_v45 = vpop.permute.xlu0 %2257 }
 0x240   : > { %2713 = vrot.lane.b32.xlu1 %v12748_v0, %s5323_s13  ;;  %v12753_v58 = vrot.slane %v8267_v20, 2  ;;  %v8604_v62 = vmul.f32 %v3636_v48, %v8186_v49  ;;  %v3638_v37 = vmul.f32 %v3636_v48, %v8188_v51  ;;  %v3639_v26 = vmul.f32 %v3636_v48, %v8191_v25 }
 0x241   : > { %v2029_v61 = vadd.f32 %v12750_v10, %v1943_v32  ;;  %2711 = vrot.lane.b32.xlu0 %v12752_v16, %s5323_s13  ;;  %v3666_v7 = vmul.f32 %v3664_v52, %v8573_v19  ;;  %v3667_v27 = vmul.f32 %v3664_v52, %v8575_v9  ;;  %v3692_v56 = vstv %s8526_s12  ;;  %s9034_s12 = sld [smem:[#allocation9 + $0x8e]] }
 0x242   : > { %v8601_v42 = vsel %vm2914_vm2, %v12753_v58, %v3616_v2  ;;  %12755 = vst [vmem:[#allocation77_spill] sm:$0xff] %v8604_v62  ;;  %v2100_v15 = vadd.f32 %v8258_v23, %v2028_v24  ;;  %v8618_v32 = vsel %vm2914_vm2, %v3616_v2, %v3618_v3  ;;  %v8621_v51 = vmul.f32 %v3664_v52, %v8588_v17 }
 0x243   : > { %12754 = vst [vmem:[#allocation72_spill] sm:$0xff] %v8601_v42  ;;  %v2101_v41 = vadd.f32 %v8258_v23, %v2029_v61  ;;  %12756 = vst [vmem:[#allocation124_spill] sm:$0xff] %v8618_v32  ;;  %v8624_v11 = vadd.f32 %v8327_v13, %v2074_v47  ;;  %v8627_v25 = vadd.f32 %v8327_v13, %v2075_v12  ;;  %v12758_v2 = vrot.slane %v7982_v55, 1  ;;  %v12759_v47 = vld [vmem:[#allocation127_spill] sm:$0xff] }
 0x244   : > { %12757 = vst [vmem:[#allocation62_spill] sm:$0xff] %v8621_v51  ;;  %v8631_v48 = vadd.f32 %v8329_v34, %v8488_v40  ;;  %v8635_v23 = vadd.f32 %v8329_v34, %v8491_v29  ;;  %v12760_v3 = vrot.slane %v12759_v47, 1  ;;  %v11963_v13 = vrot.slane %v8604_v62, 2  ;;  %v8650_v34 = vpop.permute.xlu1 %2281  ;;  %v8652_v29 = vpop.permute.xlu0 %2279 }
 0x245   : > { %2735 = vrot.lane.b32.xlu1 %v12758_v2, %s5323_s13  ;;  %v3644_v12 = vrot.slane %v3638_v37, 2  ;;  %v8647_v40 = vmul.f32 %v3692_v56, %v8588_v17  ;;  %v3694_v24 = vmul.f32 %v3692_v56, %v8573_v19  ;;  %v3646_v55 = vrot.slane %v3639_v26, 2 }
 0x246   : > { %2715 = vrot.lane.b32.xlu0 %v12760_v3, %s5323_s13  ;;  %v3672_v0 = vrot.slane %v3666_v7, 2  ;;  %v3674_v52 = vrot.slane %v3667_v27, 2  ;;  %v3720_v59 = vstv %s8564_s10  ;;  %v8658_v10 = vadd.f32 %v8356_v54, %v2096_v28  ;;  %v12764_v27 = vld [vmem:[#allocation22_spill] sm:$0xff]  ;;  %s9060_s10 = sld [smem:[#allocation9 + $0x72]] }
 0x247   : > { %12761 = vst [vmem:[#allocation117_spill] sm:$0xff] %v8647_v40  ;;  %v8661_v61 = vadd.f32 %v8356_v54, %v2097_v21  ;;  %v11964_v31 = vrot.slane %v8621_v51, 2  ;;  %v3695_v16 = vmul.f32 %v3692_v56, %v8575_v9  ;;  %v8667_v58 = vadd.f32 %v8358_v5, %v8517_v30  ;;  %v8677_v54 = vld [vmem:[#allocation2 + $0xe0] sm:$0xfe]  ;;  %v8679_v21 = vld [vmem:[#allocation2 + $0xf8] sm:$0xff] }
 0x248   : > { %v8671_v37 = vadd.f32 %v8358_v5, %v8520_v60  ;;  %v12762_v26 = vrot.slane %v7963_v35, 1  ;;  %v3722_v28 = vmul.f32 %v3720_v59, %v8573_v19  ;;  %12763 = vst [vmem:[#allocation69_spill] sm:$0xff] %v8679_v21  ;;  %v3748_v7 = vstv %s8591_s26  ;;  %v8689_v35 = vpop.permute.xlu1 %2303  ;;  %v8691_v2 = vpop.permute.xlu0 %2283  ;;  %s9263_s26 = sld [smem:[#allocation9 + $0x8f]] }
 0x249   : > { %v3700_v56 = vrot.slane %v3694_v24, 2  ;;  %v8686_v5 = vmul.f32 %v3720_v59, %v8588_v17  ;;  %v3723_v60 = vmul.f32 %v3720_v59, %v8575_v9  ;;  %v8696_v47 = vsel %vm2914_vm2, %v11963_v13, %v3644_v12 }
 0x24a   : > { %2739 = vrot.lane.b32.xlu1 %v12762_v26, %s5323_s13  ;;  %2737 = vrot.lane.b32.xlu0 %v12764_v27, %s5323_s13  ;;  %12766 = vst [vmem:[#allocation80_spill] sm:$0xff] %v8696_v47  ;;  %v8699_v3 = vsel %vm2914_vm2, %v3644_v12, %v3646_v55  ;;  %v8702_v24 = vsel %vm2914_vm2, %v3672_v0, %v3674_v52  ;;  %v12770_v26 = vld [vmem:[#allocation78_spill] sm:$0xff]  ;;  %v3702_v30 = vrot.slane %v3695_v16, 2  ;;  %v8718_v55 = vld [vmem:[#allocation2 + $0x110] sm:$0x1]  ;;  %v3776_v16 = vstv %s8640_s23  ;;  %s9293_s23 = sld [smem:[#allocation9 + $0x6d]] }
 0x24b   : > { %12765 = vst [vmem:[#allocation18_spill] sm:$0xff] %v8686_v5  ;;  %12767 = vst [vmem:[#allocation63_spill] sm:$0xff] %v8699_v3  ;;  %v8707_v59 = vsel %vm2914_vm2, %v11964_v31, %v3672_v0  ;;  %v8712_v27 = vadd.f32 %v12770_v26, %v2100_v15  ;;  %v8715_v13 = vmul.f32 %v3748_v7, %v8677_v54  ;;  %v12774_v31 = vld [vmem:[#allocation96_spill] sm:$0xff]  ;;  %v3728_v15 = vrot.slane %v3722_v28, 2  ;;  %v12775_v3 = vld [vmem:[#allocation57_spill] sm:$0xff] }
 0x24c   : > { %12768 = vst [vmem:[#allocation51_spill] sm:$0xff] %v8702_v24  ;;  %12769 = vst [vmem:[#allocation82_spill] sm:$0xff] %v8707_v59  ;;  %v3750_v12 = vmul.f32 %v3748_v7, %v8679_v21  ;;  %v8721_v52 = vadd.f32 %v12770_v26, %v2101_v41  ;;  %v12773_v24 = vld [vmem:[#allocation71_spill] sm:$0xff]  ;;  %v12776_v41 = vrot.slane %v12775_v3, 1  ;;  %v12777_v26 = vrot.slane %v8647_v40, 2  ;;  %v8745_v28 = vpop.permute.xlu1 %2307  ;;  %v8747_v62 = vpop.permute.xlu0 %2305 }
 0x24d   : > { %12771 = vst [vmem:[#allocation118_spill] sm:$0xff] %v8715_v13  ;;  %12772 = vst [vmem:[#allocation76_spill] sm:$0xff] %v8718_v55  ;;  %v8725_v0 = vadd.f32 %v12773_v24, %v8553_v43  ;;  %v8734_v59 = vadd.f32 %v12773_v24, %v8556_v50  ;;  %v3751_v47 = vmul.f32 %v3748_v7, %v8718_v55  ;;  %v3804_v3 = vstv %s8655_s5  ;;  %s9323_s5 = sld [smem:[#allocation9 + $0x70]] }
 0x24e   : > { %2761 = vrot.lane.b32.xlu1 %v12774_v31, %s5323_s13  ;;  %2759 = vrot.lane.b32.xlu0 %v12776_v41, %s5323_s13  ;;  %v8742_v43 = vsel %vm2914_vm2, %v12777_v26, %v3700_v56  ;;  %v3730_v31 = vrot.slane %v3723_v60, 2  ;;  %v3778_v50 = vmul.f32 %v3776_v16, %v8679_v21  ;;  %v3779_v24 = vmul.f32 %v3776_v16, %v8718_v55 }
 0x24f   : > { %12778 = vst [vmem:[#allocation88_spill] sm:$0xff] %v8742_v43  ;;  %v8754_v41 = vsel %vm2914_vm2, %v3700_v56, %v3702_v30  ;;  %v3756_v40 = vrot.slane %v3750_v12, 2  ;;  %v8758_v51 = vmul.f32 %v3776_v16, %v8677_v54  ;;  %v8762_v60 = vadd.f32 %v8418_v4, %v8580_v44  ;;  %v12781_v43 = vld [vmem:[#allocation54_spill] sm:$0xff]  ;;  %v12782_v30 = vld [vmem:[#allocation91_spill] sm:$0xff]  ;;  %v8780_v44 = vld [vmem:[#allocation2 + $0x158] sm:$0xff] }
 0x250   : > { %12779 = vst [vmem:[#allocation84_spill] sm:$0xff] %v8754_v41  ;;  %v8766_v7 = vadd.f32 %v8418_v4, %v8584_v39  ;;  %v8770_v42 = vadd.f32 %v12781_v43, %v8536_v33  ;;  %v12783_v56 = vrot.slane %v12782_v30, 1  ;;  %v12784_v12 = vrot.slane %v8686_v5, 2  ;;  %12786 = vst [vmem:[#allocation85_spill] sm:$0xff] %v8780_v44  ;;  %v12787_v39 = vld [vmem:[#allocation23_spill] sm:$0xff] }
 0x251   : > { %12780 = vst [vmem:[#allocation83_spill] sm:$0xff] %v8758_v51  ;;  %v8784_v4 = vadd.f32 %v12781_v43, %v8545_v36  ;;  %v12788_v33 = vrot.slane %v12787_v39, 1  ;;  %v8790_v26 = vsel %vm2914_vm2, %v3728_v15, %v3730_v31  ;;  %v8793_v30 = vmul.f32 %v3804_v3, %v8677_v54  ;;  %v8802_v36 = vpop.permute.xlu0 %2327 }
 0x252   : > { %2783 = vrot.lane.b32.xlu1 %v12783_v56, %s5323_s13  ;;  %v8778_v16 = vsel %vm2914_vm2, %v12784_v12, %v3728_v15  ;;  %12789 = vst [vmem:[#allocation39_spill] sm:$0xff] %v8790_v26  ;;  %v3806_v56 = vmul.f32 %v3804_v3, %v8679_v21  ;;  %v8796_v12 = vld [vmem:[#allocation2 + $0x140] sm:$0xfe]  ;;  %v3758_v43 = vrot.slane %v3751_v47, 2  ;;  %v3784_v39 = vrot.slane %v3778_v50, 2 }
 0x253   : > { %12785 = vst [vmem:[#allocation119_spill] sm:$0xff] %v8778_v16  ;;  %2763 = vrot.lane.b32.xlu0 %v12788_v33, %s5323_s13  ;;  %12790 = vst [vmem:[#allocation92_spill] sm:$0xff] %v8793_v30  ;;  %v8800_v16 = vpop.permute.xlu1 %2329  ;;  %v3786_v33 = vrot.slane %v3779_v24, 2  ;;  %v3832_v41 = vstv %s8709_s20  ;;  %v12792_v15 = vrot.slane %v8715_v13, 2  ;;  %v3807_v5 = vmul.f32 %v3804_v3, %v8718_v55  ;;  %v3242_v21 = vld [vmem:[#allocation2 + $0x170] sm:$0x1] }
 0x254   : > { %12791 = vst [vmem:[#allocation27_spill] sm:$0xff] %v8796_v12  ;;  %v8815_v32 = vmul.f32 %v3832_v41, %v8780_v44  ;;  %v8819_v47 = vadd.f32 %v8448_v8, %v8631_v48  ;;  %v8823_v50 = vadd.f32 %v8448_v8, %v8635_v23  ;;  %v8827_v24 = vadd.f32 %v8450_v14, %v8568_v6  ;;  %v12796_v48 = vld [vmem:[#allocation130_spill] sm:$0xff]  ;;  %s9327_s20 = sld [smem:[#allocation9 + $0x73]] }
 0x255   : > { %v8810_v31 = vsel %vm2914_vm2, %v12792_v15, %v3756_v40  ;;  %v12794_v15 = vld [vmem:[#allocation35_spill] sm:$0xff]  ;;  %v3860_v3 = vstv %s8730_s22  ;;  %v8835_v13 = vadd.f32 %v8450_v14, %v8571_v38  ;;  %v3812_v8 = vrot.slane %v3806_v56, 2  ;;  %v8845_v55 = vpop.permute.xlu0 %2331  ;;  %s9469_s22 = sld [smem:[#allocation9 + $0x6e]] }
 0x256   : > { %12793 = vst [vmem:[#allocation38_spill] sm:$0xff] %v8810_v31  ;;  %v12795_v26 = vrot.slane %v12794_v15, 1  ;;  %v8841_v23 = vmul.f32 %v3832_v41, %v8796_v12  ;;  %v8851_v15 = vsel %vm2914_vm2, %v3784_v39, %v3786_v33  ;;  %v12800_v14 = vrot.slane %v8758_v51, 2 }
 0x257   : > { %2785 = vrot.lane.b32.xlu0 %v12796_v48, %s5323_s13  ;;  %v8843_v6 = vpop.permute.xlu1 %2351  ;;  %12799 = vst [vmem:[#allocation21_spill] sm:$0xff] %v8851_v15  ;;  %v3835_v56 = vmul.f32 %v3832_v41, %v3242_v21  ;;  %v3814_v48 = vrot.slane %v3807_v5, 2  ;;  %v3840_v31 = vrot.slane %v8815_v32, 2  ;;  %v8862_v9 = vmul.f32 %v3860_v3, %v8796_v12  ;;  %v12803_v5 = vld [vmem:[#allocation41_spill] sm:$0xff] }
 0x258   : > { %2787 = vrot.lane.b32.xlu1 %v12795_v26, %s5323_s13  ;;  %12797 = vst [vmem:[#allocation34_spill] sm:$0xff] %v8841_v23  ;;  %v8848_v26 = vsel %vm2914_vm2, %v3756_v40, %v3758_v43  ;;  %v8856_v38 = vsel %vm2914_vm2, %v12800_v14, %v3784_v39  ;;  %v3862_v40 = vmul.f32 %v3860_v3, %v8780_v44  ;;  %v12804_v39 = vld [vmem:[#allocation94_spill] sm:$0xff]  ;;  %v12806_v14 = vrot.slane %v8793_v30, 2  ;;  %v8902_v30 = vld [vmem:[#allocation2 + $0x1b8] sm:$0xff] }
 0x259   : > { %12798 = vst [vmem:[#allocation58_spill] sm:$0xff] %v8848_v26  ;;  %12801 = vst [vmem:[#allocation56_spill] sm:$0xff] %v8856_v38  ;;  %v8867_v43 = vadd.f32 %v8481_v18, %v8667_v58  ;;  %v8871_v33 = vadd.f32 %v8481_v18, %v8671_v37  ;;  %v8875_v41 = vadd.f32 %v8483_v22, %v8624_v11  ;;  %v12805_v58 = vrot.slane %v12804_v39, 1 }
 0x25a   : > { %12802 = vst [vmem:[#allocation40_spill] sm:$0xff] %v8862_v9  ;;  %v8879_v32 = vadd.f32 %v8483_v22, %v8627_v25  ;;  %v8889_v18 = vsel %vm2914_vm2, %v12806_v14, %v3812_v8  ;;  %v11979_v11 = vrot.slane %v8841_v23, 2  ;;  %v3888_v37 = vstv %s8798_s25  ;;  %v8897_v25 = vpop.permute.xlu0 %2353  ;;  %12809 = vst [vmem:[#allocation55_spill] sm:$0xff] %v8902_v30  ;;  %s9489_s25 = sld [smem:[#allocation9 + $0x71]] }
 0x25b   : > { %2807 = vrot.lane.b32.xlu0 %v12805_v58, %s5323_s13  ;;  %12807 = vst [vmem:[#allocation20_spill] sm:$0xff] %v8889_v18  ;;  %v3863_v38 = vmul.f32 %v3860_v3, %v3242_v21  ;;  %v8895_v22 = vpop.permute.xlu1 %2355  ;;  %v3890_v15 = vmul.f32 %v3888_v37, %v8780_v44  ;;  %v3891_v39 = vmul.f32 %v3888_v37, %v3242_v21  ;;  %v8900_v58 = vld [vmem:[#allocation2 + $0x1a0] sm:$0xfe]  ;;  %v3916_v14 = vstv %s8805_s30  ;;  %s9533_s30 = sld [smem:[#allocation9 + $0x74]] }
 0x25c   : > { %2809 = vrot.lane.b32.xlu1 %v12803_v5, %s5323_s13  ;;  %v3842_v5 = vrot.slane %v3835_v56, 2  ;;  %12808 = vst [vmem:[#allocation26_spill] sm:$0xff] %v8900_v58  ;;  %v8906_v18 = vsel %vm2914_vm2, %v3812_v8, %v3814_v48  ;;  %v8911_v3 = vsel %vm2914_vm2, %v11979_v11, %v3840_v31  ;;  %v3868_v51 = vrot.slane %v3862_v40, 2  ;;  %v3356_v56 = vld [vmem:[#allocation2 + $0x1d0] sm:$0x1] }
 0x25d   : > { %12810 = vst [vmem:[#allocation86_spill] sm:$0xff] %v8906_v18  ;;  %12811 = vst [vmem:[#allocation65_spill] sm:$0xff] %v8911_v3  ;;  %v8916_v21 = vadd.f32 %v8522_v57, %v8725_v0  ;;  %v8920_v44 = vadd.f32 %v8522_v57, %v8734_v59  ;;  %v8924_v8 = vadd.f32 %v8524_v46, %v8658_v10  ;;  %v12812_v48 = vld [vmem:[#allocation32_spill] sm:$0xff]  ;;  %v12815_v0 = vld [vmem:[#allocation129_spill] sm:$0xff]  ;;  %v3870_v57 = vrot.slane %v3863_v38, 2 }
 0x25e   : > { %v12813_v11 = vrot.slane %v12812_v48, 1  ;;  %v8930_v40 = vmul.f32 %v3888_v37, %v8796_v12  ;;  %v8934_v26 = vadd.f32 %v8524_v46, %v8661_v61  ;;  %v12816_v3 = vrot.slane %v12815_v0, 1  ;;  %v8947_v37 = vpop.permute.xlu0 %2375 }
 0x25f   : > { %v8940_v59 = vmul.f32 %v3916_v14, %v8900_v58  ;;  %v3918_v10 = vmul.f32 %v3916_v14, %v8902_v30  ;;  %v3896_v48 = vrot.slane %v3890_v15, 2  ;;  %v3898_v12 = vrot.slane %v3891_v39, 2 }
 0x260   : > { %2831 = vrot.lane.b32.xlu1 %v12813_v11, %s5323_s13  ;;  %12814 = vst [vmem:[#allocation61_spill] sm:$0xff] %v8930_v40  ;;  %2811 = vrot.lane.b32.xlu0 %v12816_v3, %s5323_s13  ;;  %v8945_v11 = vpop.permute.xlu1 %2377  ;;  %v3944_v46 = vstv %s8858_s6  ;;  %v3919_v61 = vmul.f32 %v3916_v14, %v3356_v56  ;;  %v8951_v0 = vsel %vm2914_vm2, %v3840_v31, %v3842_v5  ;;  %v12820_v38 = vrot.slane %v8862_v9, 2  ;;  %v12822_v5 = vld [vmem:[#allocation93_spill] sm:$0xff]  ;;  %v12824_v9 = vld [vmem:[#allocation43_spill] sm:$0xff]  ;;  %s9598_s6 = sld [smem:[#allocation9 + $0x90]] }
 0x261   : > { %12817 = vst [vmem:[#allocation67_spill] sm:$0xff] %v8940_v59  ;;  %12818 = vst [vmem:[#allocation73_spill] sm:$0xff] %v8945_v11  ;;  %v3946_v18 = vmul.f32 %v3944_v46, %v8902_v30  ;;  %v3947_v23 = vmul.f32 %v3944_v46, %v3356_v56  ;;  %v8961_v11 = vadd.f32 %v8559_v1, %v8770_v42  ;;  %v12823_v39 = vrot.slane %v12822_v5, 1 }
 0x262   : > { %12819 = vst [vmem:[#allocation60_spill] sm:$0xff] %v8951_v0  ;;  %v8956_v3 = vsel %vm2914_vm2, %v12820_v38, %v3868_v51  ;;  %v8965_v15 = vadd.f32 %v8559_v1, %v8784_v4  ;;  %v2244_v31 = vadd.f32 %v8561_v63, %v8712_v27  ;;  %v11984_v14 = vrot.slane %v8930_v40, 2  ;;  %v8981_v0 = vpop.permute.xlu0 %2379 }
 0x263   : > { %12821 = vst [vmem:[#allocation24_spill] sm:$0xff] %v8956_v3  ;;  %v2245_v38 = vadd.f32 %v8561_v63, %v8721_v52  ;;  %v11985_v42 = vrot.slane %v8940_v59, 2  ;;  %v3924_v3 = vrot.slane %v3918_v10, 2  ;;  %v3972_v1 = vstv %s8893_s11  ;;  %s9835_s11 = sld [smem:[#allocation9 + $0x91]] }
 0x264   : > { %2835 = vrot.lane.b32.xlu1 %v12823_v39, %s5323_s13  ;;  %2833 = vrot.lane.b32.xlu0 %v12824_v9, %s5323_s13  ;;  %v8979_v4 = vpop.permute.xlu1 %2399  ;;  %v8984_v27 = vsel %vm2914_vm2, %v3868_v51, %v3870_v57  ;;  %v8987_v5 = vsel %vm2914_vm2, %v3896_v48, %v3898_v12  ;;  %v8990_v39 = vmul.f32 %v3944_v46, %v8900_v58  ;;  %v3926_v63 = vrot.slane %v3919_v61, 2  ;;  %v9001_v57 = vld [vmem:[#allocation2 + $0x218] sm:$0xff]  ;;  %v12830_v46 = vld [vmem:[#allocation106_spill] sm:$0xff] }
 0x265   : > { %12825 = vst [vmem:[#allocation89_spill] sm:$0xff] %v8984_v27  ;;  %12826 = vst [vmem:[#allocation87_spill] sm:$0xff] %v8987_v5  ;;  %v8994_v9 = vadd.f32 %v8607_v53, %v8827_v24  ;;  %v8999_v52 = vsel %vm2914_vm2, %v11984_v14, %v3896_v48  ;;  %v3952_v10 = vrot.slane %v3946_v18, 2  ;;  %v3954_v51 = vrot.slane %v3947_v23, 2  ;;  %v12832_v48 = vld [vmem:[#allocation101_spill] sm:$0xff] }
 0x266   : > { %12827 = vst [vmem:[#allocation97_spill] sm:$0xff] %v8990_v39  ;;  %12828 = vst [vmem:[#allocation99_spill] sm:$0xff] %v8999_v52  ;;  %v9007_v12 = vadd.f32 %v8607_v53, %v8835_v13  ;;  %v2266_v24 = vadd.f32 %v8609_v45, %v8762_v60  ;;  %v9014_v61 = vmul.f32 %v3972_v1, %v8900_v58  ;;  %v12833_v53 = vrot.slane %v12832_v48, 1  ;;  %v9029_v60 = vld [vmem:[#allocation2 + $0x200] sm:$0xfe]  ;;  %v9042_v48 = vpop.permute.xlu0 %2401  ;;  %v9208_v5 = vld [vmem:[#allocation2 + $0x38] sm:$0xff] }
 0x267   : > { %12829 = vst [vmem:[#allocation42_spill] sm:$0xff] %v9001_v57  ;;  %v3974_v18 = vmul.f32 %v3972_v1, %v8902_v30  ;;  %v2267_v23 = vadd.f32 %v8609_v45, %v8766_v7  ;;  %v9027_v13 = vsel %vm2914_vm2, %v11985_v42, %v3924_v3  ;;  %12835 = vst [vmem:[#allocation68_spill] sm:$0xff] %v9029_v60  ;;  %v9032_v52 = vld [vmem:[#allocation2 + $0x230] sm:$0x1] }
 0x268   : > { %2857 = vrot.lane.b32.xlu1 %v12830_v46, %s5323_s13  ;;  %12831 = vst [vmem:[#allocation125_spill] sm:$0xff] %v9014_v61  ;;  %2855 = vrot.lane.b32.xlu0 %v12833_v53, %s5323_s13  ;;  %12834 = vst [vmem:[#allocation66_spill] sm:$0xff] %v9027_v13  ;;  %v4000_v46 = vstv %s8943_s7  ;;  %v3975_v14 = vmul.f32 %v3972_v1, %v3356_v56  ;;  %v9038_v45 = vadd.f32 %v8650_v34, %v8875_v41  ;;  %v9040_v7 = vpop.permute.xlu1 %2403  ;;  %s9875_s7 = sld [smem:[#allocation9 + $0x75]] }
 0x269   : > { %12836 = vst [vmem:[#allocation29_spill] sm:$0xff] %v9032_v52  ;;  %v9046_v42 = vsel %vm2914_vm2, %v3924_v3, %v3926_v63  ;;  %v4002_v59 = vmul.f32 %v4000_v46, %v9001_v57  ;;  %v9051_v56 = vadd.f32 %v8650_v34, %v8879_v32  ;;  %v2288_v1 = vadd.f32 %v8652_v29, %v8819_v47  ;;  %v12839_v3 = vld [vmem:[#allocation131_spill] sm:$0xff] }
 0x26a   : > { %12837 = vst [vmem:[#allocation33_spill] sm:$0xff] %v9046_v42  ;;  %v2289_v41 = vadd.f32 %v8652_v29, %v8823_v50  ;;  %v9058_v13 = vsel %vm2914_vm2, %v3952_v10, %v3954_v51  ;;  %v12840_v63 = vrot.slane %v12839_v3, 1  ;;  %v11987_v53 = vrot.slane %v9014_v61, 2  ;;  %v12842_v32 = vld [vmem:[#allocation103_spill] sm:$0xff] }
 0x26b   : > { %12838 = vst [vmem:[#allocation120_spill] sm:$0xff] %v9058_v13  ;;  %v3980_v42 = vrot.slane %v3974_v18, 2  ;;  %v9067_v34 = vmul.f32 %v4000_v46, %v9029_v60  ;;  %v4003_v47 = vmul.f32 %v4000_v46, %v9032_v52  ;;  %v9072_v29 = vadd.f32 %v8689_v35, %v8924_v8 }
 0x26c   : > { %2879 = vrot.lane.b32.xlu1 %v12840_v63, %s5323_s13  ;;  %v9076_v50 = vadd.f32 %v8689_v35, %v8934_v26  ;;  %v12843_v51 = vrot.slane %v12842_v32, 1  ;;  %v12844_v18 = vrot.slane %v8990_v39, 2  ;;  %v3982_v63 = vrot.slane %v3975_v14, 2  ;;  %v9097_v26 = vpop.permute.xlu1 %2425  ;;  %v9099_v32 = vpop.permute.xlu0 %2423 }
 0x26d   : > { %12841 = vst [vmem:[#allocation25_spill] sm:$0xff] %v9067_v34  ;;  %v9088_v46 = vadd.f32 %v8691_v2, %v8867_v43  ;;  %v9092_v8 = vadd.f32 %v8691_v2, %v8871_v33  ;;  %v9095_v35 = vadd.f32 %v8745_v28, %v2244_v31  ;;  %v9102_v14 = vadd.f32 %v8745_v28, %v2245_v38  ;;  %v9112_v33 = vld [vmem:[#allocation2 + $0x18] sm:$0xfe] }
 0x26e   : > { %2859 = vrot.lane.b32.xlu0 %v12843_v51, %s5323_s13  ;;  %v9084_v3 = vsel %vm2914_vm2, %v12844_v18, %v3952_v10  ;;  %v4008_v51 = vrot.slane %v4002_v59, 2  ;;  %v9106_v43 = vadd.f32 %v8747_v62, %v8916_v21  ;;  %v9110_v2 = vadd.f32 %v8747_v62, %v8920_v44  ;;  %v12846_v10 = vld [vmem:[#allocation104_spill] sm:$0xff]  ;;  %v9124_v38 = vld [vmem:[#allocation2 + $0x78] sm:$0xfe] }
 0x26f   : > { %12845 = vst [vmem:[#allocation19_spill] sm:$0xff] %v9084_v3  ;;  %v2901_v31 = vstv %s9003_s29  ;;  %v12847_v18 = vrot.slane %v12846_v10, 1  ;;  %v9121_v28 = vsel %vm2914_vm2, %v11987_v53, %v3980_v42  ;;  %v4010_v21 = vrot.slane %v4003_v47, 2  ;;  %v12849_v10 = vld [vmem:[#allocation74_spill] sm:$0xff]  ;;  %s9908_s29 = sld [smem:[#allocation9 + $0x78]] }
 0x270   : > { %12848 = vst [vmem:[#allocation90_spill] sm:$0xff] %v9121_v28  ;;  %v3016_v3 = vstv %s9017_s14  ;;  %v9128_v62 = vadd.f32 %v8800_v16, %v2266_v24  ;;  %v9131_v44 = vadd.f32 %v8800_v16, %v2267_v23  ;;  %v9139_v53 = vstv %s9034_s12  ;;  %v9149_v24 = vpop.permute.xlu1 %2447  ;;  %v9151_v16 = vpop.permute.xlu0 %2427  ;;  %v9190_v28 = vld [vmem:[#allocation2 + $0x8] sm:$0xff]  ;;  %s9925_s14 = sld [smem:[#allocation9 + $0x7b]]  ;;  %s10053_s12 = sld [smem:[#allocation9 + $0x76]] }
 0x271   : > { %2883 = vrot.lane.b32.xlu1 %v12847_v18, %s5323_s13  ;;  %v9136_v18 = vsel %vm2914_vm2, %v3980_v42, %v3982_v63  ;;  %v9143_v47 = vadd.f32 %v8802_v36, %v8961_v11  ;;  %v9147_v59 = vadd.f32 %v8802_v36, %v8965_v15  ;;  %12851 = vst [vmem:[#allocation100_spill] sm:$0xff] %v9151_v16  ;;  %v12852_v23 = vrot.slane %v9067_v34, 2  ;;  %v9170_v15 = vld [vmem:[#allocation2 + $0xd8] sm:$0xfe]  ;;  %v9175_v34 = vld [vmem:[#allocation2 + $0x48] sm:$0x1] }
 0x272   : > { %2881 = vrot.lane.b32.xlu0 %v12849_v10, %s5323_s13  ;;  %12850 = vst [vmem:[#allocation98_spill] sm:$0xff] %v9136_v18  ;;  %v9159_v42 = vmul.f32 %v2901_v31, %v9112_v33  ;;  %v9162_v63 = vmul.f32 %v2901_v31, %v8186_v49  ;;  %v9165_v11 = vmul.f32 %v3016_v3, %v9124_v38  ;;  %v9173_v18 = vstv %s9060_s10  ;;  %v9275_v16 = vld [vmem:[#allocation2 + $0x108] sm:$0x1]  ;;  %s10073_s10 = sld [smem:[#allocation9 + $0x79]] }
 0x273   : > { %v9156_v10 = vsel %vm2914_vm2, %v12852_v23, %v4008_v51  ;;  %v9168_v36 = vmul.f32 %v3016_v3, %v8588_v17  ;;  %12858 = vst [vmem:[#allocation44_spill] sm:$0xff] %v9175_v34  ;;  %v12859_v23 = vld [vmem:[#allocation31_spill] sm:$0xff]  ;;  %v9184_v49 = vmul.f32 %v9139_v53, %v9029_v60  ;;  %v9188_v61 = vmul.f32 %v9139_v53, %v9001_v57 }
 0x274   : > { %12853 = vst [vmem:[#allocation36_spill] sm:$0xff] %v9156_v10  ;;  %12854 = vst [vmem:[#allocation107_spill] sm:$0xff] %v9159_v42  ;;  %v9180_v10 = vsel %vm2914_vm2, %v4008_v51, %v4010_v21  ;;  %v9193_v13 = vmul.f32 %v9190_v28, %v2901_v31  ;;  %v9196_v39 = vadd.f32 %v8843_v6, %v2288_v1  ;;  %v12862_v21 = vld [vmem:[#allocation132_spill] sm:$0xff]  ;;  %v9217_v58 = vpop.permute.xlu1 %2451 }
 0x275   : > { %12855 = vst [vmem:[#allocation121_spill] sm:$0xff] %v9162_v63  ;;  %12856 = vst [vmem:[#allocation105_spill] sm:$0xff] %v9165_v11  ;;  %3594 = vrot.lane.b32.xlu1 %v12859_v23, %s5322_s8  ;;  %v9199_v23 = vadd.f32 %v8843_v6, %v2289_v41  ;;  %v9203_v51 = vadd.f32 %v8845_v55, %v8994_v9  ;;  %v9211_v27 = vmul.f32 %v9208_v5, %v2901_v31  ;;  %v9224_v41 = vld [vmem:[#allocation2 + $0x50] sm:$0x1] }
 0x276   : > { %12857 = vst [vmem:[#allocation102_spill] sm:$0xff] %v9168_v36  ;;  %12860 = vst [vmem:[#allocation28_spill] sm:$0xff] %v9180_v10  ;;  %v12863_v10 = vrot.slane %v12862_v21, 2  ;;  %v9215_v1 = vadd.f32 %v8845_v55, %v9007_v12  ;;  %v9221_v6 = vmul.f32 %v9173_v18, %v9170_v15  ;;  %v2906_v9 = vmul.f32 %v2901_v31, %v9175_v34  ;;  %v9227_v21 = vpop.permute.xlu0 %2449 }
 0x277   : > { %12861 = vst [vmem:[#allocation95_spill] sm:$0xff] %v9184_v49  ;;  %12864 = vst [vmem:[#allocation45_spill] sm:$0xff] %v9217_v58  ;;  %v12868_v58 = vrot.slane %v8267_v20, 2  ;;  %v9238_v34 = vmul.f32 %v9173_v18, %v8677_v54  ;;  %v2917_v40 = vrot.slane %v9193_v13, 2  ;;  %v9247_v55 = vadd.f32 %v8895_v22, %v9088_v46  ;;  %v12873_v13 = vld [vmem:[#allocation116_spill] sm:$0xff] }
 0x278   : > { %3592 = vrot.lane.b32.xlu0 %v12863_v10, %s5322_s8  ;;  %12865 = vst [vmem:[#allocation110_spill] sm:$0xff] %v9221_v6  ;;  %12866 = vst [vmem:[#allocation109_spill] sm:$0xff] %v9224_v41  ;;  %v2907_v10 = vmul.f32 %v9224_v41, %v2901_v31  ;;  %v9251_v20 = vadd.f32 %v8895_v22, %v9092_v8  ;;  %v9259_v12 = vadd.f32 %v8897_v25, %v9051_v56  ;;  %v9265_v30 = vpop.permute.xlu1 %2473 }
 0x279   : > { %12867 = vst [vmem:[#allocation70_spill] sm:$0xff] %v9227_v21  ;;  %3620 = vrot.lane.b32.xlu1 %v12868_v58, %s5322_s8  ;;  %12869 = vst [vmem:[#allocation128_spill] sm:$0xff] %v9238_v34  ;;  %v9243_v21 = vld [vmem:[#allocation2 + $0xa8] sm:$0x1]  ;;  %v9255_v58 = vadd.f32 %v8897_v25, %v9038_v45  ;;  %v2919_v22 = vrot.slane %v9211_v27, 2  ;;  %v2921_v8 = vrot.slane %v2906_v9, 2  ;;  %v3019_v45 = vmul.f32 %v9190_v28, %v3016_v3 }
 0x27a   : > { %12870 = vst [vmem:[#allocation108_spill] sm:$0xff] %v9243_v21  ;;  %12871 = vst [vmem:[#allocation37_spill] sm:$0xff] %v9247_v55  ;;  %v2923_v31 = vrot.slane %v2907_v10, 2  ;;  %v9269_v41 = vpop.permute.xlu0 %2471  ;;  %v3020_v25 = vmul.f32 %v3016_v3, %v8573_v19  ;;  %v3021_v56 = vmul.f32 %v3016_v3, %v9243_v21  ;;  %v12878_v27 = vld [vmem:[#allocation124_spill] sm:$0xff]  ;;  %v12879_v10 = vrot.slane %v9188_v61, 2 }
 0x27b   : > { %12872 = vst [vmem:[#allocation49_spill] sm:$0xff] %v9251_v20  ;;  %12874 = vst [vmem:[#allocation122_spill] sm:$0xff] %v9265_v30  ;;  %v12876_v20 = vld [vmem:[#allocation79_spill] sm:$0xff]  ;;  %v12877_v30 = vld [vmem:[#allocation73_spill] sm:$0xff]  ;;  %v12880_v46 = vrot.slane %v9184_v49, 2  ;;  %v9305_v9 = vadd.f32 %v8947_v37, %v9076_v50 }
 0x27c   : > { %3596 = vrot.lane.b32.xlu0 %v12873_v13, %s5322_s8  ;;  %12875 = vst [vmem:[#allocation30_spill] sm:$0xff] %v9269_v41  ;;  %v3022_v13 = vmul.f32 %v3016_v3, %v12876_v20  ;;  %v9279_v55 = vadd.f32 %v12877_v30, %v9106_v43  ;;  %v3133_v3 = vmul.f32 %v9190_v28, %v9173_v18  ;;  %v3033_v21 = vrot.slane %v3020_v25, 2 }
 0x27d   : > { %3624 = vrot.lane.b32.xlu1 %v12878_v27, %s5322_s8  ;;  %v9289_v41 = vsel %vm2914_vm2, %v12880_v46, %v12879_v10  ;;  %v9297_v43 = vadd.f32 %v12877_v30, %v9110_v2  ;;  %v9301_v27 = vadd.f32 %v8947_v37, %v9072_v29  ;;  %v12883_v46 = vld [vmem:[#allocation72_spill] sm:$0xff]  ;;  %v12884_v10 = vld [vmem:[#allocation69_spill] sm:$0xff]  ;;  %v9314_v20 = vsel %vm2914_vm2, %v2917_v40, %v2921_v8 }
 0x27e   : > { %12881 = vst [vmem:[#allocation114_spill] sm:$0xff] %v9289_v41  ;;  %v3134_v49 = vmul.f32 %v9173_v18, %v12884_v10  ;;  %v9311_v41 = vpop.permute.xlu1 %2495  ;;  %12886 = vst [vmem:[#allocation81_spill] sm:$0xff] %v9314_v20  ;;  %v9317_v30 = vsel %vm2914_vm2, %v2919_v22, %v2923_v31  ;;  %v3135_v29 = vmul.f32 %v9173_v18, %v9275_v16  ;;  %v12888_v2 = vld [vmem:[#allocation76_spill] sm:$0xff]  ;;  %v9325_v50 = vpop.permute.xlu0 %2475  ;;  %v3145_v8 = vrot.slane %v3133_v3, 2 }
 0x27f   : > { %12882 = vst [vmem:[#allocation47_spill] sm:$0xff] %v9297_v43  ;;  %12885 = vst [vmem:[#allocation46_spill] sm:$0xff] %v9311_v41  ;;  %v3136_v37 = vmul.f32 %v9173_v18, %v12888_v2  ;;  %v3035_v41 = vrot.slane %v3021_v56, 2  ;;  %v3037_v43 = vrot.slane %v3022_v13, 2  ;;  %v12889_v31 = vld [vmem:[#allocation80_spill] sm:$0xff]  ;;  %v12892_v18 = vrot.slane %v9162_v63, 2 }
 0x280   : > { %3622 = vrot.lane.b32.xlu0 %v12883_v46, %s5322_s8  ;;  %12887 = vst [vmem:[#allocation112_spill] sm:$0xff] %v9317_v30  ;;  %v3031_v46 = vrot.slane %v3019_v45, 2  ;;  %v12890_v30 = vrot.slane %v9159_v42, 2  ;;  %v4031_v45 = vmul.f32 %v9139_v53, %v9032_v52  ;;  %v9345_v25 = vadd.f32 %v8979_v4, %v9143_v47  ;;  %v12894_v13 = vld [vmem:[#allocation77_spill] sm:$0xff] }
 0x281   : > { %3650 = vrot.lane.b32.xlu1 %v12889_v31, %s5322_s8  ;;  %v9339_v2 = vsel %vm2914_vm2, %v12892_v18, %v2919_v22  ;;  %v9349_v56 = vadd.f32 %v8979_v4, %v9147_v59  ;;  %v3147_v3 = vrot.slane %v3134_v49, 2  ;;  %v9359_v22 = vadd.f32 %v8981_v0, %v9095_v35 }
 0x282   : > { %v9334_v20 = vsel %vm2914_vm2, %v12890_v30, %v2917_v40  ;;  %12893 = vst [vmem:[#allocation48_spill] sm:$0xff] %v9339_v2  ;;  %v12895_v40 = vrot.slane %v12894_v13, 2  ;;  %v9355_v30 = vstv %s9263_s26  ;;  %v9363_v53 = vadd.f32 %v8981_v0, %v9102_v14  ;;  %v9365_v47 = vpop.permute.xlu1 %2499  ;;  %v9367_v31 = vpop.permute.xlu0 %2497  ;;  %s10121_s26 = sld [smem:[#allocation9 + $0x7c]] }
 0x283   : > { %12891 = vst [vmem:[#allocation50_spill] sm:$0xff] %v9334_v20  ;;  %v3149_v4 = vrot.slane %v3135_v29, 2  ;;  %v3151_v59 = vrot.slane %v3136_v37, 2  ;;  %v9370_v18 = vsel %vm2914_vm2, %v3031_v46, %v3035_v41  ;;  %v9373_v49 = vsel %vm2914_vm2, %v3033_v21, %v3037_v43  ;;  %v12902_v29 = vld [vmem:[#allocation62_spill] sm:$0xff] }
 0x284   : > { %3648 = vrot.lane.b32.xlu0 %v12895_v40, %s5322_s8  ;;  %12896 = vst [vmem:[#allocation123_spill] sm:$0xff] %v9370_v18  ;;  %12897 = vst [vmem:[#allocation53_spill] sm:$0xff] %v9373_v49  ;;  %v12898_v13 = vrot.slane %v9165_v11, 2  ;;  %v12900_v0 = vrot.slane %v9168_v36, 2  ;;  %v12903_v37 = vrot.slane %v12902_v29, 2  ;;  %v12904_v41 = vrot.slane %v9221_v6, 2 }
 0x285   : > { %v9395_v40 = vmul.f32 %v9355_v30, %v9029_v60  ;;  %v9410_v29 = vadd.f32 %v9042_v48, %v9128_v62  ;;  %v9429_v62 = vsel %vm2914_vm2, %v3147_v3, %v3151_v59  ;;  %v12915_v59 = vrot.slane %v9188_v61, 2  ;;  %v12921_v6 = vld [vmem:[#allocation88_spill] sm:$0xff]  ;;  %v12925_v36 = vld [vmem:[#allocation117_spill] sm:$0xff] }
 0x286   : > { %v9378_v35 = vsel %vm2914_vm2, %v12898_v13, %v3031_v46  ;;  %v9383_v14 = vsel %vm2914_vm2, %v12900_v0, %v3033_v21  ;;  %3676 = vrot.lane.b32.xlu1 %v12903_v37, %s5322_s8  ;;  %v9391_v43 = vsel %vm2914_vm2, %v12904_v41, %v3145_v8  ;;  %v4038_v46 = vrot.slane %v4031_v45, 2  ;;  %v12907_v37 = vld [vmem:[#allocation63_spill] sm:$0xff]  ;;  %12911 = vst [vmem:[#allocation113_spill] sm:$0xff] %v9429_v62  ;;  %v12924_v18 = vld [vmem:[#allocation100_spill] sm:$0xff] }
 0x287   : > { %12899 = vst [vmem:[#allocation52_spill] sm:$0xff] %v9378_v35  ;;  %12901 = vst [vmem:[#allocation75_spill] sm:$0xff] %v9383_v14  ;;  %v9398_v13 = vstv %s9293_s23  ;;  %v9402_v21 = vadd.f32 %v9040_v7, %v9203_v51  ;;  %v9406_v0 = vadd.f32 %v9040_v7, %v9215_v1  ;;  %v12908_v45 = vrot.slane %v9238_v34, 2  ;;  %s10184_s23 = sld [smem:[#allocation9 + $0x92]] }
 0x288   : > { %12905 = vst [vmem:[#allocation115_spill] sm:$0xff] %v9391_v43  ;;  %12906 = vst [vmem:[#allocation111_spill] sm:$0xff] %v9395_v40  ;;  %3652 = vrot.lane.b32.xlu0 %v12907_v37, %s5322_s8  ;;  %v9421_v51 = vadd.f32 %v9042_v48, %v9131_v44  ;;  %v9423_v43 = vpop.permute.xlu1 %2521  ;;  %v9426_v7 = vsel %vm2914_vm2, %v3145_v8, %v3149_v4  ;;  %v9432_v1 = vstv %s9323_s5  ;;  %v9434_v37 = vpop.permute.xlu0 %2519  ;;  %v9447_v44 = vstv %s9327_s20  ;;  %v12917_v4 = vld [vmem:[#allocation82_spill] sm:$0xff]  ;;  %s10434_s5 = sld [smem:[#allocation9 + $0x93]]  ;;  %s10480_s20 = sld [smem:[#allocation9 + $0x77]] }
 0x289   : > { %v9417_v41 = vsel %vm2914_vm2, %v12908_v45, %v3147_v3  ;;  %12910 = vst [vmem:[#allocation59_spill] sm:$0xff] %v9426_v7  ;;  %v9438_v45 = vmul.f32 %v9398_v13, %v9112_v33  ;;  %v9451_v8 = vmul.f32 %v9355_v30, %v9001_v57  ;;  %v12914_v3 = vld [vmem:[#allocation51_spill] sm:$0xff]  ;;  %v9459_v62 = vsel %vm2914_vm2, %v12915_v59, %v4038_v46 }
 0x28a   : > { %12909 = vst [vmem:[#allocation64_spill] sm:$0xff] %v9417_v41  ;;  %v9440_v41 = vld [vmem:[#allocation2 + $0x20] sm:$0xfe]  ;;  %3680 = vrot.lane.b32.xlu1 %v12914_v3, %s5322_s8  ;;  %12916 = vst [vmem:[#allocation22_spill] sm:$0xff] %v9459_v62  ;;  %v9463_v7 = vmul.f32 %v9190_v28, %v9398_v13  ;;  %v9467_v14 = vmul.f32 %v9208_v5, %v9398_v13  ;;  %v9473_v3 = vadd.f32 %v9097_v26, %v9255_v58 }
 0x28b   : > { %12912 = vst [vmem:[#allocation126_spill] sm:$0xff] %v9438_v45  ;;  %v9444_v48 = vmul.f32 %v9440_v41, %v9398_v13  ;;  %v9477_v61 = vadd.f32 %v9097_v26, %v9259_v12  ;;  %v9481_v46 = vadd.f32 %v9099_v32, %v9196_v39  ;;  %v9485_v59 = vadd.f32 %v9099_v32, %v9199_v23 }
 0x28c   : > { %3678 = vrot.lane.b32.xlu0 %v12917_v4, %s5322_s8  ;;  %v9491_v35 = vpop.permute.xlu1 %2543  ;;  %v9495_v58 = vmul.f32 %v9432_v1, %v9124_v38  ;;  %v9499_v26 = vmul.f32 %v9432_v1, %v8588_v17  ;;  %v9503_v39 = vmul.f32 %v9190_v28, %v9432_v1  ;;  %v9507_v32 = vmul.f32 %v9432_v1, %v8573_v19  ;;  %v9509_v23 = vpop.permute.xlu0 %2523  ;;  %v12923_v19 = vld [vmem:[#allocation37_spill] sm:$0xff] }
 0x28d   : > { %12913 = vst [vmem:[#allocation127_spill] sm:$0xff] %v9444_v48  ;;  %v9515_v49 = vmul.f32 %v9447_v44, %v9170_v15  ;;  %v9519_v34 = vmul.f32 %v9190_v28, %v9447_v44  ;;  %v9527_v12 = vmul.f32 %v9447_v44, %v8677_v54  ;;  %v9531_v4 = vmul.f32 %v9447_v44, %v12884_v10 }
 0x28e   : > { %12918 = vst [vmem:[#allocation78_spill] sm:$0xff] %v9495_v58  ;;  %12919 = vst [vmem:[#allocation71_spill] sm:$0xff] %v9499_v26  ;;  %3706 = vrot.lane.b32.xlu1 %v12921_v6, %s5322_s8  ;;  %v9537_v2 = vadd.f32 %v9149_v24, %v9301_v27  ;;  %v9541_v6 = vadd.f32 %v9149_v24, %v9305_v9  ;;  %v9545_v20 = vadd.f32 %v12924_v18, %v12923_v19  ;;  %v12927_v19 = vld [vmem:[#allocation49_spill] sm:$0xff]  ;;  %v12929_v27 = vld [vmem:[#allocation18_spill] sm:$0xff] }
 0x28f   : > { %12920 = vst [vmem:[#allocation96_spill] sm:$0xff] %v9515_v49  ;;  %12922 = vst [vmem:[#allocation57_spill] sm:$0xff] %v9527_v12  ;;  %v12926_v11 = vrot.slane %v12925_v36, 2  ;;  %v4059_v63 = vmul.f32 %v9355_v30, %v9032_v52  ;;  %v9560_v57 = vadd.f32 %v12924_v18, %v12927_v19  ;;  %v4064_v52 = vrot.slane %v9451_v8, 2  ;;  %v12934_v30 = vld [vmem:[#allocation45_spill] sm:$0xff]  ;;  %v12939_v19 = vld [vmem:[#allocation70_spill] sm:$0xff] }
 0x290   : > { %v9552_v42 = vpop.permute.xlu1 %2547  ;;  %v12930_v62 = vrot.slane %v12929_v27, 2  ;;  %v12931_v24 = vrot.slane %v9463_v7, 2  ;;  %v12932_v9 = vrot.slane %v9438_v45, 2  ;;  %v9580_v36 = vstv %s9469_s22  ;;  %v12935_v27 = vld [vmem:[#allocation84_spill] sm:$0xff]  ;;  %s10516_s22 = sld [smem:[#allocation9 + $0x7a]] }
 0x291   : > { %3704 = vrot.lane.b32.xlu0 %v12926_v11, %s5322_s8  ;;  %v9562_v11 = vpop.permute.xlu0 %2545  ;;  %v9584_v8 = vadd.f32 %v12934_v30, %v9359_v22  ;;  %v12937_v45 = vrot.slane %v9444_v48, 2  ;;  %v9596_v18 = vstv %s9489_s25  ;;  %v9602_v22 = vadd.f32 %v12934_v30, %v9363_v53  ;;  %v12947_v30 = vld [vmem:[#allocation47_spill] sm:$0xff]  ;;  %s10532_s25 = sld [smem:[#allocation9 + $0x7d]] }
 0x292   : > { %12928 = vst [vmem:[#allocation54_spill] sm:$0xff] %v9562_v11  ;;  %3732 = vrot.lane.b32.xlu1 %v12930_v62, %s5322_s8  ;;  %v9575_v60 = vsel %vm2914_vm2, %v12932_v9, %v12931_v24  ;;  %v12936_v62 = vrot.slane %v9467_v14, 2  ;;  %v4066_v9 = vrot.slane %v4059_v63, 2  ;;  %v12941_v48 = vrot.slane %v9503_v39, 2 }
 0x293   : > { %12933 = vst [vmem:[#allocation91_spill] sm:$0xff] %v9575_v60 }
 0x294   : > { %v9593_v24 = vsel %vm2914_vm2, %v12937_v45, %v12936_v62  ;;  %v9608_v60 = vpop.permute.xlu1 %2569  ;;  %v12942_v45 = vrot.slane %v9495_v58, 2  ;;  %v12944_v62 = vrot.slane %v9507_v32, 2  ;;  %v12950_v58 = vrot.slane %v9515_v49, 2 }
 0x295   : > { %3708 = vrot.lane.b32.xlu0 %v12935_v27, %s5322_s8  ;;  %12938 = vst [vmem:[#allocation23_spill] sm:$0xff] %v9593_v24  ;;  %v9606_v27 = vadd.f32 %v12939_v19, %v9279_v55  ;;  %12940 = vst [vmem:[#allocation35_spill] sm:$0xff] %v9608_v60  ;;  %v12945_v24 = vrot.slane %v9499_v26, 2  ;;  %v9626_v55 = vadd.f32 %v12939_v19, %v12947_v30  ;;  %v9628_v11 = vpop.permute.xlu0 %2567  ;;  %v12949_v60 = vrot.slane %v9519_v34, 2  ;;  %v12955_v19 = vld [vmem:[#allocation39_spill] sm:$0xff] }
 0x296   : > { %v9615_v63 = vsel %vm2914_vm2, %v12942_v45, %v12941_v48  ;;  %12948 = vst [vmem:[#allocation94_spill] sm:$0xff] %v9628_v11  ;;  %v12952_v45 = vrot.slane %v9395_v40, 2  ;;  %3736 = vrot.lane.b32.xlu1 %v12955_v19, %s5322_s8  ;;  %v12957_v30 = vrot.slane %v9527_v12, 2 }
 0x297   : > { %12943 = vst [vmem:[#allocation130_spill] sm:$0xff] %v9615_v63  ;;  %v9622_v53 = vsel %vm2914_vm2, %v12945_v24, %v12944_v62  ;;  %v9635_v48 = vsel %vm2914_vm2, %v12950_v58, %v12949_v60  ;;  %v9644_v24 = vmul.f32 %v9580_v36, %v9112_v33  ;;  %v12956_v62 = vrot.slane %v9531_v4, 2 }
 0x298   : > { %12946 = vst [vmem:[#allocation41_spill] sm:$0xff] %v9622_v53  ;;  %12951 = vst [vmem:[#allocation32_spill] sm:$0xff] %v9635_v48  ;;  %v9640_v26 = vsel %vm2914_vm2, %v12952_v45, %v4064_v52  ;;  %v9657_v60 = vmul.f32 %v9440_v41, %v9580_v36  ;;  %v9661_v58 = vmul.f32 %v9596_v18, %v9124_v38  ;;  %v9664_v33 = vstv %s9533_s30  ;;  %v12961_v45 = vld [vmem:[#allocation122_spill] sm:$0xff]  ;;  %v9685_v63 = vpop.permute.xlu1 %2591  ;;  %s10720_s30 = sld [smem:[#allocation9 + $0x94]] }
 0x299   : > { %12953 = vst [vmem:[#allocation129_spill] sm:$0xff] %v9640_v26  ;;  %12954 = vst [vmem:[#allocation93_spill] sm:$0xff] %v9644_v24  ;;  %v9653_v49 = vsel %vm2914_vm2, %v12957_v30, %v12956_v62  ;;  %v9668_v19 = vadd.f32 %v12961_v45, %v9410_v29  ;;  %v9672_v12 = vadd.f32 %v12961_v45, %v9421_v51  ;;  %v12964_v62 = vld [vmem:[#allocation119_spill] sm:$0xff]  ;;  %v12967_v48 = vld [vmem:[#allocation30_spill] sm:$0xff]  ;;  %v9699_v26 = vpop.permute.xlu0 %2571 }
 0x29a   : > { %12958 = vst [vmem:[#allocation43_spill] sm:$0xff] %v9653_v49  ;;  %12959 = vst [vmem:[#allocation106_spill] sm:$0xff] %v9657_v60  ;;  %3734 = vrot.lane.b32.xlu0 %v12964_v62, %s5322_s8  ;;  %v9677_v30 = vsel %vm2914_vm2, %v4064_v52, %v4066_v9  ;;  %v12966_v49 = vld [vmem:[#allocation44_spill] sm:$0xff]  ;;  %v9683_v53 = vadd.f32 %v12967_v48, %v9345_v25  ;;  %v9689_v29 = vmul.f32 %v9596_v18, %v8588_v17  ;;  %v12970_v51 = vld [vmem:[#allocation109_spill] sm:$0xff] }
 0x29b   : > { %12960 = vst [vmem:[#allocation101_spill] sm:$0xff] %v9661_v58  ;;  %12962 = vst [vmem:[#allocation131_spill] sm:$0xff] %v9668_v19  ;;  %v2943_v38 = vmul.f32 %v9398_v13, %v12966_v49  ;;  %v2944_v45 = vmul.f32 %v12970_v51, %v9398_v13  ;;  %v12971_v62 = vld [vmem:[#allocation108_spill] sm:$0xff]  ;;  %v9697_v9 = vadd.f32 %v12967_v48, %v9349_v56  ;;  %v12975_v13 = vld [vmem:[#allocation38_spill] sm:$0xff]  ;;  %v9730_v56 = vstv %s9598_s6  ;;  %s10870_s6 = sld [smem:[#allocation9 + $0x96]] }
 0x29c   : > { %12963 = vst [vmem:[#allocation103_spill] sm:$0xff] %v9672_v12  ;;  %12965 = vst [vmem:[#allocation104_spill] sm:$0xff] %v9677_v30  ;;  %v3057_v52 = vmul.f32 %v9432_v1, %v12971_v62  ;;  %v9704_v30 = vmul.f32 %v9664_v33, %v9170_v15  ;;  %v9708_v17 = vmul.f32 %v9664_v33, %v8677_v54  ;;  %3762 = vrot.lane.b32.xlu1 %v12975_v13, %s5322_s8  ;;  %v12976_v48 = vld [vmem:[#allocation79_spill] sm:$0xff]  ;;  %v12977_v15 = vld [vmem:[#allocation46_spill] sm:$0xff]  ;;  %v9732_v58 = vpop.permute.xlu1 %2595 }
 0x29d   : > { %12968 = vst [vmem:[#allocation74_spill] sm:$0xff] %v9685_v63  ;;  %12969 = vst [vmem:[#allocation31_spill] sm:$0xff] %v9689_v29  ;;  %v3171_v25 = vmul.f32 %v9447_v44, %v9275_v16  ;;  %v9720_v63 = vadd.f32 %v12977_v15, %v9481_v46  ;;  %v9724_v54 = vadd.f32 %v12977_v15, %v9485_v59  ;;  %v12978_v13 = vld [vmem:[#allocation118_spill] sm:$0xff]  ;;  %v2957_v40 = vrot.slane %v2943_v38, 2  ;;  %v12980_v19 = vld [vmem:[#allocation76_spill] sm:$0xff] }
 0x29e   : > { %12972 = vst [vmem:[#allocation132_spill] sm:$0xff] %v9699_v26  ;;  %12973 = vst [vmem:[#allocation116_spill] sm:$0xff] %v9704_v30  ;;  %v3058_v26 = vmul.f32 %v9432_v1, %v12976_v48  ;;  %v12979_v11 = vrot.slane %v12978_v13, 2  ;;  %v2959_v48 = vrot.slane %v2944_v45, 2  ;;  %v3071_v12 = vrot.slane %v3057_v52, 2  ;;  %v12981_v45 = vld [vmem:[#allocation83_spill] sm:$0xff] }
 0x29f   : > { %12974 = vst [vmem:[#allocation73_spill] sm:$0xff] %v9708_v17  ;;  %v3172_v46 = vmul.f32 %v9447_v44, %v12980_v19  ;;  %v9739_v59 = vadd.f32 %v9325_v50, %v9402_v21  ;;  %v9743_v15 = vadd.f32 %v9325_v50, %v9406_v0  ;;  %v12982_v52 = vrot.slane %v12981_v45, 2  ;;  %v12984_v45 = vld [vmem:[#allocation58_spill] sm:$0xff] }
 0x2a0   : > { %3760 = vrot.lane.b32.xlu0 %v12979_v11, %s5322_s8  ;;  %v9745_v11 = vpop.permute.xlu0 %2593  ;;  %v3073_v1 = vrot.slane %v3058_v26, 2  ;;  %v3185_v44 = vrot.slane %v3171_v25, 2  ;;  %v9754_v21 = vmul.f32 %v9440_v41, %v9730_v56  ;;  %v9758_v50 = vmul.f32 %v9208_v5, %v9730_v56 }
 0x2a1   : > { %3788 = vrot.lane.b32.xlu1 %v12982_v52, %s5322_s8  ;;  %v9762_v0 = vadd.f32 %v9365_v47, %v9545_v20  ;;  %v9766_v13 = vadd.f32 %v9365_v47, %v9560_v57  ;;  %v12985_v26 = vrot.slane %v9463_v7, 2  ;;  %v2977_v52 = vmul.f32 %v9190_v28, %v9580_v36  ;;  %v9781_v20 = vpop.permute.xlu1 %2617 }
 0x2a2   : > { %12983 = vst [vmem:[#allocation124_spill] sm:$0xff] %v9754_v21  ;;  %v9779_v38 = vadd.f32 %v9367_v31, %v9473_v3  ;;  %v12987_v57 = vrot.slane %v9467_v14, 2  ;;  %v2978_v3 = vmul.f32 %v9208_v5, %v9580_v36  ;;  %v2979_v14 = vmul.f32 %v9580_v36, %v12966_v49 }
 0x2a3   : > { %v9773_v25 = vsel %vm2914_vm2, %v12985_v26, %v2957_v40  ;;  %v3187_v40 = vrot.slane %v3172_v46, 2  ;;  %v9795_v26 = vadd.f32 %v9367_v31, %v9477_v61  ;;  %v12994_v31 = vrot.slane %v9519_v34, 2 }
 0x2a4   : > { %3764 = vrot.lane.b32.xlu0 %v12984_v45, %s5322_s8  ;;  %12986 = vst [vmem:[#allocation72_spill] sm:$0xff] %v9773_v25  ;;  %v9786_v47 = vsel %vm2914_vm2, %v12987_v57, %v2959_v48  ;;  %v12989_v45 = vrot.slane %v9503_v39, 2  ;;  %v9797_v25 = vpop.permute.xlu0 %2615  ;;  %v2980_v48 = vmul.f32 %v12970_v51, %v9580_v36  ;;  %v12991_v39 = vld [vmem:[#allocation21_spill] sm:$0xff]  ;;  %v9821_v36 = vadd.f32 %v9423_v43, %v9606_v27 }
 0x2a5   : > { %12988 = vst [vmem:[#allocation69_spill] sm:$0xff] %v9786_v47  ;;  %3792 = vrot.lane.b32.xlu1 %v12991_v39, %s5322_s8  ;;  %v9815_v61 = vsel %vm2914_vm2, %v12994_v31, %v3185_v44  ;;  %v3091_v34 = vmul.f32 %v9190_v28, %v9596_v18  ;;  %v9839_v27 = vadd.f32 %v9434_v37, %v9537_v2  ;;  %v9841_v39 = vpop.permute.xlu1 %2639  ;;  %v9850_v31 = vld [vmem:[#allocation2 + $0xb0] sm:$0x1]  ;;  %v2989_v49 = vrot.slane %v2977_v52, 2 }
 0x2a6   : > { %v9791_v7 = vsel %vm2914_vm2, %v12989_v45, %v3071_v12  ;;  %v12992_v12 = vrot.slane %v9507_v32, 2  ;;  %12995 = vst [vmem:[#allocation62_spill] sm:$0xff] %v9815_v61  ;;  %v9825_v45 = vadd.f32 %v9423_v43, %v9626_v55  ;;  %v12996_v32 = vld [vmem:[#allocation56_spill] sm:$0xff]  ;;  %v12998_v43 = vrot.slane %v9531_v4, 2  ;;  %13000 = vst [vmem:[#allocation82_spill] sm:$0xff] %v9850_v31 }
 0x2a7   : > { %12990 = vst [vmem:[#allocation80_spill] sm:$0xff] %v9791_v7  ;;  %v2991_v2 = vrot.slane %v2978_v3, 2  ;;  %v2993_v61 = vrot.slane %v2979_v14, 2  ;;  %v9858_v4 = vadd.f32 %v9434_v37, %v9541_v6  ;;  %v3205_v3 = vmul.f32 %v9190_v28, %v9664_v33  ;;  %v13005_v6 = vld [vmem:[#allocation92_spill] sm:$0xff] }
 0x2a8   : > { %v9810_v46 = vsel %vm2914_vm2, %v12992_v12, %v3073_v1  ;;  %3790 = vrot.lane.b32.xlu0 %v12996_v32, %s5322_s8  ;;  %v9831_v1 = vld [vmem:[#allocation2 + $0x98] sm:$0xff]  ;;  %v9846_v55 = vsel %vm2914_vm2, %v12998_v43, %v3187_v40  ;;  %v3093_v12 = vmul.f32 %v9596_v18, %v12971_v62  ;;  %v3094_v32 = vmul.f32 %v9850_v31, %v9596_v18  ;;  %v9854_v57 = vpop.permute.xlu0 %2619  ;;  %v13001_v62 = vld [vmem:[#allocation20_spill] sm:$0xff] }
 0x2a9   : > { %12993 = vst [vmem:[#allocation77_spill] sm:$0xff] %v9810_v46  ;;  %12997 = vst [vmem:[#allocation63_spill] sm:$0xff] %v9831_v1  ;;  %v3092_v44 = vmul.f32 %v9831_v1, %v9596_v18  ;;  %v2995_v46 = vrot.slane %v2980_v48, 2  ;;  %v9862_v40 = vadd.f32 %v9491_v35, %v9683_v53  ;;  %3818 = vrot.lane.b32.xlu1 %v13001_v62, %s5322_s8  ;;  %v13002_v43 = vrot.slane %v9758_v50, 2  ;;  %v13060_v47 = vld [vmem:[#allocation68_spill] sm:$0xff] }
 0x2aa   : > { %12999 = vst [vmem:[#allocation51_spill] sm:$0xff] %v9846_v55  ;;  %v13003_v18 = vrot.slane %v9754_v21, 2  ;;  %v9879_v37 = vadd.f32 %v9491_v35, %v9697_v9  ;;  %v13006_v53 = vrot.slane %v13005_v6, 2  ;;  %v3103_v14 = vrot.slane %v3091_v34, 2  ;;  %v13062_v21 = vld [vmem:[#allocation42_spill] sm:$0xff] }
 0x2ab   : > { %v3105_v48 = vrot.slane %v3092_v44, 2  ;;  %v3206_v62 = vmul.f32 %v9664_v33, %v12884_v10  ;;  %v3109_v55 = vrot.slane %v3094_v32, 2  ;;  %v3207_v7 = vmul.f32 %v9664_v33, %v9275_v16  ;;  %v13009_v16 = vld [vmem:[#allocation34_spill] sm:$0xff] }
 0x2ac   : > { %v9871_v52 = vsel %vm2914_vm2, %v13003_v18, %v13002_v43  ;;  %3816 = vrot.lane.b32.xlu0 %v13006_v53, %s5322_s8  ;;  %v9886_v43 = vpop.permute.xlu1 %2643  ;;  %v3107_v18 = vrot.slane %v3093_v12, 2  ;;  %v3208_v35 = vmul.f32 %v9664_v33, %v12980_v19  ;;  %v9894_v9 = vadd.f32 %v9509_v23, %v9584_v8  ;;  %v9900_v10 = vpop.permute.xlu0 %2641 }
 0x2ad   : > { %13004 = vst [vmem:[#allocation88_spill] sm:$0xff] %v9871_v52  ;;  %v9898_v34 = vadd.f32 %v9509_v23, %v9602_v22  ;;  %v9903_v44 = vsel %vm2914_vm2, %v2989_v49, %v2993_v61  ;;  %v9906_v12 = vsel %vm2914_vm2, %v2991_v2, %v2995_v46  ;;  %v13010_v33 = vrot.slane %v13009_v16, 2 }
 0x2ae   : > { %13007 = vst [vmem:[#allocation37_spill] sm:$0xff] %v9903_v44  ;;  %13008 = vst [vmem:[#allocation100_spill] sm:$0xff] %v9906_v12  ;;  %v3217_v8 = vrot.slane %v3205_v3, 2  ;;  %v13011_v19 = vrot.slane %v9644_v24, 2  ;;  %v13013_v22 = vrot.slane %v9657_v60, 2  ;;  %v4087_v46 = vmul.f32 %v12970_v51, %v9730_v56 }
 0x2af   : > { %3844 = vrot.lane.b32.xlu1 %v13010_v33, %s5322_s8  ;;  %v9929_v32 = vadd.f32 %v9552_v42, %v9739_v59  ;;  %v9933_v3 = vadd.f32 %v9552_v42, %v9743_v15  ;;  %v3219_v6 = vrot.slane %v3206_v62, 2  ;;  %v9938_v53 = vstv %s9835_s11  ;;  %v13019_v42 = vld [vmem:[#allocation54_spill] sm:$0xff]  ;;  %s10899_s11 = sld [smem:[#allocation9 + $0x97]] }
 0x2b0   : > { %v9916_v23 = vsel %vm2914_vm2, %v13011_v19, %v2989_v49  ;;  %v9921_v61 = vsel %vm2914_vm2, %v13013_v22, %v2991_v2  ;;  %v13015_v49 = vld [vmem:[#allocation86_spill] sm:$0xff]  ;;  %v9940_v2 = vpop.permute.xlu1 %2665  ;;  %v9943_v56 = vsel %vm2914_vm2, %v3103_v14, %v3107_v18  ;;  %v9946_v16 = vsel %vm2914_vm2, %v3105_v48, %v3109_v55  ;;  %v13018_v19 = vld [vmem:[#allocation131_spill] sm:$0xff] }
 0x2b1   : > { %13012 = vst [vmem:[#allocation117_spill] sm:$0xff] %v9916_v23  ;;  %13014 = vst [vmem:[#allocation49_spill] sm:$0xff] %v9921_v61  ;;  %3820 = vrot.lane.b32.xlu0 %v13015_v49, %s5322_s8  ;;  %v3221_v59 = vrot.slane %v3207_v7, 2  ;;  %v3223_v33 = vrot.slane %v3208_v35, 2  ;;  %v9950_v15 = vadd.f32 %v13019_v42, %v13018_v19  ;;  %v13020_v22 = vld [vmem:[#allocation103_spill] sm:$0xff]  ;;  %v9956_v49 = vpop.permute.xlu0 %2663  ;;  %v13021_v61 = vld [vmem:[#allocation101_spill] sm:$0xff] }
 0x2b2   : > { %13016 = vst [vmem:[#allocation18_spill] sm:$0xff] %v9943_v56  ;;  %13017 = vst [vmem:[#allocation45_spill] sm:$0xff] %v9946_v16  ;;  %v9954_v62 = vadd.f32 %v13019_v42, %v13020_v22  ;;  %v13022_v23 = vrot.slane %v13021_v61, 2  ;;  %v13024_v55 = vrot.slane %v9689_v29, 2  ;;  %v13026_v35 = vld [vmem:[#allocation60_spill] sm:$0xff]  ;;  %v13027_v19 = vrot.slane %v9704_v30, 2 }
 0x2b3   : > { %3848 = vrot.lane.b32.xlu1 %v13026_v35, %s5322_s8  ;;  %v9977_v22 = vmul.f32 %v9440_v41, %v9938_v53  ;;  %v4094_v16 = vrot.slane %v4087_v46, 2  ;;  %v13040_v30 = vld [vmem:[#allocation27_spill] sm:$0xff]  ;;  %v10071_v29 = vld [vmem:[#allocation2 + $0x1f8] sm:$0xfe] }
 0x2b4   : > { %v9961_v18 = vsel %vm2914_vm2, %v13022_v23, %v3103_v14  ;;  %v9966_v7 = vsel %vm2914_vm2, %v13024_v55, %v3105_v48  ;;  %v9973_v42 = vsel %vm2914_vm2, %v13027_v19, %v3217_v8  ;;  %v9979_v14 = vld [vmem:[#allocation2 + $0x138] sm:$0xfe]  ;;  %v9982_v23 = vstv %s9875_s7  ;;  %v13031_v48 = vld [vmem:[#allocation35_spill] sm:$0xff]  ;;  %v10007_v56 = vpop.permute.xlu1 %2687  ;;  %13050 = vst [vmem:[#allocation46_spill] sm:$0xff] %v10071_v29  ;;  %s11050_s7 = sld [smem:[#allocation9 + $0x98]] }
 0x2b5   : > { %13023 = vst [vmem:[#allocation84_spill] sm:$0xff] %v9961_v18  ;;  %13025 = vst [vmem:[#allocation70_spill] sm:$0xff] %v9966_v7  ;;  %v9986_v55 = vadd.f32 %v13031_v48, %v9779_v38  ;;  %v9990_v35 = vadd.f32 %v13031_v48, %v9795_v26  ;;  %v13032_v19 = vld [vmem:[#allocation65_spill] sm:$0xff]  ;;  %v10001_v7 = vmul.f32 %v9190_v28, %v9982_v23  ;;  %v13035_v38 = vld [vmem:[#allocation94_spill] sm:$0xff] }
 0x2b6   : > { %13028 = vst [vmem:[#allocation47_spill] sm:$0xff] %v9973_v42  ;;  %13029 = vst [vmem:[#allocation39_spill] sm:$0xff] %v9977_v22  ;;  %3846 = vrot.lane.b32.xlu0 %v13032_v19, %s5322_s8  ;;  %v13033_v42 = vrot.slane %v9708_v17, 2  ;;  %v10005_v18 = vadd.f32 %v13035_v38, %v9720_v63  ;;  %v10010_v26 = vsel %vm2914_vm2, %v3217_v8, %v3221_v59  ;;  %v13038_v19 = vld [vmem:[#allocation85_spill] sm:$0xff]  ;;  %v10023_v17 = vpop.permute.xlu0 %2667  ;;  %v13042_v59 = vld [vmem:[#allocation24_spill] sm:$0xff] }
 0x2b7   : > { %13030 = vst [vmem:[#allocation122_spill] sm:$0xff] %v9979_v14  ;;  %13036 = vst [vmem:[#allocation44_spill] sm:$0xff] %v10010_v26  ;;  %v10013_v48 = vsel %vm2914_vm2, %v3219_v6, %v3223_v33  ;;  %v10027_v63 = vmul.f32 %v9982_v23, %v9979_v14  ;;  %v10031_v8 = vmul.f32 %v9982_v23, %v13040_v30  ;;  %3874 = vrot.lane.b32.xlu1 %v13042_v59, %s5322_s8  ;;  %v13046_v26 = vld [vmem:[#allocation74_spill] sm:$0xff]  ;;  %v13048_v33 = vld [vmem:[#allocation40_spill] sm:$0xff] }
 0x2b8   : > { %v9997_v46 = vsel %vm2914_vm2, %v13033_v42, %v3219_v6  ;;  %13037 = vst [vmem:[#allocation30_spill] sm:$0xff] %v10013_v48  ;;  %v10017_v42 = vmul.f32 %v9982_v23, %v13038_v19  ;;  %v10034_v6 = vstv %s9908_s29  ;;  %v10044_v19 = vld [vmem:[#allocation2 + $0x198] sm:$0xfe]  ;;  %v10047_v48 = vstv %s9925_s14  ;;  %s11118_s29 = sld [smem:[#allocation9 + $0x99]]  ;;  %s11156_s14 = sld [smem:[#allocation9 + $0x9a]] }
 0x2b9   : > { %13034 = vst [vmem:[#allocation119_spill] sm:$0xff] %v9997_v46  ;;  %v10021_v46 = vadd.f32 %v13035_v38, %v9724_v54  ;;  %13039 = vst [vmem:[#allocation109_spill] sm:$0xff] %v10027_v63  ;;  %v13043_v54 = vrot.slane %v9758_v50, 2  ;;  %v10051_v30 = vmul.f32 %v9208_v5, %v9938_v53  ;;  %v10057_v59 = vadd.f32 %v13046_v26, %v9839_v27 }
 0x2ba   : > { %13041 = vst [vmem:[#allocation108_spill] sm:$0xff] %v10031_v8  ;;  %13045 = vst [vmem:[#allocation79_spill] sm:$0xff] %v10044_v19  ;;  %v10061_v50 = vadd.f32 %v13046_v26, %v9858_v4  ;;  %v13049_v12 = vrot.slane %v13048_v33, 2  ;;  %v10079_v4 = vpop.permute.xlu1 %2691  ;;  %v13052_v33 = vld [vmem:[#allocation55_spill] sm:$0xff]  ;;  %v10090_v44 = vpop.permute.xlu0 %2689  ;;  %v13055_v26 = vld [vmem:[#allocation61_spill] sm:$0xff]  ;;  %v10111_v61 = vmul.f32 %v10047_v48, %v10071_v29  ;;  %v10119_v52 = vmul.f32 %v10047_v48, %v13062_v21 }
 0x2bb   : > { %v10042_v38 = vsel %vm2914_vm2, %v13043_v54, %v4094_v16  ;;  %v13047_v16 = vld [vmem:[#allocation132_spill] sm:$0xff]  ;;  %13051 = vst [vmem:[#allocation118_spill] sm:$0xff] %v10079_v4  ;;  %13053 = vst [vmem:[#allocation76_spill] sm:$0xff] %v10090_v44  ;;  %v13056_v60 = vrot.slane %v13055_v26, 2  ;;  %v10129_v26 = vadd.f32 %v9732_v58, %v9898_v34  ;;  %v13064_v31 = vrot.slane %v10001_v7, 2 }
 0x2bc   : > { %13044 = vst [vmem:[#allocation38_spill] sm:$0xff] %v10042_v38  ;;  %v10065_v54 = vadd.f32 %v13047_v16, %v9762_v0  ;;  %3872 = vrot.lane.b32.xlu0 %v13049_v12, %s5322_s8  ;;  %v10077_v27 = vadd.f32 %v13047_v16, %v9766_v13  ;;  %v10084_v0 = vmul.f32 %v9190_v28, %v10034_v6  ;;  %13059 = vst [vmem:[#allocation21_spill] sm:$0xff] %v10111_v61 }
 0x2bd   : > { %v10088_v12 = vmul.f32 %v10034_v6, %v13052_v33  ;;  %v10096_v13 = vmul.f32 %v10034_v6, %v10044_v19  ;;  %v10100_v16 = vmul.f32 %v9190_v28, %v10047_v48  ;;  %3900 = vrot.lane.b32.xlu1 %v13056_v60, %s5322_s8  ;;  %v13057_v33 = vld [vmem:[#allocation26_spill] sm:$0xff]  ;;  %v10115_v38 = vmul.f32 %v10047_v48, %v13060_v47 }
 0x2be   : > { %v10107_v24 = vmul.f32 %v10034_v6, %v13057_v33  ;;  %v10125_v60 = vadd.f32 %v9732_v58, %v9894_v9  ;;  %v13063_v33 = vld [vmem:[#allocation89_spill] sm:$0xff]  ;;  %v13065_v1 = vrot.slane %v10027_v63, 2  ;;  %v4115_v44 = vmul.f32 %v12970_v51, %v9938_v53  ;;  %v10146_v58 = vpop.permute.xlu1 %2713 }
 0x2bf   : > { %13054 = vst [vmem:[#allocation83_spill] sm:$0xff] %v10096_v13  ;;  %13061 = vst [vmem:[#allocation56_spill] sm:$0xff] %v10115_v38  ;;  %v10144_v9 = vadd.f32 %v9745_v11, %v9821_v36  ;;  %v13067_v34 = vrot.slane %v10017_v42, 2  ;;  %v10159_v53 = vadd.f32 %v9745_v11, %v9825_v45  ;;  %v10161_v36 = vpop.permute.xlu0 %2711  ;;  %v10176_v11 = vadd.f32 %v9781_v20, %v9950_v15  ;;  %v13071_v45 = vld [vmem:[#allocation99_spill] sm:$0xff] }
 0x2c0   : > { %13058 = vst [vmem:[#allocation58_spill] sm:$0xff] %v10107_v24  ;;  %3876 = vrot.lane.b32.xlu0 %v13063_v33, %s5322_s8  ;;  %v10138_v21 = vsel %vm2914_vm2, %v13065_v1, %v13064_v31  ;;  %v13068_v33 = vrot.slane %v10031_v8, 2  ;;  %v4120_v8 = vrot.slane %v10051_v30, 2  ;;  %v10182_v63 = vstv %s10073_s10  ;;  %s11251_s10 = sld [smem:[#allocation9 + $0x9c]] }
 0x2c1   : > { %13066 = vst [vmem:[#allocation20_spill] sm:$0xff] %v10138_v21  ;;  %v4122_v21 = vrot.slane %v4115_v44, 2  ;;  %v10192_v31 = vadd.f32 %v9797_v25, %v9862_v40  ;;  %v13074_v30 = vrot.slane %v10096_v13, 2  ;;  %v13076_v1 = vrot.slane %v10088_v12, 2 }
 0x2c2   : > { %v10153_v4 = vsel %vm2914_vm2, %v13068_v33, %v13067_v34  ;;  %v13070_v34 = vld [vmem:[#allocation87_spill] sm:$0xff]  ;;  %v12048_v33 = vrot.slane %v10107_v24, 2  ;;  %v10194_v15 = vpop.permute.xlu1 %2735  ;;  %v10214_v40 = vadd.f32 %v9797_v25, %v9879_v37  ;;  %v13079_v13 = vrot.slane %v10100_v16, 2  ;;  %v13085_v25 = vld [vmem:[#allocation66_spill] sm:$0xff] }
 0x2c3   : > { %13069 = vst [vmem:[#allocation92_spill] sm:$0xff] %v10153_v4  ;;  %3904 = vrot.lane.b32.xlu1 %v13070_v34, %s5322_s8  ;;  %v10172_v4 = vstv %s10053_s12  ;;  %v10188_v34 = vadd.f32 %v9781_v20, %v9954_v62  ;;  %13072 = vst [vmem:[#allocation34_spill] sm:$0xff] %v10194_v15  ;;  %v10210_v62 = vld [vmem:[#allocation2 + $0x168] sm:$0x1]  ;;  %v10216_v15 = vpop.permute.xlu0 %2715  ;;  %v13082_v24 = vrot.slane %v9977_v22, 2  ;;  %v13086_v37 = vrot.slane %v10119_v52, 2 }
 0x2c4   : > { %3902 = vrot.lane.b32.xlu0 %v13071_v45, %s5322_s8  ;;  %v13073_v45 = vrot.slane %v10084_v0, 2  ;;  %v10208_v20 = vsel %vm2914_vm2, %v12048_v33, %v13076_v1  ;;  %13078 = vst [vmem:[#allocation54_spill] sm:$0xff] %v10216_v15  ;;  %v10232_v33 = vmul.f32 %v10172_v4, %v9979_v14  ;;  %v10274_v22 = vld [vmem:[#allocation2 + $0x228] sm:$0x1]  ;;  %s11215_s12 = sld [smem:[#allocation9 + $0x9b]] }
 0x2c5   : > { %13077 = vst [vmem:[#allocation131_spill] sm:$0xff] %v10208_v20  ;;  %v10228_v1 = vsel %vm2914_vm2, %v13082_v24, %v4120_v8  ;;  %v13087_v20 = vrot.slane %v10115_v38, 2  ;;  %v10260_v38 = vadd.f32 %v9841_v39, %v10005_v18  ;;  %v10278_v18 = vadd.f32 %v9854_v57, %v9929_v32 }
 0x2c6   : > { %v10201_v44 = vsel %vm2914_vm2, %v13074_v30, %v13073_v45  ;;  %v13080_v30 = vrot.slane %v10111_v61, 2  ;;  %13083 = vst [vmem:[#allocation60_spill] sm:$0xff] %v10228_v1  ;;  %13084 = vst [vmem:[#allocation35_spill] sm:$0xff] %v10232_v33  ;;  %v3249_v1 = vmul.f32 %v9982_v23, %v10210_v62 }
 0x2c7   : > { %13075 = vst [vmem:[#allocation86_spill] sm:$0xff] %v10201_v44  ;;  %3930 = vrot.lane.b32.xlu1 %v13085_v25, %s5322_s8  ;;  %v10241_v61 = vsel %vm2914_vm2, %v13087_v20, %v13086_v37  ;;  %v10256_v25 = vld [vmem:[#allocation2 + $0x1c8] sm:$0x1]  ;;  %v10264_v20 = vadd.f32 %v9841_v39, %v10021_v46  ;;  %v10270_v44 = vsel %vm2914_vm2, %v4120_v8, %v4122_v21  ;;  %v10284_v46 = vpop.permute.xlu1 %2739  ;;  %v10292_v8 = vld [vmem:[#allocation2 + $0x170] sm:$0x1]  ;;  %v10296_v32 = vpop.permute.xlu0 %2737 }
 0x2c8   : > { %v10223_v45 = vsel %vm2914_vm2, %v13080_v30, %v13079_v13  ;;  %13088 = vst [vmem:[#allocation65_spill] sm:$0xff] %v10241_v61  ;;  %v10243_v13 = vld [vmem:[#allocation2 + $0x140] sm:$0xfe]  ;;  %v10251_v30 = vmul.f32 %v10182_v63, %v10044_v19  ;;  %v13092_v37 = vld [vmem:[#allocation67_spill] sm:$0xff]  ;;  %13094 = vst [vmem:[#allocation24_spill] sm:$0xff] %v10270_v44  ;;  %v10282_v39 = vadd.f32 %v9854_v57, %v9933_v3 }
 0x2c9   : > { %13081 = vst [vmem:[#allocation103_spill] sm:$0xff] %v10223_v45  ;;  %13089 = vst [vmem:[#allocation94_spill] sm:$0xff] %v10243_v13  ;;  %v10247_v24 = vmul.f32 %v10243_v13, %v10172_v4  ;;  %v10254_v45 = vstv %s10121_s26  ;;  %v13093_v61 = vrot.slane %v13092_v37, 2  ;;  %v10286_v37 = vld [vmem:[#allocation2 + $0x1a0] sm:$0xfe]  ;;  %v3250_v21 = vmul.f32 %v10292_v8, %v9982_v23  ;;  %v13101_v19 = vld [vmem:[#allocation97_spill] sm:$0xff] }
 0x2ca   : > { %13091 = vst [vmem:[#allocation27_spill] sm:$0xff] %v10251_v30  ;;  %13095 = vst [vmem:[#allocation74_spill] sm:$0xff] %v10284_v46  ;;  %v10301_v57 = vmul.f32 %v10254_v45, %v10071_v29  ;;  %v10305_v3 = vmul.f32 %v10254_v45, %v13060_v47  ;;  %v13102_v46 = vrot.slane %v13101_v19, 2  ;;  %v10314_v44 = vld [vmem:[#allocation2 + $0x1d0] sm:$0x1]  ;;  %v3477_v47 = vmul.f32 %v10047_v48, %v10274_v22  ;;  %s11303_s26 = sld [smem:[#allocation9 + $0x9d]] }
 0x2cb   : > { %13090 = vst [vmem:[#allocation85_spill] sm:$0xff] %v10247_v24  ;;  %3928 = vrot.lane.b32.xlu0 %v13093_v61, %s5322_s8  ;;  %13096 = vst [vmem:[#allocation132_spill] sm:$0xff] %v10286_v37  ;;  %v10290_v61 = vmul.f32 %v10286_v37, %v10182_v63  ;;  %v3363_v37 = vmul.f32 %v10034_v6, %v10256_v25  ;;  %v3364_v29 = vmul.f32 %v10314_v44, %v10034_v6  ;;  %v10337_v14 = vpop.permute.xlu1 %2761 }
 0x2cc   : > { %13098 = vst [vmem:[#allocation55_spill] sm:$0xff] %v10296_v32  ;;  %13099 = vst [vmem:[#allocation61_spill] sm:$0xff] %v10301_v57  ;;  %3956 = vrot.lane.b32.xlu1 %v13102_v46, %s5322_s8  ;;  %v10322_v13 = vadd.f32 %v9886_v43, %v10065_v54  ;;  %v10326_v19 = vadd.f32 %v9886_v43, %v10077_v27  ;;  %v13106_v46 = vld [vmem:[#allocation33_spill] sm:$0xff]  ;;  %v3263_v32 = vrot.slane %v3249_v1, 2  ;;  %v10331_v23 = vstv %s10184_s23  ;;  %v10346_v27 = vpop.permute.xlu0 %2759  ;;  %s11325_s23 = sld [smem:[#allocation9 + $0x9e]] }
 0x2cd   : > { %13097 = vst [vmem:[#allocation40_spill] sm:$0xff] %v10290_v61  ;;  %13100 = vst [vmem:[#allocation26_spill] sm:$0xff] %v10305_v3  ;;  %v10335_v6 = vadd.f32 %v9900_v10, %v9986_v55  ;;  %v3265_v54 = vrot.slane %v3250_v21, 2  ;;  %v10344_v43 = vadd.f32 %v9900_v10, %v9990_v35  ;;  %v3377_v55 = vrot.slane %v3363_v37, 2  ;;  %v13110_v35 = vld [vmem:[#allocation19_spill] sm:$0xff] }
 0x2ce   : > { %13103 = vst [vmem:[#allocation68_spill] sm:$0xff] %v10314_v44  ;;  %13104 = vst [vmem:[#allocation42_spill] sm:$0xff] %v10322_v13  ;;  %v13108_v13 = vld [vmem:[#allocation29_spill] sm:$0xff]  ;;  %v3491_v15 = vrot.slane %v3477_v47, 2  ;;  %v10354_v21 = vmul.f32 %v9440_v41, %v10331_v23  ;;  %v10358_v10 = vmul.f32 %v9208_v5, %v10331_v23  ;;  %v3285_v41 = vmul.f32 %v10172_v4, %v10210_v62 }
 0x2cf   : > { %13105 = vst [vmem:[#allocation89_spill] sm:$0xff] %v10326_v19  ;;  %3932 = vrot.lane.b32.xlu0 %v13106_v46, %s5322_s8  ;;  %13107 = vst [vmem:[#allocation87_spill] sm:$0xff] %v10337_v14  ;;  %v3478_v30 = vmul.f32 %v10047_v48, %v13108_v13  ;;  %v13109_v19 = vld [vmem:[#allocation120_spill] sm:$0xff]  ;;  %v3379_v14 = vrot.slane %v3364_v29, 2  ;;  %v13111_v48 = vrot.slane %v10001_v7, 2  ;;  %v10369_v29 = vmul.f32 %v9190_v28, %v10172_v4 }
 0x2d0   : > { %3960 = vrot.lane.b32.xlu1 %v13109_v19, %s5322_s8  ;;  %v3286_v37 = vmul.f32 %v10292_v8, %v10172_v4  ;;  %v10377_v5 = vadd.f32 %v9940_v2, %v10144_v9  ;;  %v10381_v7 = vadd.f32 %v9940_v2, %v10159_v53  ;;  %v13113_v47 = vrot.slane %v10017_v42, 2  ;;  %v10398_v46 = vpop.permute.xlu0 %2763  ;;  %v10405_v42 = vld [vmem:[#allocation2 + $0x158] sm:$0xff] }
 0x2d1   : > { %v10365_v13 = vsel %vm2914_vm2, %v13111_v48, %v3263_v32  ;;  %v10383_v32 = vpop.permute.xlu1 %2783  ;;  %v10392_v48 = vadd.f32 %v9956_v49, %v10057_v59  ;;  %v10396_v9 = vadd.f32 %v9956_v49, %v10061_v50  ;;  %v13115_v2 = vrot.slane %v10084_v0, 2  ;;  %13117 = vst [vmem:[#allocation97_spill] sm:$0xff] %v10405_v42 }
 0x2d2   : > { %13112 = vst [vmem:[#allocation99_spill] sm:$0xff] %v10365_v13  ;;  %v10388_v19 = vsel %vm2914_vm2, %v13113_v47, %v3265_v54  ;;  %v13118_v54 = vld [vmem:[#allocation90_spill] sm:$0xff]  ;;  %v13119_v59 = vrot.slane %v10088_v12, 2  ;;  %v13121_v50 = vrot.slane %v10100_v16, 2  ;;  %v12065_v47 = vrot.slane %v10358_v10, 2 }
 0x2d3   : > { %3958 = vrot.lane.b32.xlu0 %v13110_v35, %s5322_s8  ;;  %13114 = vst [vmem:[#allocation66_spill] sm:$0xff] %v10388_v19  ;;  %v3493_v35 = vrot.slane %v3478_v30, 2  ;;  %v10403_v53 = vsel %vm2914_vm2, %v13115_v2, %v3377_v55  ;;  %v3284_v30 = vmul.f32 %v10405_v42, %v10172_v4  ;;  %v10425_v4 = vadd.f32 %v10007_v56, %v10192_v31  ;;  %v13129_v55 = vld [vmem:[#allocation25_spill] sm:$0xff] }
 0x2d4   : > { %13116 = vst [vmem:[#allocation67_spill] sm:$0xff] %v10403_v53  ;;  %3986 = vrot.lane.b32.xlu1 %v13118_v54, %s5322_s8  ;;  %v10414_v49 = vsel %vm2914_vm2, %v13119_v59, %v3379_v14  ;;  %v10419_v0 = vsel %vm2914_vm2, %v13121_v50, %v3491_v15  ;;  %v10429_v2 = vadd.f32 %v10007_v56, %v10214_v40  ;;  %v13123_v14 = vld [vmem:[#allocation125_spill] sm:$0xff]  ;;  %v3299_v16 = vrot.slane %v3285_v41, 2  ;;  %v10451_v41 = vpop.permute.xlu0 %2785  ;;  %v13138_v53 = vld [vmem:[#allocation28_spill] sm:$0xff] }
 0x2d5   : > { %13120 = vst [vmem:[#allocation33_spill] sm:$0xff] %v10414_v49  ;;  %13122 = vst [vmem:[#allocation29_spill] sm:$0xff] %v10419_v0  ;;  %v13124_v12 = vrot.slane %v13123_v14, 2  ;;  %v3301_v54 = vrot.slane %v3286_v37, 2  ;;  %v10438_v15 = vadd.f32 %v10023_v17, %v10125_v60  ;;  %v10440_v59 = vpop.permute.xlu1 %2787  ;;  %v13125_v31 = vrot.slane %v10119_v52, 2 }
 0x2d6   : > { %v3399_v56 = vmul.f32 %v10182_v63, %v10256_v25  ;;  %v3400_v40 = vmul.f32 %v10314_v44, %v10182_v63  ;;  %v3295_v37 = vrot.slane %v10369_v29, 2  ;;  %v3297_v14 = vrot.slane %v3284_v30, 2 }
 0x2d7   : > { %3984 = vrot.lane.b32.xlu0 %v13124_v12, %s5322_s8  ;;  %v10445_v50 = vsel %vm2914_vm2, %v13125_v31, %v3493_v35  ;;  %v3397_v60 = vmul.f32 %v9190_v28, %v10182_v63  ;;  %v10456_v12 = vld [vmem:[#allocation2 + $0x1b8] sm:$0xff]  ;;  %v10462_v35 = vadd.f32 %v10023_v17, %v10129_v26  ;;  %v13128_v31 = vld [vmem:[#allocation118_spill] sm:$0xff]  ;;  %v13130_v29 = vrot.slane %v13129_v55, 2 }
 0x2d8   : > { %13126 = vst [vmem:[#allocation120_spill] sm:$0xff] %v10445_v50  ;;  %13127 = vst [vmem:[#allocation19_spill] sm:$0xff] %v10456_v12  ;;  %v3398_v52 = vmul.f32 %v10456_v12, %v10182_v63  ;;  %v10466_v1 = vadd.f32 %v13128_v31, %v10278_v18  ;;  %v13131_v30 = vrot.slane %v10354_v21, 2  ;;  %v3511_v63 = vmul.f32 %v9190_v28, %v10254_v45  ;;  %v13132_v26 = vld [vmem:[#allocation98_spill] sm:$0xff]  ;;  %v10514_v49 = vpop.permute.xlu0 %2807 }
 0x2d9   : > { %4012 = vrot.lane.b32.xlu1 %v13130_v29, %s5322_s8  ;;  %v10484_v17 = vadd.f32 %v13128_v31, %v10282_v39  ;;  %v10489_v18 = vsel %vm2914_vm2, %v3295_v37, %v3299_v16  ;;  %v10492_v55 = vsel %vm2914_vm2, %v3297_v14, %v3301_v54  ;;  %v10494_v29 = vld [vmem:[#allocation2 + $0x218] sm:$0xff]  ;;  %v3415_v0 = vrot.slane %v3400_v40, 2  ;;  %v10502_v31 = vld [vmem:[#allocation2 + $0x230] sm:$0x1] }
 0x2da   : > { %v10476_v50 = vsel %vm2914_vm2, %v13131_v30, %v12065_v47  ;;  %13133 = vst [vmem:[#allocation90_spill] sm:$0xff] %v10489_v18  ;;  %13134 = vst [vmem:[#allocation125_spill] sm:$0xff] %v10492_v55  ;;  %v3512_v28 = vmul.f32 %v10494_v29, %v10254_v45  ;;  %v10498_v30 = vpop.permute.xlu1 %2809  ;;  %v3413_v47 = vrot.slane %v3399_v56, 2  ;;  %v3513_v39 = vmul.f32 %v10254_v45, %v10274_v22  ;;  %v13137_v54 = vld [vmem:[#allocation76_spill] sm:$0xff] }
 0x2db   : > { %3988 = vrot.lane.b32.xlu0 %v13132_v26, %s5322_s8  ;;  %13135 = vst [vmem:[#allocation118_spill] sm:$0xff] %v10494_v29  ;;  %13136 = vst [vmem:[#allocation25_spill] sm:$0xff] %v10502_v31  ;;  %v3514_v16 = vmul.f32 %v10502_v31, %v10254_v45  ;;  %v10508_v26 = vadd.f32 %v13137_v54, %v10176_v11  ;;  %v10512_v55 = vadd.f32 %v13137_v54, %v10188_v34 }
 0x2dc   : > { %v3409_v56 = vrot.slane %v3397_v60, 2  ;;  %v3411_v40 = vrot.slane %v3398_v52, 2  ;;  %v3523_v18 = vrot.slane %v3511_v63, 2  ;;  %v13139_v45 = vrot.slane %v10232_v33, 2  ;;  %v13182_v33 = vld [vmem:[#allocation87_spill] sm:$0xff] }
 0x2dd   : > { %4016 = vrot.lane.b32.xlu1 %v13138_v53, %s5322_s8  ;;  %v13141_v19 = vrot.slane %v10247_v24, 2  ;;  %v4143_v60 = vmul.f32 %v12970_v51, %v10331_v23  ;;  %v10536_v52 = vadd.f32 %v10146_v58, %v10335_v6  ;;  %v10540_v53 = vadd.f32 %v10146_v58, %v10344_v43 }
 0x2de   : > { %v10523_v11 = vsel %vm2914_vm2, %v13139_v45, %v3295_v37  ;;  %v13143_v37 = vld [vmem:[#allocation36_spill] sm:$0xff]  ;;  %v3525_v63 = vrot.slane %v3512_v28, 2  ;;  %v10545_v54 = vstv %s10434_s5  ;;  %v10550_v51 = vsel %vm2914_vm2, %v3409_v56, %v3413_v47  ;;  %v10563_v28 = vpop.permute.xlu0 %2811  ;;  %v13146_v45 = vld [vmem:[#allocation27_spill] sm:$0xff]  ;;  %s11388_s5 = sld [smem:[#allocation9 + $0x9f]] }
 0x2df   : > { %13140 = vst [vmem:[#allocation98_spill] sm:$0xff] %v10523_v11  ;;  %v10528_v34 = vsel %vm2914_vm2, %v13141_v19, %v3297_v14  ;;  %4014 = vrot.lane.b32.xlu0 %v13143_v37, %s5322_s8  ;;  %v10547_v19 = vpop.permute.xlu1 %2831  ;;  %13144 = vst [vmem:[#allocation28_spill] sm:$0xff] %v10550_v51  ;;  %v10553_v23 = vsel %vm2914_vm2, %v3411_v40, %v3415_v0  ;;  %v3527_v6 = vrot.slane %v3513_v39, 2  ;;  %v3529_v14 = vrot.slane %v3514_v16, 2  ;;  %v13151_v16 = vld [vmem:[#allocation114_spill] sm:$0xff] }
 0x2e0   : > { %13142 = vst [vmem:[#allocation76_spill] sm:$0xff] %v10528_v34  ;;  %13145 = vst [vmem:[#allocation36_spill] sm:$0xff] %v10553_v23  ;;  %v10557_v58 = vadd.f32 %v10161_v36, %v10260_v38  ;;  %v10561_v43 = vadd.f32 %v10161_v36, %v10264_v20  ;;  %v13147_v37 = vrot.slane %v13146_v45, 2  ;;  %v13149_v0 = vrot.slane %v10290_v61, 2  ;;  %v10582_v20 = vld [vmem:[#allocation2 + $0x80] sm:$0xfe] }
 0x2e1   : > { %4042 = vrot.lane.b32.xlu1 %v13151_v16, %s5322_s8  ;;  %v13152_v38 = vrot.slane %v10301_v57, 2  ;;  %v10586_v23 = vmul.f32 %v10582_v20, %v10545_v54  ;;  %v13155_v16 = vld [vmem:[#allocation95_spill] sm:$0xff]  ;;  %v13163_v34 = vld [vmem:[#allocation89_spill] sm:$0xff]  ;;  %v10641_v45 = vstv %s10516_s22  ;;  %s11461_s22 = sld [smem:[#allocation9 + $0xa1]] }
 0x2e2   : > { %v10568_v47 = vsel %vm2914_vm2, %v13147_v37, %v3409_v56  ;;  %v10573_v39 = vsel %vm2914_vm2, %v13149_v0, %v3411_v40  ;;  %v4150_v56 = vrot.slane %v4143_v60, 2  ;;  %v10589_v37 = vstv %s10480_s20  ;;  %v13154_v40 = vld [vmem:[#allocation34_spill] sm:$0xff]  ;;  %s11433_s20 = sld [smem:[#allocation9 + $0xa0]] }
 0x2e3   : > { %13148 = vst [vmem:[#allocation133_spill] sm:$0xff] %v10568_v47  ;;  %13150 = vst [vmem:[#allocation134_spill] sm:$0xff] %v10573_v39  ;;  %v10580_v36 = vsel %vm2914_vm2, %v13152_v38, %v3523_v18  ;;  %v10593_v0 = vadd.f32 %v13154_v40, %v10392_v48  ;;  %v13156_v39 = vrot.slane %v13155_v16, 2  ;;  %v13157_v38 = vrot.slane %v10305_v3, 2  ;;  %v5136_v47 = vld [vmem:[#allocation2 + $0x8] sm:$0xff]  ;;  %v13159_v16 = vld [vmem:[#allocation42_spill] sm:$0xff]  ;;  %v10618_v3 = vpop.permute.xlu1 %2835 }
 0x2e4   : > { %13153 = vst [vmem:[#allocation114_spill] sm:$0xff] %v10580_v36  ;;  %v10604_v60 = vmul.f32 %v5136_v47, %v10589_v37  ;;  %v10608_v51 = vmul.f32 %v10405_v42, %v10589_v37  ;;  %v10612_v48 = vadd.f32 %v13154_v40, %v10396_v9  ;;  %v10630_v42 = vpop.permute.xlu0 %2833  ;;  %v13164_v9 = vld [vmem:[#allocation122_spill] sm:$0xff] }
 0x2e5   : > { %4040 = vrot.lane.b32.xlu0 %v13156_v39, %s5322_s8  ;;  %v10601_v36 = vsel %vm2914_vm2, %v13157_v38, %v3525_v63  ;;  %v13160_v39 = vld [vmem:[#allocation54_spill] sm:$0xff]  ;;  %v10621_v38 = vsel %vm2914_vm2, %v3523_v18, %v3527_v6  ;;  %v10634_v40 = vmul.f32 %v10589_v37, %v13164_v9  ;;  %v13168_v18 = vld [vmem:[#allocation111_spill] sm:$0xff] }
 0x2e6   : > { %13158 = vst [vmem:[#allocation34_spill] sm:$0xff] %v10601_v36  ;;  %v10616_v57 = vadd.f32 %v13160_v39, %v13159_v16  ;;  %13161 = vst [vmem:[#allocation95_spill] sm:$0xff] %v10621_v38  ;;  %v10624_v36 = vsel %vm2914_vm2, %v3525_v63, %v3529_v14  ;;  %v10628_v11 = vadd.f32 %v13160_v39, %v13163_v34  ;;  %v13166_v16 = vld [vmem:[#allocation94_spill] sm:$0xff]  ;;  %v13169_v63 = vrot.slane %v13168_v18, 2  ;;  %v13172_v9 = vld [vmem:[#allocation63_spill] sm:$0xff] }
 0x2e7   : > { %13162 = vst [vmem:[#allocation42_spill] sm:$0xff] %v10624_v36  ;;  %13165 = vst [vmem:[#allocation54_spill] sm:$0xff] %v10634_v40  ;;  %v10638_v61 = vmul.f32 %v13166_v16, %v10589_v37  ;;  %v13170_v34 = vrot.slane %v10358_v10, 2  ;;  %v10653_v39 = vstv %s10532_s25  ;;  %v10657_v36 = vmul.f32 %v13172_v9, %v10545_v54  ;;  %v13173_v38 = vld [vmem:[#allocation74_spill] sm:$0xff]  ;;  %v13178_v10 = vld [vmem:[#allocation79_spill] sm:$0xff]  ;;  %s5324_s25 = smov 1  }
 0x2e8   : > { %4068 = vrot.lane.b32.xlu1 %v13169_v63, %s5322_s8  ;;  %v10661_v16 = vadd.f32 %v13173_v38, %v10438_v15  ;;  %v10665_v18 = vadd.f32 %v13173_v38, %v10462_v35  ;;  %v13174_v63 = vld [vmem:[#allocation22_spill] sm:$0xff]  ;;  %v10679_v15 = vpop.permute.xlu1 %2857  ;;  %v10682_v35 = vmul.f32 %v5136_v47, %v10641_v45  ;;  %v10686_v38 = vmul.f32 %v10456_v12, %v10641_v45 }
 0x2e9   : > { %13167 = vst [vmem:[#allocation89_spill] sm:$0xff] %v10638_v61  ;;  %v10650_v14 = vsel %vm2914_vm2, %v13170_v34, %v4150_v56  ;;  %4044 = vrot.lane.b32.xlu0 %v13174_v63, %s5322_s8  ;;  %v13175_v34 = vld [vmem:[#allocation55_spill] sm:$0xff]  ;;  %13176 = vst [vmem:[#allocation111_spill] sm:$0xff] %v10679_v15  ;;  %v10688_v63 = vpop.permute.xlu0 %2855  ;;  %v10694_v24 = vmul.f32 %v10641_v45, %v13178_v10  ;;  %v10706_v12 = vadd.f32 %v13182_v33, %v10512_v55  ;;  %v13184_v56 = vld [vmem:[#allocation104_spill] sm:$0xff] }
 0x2ea   : > { %13171 = vst [vmem:[#allocation122_spill] sm:$0xff] %v10650_v14  ;;  %v10673_v6 = vadd.f32 %v13175_v34, %v10377_v5  ;;  %v10677_v13 = vadd.f32 %v13175_v34, %v10381_v7  ;;  %13177 = vst [vmem:[#allocation63_spill] sm:$0xff] %v10688_v63  ;;  %v13180_v7 = vld [vmem:[#allocation132_spill] sm:$0xff]  ;;  %v10702_v14 = vadd.f32 %v13182_v33, %v10508_v26  ;;  %v13185_v5 = vld [vmem:[#allocation46_spill] sm:$0xff]  ;;  %v13190_v33 = vrot.slane %v10604_v60, 2 }
 0x2eb   : > { %13179 = vst [vmem:[#allocation74_spill] sm:$0xff] %v10694_v24  ;;  %v10698_v34 = vmul.f32 %v13180_v7, %v10641_v45  ;;  %13183 = vst [vmem:[#allocation55_spill] sm:$0xff] %v10706_v12  ;;  %v10712_v63 = vmul.f32 %v10653_v39, %v13185_v5  ;;  %v10714_v10 = vld [vmem:[#allocation2 + $0x200] sm:$0xfe]  ;;  %v13189_v26 = vld [vmem:[#allocation129_spill] sm:$0xff]  ;;  %v13191_v55 = vrot.slane %v10634_v40, 2  ;;  %v10747_v40 = vadd.f32 %v10346_v27, %v10425_v4 }
 0x2ec   : > { %4072 = vrot.lane.b32.xlu1 %v13184_v56, %s5322_s8  ;;  %13187 = vst [vmem:[#allocation87_spill] sm:$0xff] %v10714_v10  ;;  %v10718_v7 = vmul.f32 %v10714_v10, %v10653_v39  ;;  %v13193_v5 = vrot.slane %v10608_v51, 2  ;;  %v13194_v15 = vrot.slane %v10638_v61, 2  ;;  %v10739_v10 = vmul.f32 %v5136_v47, %v10653_v39  ;;  %v13199_v4 = vld [vmem:[#allocation124_spill] sm:$0xff] }
 0x2ed   : > { %13181 = vst [vmem:[#allocation22_spill] sm:$0xff] %v10698_v34  ;;  %13186 = vst [vmem:[#allocation79_spill] sm:$0xff] %v10712_v63  ;;  %4070 = vrot.lane.b32.xlu0 %v13189_v26, %s5322_s8  ;;  %v10729_v56 = vsel %vm2914_vm2, %v13191_v55, %v13190_v33  ;;  %v10743_v26 = vmul.f32 %v10494_v29, %v10653_v39  ;;  %v10749_v33 = vpop.permute.xlu1 %2879  ;;  %v3445_v55 = vrot.slane %v10682_v35, 2  ;;  %s10755_s8 = sld [smem:[#allocation9 + $0x95]]  ;;  %v10759_v29 = vpop.permute.xlu0 %2859  ;;  %v13198_v35 = vld [vmem:[#allocation88_spill] sm:$0xff] }
 0x2ee   : > { %13188 = vst [vmem:[#allocation104_spill] sm:$0xff] %v10718_v7  ;;  %13192 = vst [vmem:[#allocation46_spill] sm:$0xff] %v10729_v56  ;;  %v10736_v12 = vsel %vm2914_vm2, %v13194_v15, %v13193_v5  ;;  %v13197_v15 = vld [vmem:[#allocation82_spill] sm:$0xff]  ;;  %v2769_v47 = vadd.f32 %v10346_v27, %v10429_v2  ;;  %v4176_v56 = vrot.slane %v10657_v36, 2  ;;  %v3322_v27 = vmul.f32 %v10292_v8, %v10589_v37 }
 0x2ef   : > { %13195 = vst [vmem:[#allocation129_spill] sm:$0xff] %v10736_v12  ;;  %13196 = vst [vmem:[#allocation135_spill] sm:$0xff] %v10749_v33  ;;  %v4171_v5 = vmul.f32 %v13197_v15, %v10545_v54  ;;  %v12084_v12 = vrot.slane %v10694_v24, 2  ;;  %v3321_v33 = vmul.f32 %v10589_v37, %v10210_v62  ;;  %v10774_v2 = vadd.f32 %v10383_v32, %v10557_v58 }
 0x2f0   : > { %4098 = vrot.lane.b32.xlu1 %v13198_v35, %s5323_s13  ;;  %v13200_v36 = vrot.slane %v13199_v4, 2  ;;  %v3559_v35 = vrot.slane %v10739_v10, 2  ;;  %v3561_v61 = vrot.slane %v10743_v26, 2  ;;  %v3435_v54 = vmul.f32 %v10641_v45, %v10256_v25 }
 0x2f1   : > { %v10785_v62 = vadd.f32 %v10383_v32, %v10561_v43  ;;  %v10787_v37 = vpop.permute.xlu1 %2883  ;;  %v10792_v58 = vsel %vm2914_vm2, %v12084_v12, %v3445_v55  ;;  %v13202_v4 = vrot.slane %v10686_v38, 2  ;;  %v13203_v10 = vrot.slane %v10698_v34, 2  ;;  %v10805_v43 = vpop.permute.xlu0 %2881 }
 0x2f2   : > { %4096 = vrot.lane.b32.xlu0 %v13200_v36, %s5323_s13  ;;  %13201 = vst [vmem:[#allocation82_spill] sm:$0xff] %v10792_v58  ;;  %v4178_v36 = vrot.slane %v4171_v5, 2  ;;  %v2772_v25 = vadd.f32 %v10398_v46, %v10466_v1  ;;  %v2773_v32 = vadd.f32 %v10398_v46, %v10484_v17  ;;  %v13205_v24 = vrot.slane %v10586_v23, 2 }
 0x2f3   : > { %v10799_v26 = vsel %vm2914_vm2, %v13203_v10, %v13202_v4  ;;  %v3436_v34 = vmul.f32 %v10314_v44, %v10641_v45  ;;  %v13206_v4 = vld [vmem:[#allocation39_spill] sm:$0xff]  ;;  %v3335_v10 = vrot.slane %v3321_v33, 2  ;;  %v3337_v1 = vrot.slane %v3322_v27, 2 }
 0x2f4   : > { %13204 = vst [vmem:[#allocation88_spill] sm:$0xff] %v10799_v26  ;;  %v10810_v12 = vsel %vm2914_vm2, %v13205_v24, %v4176_v56  ;;  %v13207_v5 = vrot.slane %v13206_v4, 2  ;;  %v3549_v46 = vmul.f32 %v10653_v39, %v10274_v22  ;;  %v4196_v17 = vstv %s10720_s30  ;;  %v13208_v26 = vld [vmem:[#allocation38_spill] sm:$0xff]  ;;  %s5007_s30 = sld [smem:[#allocation10 + $0x1]] }
 0x2f5   : > { %v13209_v24 = vrot.slane %v10712_v63, 2  ;;  %v13210_v45 = vrot.slane %v10718_v7, 2  ;;  %v3449_v4 = vrot.slane %v3435_v54, 2  ;;  %v3550_v33 = vmul.f32 %v10502_v31, %v10653_v39  ;;  %v13214_v63 = vld [vmem:[#allocation60_spill] sm:$0xff] }
 0x2f6   : > { %4124 = vrot.lane.b32.xlu1 %v13207_v5, %s5323_s13  ;;  %4100 = vrot.lane.b32.xlu0 %v13208_v26, %s5323_s13  ;;  %v10836_v22 = vadd.f32 %v10440_v59, %v10616_v57  ;;  %v10840_v27 = vadd.f32 %v10440_v59, %v10628_v11  ;;  %v10842_v26 = vpop.permute.xlu1 %3594  ;;  %v10845_v5 = vsel %vm2914_vm2, %v4176_v56, %v4178_v36  ;;  %v13211_v11 = vld [vmem:[#allocation24_spill] sm:$0xff]  ;;  %v13212_v56 = vrot.slane %v10604_v60, 2 }
 0x2f7   : > { %v10825_v58 = vsel %vm2914_vm2, %v13209_v24, %v3559_v35  ;;  %v10830_v44 = vsel %vm2914_vm2, %v13210_v45, %v3561_v61  ;;  %v4224_v24 = vstv %s10755_s8  ;;  %v2794_v54 = vadd.f32 %v10451_v41, %v10536_v52  ;;  %v10852_v45 = vpop.permute.xlu0 %3592  ;;  %s5011_s8 = sld [smem:[#allocation10 + $0x2]] }
 0x2f8   : > { %v2795_v39 = vadd.f32 %v10451_v41, %v10540_v53  ;;  %v10855_v57 = vmul.f32 %v10582_v20, %v4196_v17  ;;  %v4198_v59 = vmul.f32 %v13172_v9, %v4196_v17  ;;  %v10863_v36 = vsel %vm2914_vm2, %v13212_v56, %v3335_v10 }
 0x2f9   : > { %v13213_v52 = vrot.slane %v10608_v51, 2  ;;  %v3451_v41 = vrot.slane %v3436_v34, 2  ;;  %v3563_v53 = vrot.slane %v3549_v46, 2  ;;  %v10875_v7 = vsel %vm2914_vm2, %v3445_v55, %v3449_v4 }
 0x2fa   : > { %4128 = vrot.lane.b32.xlu1 %v13211_v11, %s5323_s13  ;;  %4126 = vrot.lane.b32.xlu0 %v13214_v63, %s5323_s13  ;;  %13215 = vst [vmem:[#allocation124_spill] sm:$0xff] %v10875_v7  ;;  %v3565_v11 = vrot.slane %v3550_v33, 2  ;;  %v10878_v60 = vmul.f32 %v10582_v20, %v4224_v24  ;;  %v4199_v10 = vmul.f32 %v13197_v15, %v4196_v17  ;;  %v12091_v20 = vrot.slane %v10855_v57, 2 }
 0x2fb   : > { %v10868_v31 = vsel %vm2914_vm2, %v13213_v52, %v3337_v1  ;;  %v10883_v51 = vadd.f32 %v10498_v30, %v10673_v6  ;;  %v10887_v34 = vadd.f32 %v10498_v30, %v10677_v13  ;;  %v2840_v63 = vadd.f32 %v10547_v19, %v10747_v40  ;;  %v10892_v1 = vpop.permute.xlu1 %3620  ;;  %v10894_v46 = vpop.permute.xlu0 %3596 }
 0x2fc   : > { %v2841_v55 = vadd.f32 %v10547_v19, %v2769_v47  ;;  %v4204_v17 = vrot.slane %v4198_v59, 2  ;;  %v4226_v4 = vmul.f32 %v13172_v9, %v4224_v24  ;;  %v4227_v6 = vmul.f32 %v13197_v15, %v4224_v24  ;;  %v13222_v24 = vld [vmem:[#allocation121_spill] sm:$0xff] }
 0x2fd   : > { %v2816_v13 = vadd.f32 %v10514_v49, %v10593_v0  ;;  %v2817_v30 = vadd.f32 %v10514_v49, %v10612_v48  ;;  %v13216_v19 = vrot.slane %v10686_v38, 2  ;;  %v10913_v9 = vsel %vm2914_vm2, %v3559_v35, %v3563_v53  ;;  %v13220_v48 = vld [vmem:[#allocation107_spill] sm:$0xff] }
 0x2fe   : > { %4154 = vrot.lane.b32.xlu1 %v10476_v50, %s5323_s13  ;;  %13217 = vst [vmem:[#allocation39_spill] sm:$0xff] %v10913_v9  ;;  %v2844_v15 = vadd.f32 %v10618_v3, %v2772_v25  ;;  %v13218_v47 = vrot.slane %v10354_v21, 2  ;;  %v10920_v0 = vsel %vm2914_vm2, %v3561_v61, %v3565_v11  ;;  %v12090_v49 = vrot.slane %v10878_v60, 2 }
 0x2ff   : > { %v10910_v40 = vsel %vm2914_vm2, %v13216_v19, %v3451_v41  ;;  %13219 = vst [vmem:[#allocation38_spill] sm:$0xff] %v10920_v0  ;;  %v4206_v50 = vrot.slane %v4199_v10, 2  ;;  %v13221_v38 = vrot.slane %v13220_v48, 2  ;;  %v13223_v59 = vrot.slane %v13222_v24, 2  ;;  %v10930_v21 = vpop.permute.xlu1 %3624  ;;  %v10934_v52 = vpop.permute.xlu0 %3622 }
 0x300   : > { %4152 = vrot.lane.b32.xlu0 %v13218_v47, %s5323_s13  ;;  %v2820_v25 = vadd.f32 %v10563_v28, %v10661_v16  ;;  %v2845_v56 = vadd.f32 %v10618_v3, %v2773_v32  ;;  %v2821_v61 = vadd.f32 %v10563_v28, %v10665_v18  ;;  %v4205_v41 = vsel %vm2914_vm2, %v12091_v20, %v4204_v17  ;;  %v13225_v3 = vld [vmem:[#allocation111_spill] sm:$0xff]  ;;  %v13227_v18 = vld [vmem:[#allocation81_spill] sm:$0xff] }
 0x301   : > { %v2931_v33 = vadd.f32 %v13221_v38, %v2840_v63  ;;  %v2932_v35 = vadd.f32 %v13223_v59, %v2841_v55  ;;  %v4232_v53 = vrot.slane %v4226_v4, 2  ;;  %v4234_v11 = vrot.slane %v4227_v6, 2  ;;  %v13224_v63 = vld [vmem:[#allocation55_spill] sm:$0xff] }
 0x302   : > { %v2842_v10 = vadd.f32 %v10630_v42, %v10702_v14  ;;  %v2843_v16 = vadd.f32 %v10630_v42, %v13224_v63  ;;  %v2866_v32 = vadd.f32 %v13225_v3, %v2794_v54  ;;  %v13226_v55 = vrot.slane %v10586_v23, 2  ;;  %v13228_v6 = vld [vmem:[#allocation63_spill] sm:$0xff]  ;;  %v13229_v14 = vld [vmem:[#allocation122_spill] sm:$0xff]  ;;  %v13230_v54 = vld [vmem:[#allocation105_spill] sm:$0xff] }
 0x303   : > { %v10948_v28 = vstv %s10870_s6  ;;  %v2935_v19 = vadd.f32 %v13227_v18, %v2844_v15  ;;  %v2867_v4 = vadd.f32 %v13225_v3, %v2795_v39  ;;  %v2864_v47 = vadd.f32 %v13228_v6, %v10774_v2  ;;  %v13232_v23 = vld [vmem:[#allocation102_spill] sm:$0xff]  ;;  %v13234_v63 = vld [vmem:[#allocation112_spill] sm:$0xff]  ;;  %v10964_v39 = vpop.permute.xlu1 %3650  ;;  %v10966_v3 = vpop.permute.xlu0 %3648  ;;  %s11673_s6 = scalar_lea.vmem [#allocation12], %s5021_s9  ;;  %s5022_s9 = smul.u32 768, %s5374_s19 }
 0x304   : > { %4180 = vrot.lane.b32.xlu1 %v13226_v55, %s5323_s13  ;;  %4156 = vrot.lane.b32.xlu0 %v13229_v14, %s5323_s13  ;;  %v4207_v42 = vsel %vm2914_vm2, %v4204_v17, %v4206_v50  ;;  %v13231_v48 = vrot.slane %v13230_v54, 2  ;;  %v13233_v24 = vrot.slane %v13232_v23, 2  ;;  %v2936_v55 = vadd.f32 %v13234_v63, %v2845_v56  ;;  %13235 = vst [vmem:[#allocation24_spill] sm:$0xff] %v10966_v3  ;;  %v10976_v50 = vld [vmem:[#allocation2 + $0xe0] sm:$0xfe]  ;;  %v13237_v18 = vld [vmem:[#allocation48_spill] sm:$0xff] }
 0x305   : > { %v2865_v15 = vadd.f32 %v13228_v6, %v10785_v62  ;;  %v10969_v2 = vsel %vm2914_vm2, %v4232_v53, %v4234_v11  ;;  %v10974_v17 = vsel %vm2914_vm2, %v12090_v49, %v4232_v53  ;;  %v13236_v62 = vld [vmem:[#allocation50_spill] sm:$0xff]  ;;  %v2934_v6 = vadd.f32 %v13237_v18, %v2843_v16  ;;  %v13238_v14 = vld [vmem:[#allocation91_spill] sm:$0xff]  ;;  %s4698_s19 = scalar_lea.sflag [#allocation5], %s5535_s0 }
 0x306   : > { %v3045_v38 = vadd.f32 %v13231_v48, %v2931_v33  ;;  %v3046_v59 = vadd.f32 %v13233_v24, %v2932_v35  ;;  %v10980_v33 = vmul.f32 %v10976_v50, %v10948_v28  ;;  %v10983_v35 = vstv %s10899_s11  ;;  %v13239_v54 = vld [vmem:[#allocation135_spill] sm:$0xff]  ;;  %v13242_v49 = vld [vmem:[#allocation126_spill] sm:$0xff]  ;;  %s4711_s11 = sshll.u32 %s11673_s6, 4  ;;  %s11705_s11 = int_to_ptr.vmem [resolvable:$true] %s4711_s11 }
 0x307   : > { %v2933_v56 = vadd.f32 %v13236_v62, %v2842_v10  ;;  %v2969_v11 = vadd.f32 %v13238_v14, %v2866_v32  ;;  %v2888_v48 = vadd.f32 %v13239_v54, %v2816_v13  ;;  %v13240_v53 = vld [vmem:[#allocation123_spill] sm:$0xff]  ;;  %v13243_v20 = vrot.slane %v13242_v49, 2  ;;  %v13244_v10 = vld [vmem:[#allocation110_spill] sm:$0xff]  ;;  %v13246_v13 = vld [vmem:[#allocation128_spill] sm:$0xff]  ;;  %v11009_v49 = vpop.permute.xlu1 %3676 }
 0x308   : > { %4184 = vrot.lane.b32.xlu1 %v10845_v5, %s5323_s13  ;;  %v3049_v23 = vadd.f32 %v13240_v53, %v2935_v19  ;;  %v13241_v24 = vld [vmem:[#allocation23_spill] sm:$0xff]  ;;  %v2889_v7 = vadd.f32 %v13239_v54, %v2817_v30  ;;  %4182 = vrot.lane.b32.xlu0 %v10810_v12, %s5323_s13  ;;  %v13245_v16 = vrot.slane %v13244_v10, 2  ;;  %v13247_v62 = vrot.slane %v13246_v13, 2  ;;  %v13248_v5 = vld [vmem:[#allocation53_spill] sm:$0xff]  ;;  %v11015_v30 = vpop.permute.xlu0 %3652  ;;  %v13254_v10 = vld [vmem:[#allocation130_spill] sm:$0xff] }
 0x309   : > { %v2970_v63 = vadd.f32 %v13241_v24, %v2867_v4  ;;  %v2967_v9 = vadd.f32 %v13243_v20, %v2864_v47  ;;  %v3050_v19 = vadd.f32 %v13248_v5, %v2936_v55  ;;  %v13249_v14 = vld [vmem:[#allocation127_spill] sm:$0xff]  ;;  %v2868_v20 = vadd.f32 %v10759_v29, %v10836_v22  ;;  %13251 = vst [vmem:[#allocation60_spill] sm:$0xff] %v11015_v30  ;;  %v11017_v47 = vld [vmem:[#allocation2 + $0xf8] sm:$0xff]  ;;  %v13252_v55 = vld [vmem:[#allocation52_spill] sm:$0xff] }
 0x30a   : > { %v11000_v32 = vadd.f32 %v13245_v16, %v3045_v38  ;;  %v11004_v18 = vadd.f32 %v13247_v62, %v3046_v59  ;;  %v13250_v4 = vrot.slane %v13249_v14, 2  ;;  %v2869_v12 = vadd.f32 %v10759_v29, %v10840_v27  ;;  %v13253_v54 = vld [vmem:[#allocation75_spill] sm:$0xff]  ;;  %v13255_v22 = vld [vmem:[#allocation93_spill] sm:$0xff]  ;;  %v13261_v59 = vld [vmem:[#allocation106_spill] sm:$0xff] }
 0x30b   : > { %v11021_v38 = vmul.f32 %v11017_v47, %v10948_v28  ;;  %v3048_v24 = vadd.f32 %v13253_v54, %v2934_v6  ;;  %v3083_v16 = vadd.f32 %v13254_v10, %v2969_v11  ;;  %v13256_v13 = vrot.slane %v13255_v22, 2  ;;  %v13257_v29 = vld [vmem:[#allocation59_spill] sm:$0xff]  ;;  %v13258_v5 = vld [vmem:[#allocation41_spill] sm:$0xff]  ;;  %v11048_v10 = vpop.permute.xlu1 %3680  ;;  %v13270_v22 = vld [vmem:[#allocation64_spill] sm:$0xff] }
 0x30c   : > { %v2968_v53 = vadd.f32 %v13250_v4, %v2865_v15  ;;  %v3047_v15 = vadd.f32 %v13252_v55, %v2933_v56  ;;  %4210 = vrot.lane.b32.xlu1 %v4205_v41, %s5323_s13  ;;  %v11031_v27 = vadd.f32 %v13257_v29, %v3049_v23  ;;  %v3084_v14 = vadd.f32 %v13258_v5, %v2970_v63  ;;  %v13259_v4 = vld [vmem:[#allocation78_spill] sm:$0xff]  ;;  %v13264_v11 = vld [vmem:[#allocation113_spill] sm:$0xff] }
 0x30d   : > { %v3003_v62 = vadd.f32 %v13256_v13, %v2888_v48  ;;  %v13260_v30 = vrot.slane %v13259_v4, 2  ;;  %v13262_v3 = vrot.slane %v13261_v59, 2  ;;  %v13263_v6 = vrot.slane %v10855_v57, 2  ;;  %v13265_v48 = vld [vmem:[#allocation71_spill] sm:$0xff]  ;;  %v11058_v59 = vpop.permute.xlu0 %3678  ;;  %v13272_v29 = vld [vmem:[#allocation101_spill] sm:$0xff] }
 0x30e   : > { %v11042_v55 = vadd.f32 %v13264_v11, %v3050_v19  ;;  %v13266_v41 = vrot.slane %v13265_v48, 2  ;;  %v2892_v23 = vadd.f32 %v10787_v37, %v2820_v25  ;;  %v2893_v63 = vadd.f32 %v10787_v37, %v2821_v61  ;;  %v13271_v61 = vld [vmem:[#allocation32_spill] sm:$0xff]  ;;  %v13278_v11 = vld [vmem:[#allocation31_spill] sm:$0xff] }
 0x30f   : > { %v3081_v0 = vadd.f32 %v13260_v30, %v2967_v9  ;;  %v3004_v56 = vadd.f32 %v13262_v3, %v2889_v7  ;;  %4208 = vrot.lane.b32.xlu0 %v13263_v6, %s5323_s13  ;;  %v13267_v9 = vld [vmem:[#allocation72_spill] sm:$0xff]  ;;  %v13268_v3 = vld [vmem:[#allocation69_spill] sm:$0xff]  ;;  %v2890_v57 = vadd.f32 %v10805_v43, %v10883_v51  ;;  %v2891_v19 = vadd.f32 %v10805_v43, %v10887_v34  ;;  %v13275_v51 = vld [vmem:[#allocation43_spill] sm:$0xff] }
 0x310   : > { %v3082_v54 = vadd.f32 %v13266_v41, %v2968_v53  ;;  %v2971_v7 = vadd.f32 %v13267_v9, %v2868_v20  ;;  %v2972_v30 = vadd.f32 %v13268_v3, %v2869_v12  ;;  %v13269_v53 = vld [vmem:[#allocation115_spill] sm:$0xff]  ;;  %v3162_v37 = vadd.f32 %v13270_v22, %v3048_v24  ;;  %v13276_v43 = vld [vmem:[#allocation96_spill] sm:$0xff]  ;;  %v13282_v9 = vld [vmem:[#allocation37_spill] sm:$0xff]  ;;  %v11083_v22 = vpop.permute.xlu1 %3706 }
 0x311   : > { %v3161_v25 = vadd.f32 %v13269_v53, %v3047_v15  ;;  %v11063_v13 = vadd.f32 %v13271_v61, %v3083_v16  ;;  %v13273_v5 = vrot.slane %v13272_v29, 2  ;;  %v13274_v12 = vrot.slane %v10878_v60, 2  ;;  %v13280_v16 = vld [vmem:[#allocation57_spill] sm:$0xff]  ;;  %v13283_v60 = vld [vmem:[#allocation100_spill] sm:$0xff]  ;;  %13284 = vst [vmem:[#allocation107_spill] sm:$0xff] %v11083_v22 }
 0x312   : > { %v11071_v4 = vadd.f32 %v13275_v51, %v3084_v14  ;;  %v13277_v34 = vrot.slane %v13276_v43, 2  ;;  %v13279_v15 = vrot.slane %v13278_v11, 2  ;;  %v4260_v24 = vrot.slane %v11021_v38, 2  ;;  %v11085_v14 = vld [vmem:[#allocation2 + $0x110] sm:$0x1]  ;;  %v13286_v29 = vld [vmem:[#allocation77_spill] sm:$0xff] }
 0x313   : > { %v3117_v20 = vadd.f32 %v13273_v5, %v3003_v62  ;;  %4236 = vrot.lane.b32.xlu1 %v13274_v12, %s5323_s13  ;;  %4212 = vrot.lane.b32.xlu0 %v4207_v42, %s5323_s13  ;;  %v13281_v41 = vrot.slane %v13280_v16, 2  ;;  %v3007_v3 = vadd.f32 %v13282_v9, %v2892_v23  ;;  %v3008_v53 = vadd.f32 %v13283_v60, %v2893_v63  ;;  %v13285_v61 = vld [vmem:[#allocation80_spill] sm:$0xff]  ;;  %v13287_v5 = vld [vmem:[#allocation117_spill] sm:$0xff] }
 0x314   : > { %v3195_v6 = vadd.f32 %v13277_v34, %v3081_v0  ;;  %v3118_v48 = vadd.f32 %v13279_v15, %v3004_v56  ;;  %v4255_v0 = vmul.f32 %v11085_v14, %v10948_v28  ;;  %v3085_v56 = vadd.f32 %v13285_v61, %v2971_v7  ;;  %v13288_v12 = vld [vmem:[#allocation49_spill] sm:$0xff]  ;;  %v13289_v23 = vld [vmem:[#allocation116_spill] sm:$0xff]  ;;  %v11122_v60 = vpop.permute.xlu1 %3732 }
 0x315   : > { %v3196_v62 = vadd.f32 %v13281_v41, %v3082_v54  ;;  %v3086_v42 = vadd.f32 %v13286_v29, %v2972_v30  ;;  %v3005_v38 = vadd.f32 %v13287_v5, %v2890_v57  ;;  %v3006_v51 = vadd.f32 %v13288_v12, %v2891_v19  ;;  %v11093_v54 = vpop.permute.xlu0 %3704  ;;  %v13291_v34 = vld [vmem:[#allocation20_spill] sm:$0xff]  ;;  %v13293_v7 = vld [vmem:[#allocation73_spill] sm:$0xff]  ;;  %v13299_v12 = vld [vmem:[#allocation70_spill] sm:$0xff] }
 0x316   : > { %v13290_v43 = vrot.slane %v13289_v23, 2  ;;  %v3275_v11 = vadd.f32 %v13291_v34, %v3161_v25  ;;  %v13292_v15 = vld [vmem:[#allocation92_spill] sm:$0xff]  ;;  %v4281_v28 = vmul.f32 %v10976_v50, %v10983_v35  ;;  %v13294_v30 = vrot.slane %v13293_v7, 2  ;;  %v13297_v9 = vld [vmem:[#allocation45_spill] sm:$0xff] }
 0x317   : > { %v3276_v16 = vadd.f32 %v13292_v15, %v3162_v37  ;;  %4240 = vrot.lane.b32.xlu1 %v10969_v2, %s5323_s13  ;;  %4238 = vrot.lane.b32.xlu0 %v10974_v17, %s5323_s13  ;;  %v13295_v19 = vrot.slane %v10980_v33, 2  ;;  %v4282_v25 = vmul.f32 %v11017_v47, %v10983_v35  ;;  %v4283_v2 = vmul.f32 %v11085_v14, %v10983_v35  ;;  %v13296_v37 = vld [vmem:[#allocation18_spill] sm:$0xff]  ;;  %v13298_v29 = vld [vmem:[#allocation84_spill] sm:$0xff] }
 0x318   : > { %v11097_v63 = vadd.f32 %v13290_v43, %v3117_v20  ;;  %v11107_v57 = vadd.f32 %v13294_v30, %v3118_v48  ;;  %v3121_v41 = vadd.f32 %v13296_v37, %v3007_v3  ;;  %v3122_v48 = vadd.f32 %v13297_v9, %v3008_v53  ;;  %v13300_v43 = vld [vmem:[#allocation109_spill] sm:$0xff]  ;;  %v13302_v35 = vld [vmem:[#allocation108_spill] sm:$0xff]  ;;  %v13304_v3 = vld [vmem:[#allocation62_spill] sm:$0xff] }
 0x319   : > { %v4261_v20 = vsel %vm2914_vm2, %v13295_v19, %v4260_v24  ;;  %v4262_v61 = vrot.slane %v4255_v0, 2  ;;  %v4308_v17 = vstv %s11050_s7  ;;  %v3119_v5 = vadd.f32 %v13298_v29, %v3005_v38  ;;  %v11133_v19 = vpop.permute.xlu0 %3708  ;;  %v13305_v37 = vld [vmem:[#allocation86_spill] sm:$0xff]  ;;  %v13306_v0 = vld [vmem:[#allocation131_spill] sm:$0xff] }
 0x31a   : > { %v3120_v23 = vadd.f32 %v13299_v12, %v3006_v51  ;;  %v13301_v34 = vrot.slane %v13300_v43, 2  ;;  %v13303_v7 = vrot.slane %v13302_v35, 2  ;;  %v3199_v53 = vadd.f32 %v13304_v3, %v3085_v56  ;;  %v13308_v43 = vld [vmem:[#allocation51_spill] sm:$0xff] }
 0x31b   : > { %v3389_v9 = vadd.f32 %v13305_v37, %v3275_v11  ;;  %v3390_v22 = vadd.f32 %v13306_v0, %v3276_v16  ;;  %4266 = vrot.lane.b32.xlu1 %v4261_v20, %s5323_s13  ;;  %v4287_v38 = vrot.slane %v4281_v28, 2  ;;  %v13307_v51 = vrot.slane %v10980_v33, 2  ;;  %v13310_v16 = vld [vmem:[#allocation30_spill] sm:$0xff]  ;;  %v11153_v28 = vpop.permute.xlu1 %3736  ;;  %v13312_v20 = vld [vmem:[#allocation47_spill] sm:$0xff] }
 0x31c   : > { %v3273_v15 = vadd.f32 %v13301_v34, %v11000_v32  ;;  %v3274_v30 = vadd.f32 %v13303_v7, %v11004_v18  ;;  %v4288_v32 = vrot.slane %v4282_v25, 2  ;;  %v4290_v29 = vrot.slane %v4283_v2, 2  ;;  %v13309_v34 = vld [vmem:[#allocation44_spill] sm:$0xff]  ;;  %13311 = vst [vmem:[#allocation121_spill] sm:$0xff] %v11153_v28  ;;  %v13316_v7 = vld [vmem:[#allocation58_spill] sm:$0xff]  ;;  %v13319_v0 = vld [vmem:[#allocation103_spill] sm:$0xff] }
 0x31d   : > { %4264 = vrot.lane.b32.xlu0 %v13307_v51, %s5323_s13  ;;  %v4309_v12 = vmul.f32 %v10976_v50, %v4308_v17  ;;  %v11144_v18 = vmul.f32 %v11017_v47, %v4308_v17  ;;  %v3200_v56 = vadd.f32 %v13308_v43, %v3086_v42  ;;  %v11148_v11 = vadd.f32 %v13309_v34, %v3121_v41  ;;  %v13313_v47 = vld [vmem:[#allocation119_spill] sm:$0xff]  ;;  %v11168_v37 = vpop.permute.xlu0 %3734 }
 0x31e   : > { %v11151_v35 = vadd.f32 %v13310_v16, %v3122_v48  ;;  %v4263_v33 = vsel %vm2914_vm2, %v4260_v24, %v4262_v61  ;;  %v11159_v50 = vadd.f32 %v13312_v20, %v3119_v5  ;;  %v11162_v25 = vadd.f32 %v13313_v47, %v3120_v23  ;;  %v13314_v42 = vld [vmem:[#allocation83_spill] sm:$0xff]  ;;  %13318 = vst [vmem:[#allocation55_spill] sm:$0xff] %v11168_v37  ;;  %v13320_v24 = vld [vmem:[#allocation65_spill] sm:$0xff]  ;;  %v13348_v37 = vld [vmem:[#allocation28_spill] sm:$0xff] }
 0x31f   : > { %v13315_v2 = vrot.slane %v13314_v42, 2  ;;  %v13317_v3 = vrot.slane %v13316_v7, 2  ;;  %v3503_v51 = vadd.f32 %v13319_v0, %v3389_v9  ;;  %v3504_v61 = vadd.f32 %v13320_v24, %v3390_v22  ;;  %v13321_v43 = vld [vmem:[#allocation35_spill] sm:$0xff]  ;;  %v13323_v5 = vld [vmem:[#allocation85_spill] sm:$0xff]  ;;  %4292 = vrot.lane.b32.xlu1 %v4287_v38, %s5323_s13  ;;  %v13326_v22 = vld [vmem:[#allocation66_spill] sm:$0xff] }
 0x320   : > { %v13322_v34 = vrot.slane %v13321_v43, 2  ;;  %v13324_v20 = vrot.slane %v13323_v5, 2  ;;  %v4291_v23 = vsel %vm2914_vm2, %v4288_v32, %v4290_v29  ;;  %v4336_v47 = vstv %s11118_s29  ;;  %v13325_v9 = vld [vmem:[#allocation99_spill] sm:$0xff]  ;;  %v13329_v0 = vld [vmem:[#allocation56_spill] sm:$0xff] }
 0x321   : > { %v3387_v41 = vadd.f32 %v13315_v2, %v3273_v15  ;;  %v3388_v48 = vadd.f32 %v13317_v3, %v3274_v30  ;;  %4268 = vrot.lane.b32.xlu0 %v4263_v33, %s5323_s13  ;;  %v4315_v15 = vrot.slane %v4309_v12, 2  ;;  %v4316_v30 = vrot.slane %v11144_v18, 2  ;;  %v13327_v12 = vld [vmem:[#allocation21_spill] sm:$0xff]  ;;  %v11199_v43 = vpop.permute.xlu0 %3760 }
 0x322   : > { %v3309_v16 = vadd.f32 %v13322_v34, %v3195_v6  ;;  %v3310_v28 = vadd.f32 %v13324_v20, %v3196_v62  ;;  %v3277_v42 = vadd.f32 %v13325_v9, %v11031_v27  ;;  %v3278_v2 = vadd.f32 %v13326_v22, %v11042_v55  ;;  %v11185_v6 = vpop.permute.xlu1 %3762  ;;  %13331 = vst [vmem:[#allocation111_spill] sm:$0xff] %v11199_v43  ;;  %v13332_v55 = vld [vmem:[#allocation27_spill] sm:$0xff]  ;;  %v13338_v20 = vld [vmem:[#allocation97_spill] sm:$0xff] }
 0x323   : > { %v4289_v62 = vsel %vm2914_vm2, %v4287_v38, %v4288_v32  ;;  %v4311_v7 = vmul.f32 %v11085_v14, %v4308_v17  ;;  %v11190_v33 = vadd.f32 %v10842_v26, %v3503_v51  ;;  %v11193_v29 = vadd.f32 %v10842_v26, %v3504_v61  ;;  %v13334_v32 = vld [vmem:[#allocation40_spill] sm:$0xff]  ;;  %v13336_v51 = vld [vmem:[#allocation90_spill] sm:$0xff]  ;;  %4296 = vrot.lane.b32.xlu1 %v4291_v23, %s5323_s13 }
 0x324   : > { %v13328_v18 = vrot.slane %v13327_v12, 2  ;;  %v13330_v27 = vrot.slane %v13329_v0, 2  ;;  %v13333_v34 = vrot.slane %v13332_v55, 2  ;;  %v13335_v14 = vrot.slane %v13334_v32, 2  ;;  %v13337_v26 = vld [vmem:[#allocation94_spill] sm:$0xff] }
 0x325   : > { %v3313_v5 = vadd.f32 %v13336_v51, %v3199_v53  ;;  %v4337_v61 = vmul.f32 %v13337_v26, %v4336_v47  ;;  %4294 = vrot.lane.b32.xlu0 %v4289_v62, %s5323_s13  ;;  %v4338_v9 = vmul.f32 %v13338_v20, %v4336_v47  ;;  %v13340_v53 = vld [vmem:[#allocation33_spill] sm:$0xff]  ;;  %v4364_v0 = vstv %s11156_s14  ;;  %v13342_v55 = vld [vmem:[#allocation98_spill] sm:$0xff]  ;;  %s11703_s14 = scalar_lea.hbm %s11756_s4, %s5022_s9 }
 0x326   : > { %v3501_v3 = vadd.f32 %v13328_v18, %v3387_v41  ;;  %v3502_v24 = vadd.f32 %v13330_v27, %v3388_v48  ;;  %v3423_v38 = vadd.f32 %v13333_v34, %v3309_v16  ;;  %v3424_v17 = vadd.f32 %v13335_v14, %v3310_v28  ;;  %v13339_v28 = vld [vmem:[#allocation67_spill] sm:$0xff]  ;;  %v11219_v23 = vpop.permute.xlu1 %3788  ;;  %v13341_v62 = vld [vmem:[#allocation125_spill] sm:$0xff]  ;;  %v11230_v14 = vpop.permute.xlu0 %3764 }
 0x327   : > { %v4317_v48 = vsel %vm2914_vm2, %v4315_v15, %v4316_v30  ;;  %v4339_v16 = vmul.f32 %v10292_v8, %v4336_v47  ;;  %v3391_v22 = vadd.f32 %v13339_v28, %v3277_v42  ;;  %v3392_v12 = vadd.f32 %v13340_v53, %v3278_v2  ;;  %v13343_v47 = vld [vmem:[#allocation76_spill] sm:$0xff]  ;;  %v13344_v42 = vld [vmem:[#allocation61_spill] sm:$0xff]  ;;  %v13346_v28 = vld [vmem:[#allocation26_spill] sm:$0xff] }
 0x328   : > { %v11209_v41 = vadd.f32 %v10852_v45, %v3501_v3  ;;  %v4318_v18 = vrot.slane %v4311_v7, 2  ;;  %v11223_v3 = vadd.f32 %v10852_v45, %v3502_v24  ;;  %v3314_v27 = vadd.f32 %v13341_v62, %v3200_v56  ;;  %4322 = vrot.lane.b32.xlu1 %v4317_v48, %s5323_s13 }
 0x329   : > { %v3311_v34 = vadd.f32 %v13342_v55, %v11063_v13  ;;  %v3312_v32 = vadd.f32 %v13343_v47, %v11071_v4  ;;  %v13345_v51 = vrot.slane %v13344_v42, 2  ;;  %v13347_v53 = vrot.slane %v13346_v28, 2  ;;  %4320 = vrot.lane.b32.xlu0 %v4315_v15, %s5323_s13  ;;  %v13353_v42 = vld [vmem:[#allocation134_spill] sm:$0xff] }
 0x32a   : > { %v3427_v43 = vadd.f32 %v13348_v37, %v3313_v5  ;;  %v4343_v45 = vrot.slane %v4337_v61, 2  ;;  %v4344_v56 = vrot.slane %v4338_v9, 2  ;;  %v4346_v13 = vrot.slane %v4339_v16, 2  ;;  %v11248_v37 = vpop.permute.xlu1 %3792  ;;  %v13351_v61 = vld [vmem:[#allocation36_spill] sm:$0xff]  ;;  %v13352_v9 = vld [vmem:[#allocation133_spill] sm:$0xff]  ;;  %v13355_v28 = vld [vmem:[#allocation46_spill] sm:$0xff] }
 0x32b   : > { %v3537_v2 = vadd.f32 %v13345_v51, %v3423_v38  ;;  %v3538_v7 = vadd.f32 %v13347_v53, %v3424_v17  ;;  %v4365_v24 = vmul.f32 %v13337_v26, %v4364_v0  ;;  %v11241_v4 = vmul.f32 %v13338_v20, %v4364_v0  ;;  %v13349_v38 = vld [vmem:[#allocation29_spill] sm:$0xff]  ;;  %v13350_v17 = vld [vmem:[#allocation120_spill] sm:$0xff] }
 0x32c   : > { %v3505_v55 = vadd.f32 %v13349_v38, %v3391_v22  ;;  %v3506_v47 = vadd.f32 %v13350_v17, %v3392_v12  ;;  %v4319_v5 = vsel %vm2914_vm2, %v4316_v30, %v4318_v18  ;;  %v3428_v48 = vadd.f32 %v13351_v61, %v3314_v27  ;;  %v13354_v30 = vld [vmem:[#allocation95_spill] sm:$0xff]  ;;  %4348 = vrot.lane.b32.xlu1 %v4343_v45, %s5323_s13 }
 0x32d   : > { %v11244_v62 = vadd.f32 %v10892_v1, %v3537_v2  ;;  %v11254_v15 = vadd.f32 %v10892_v1, %v3538_v7  ;;  %v3425_v16 = vadd.f32 %v13352_v9, %v3311_v34  ;;  %v3426_v51 = vadd.f32 %v13353_v42, %v3312_v32  ;;  %v11259_v2 = vpop.permute.xlu0 %3790  ;;  %4324 = vrot.lane.b32.xlu0 %v4319_v5, %s5323_s13  ;;  %v13356_v7 = vld [vmem:[#allocation129_spill] sm:$0xff]  ;;  %v13359_v5 = vld [vmem:[#allocation42_spill] sm:$0xff] }
 0x32e   : > { %v11262_v22 = vadd.f32 %v10894_v46, %v3505_v55  ;;  %v3606_v12 = vadd.f32 %v10894_v46, %v3506_v47  ;;  %v3541_v18 = vadd.f32 %v13354_v30, %v3427_v43  ;;  %v3347_v53 = vadd.f32 %v13355_v28, %v11159_v50  ;;  %v13357_v46 = vld [vmem:[#allocation89_spill] sm:$0xff]  ;;  %v11278_v17 = vpop.permute.xlu1 %3818  ;;  %v13361_v9 = vld [vmem:[#allocation34_spill] sm:$0xff] }
 0x32f   : > { %v4347_v1 = vsel %vm2914_vm2, %v4344_v56, %v4346_v13  ;;  %v4371_v27 = vrot.slane %v4365_v24, 2  ;;  %v4372_v34 = vrot.slane %v11241_v4, 2  ;;  %v4392_v32 = vstv %s11215_s12  ;;  %v13360_v13 = vld [vmem:[#allocation114_spill] sm:$0xff]  ;;  %s5235_s12 = scalar_lea.vmem %s11705_s11, 768 }
 0x330   : > { %v3348_v38 = vadd.f32 %v13356_v7, %v11162_v25  ;;  %v13358_v55 = vrot.slane %v13357_v46, 2  ;;  %v4345_v50 = vsel %vm2914_vm2, %v4343_v45, %v4344_v56  ;;  %v4367_v47 = vmul.f32 %v10292_v8, %v4364_v0  ;;  %v13362_v42 = vld [vmem:[#allocation54_spill] sm:$0xff]  ;;  %4352 = vrot.lane.b32.xlu1 %v4347_v1, %s5323_s13  ;;  %p5236_p6 = scmp.ne.s32.totalorder %s11705_s11, %s5235_s12 }
 0x331   : > { %v3542_v61 = vadd.f32 %v13359_v5, %v3428_v48  ;;  %v3539_v24 = vadd.f32 %v13360_v13, %v3425_v16  ;;  %v3540_v4 = vadd.f32 %v13361_v9, %v3426_v51  ;;  %v13363_v30 = vrot.slane %v13362_v42, 2  ;;  %v11288_v28 = vpop.permute.xlu0 %3816  ;;  %v13364_v7 = vld [vmem:[#allocation82_spill] sm:$0xff]  ;;  %4350 = vrot.lane.b32.xlu0 %v4345_v50, %s5323_s13  ;;  %v13370_v9 = vld [vmem:[#allocation132_spill] sm:$0xff] }
 0x332   : > { %v3346_v43 = vadd.f32 %v13358_v55, %v11107_v57  ;;  %v3461_v57 = vadd.f32 %v13364_v7, %v3347_v53  ;;  %v3350_v45 = vadd.f32 %v10868_v31, %v11151_v35  ;;  %v4393_v0 = vmul.f32 %v13337_v26, %v4392_v32  ;;  %v13365_v31 = vld [vmem:[#allocation88_spill] sm:$0xff]  ;;  %v13366_v53 = vld [vmem:[#allocation22_spill] sm:$0xff]  ;;  %v11308_v46 = vpop.permute.xlu1 %3844  ;;  %p5237_p0 = pnand %p5236_p6, %p13389_p12 }
 0x333   : > { %v3345_v25 = vadd.f32 %v13363_v30, %v11097_v63  ;;  %v4394_v56 = vmul.f32 %v13338_v20, %v4392_v32  ;;  %v11297_v48 = vadd.f32 %v10930_v21, %v3541_v18  ;;  %v3634_v16 = vadd.f32 %v10930_v21, %v3542_v61  ;;  %v13368_v50 = vld [vmem:[#allocation74_spill] sm:$0xff]  ;;  %v13372_v30 = vld [vmem:[#allocation104_spill] sm:$0xff] }
 0x334   : > { %v4373_v63 = vsel %vm2914_vm2, %v4371_v27, %v4372_v34  ;;  %v4395_v51 = vmul.f32 %v10292_v8, %v4392_v32  ;;  %v3462_v35 = vadd.f32 %v13365_v31, %v3348_v38  ;;  %v13367_v1 = vrot.slane %v13366_v53, 2  ;;  %p5238_p7 = pneg %p5237_p0 }
 0x335   : > { %v4374_v20 = vrot.slane %v4367_v47, 2  ;;  %v4420_v18 = vstv %s11251_s10  ;;  %v11312_v55 = vadd.f32 %v10934_v52, %v3539_v24  ;;  %v11315_v21 = vadd.f32 %v10934_v52, %v3540_v4  ;;  %v11320_v61 = vpop.permute.xlu0 %3820  ;;  %4378 = vrot.lane.b32.xlu1 %v4373_v63, %s5323_s13  ;;  %4376 = vrot.lane.b32.xlu0 %v4371_v27, %s5323_s13  ;;  %v13374_v27 = vld [vmem:[#allocation79_spill] sm:$0xff]  ;;  %s5325_s10 = smov [#allocation12]  }
 0x336   : > { %v3460_v26 = vadd.f32 %v13367_v1, %v3346_v43  ;;  %v13369_v5 = vrot.slane %v13368_v50, 2  ;;  %v3690_v32 = vadd.f32 %v11048_v10, %v3606_v12  ;;  %v3575_v38 = vadd.f32 %v10825_v58, %v3461_v57  ;;  %v13371_v12 = vld [vmem:[#allocation19_spill] sm:$0xff]  ;;  %v11338_v57 = vpop.permute.xlu1 %3848 }
 0x337   : > { %v3464_v43 = vadd.f32 %v10910_v40, %v3350_v45  ;;  %v4399_v47 = vrot.slane %v4393_v0, 2  ;;  %v4400_v13 = vrot.slane %v4394_v56, 2  ;;  %v4402_v24 = vrot.slane %v4395_v51, 2 }
 0x338   : > { %v3459_v8 = vadd.f32 %v13369_v5, %v3345_v25  ;;  %v3774_v52 = vadd.f32 %v11230_v14, %v3690_v32  ;;  %v4421_v4 = vmul.f32 %v13370_v9, %v4420_v18  ;;  %v11331_v42 = vmul.f32 %v13371_v12, %v4420_v18 }
 0x339   : > { %v3576_v58 = vadd.f32 %v10830_v44, %v3462_v35  ;;  %v13373_v40 = vrot.slane %v13372_v30, 2  ;;  %v3349_v7 = vadd.f32 %v10863_v36, %v11148_v11  ;;  %v4375_v45 = vsel %vm2914_vm2, %v4372_v34, %v4374_v20  ;;  %v11354_v36 = vpop.permute.xlu0 %3846  ;;  %v13376_v34 = vld [vmem:[#allocation24_spill] sm:$0xff]  ;;  %v13377_v35 = vld [vmem:[#allocation38_spill] sm:$0xff]  ;;  %4404 = vrot.lane.b32.xlu1 %v4399_v47, %s5323_s13 }
 0x33a   : > { %v13375_v0 = vrot.slane %v13374_v27, 2  ;;  %v11345_v63 = vadd.f32 %v11009_v49, %v11209_v41  ;;  %v11349_v44 = vadd.f32 %v11009_v49, %v11223_v3  ;;  %v11352_v51 = vadd.f32 %v11338_v57, %v3774_v52  ;;  %4380 = vrot.lane.b32.xlu0 %v4375_v45, %s5323_s13  ;;  %v13378_v20 = vld [vmem:[#allocation124_spill] sm:$0xff]  ;;  %v13381_v45 = vld [vmem:[#allocation39_spill] sm:$0xff] }
 0x33b   : > { %v3574_v25 = vadd.f32 %v13373_v40, %v3460_v26  ;;  %v11357_v11 = vadd.f32 %v10964_v39, %v3575_v38  ;;  %v3578_v53 = vadd.f32 %v13377_v35, %v3464_v43  ;;  %v3714_v41 = vadd.f32 %v11093_v54, %v11254_v15  ;;  %v13379_v15 = vld [vmem:[#allocation68_spill] sm:$0xff] }
 0x33c   : > { %v3573_v56 = vadd.f32 %v13375_v0, %v3459_v8  ;;  %v4403_v49 = vsel %vm2914_vm2, %v4400_v13, %v4402_v24  ;;  %v4427_v3 = vrot.slane %v4421_v4, 2  ;;  %v4428_v1 = vrot.slane %v11331_v42, 2  ;;  %v11370_v8 = vpop.permute.xlu1 %3874  ;;  %v13380_v24 = vld [vmem:[#allocation60_spill] sm:$0xff] }
 0x33d   : > { %v3658_v31 = vadd.f32 %v13376_v34, %v3574_v25  ;;  %v4448_v26 = vstv %s11303_s26  ;;  %v3463_v50 = vadd.f32 %v13378_v20, %v3349_v7  ;;  %v3798_v5 = vadd.f32 %v11219_v23, %v3714_v41  ;;  %v11380_v42 = vpop.permute.xlu0 %3872  ;;  %4408 = vrot.lane.b32.xlu1 %v4403_v49, %s5323_s13  ;;  %v5142_v7 = vld [vmem:[#allocation2 + $0x1d0] sm:$0x1]  ;;  %v13382_v41 = vld [vmem:[#allocation121_spill] sm:$0xff]  ;;  %s5239_s26 = sshll.u32 %s5325_s10, 4  ;;  %s5240_s26 = int_to_ptr.vmem [resolvable:$false] %s5239_s26 }
 0x33e   : > { %v4401_v32 = vsel %vm2914_vm2, %v4399_v47, %v4400_v13  ;;  %v4423_v38 = vmul.f32 %v13379_v15, %v4420_v18  ;;  %v11375_v43 = vadd.f32 %v10964_v39, %v3576_v58  ;;  %v3657_v52 = vadd.f32 %v13376_v34, %v3573_v56  ;;  %v5141_v47 = vld [vmem:[#allocation2 + $0x1a0] sm:$0xfe]  ;;  %v13383_v15 = vld [vmem:[#allocation107_spill] sm:$0xff]  ;;  %p5242_p13 = scmp.lt.s32.totalorder %s11705_s11, %s5240_s26 }
 0x33f   : > { %v3662_v9 = vadd.f32 %v13380_v24, %v3578_v53  ;;  %v3742_v4 = vadd.f32 %v11122_v60, %v3658_v31  ;;  %v3718_v30 = vadd.f32 %v11133_v19, %v3634_v16  ;;  %v11384_v40 = vadd.f32 %v11380_v42, %v3798_v5  ;;  %4406 = vrot.lane.b32.xlu0 %v4401_v32, %s5323_s13 }
 0x340   : > { %v4449_v18 = vmul.f32 %v5141_v47, %v4448_v26  ;;  %v4476_v13 = vstv %s11325_s23  ;;  %v4429_v58 = vsel %vm2914_vm2, %v4427_v3, %v4428_v1  ;;  %v4450_v25 = vmul.f32 %v13371_v12, %v4448_v26  ;;  %v11398_v34 = vpop.permute.xlu1 %3900  ;;  %s5241_s23 = scalar_lea.vmem %s5240_s26, 1536 }
 0x341   : > { %v3826_v39 = vadd.f32 %v11288_v28, %v3742_v4  ;;  %v4451_v16 = vmul.f32 %v5142_v7, %v4448_v26  ;;  %v3577_v27 = vadd.f32 %v13381_v45, %v3463_v50  ;;  %v3689_v0 = vadd.f32 %v11048_v10, %v11262_v22  ;;  %v11408_v20 = vpop.permute.xlu0 %3876  ;;  %4434 = vrot.lane.b32.xlu1 %v4429_v58, %s5323_s13  ;;  %p5243_p9 = scmp.lt.s32.totalorder %s5241_s23, %s5235_s12 }
 0x342   : > { %v3802_v56 = vadd.f32 %v11248_v37, %v3718_v30  ;;  %v4430_v31 = vrot.slane %v4423_v38, 2  ;;  %v3687_v35 = vadd.f32 %v11058_v59, %v11190_v33  ;;  %v3688_v53 = vadd.f32 %v11058_v59, %v11193_v29 }
 0x343   : > { %v3746_v49 = vadd.f32 %v13382_v41, %v3662_v9  ;;  %v11406_v26 = vadd.f32 %v11398_v34, %v3826_v39  ;;  %v11411_v10 = vadd.f32 %v13380_v24, %v3577_v27  ;;  %v4455_v50 = vrot.slane %v4449_v18, 2  ;;  %4432 = vrot.lane.b32.xlu0 %v4427_v3, %s5323_s13  ;;  %p5244_p5 = por %p5243_p9, %p5242_p13 }
 0x344   : > { %v11414_v22 = vadd.f32 %v11408_v20, %v3802_v56  ;;  %v11417_v33 = vmul.f32 %v5141_v47, %v4476_v13  ;;  %v4456_v29 = vrot.slane %v4450_v25, 2  ;;  %v4458_v5 = vrot.slane %v4451_v16, 2  ;;  %v11430_v4 = vpop.permute.xlu1 %3904 }
 0x345   : > { %v3830_v59 = vadd.f32 %v11320_v61, %v3746_v49  ;;  %v11422_v32 = vmul.f32 %v13371_v12, %v4476_v13  ;;  %v3715_v38 = vadd.f32 %v13383_v15, %v11312_v55  ;;  %v3716_v24 = vadd.f32 %v13383_v15, %v11315_v21  ;;  %v11443_v21 = vpop.permute.xlu0 %3902  ;;  %4460 = vrot.lane.b32.xlu1 %v4455_v50, %s5323_s13  ;;  %p5245_p2 = pnand %p5244_p5, %p5238_p7 }
 0x346   : > { %v3713_v9 = vadd.f32 %v11093_v54, %v11244_v62  ;;  %v4431_v30 = vsel %vm2914_vm2, %v4428_v1, %v4430_v31  ;;  %v11436_v3 = vadd.f32 %v11122_v60, %v3657_v52  ;;  %v3771_v12 = vadd.f32 %v11185_v6, %v3687_v35  ;;  %v13384_v62 = vld [vmem:[#allocation111_spill] sm:$0xff] }
 0x347   : > { %v3772_v47 = vadd.f32 %v11185_v6, %v3688_v53  ;;  %v11441_v55 = vadd.f32 %v11430_v4, %v3830_v59  ;;  %v3717_v54 = vadd.f32 %v11133_v19, %v11297_v48  ;;  %v3770_v1 = vadd.f32 %v13384_v62, %v11349_v44  ;;  %4436 = vrot.lane.b32.xlu0 %v4431_v30, %s5323_s13  ;;  %v13385_v19 = vld [vmem:[#allocation55_spill] sm:$0xff] }
 0x348   : > { %v4483_v60 = vrot.slane %v11417_v33, 2  ;;  %v4504_v52 = vstv %s11388_s5  ;;  %v3855_v18 = vadd.f32 %v11354_v36, %v3771_v12  ;;  %v4459_v39 = vsel %vm2914_vm2, %v4456_v29, %v4458_v5  ;;  %v3931_v25 = vpop.permute.xlu1 %3930  ;;  %v13386_v35 = vld [vmem:[#allocation87_spill] sm:$0xff] }
 0x349   : > { %v3856_v6 = vadd.f32 %v11354_v36, %v3772_v47  ;;  %v4484_v58 = vrot.slane %v11422_v32, 2  ;;  %v3743_v48 = vadd.f32 %v13385_v19, %v11357_v11  ;;  %v3854_v44 = vadd.f32 %v11308_v46, %v3770_v1  ;;  %v11468_v31 = vpop.permute.xlu0 %3928  ;;  %4464 = vrot.lane.b32.xlu1 %v4459_v39, %s5323_s13  ;;  %v5143_v1 = vld [vmem:[#allocation2 + $0x218] sm:$0xff] }
 0x34a   : > { %v4457_v16 = vsel %vm2914_vm2, %v4455_v50, %v4456_v29  ;;  %v4479_v45 = vmul.f32 %v5142_v7, %v4476_v13  ;;  %v3797_v27 = vadd.f32 %v11219_v23, %v3713_v9  ;;  %v11464_v36 = vadd.f32 %v3931_v25, %v3855_v18  ;;  %v13387_v13 = vld [vmem:[#allocation118_spill] sm:$0xff]  ;;  %v13388_v50 = vld [vmem:[#allocation25_spill] sm:$0xff] }
 0x34b   : > { %v11466_v56 = vadd.f32 %v3931_v25, %v3856_v6  ;;  %v4505_v53 = vmul.f32 %v13386_v35, %v4504_v52  ;;  %v3773_v11 = vadd.f32 %v11230_v14, %v3689_v0  ;;  %v11473_v49 = vadd.f32 %v11468_v31, %v3854_v44  ;;  %4462 = vrot.lane.b32.xlu0 %v4457_v16, %s5323_s13 }
 0x34c   : > { %v4506_v7 = vmul.f32 %v13387_v13, %v4504_v52  ;;  %v4507_v23 = vmul.f32 %v13388_v50, %v4504_v52  ;;  %v3744_v33 = vadd.f32 %v13385_v19, %v11375_v43  ;;  %v3801_v59 = vadd.f32 %v11248_v37, %v3717_v54  ;;  %v3957_v32 = vpop.permute.xlu1 %3956 }
 0x34d   : > { %v3881_v29 = vadd.f32 %v11380_v42, %v3797_v27  ;;  %v4485_v14 = vsel %vm2914_vm2, %v4483_v60, %v4484_v58  ;;  %v3799_v0 = vadd.f32 %v11259_v2, %v3715_v38  ;;  %v3857_v5 = vadd.f32 %v11338_v57, %v3773_v11  ;;  %v3933_v37 = vpop.permute.xlu0 %3932  ;;  %v5144_v11 = vld [vmem:[#allocation2 + $0x230] sm:$0x1] }
 0x34e   : > { %v4486_v15 = vrot.slane %v4479_v45, 2  ;;  %v4532_v9 = vstv %s11433_s20  ;;  %v3800_v30 = vadd.f32 %v11259_v2, %v3716_v24  ;;  %v11491_v43 = vadd.f32 %v3957_v32, %v11384_v40  ;;  %4490 = vrot.lane.b32.xlu1 %v4485_v14, %s5323_s13 }
 0x34f   : > { %v11488_v12 = vadd.f32 %v3957_v32, %v3881_v29  ;;  %v4511_v42 = vrot.slane %v4505_v53, 2  ;;  %v11493_v47 = vadd.f32 %v3933_v37, %v3857_v5  ;;  %v11496_v54 = vadd.f32 %v3933_v37, %v11352_v51  ;;  %4488 = vrot.lane.b32.xlu0 %v4483_v60, %s5323_s13 }
 0x350   : > { %v4512_v57 = vrot.slane %v4506_v7, 2  ;;  %v4514_v38 = vrot.slane %v4507_v23, 2  ;;  %v3769_v2 = vadd.f32 %v13384_v62, %v11345_v63  ;;  %v3885_v24 = vadd.f32 %v11408_v20, %v3801_v59  ;;  %v3961_v6 = vpop.permute.xlu1 %3960 }
 0x351   : > { %v4533_v40 = vmul.f32 %v13386_v35, %v4532_v9  ;;  %v4534_v52 = vmul.f32 %v5143_v1, %v4532_v9  ;;  %v3883_v18 = vadd.f32 %v11370_v8, %v3799_v0  ;;  %v3884_v51 = vadd.f32 %v11370_v8, %v3800_v30  ;;  %v3959_v60 = vpop.permute.xlu0 %3958 }
 0x352   : > { %v4487_v39 = vsel %vm2914_vm2, %v4484_v58, %v4486_v15  ;;  %v4560_v19 = vstv %s11461_s22  ;;  %v3827_v44 = vadd.f32 %v11278_v17, %v3743_v48  ;;  %v3828_v63 = vadd.f32 %v11278_v17, %v3744_v33  ;;  %4516 = vrot.lane.b32.xlu1 %v4511_v42, %s5323_s13 }
 0x353   : > { %v11510_v62 = vadd.f32 %v3961_v6, %v3885_v24  ;;  %v11513_v20 = vadd.f32 %v3961_v6, %v11414_v22  ;;  %v3825_v25 = vadd.f32 %v11288_v28, %v11436_v3  ;;  %v3967_v16 = vadd.f32 %v3959_v60, %v3883_v18  ;;  %4492 = vrot.lane.b32.xlu0 %v4487_v39, %s5323_s13 }
 0x354   : > { %v3968_v45 = vadd.f32 %v3959_v60, %v3884_v51  ;;  %v4515_v8 = vsel %vm2914_vm2, %v4512_v57, %v4514_v38  ;;  %v3911_v58 = vadd.f32 %v11443_v21, %v3827_v44  ;;  %v3912_v48 = vadd.f32 %v11443_v21, %v3828_v63  ;;  %v3987_v28 = vpop.permute.xlu1 %3986 }
 0x355   : > { %v4539_v17 = vrot.slane %v4533_v40, 2  ;;  %v4540_v27 = vrot.slane %v4534_v52, 2  ;;  %v3745_v22 = vadd.f32 %v13382_v41, %v11411_v10  ;;  %v3909_v53 = vadd.f32 %v11398_v34, %v3825_v25  ;;  %v3985_v33 = vpop.permute.xlu0 %3984 }
 0x356   : > { %v4513_v3 = vsel %vm2914_vm2, %v4511_v42, %v4512_v57  ;;  %v4535_v13 = vmul.f32 %v5144_v11, %v4532_v9  ;;  %v3853_v7 = vadd.f32 %v11308_v46, %v3769_v2  ;;  %v3995_v50 = vadd.f32 %v3987_v28, %v3911_v58  ;;  %4520 = vrot.lane.b32.xlu1 %v4515_v8, %s5323_s13 }
 0x357   : > { %v3996_v23 = vadd.f32 %v3987_v28, %v3912_v48  ;;  %v3829_v21 = vadd.f32 %v11320_v61, %v3745_v22  ;;  %v3993_v59 = vadd.f32 %v3985_v33, %v3909_v53  ;;  %v3994_v29 = vadd.f32 %v3985_v33, %v11406_v26  ;;  %4518 = vrot.lane.b32.xlu0 %v4513_v3, %s5323_s13 }
 0x358   : > { %v4561_v41 = vmul.f32 %v13386_v35, %v4560_v19  ;;  %v3937_v34 = vadd.f32 %v11468_v31, %v3853_v7  ;;  %v4541_v10 = vsel %vm2914_vm2, %v4539_v17, %v4540_v27  ;;  %v4562_v14 = vmul.f32 %v5143_v1, %v4560_v19  ;;  %v4013_v5 = vpop.permute.xlu1 %4012 }
 0x359   : > { %v4563_v46 = vmul.f32 %v5144_v11, %v4560_v19  ;;  %v3913_v0 = vadd.f32 %v11430_v4, %v3829_v21  ;;  %v4542_v32 = vrot.slane %v4535_v13, 2  ;;  %v4022_v15 = vadd.f32 %v4013_v5, %v11473_v49  ;;  %v3989_v26 = vpop.permute.xlu0 %3988 }
 0x35a   : > { %v4021_v61 = vadd.f32 %v4013_v5, %v3937_v34  ;;  %v3998_v30 = vadd.f32 %v3989_v26, %v11441_v55  ;;  %4546 = vrot.lane.b32.xlu1 %v4541_v10, %s5323_s13  ;;  %v4567_v31 = vrot.slane %v4561_v41, 2  ;;  %v4568_v35 = vrot.slane %v4562_v14, 2 }
 0x35b   : > { %v3997_v9 = vadd.f32 %v3989_v26, %v3913_v0  ;;  %4544 = vrot.lane.b32.xlu0 %v4539_v17, %s5323_s13  ;;  %v4570_v37 = vrot.slane %v4563_v46, 2  ;;  %v4543_v57 = vsel %vm2914_vm2, %v4540_v27, %v4542_v32 }
 0x35c   : > { %v4017_v42 = vpop.permute.xlu1 %4016  ;;  %v4569_v1 = vsel %vm2914_vm2, %v4567_v31, %v4568_v35 }
 0x35d   : > { %v4025_v4 = vadd.f32 %v4017_v42, %v11493_v47  ;;  %v4026_v38 = vadd.f32 %v4017_v42, %v11496_v54  ;;  %v4015_v2 = vpop.permute.xlu0 %4014  ;;  %v4571_v55 = vsel %vm2914_vm2, %v4568_v35, %v4570_v37 }
 0x35e   : > { %v4023_v49 = vadd.f32 %v4015_v2, %v11464_v36  ;;  %v4024_v24 = vadd.f32 %v4015_v2, %v11466_v56  ;;  %4572 = vrot.lane.b32.xlu1 %v4567_v31, %s5323_s13 }
 0x35f   : > { %4548 = vrot.lane.b32.xlu0 %v4543_v57, %s5323_s13 }
 0x360   : > { %v4043_v40 = vpop.permute.xlu1 %4042 }
 0x361   : > { %v4051_v52 = vadd.f32 %v4043_v40, %v3967_v16  ;;  %v4052_v18 = vadd.f32 %v4043_v40, %v3968_v45  ;;  %v4041_v51 = vpop.permute.xlu0 %4040 }
 0x362   : > { %v4049_v47 = vadd.f32 %v4041_v51, %v11488_v12  ;;  %v4050_v54 = vadd.f32 %v4041_v51, %v11491_v43  ;;  %4576 = vrot.lane.b32.xlu1 %v4571_v55, %s5323_s13 }
 0x363   : > { %4574 = vrot.lane.b32.xlu0 %v4569_v1, %s5323_s13  ;;  %s4587_s13 = sld [smem:[#allocation10]] }
 0x364   : > { %v4069_v36 = vpop.permute.xlu1 %4068 }
 0x365   : > { %v4077_v56 = vadd.f32 %v4069_v36, %v3993_v59  ;;  %v4078_v6 = vadd.f32 %v4069_v36, %v3994_v29  ;;  %v4045_v39 = vpop.permute.xlu0 %4044 }
 0x366   : > { %v4053_v19 = vadd.f32 %v4045_v39, %v11510_v62  ;;  %v4054_v44 = vadd.f32 %v4045_v39, %v11513_v20 }
 0x368   : > { %v4073_v63 = vpop.permute.xlu1 %4072 }
 0x369   : > { %v4081_v60 = vadd.f32 %v4073_v63, %v3997_v9  ;;  %v4082_v25 = vadd.f32 %v4073_v63, %v3998_v30  ;;  %v4071_v16 = vpop.permute.xlu0 %4070 }
 0x36a   : > { %v4079_v45 = vadd.f32 %v4071_v16, %v3995_v50  ;;  %v4080_v12 = vadd.f32 %v4071_v16, %v3996_v23 }
 0x36c   : > { %v4099_v8 = vpop.permute.xlu1 %4098 }
 0x36d   : > { %v4107_v43 = vadd.f32 %v4099_v8, %v4023_v49  ;;  %v4108_v58 = vadd.f32 %v4099_v8, %v4024_v24  ;;  %v4097_v48 = vpop.permute.xlu0 %4096 }
 0x36e   : > { %v4105_v17 = vadd.f32 %v4097_v48, %v4021_v61  ;;  %v4106_v27 = vadd.f32 %v4097_v48, %v4022_v15 }
 0x370   : > { %v4125_v22 = vpop.permute.xlu1 %4124 }
 0x371   : > { %v4133_v53 = vadd.f32 %v4125_v22, %v4049_v47  ;;  %v4134_v28 = vadd.f32 %v4125_v22, %v4050_v54  ;;  %v4101_v3 = vpop.permute.xlu0 %4100 }
 0x372   : > { %v4109_v11 = vadd.f32 %v4101_v3, %v4025_v4  ;;  %v4110_v62 = vadd.f32 %v4101_v3, %v4026_v38 }
 0x374   : > { %v4129_v13 = vpop.permute.xlu1 %4128 }
 0x375   : > { %v4137_v20 = vadd.f32 %v4129_v13, %v4053_v19  ;;  %v4138_v7 = vadd.f32 %v4129_v13, %v4054_v44  ;;  %v4127_v33 = vpop.permute.xlu0 %4126 }
 0x376   : > { %v4135_v21 = vadd.f32 %v4127_v33, %v4051_v52  ;;  %v4136_v59 = vadd.f32 %v4127_v33, %v4052_v18 }
 0x378   : > { %v4155_v50 = vpop.permute.xlu1 %4154 }
 0x379   : > { %v4163_v23 = vadd.f32 %v4155_v50, %v4079_v45  ;;  %v4164_v29 = vadd.f32 %v4155_v50, %v4080_v12  ;;  %v4153_v41 = vpop.permute.xlu0 %4152 }
 0x37a   : > { %v4161_v34 = vadd.f32 %v4153_v41, %v4077_v56  ;;  %v4162_v10 = vadd.f32 %v4153_v41, %v4078_v6 }
 0x37c   : > { %v4181_v14 = vpop.permute.xlu1 %4180 }
 0x37d   : > { %v4189_v46 = vadd.f32 %v4181_v14, %v4105_v17  ;;  %v4190_v0 = vadd.f32 %v4181_v14, %v4106_v27  ;;  %v4157_v5 = vpop.permute.xlu0 %4156  ;;  %v4588_v14 = vstv %s4587_s13 }
 0x37e   : > { %v4165_v32 = vadd.f32 %v4157_v5, %v4081_v60  ;;  %v4166_v61 = vadd.f32 %v4157_v5, %v4082_v25 }
 0x380   : > { %v4185_v15 = vpop.permute.xlu1 %4184 }
 0x381   : > { %v11554_v26 = vadd.f32 %v4185_v15, %v4109_v11  ;;  %v11556_v9 = vadd.f32 %v4185_v15, %v4110_v62  ;;  %v4183_v30 = vpop.permute.xlu0 %4182 }
 0x382   : > { %v4191_v31 = vadd.f32 %v4183_v30, %v4107_v43  ;;  %v4192_v35 = vadd.f32 %v4183_v30, %v4108_v58 }
 0x384   : > { %v4211_v37 = vpop.permute.xlu1 %4210 }
 0x385   : > { %v11558_v42 = vadd.f32 %v4211_v37, %v4135_v21  ;;  %v11560_v57 = vadd.f32 %v4211_v37, %v4136_v59  ;;  %v4209_v4 = vpop.permute.xlu0 %4208 }
 0x386   : > { %v11562_v38 = vadd.f32 %v4209_v4, %v4133_v53  ;;  %v11564_v2 = vadd.f32 %v4209_v4, %v4134_v28 }
 0x388   : > { %v4237_v49 = vpop.permute.xlu1 %4236 }
 0x389   : > { %v11566_v24 = vadd.f32 %v4237_v49, %v4161_v34  ;;  %v11568_v55 = vadd.f32 %v4237_v49, %v4162_v10  ;;  %v4213_v40 = vpop.permute.xlu0 %4212 }
 0x38a   : > { %v11570_v1 = vadd.f32 %v4213_v40, %v4137_v20  ;;  %v11572_v52 = vadd.f32 %v4213_v40, %v4138_v7 }
 0x38c   : > { %v4241_v18 = vpop.permute.xlu1 %4240 }
 0x38d   : > { %v11574_v51 = vadd.f32 %v4241_v18, %v4165_v32  ;;  %v11576_v47 = vadd.f32 %v4241_v18, %v4166_v61  ;;  %v4239_v54 = vpop.permute.xlu0 %4238 }
 0x38e   : > { %v11578_v36 = vadd.f32 %v4239_v54, %v4163_v23  ;;  %v11580_v56 = vadd.f32 %v4239_v54, %v4164_v29 }
 0x390   : > { %v4267_v6 = vpop.permute.xlu1 %4266 }
 0x391   : > { %v4265_v39 = vpop.permute.xlu0 %4264  ;;  %v4275_v34 = vadd.f32 %v4267_v6, %v4191_v31  ;;  %v4276_v10 = vadd.f32 %v4267_v6, %v4192_v35 }
 0x392   : > { %v4273_v7 = vadd.f32 %v4265_v39, %v4189_v46  ;;  %v4274_v33 = vadd.f32 %v4265_v39, %v4190_v0 }
 0x394   : > { %v4293_v19 = vpop.permute.xlu1 %4292 }
 0x395   : > { %v4269_v44 = vpop.permute.xlu0 %4268  ;;  %v4301_v31 = vadd.f32 %v4293_v19, %v11562_v38  ;;  %v4302_v35 = vadd.f32 %v4293_v19, %v11564_v2 }
 0x396   : > { %v4277_v30 = vadd.f32 %v4269_v44, %v11554_v26  ;;  %v4278_v46 = vadd.f32 %v4269_v44, %v11556_v9 }
 0x398   : > { %v11582_v63 = vpop.permute.xlu1 %4296 }
 0x399   : > { %v11584_v60 = vpop.permute.xlu0 %4294 }
 0x39a   : > { %v4303_v2 = vadd.f32 %v11584_v60, %v11558_v42  ;;  %v4304_v19 = vadd.f32 %v11584_v60, %v11560_v57  ;;  %v4305_v42 = vadd.f32 %v11582_v63, %v11570_v1  ;;  %v4306_v57 = vadd.f32 %v11582_v63, %v11572_v52 }
 0x39b   : > { %v4626_v60 = vstv %s5007_s30 }
 0x39c   : > { %v11586_v25 = vpop.permute.xlu1 %4322 }
 0x39d   : > { %v11588_v16 = vpop.permute.xlu0 %4320 }
 0x39e   : > { %v4329_v1 = vadd.f32 %v11588_v16, %v11566_v24  ;;  %v4330_v52 = vadd.f32 %v11588_v16, %v11568_v55  ;;  %v4331_v55 = vadd.f32 %v11586_v25, %v11578_v36  ;;  %v4332_v16 = vadd.f32 %v11586_v25, %v11580_v56 }
 0x3a0   : > { %v4349_v45 = vpop.permute.xlu1 %4348 }
 0x3a1   : > { %v11590_v12 = vpop.permute.xlu0 %4324  ;;  %v4357_v59 = vadd.f32 %v4349_v45, %v4273_v7  ;;  %v4358_v50 = vadd.f32 %v4349_v45, %v4274_v33 }
 0x3a2   : > { %v4333_v56 = vadd.f32 %v11590_v12, %v11574_v51  ;;  %v4334_v25 = vadd.f32 %v11590_v12, %v11576_v47 }
 0x3a4   : > { %v4353_v8 = vpop.permute.xlu1 %4352 }
 0x3a5   : > { %v4351_v43 = vpop.permute.xlu0 %4350  ;;  %v4361_v40 = vadd.f32 %v4353_v8, %v4277_v30  ;;  %v4362_v18 = vadd.f32 %v4353_v8, %v4278_v46 }
 0x3a6   : > { %v4359_v0 = vadd.f32 %v4351_v43, %v4275_v34  ;;  %v4360_v37 = vadd.f32 %v4351_v43, %v4276_v10 }
 0x3a8   : > { %v11592_v58 = vpop.permute.xlu1 %4378 }
 0x3a9   : > { %v4377_v48 = vpop.permute.xlu0 %4376 }
 0x3aa   : > { %v4386_v8 = vadd.f32 %v4377_v48, %v4302_v35 }
 0x3ac   : > { %v11594_v17 = vpop.permute.xlu1 %4404 }
 0x3ad   : > { %v11596_v27 = vpop.permute.xlu0 %4380 }
 0x3b0   : > { %v11598_v22 = vpop.permute.xlu1 %4408 }
 0x3b1   : > { %v11600_v53 = vpop.permute.xlu0 %4406 }
 0x3b2   : > { %v4416_v35 = vadd.f32 %v11600_v53, %v4332_v16 }
 0x3b4   : > { %v4435_v28 = vpop.permute.xlu1 %4434 }
 0x3b5   : > { %v4433_v3 = vpop.permute.xlu0 %4432  ;;  %v4443_v54 = vadd.f32 %v4435_v28, %v4359_v0  ;;  %v4444_v39 = vadd.f32 %v4435_v28, %v4360_v37 }
 0x3b6   : > { %v4441_v29 = vadd.f32 %v4433_v3, %v4357_v59  ;;  %v4442_v41 = vadd.f32 %v4433_v3, %v4358_v50  ;;  %v4385_v3 = vadd.f32 %v4377_v48, %v4301_v31  ;;  %v4388_v48 = vadd.f32 %v11592_v58, %v4304_v19 }
 0x3b8   : > { %v4461_v11 = vpop.permute.xlu1 %4460 }
 0x3b9   : > { %v4437_v62 = vpop.permute.xlu0 %4436  ;;  %v4469_v50 = vadd.f32 %v4461_v11, %v4385_v3  ;;  %v4418_v3 = vadd.f32 %v11598_v22, %v4334_v25 }
 0x3ba   : > { %v4445_v26 = vadd.f32 %v4437_v62, %v4361_v40  ;;  %v4446_v9 = vadd.f32 %v4437_v62, %v4362_v18  ;;  %v4387_v62 = vadd.f32 %v11592_v58, %v4303_v2  ;;  %v4389_v58 = vadd.f32 %v11596_v27, %v4305_v42 }
 0x3bc   : > { %v11602_v13 = vpop.permute.xlu1 %4464 }
 0x3bd   : > { %v4463_v20 = vpop.permute.xlu0 %4462 }
 0x3c0   : > { %v11604_v21 = vpop.permute.xlu1 %4490 }
 0x3c1   : > { %v11606_v23 = vpop.permute.xlu0 %4488 }
 0x3c4   : > { %v4517_v5 = vpop.permute.xlu1 %4516 }
 0x3c5   : > { %v4525_v32 = vadd.f32 %v4517_v5, %v4441_v29  ;;  %v4526_v61 = vadd.f32 %v4517_v5, %v4442_v41  ;;  %v11608_v15 = vpop.permute.xlu0 %4492  ;;  %v4470_v29 = vadd.f32 %v4461_v11, %v4386_v8 }
 0x3c6   : > { %v4502_v12 = vadd.f32 %v11608_v15, %v4418_v3 }
 0x3c7   : > { %v4589_v4 = vadd.f32 %v4588_v14, %v4525_v32  ;;  %v4590_v49 = vadd.f32 %v4588_v14, %v4526_v61  ;;  %v4471_v32 = vadd.f32 %v4463_v20, %v4387_v62  ;;  %v4472_v61 = vadd.f32 %v4463_v20, %v4388_v48 }
 0x3c8   : > { %v4521_v6 = vpop.permute.xlu1 %4520  ;;  %v4473_v20 = vadd.f32 %v11602_v13, %v4389_v58 }
 0x3c9   : > { %v4519_v45 = vpop.permute.xlu0 %4518  ;;  %4603 = vrot.lane.b32.xlu1 %v4590_v49, %s5324_s25  ;;  %4601 = vrot.lane.b32.xlu0 %v4589_v4, %s5324_s25  ;;  %v4529_v7 = vadd.f32 %v4521_v6, %v4445_v26  ;;  %v4530_v28 = vadd.f32 %v4521_v6, %v4446_v9  ;;  %v4414_v49 = vadd.f32 %v11594_v17, %v4330_v52  ;;  %v4662_v9 = vstv %s5011_s8 }
 0x3ca   : > { %v4527_v44 = vadd.f32 %v4519_v45, %v4443_v54  ;;  %v4528_v43 = vadd.f32 %v4519_v45, %v4444_v39 }
 0x3cb   : > { %v4593_v41 = vadd.f32 %v4588_v14, %v4529_v7  ;;  %v4594_v34 = vadd.f32 %v4588_v14, %v4530_v28  ;;  %v4498_v31 = vadd.f32 %v11606_v23, %v4414_v49 }
 0x3cc   : > { %v4591_v33 = vadd.f32 %v4588_v14, %v4527_v44  ;;  %v4592_v38 = vadd.f32 %v4588_v14, %v4528_v43  ;;  %v4547_v11 = vpop.permute.xlu1 %4546  ;;  %v4390_v14 = vadd.f32 %v11596_v27, %v4306_v57  ;;  %v4413_v27 = vadd.f32 %v11594_v17, %v4329_v1 }
 0x3cd   : > { %v4545_v59 = vpop.permute.xlu0 %4544  ;;  %v4555_v30 = vadd.f32 %v4547_v11, %v4471_v32  ;;  %v4556_v46 = vadd.f32 %v4547_v11, %v4472_v61  ;;  %v4415_v17 = vadd.f32 %v11600_v53, %v4331_v55  ;;  %v4500_v43 = vadd.f32 %v11604_v21, %v4416_v35 }
 0x3ce   : > { %4607 = vrot.lane.b32.xlu1 %v4592_v38, %s5324_s25  ;;  %4605 = vrot.lane.b32.xlu0 %v4591_v33, %s5324_s25  ;;  %v4553_v10 = vadd.f32 %v4545_v59, %v4469_v50  ;;  %v4554_v5 = vadd.f32 %v4545_v59, %v4470_v29  ;;  %v4474_v4 = vadd.f32 %v11602_v13, %v4390_v14 }
 0x3cf   : > { %v4629_v40 = vadd.f32 %v4626_v60, %v4555_v30  ;;  %v4630_v18 = vadd.f32 %v4626_v60, %v4556_v46  ;;  %v4497_v13 = vadd.f32 %v11606_v23, %v4413_v27  ;;  %v4499_v44 = vadd.f32 %v11604_v21, %v4415_v17 }
 0x3d0   : > { %v4627_v0 = vadd.f32 %v4626_v60, %v4553_v10  ;;  %v4628_v37 = vadd.f32 %v4626_v60, %v4554_v5  ;;  %v4573_v39 = vpop.permute.xlu1 %4572  ;;  %v4417_v53 = vadd.f32 %v11598_v22, %v4333_v56 }
 0x3d1   : > { %v4549_v63 = vpop.permute.xlu0 %4548  ;;  %v4581_v6 = vadd.f32 %v4573_v39, %v4497_v13  ;;  %v4582_v45 = vadd.f32 %v4573_v39, %v4498_v31 }
 0x3d2   : > { %4611 = vrot.lane.b32.xlu1 %v4594_v34, %s5324_s25  ;;  %4609 = vrot.lane.b32.xlu0 %v4593_v41, %s5324_s25  ;;  %v4557_v24 = vadd.f32 %v4549_v63, %v4473_v20  ;;  %v4558_v54 = vadd.f32 %v4549_v63, %v4474_v4  ;;  %v4501_v47 = vadd.f32 %v11608_v15, %v4417_v53 }
 0x3d3   : > { %v4663_v8 = vadd.f32 %v4662_v9, %v4581_v6  ;;  %v4664_v7 = vadd.f32 %v4662_v9, %v4582_v45 }
 0x3d4   : > { %v4631_v26 = vadd.f32 %v4626_v60, %v4557_v24  ;;  %v4632_v36 = vadd.f32 %v4626_v60, %v4558_v54  ;;  %v4577_v33 = vpop.permute.xlu1 %4576 }
 0x3d5   : > { %v4575_v23 = vpop.permute.xlu0 %4574  ;;  %v4585_v21 = vadd.f32 %v4577_v33, %v4501_v47  ;;  %v4586_v38 = vadd.f32 %v4577_v33, %v4502_v12 }
 0x3d6   : > { %4641 = vrot.lane.b32.xlu1 %v4628_v37, %s5324_s25  ;;  %4639 = vrot.lane.b32.xlu0 %v4627_v0, %s5324_s25  ;;  %v4583_v51 = vadd.f32 %v4575_v23, %v4499_v44  ;;  %v4584_v28 = vadd.f32 %v4575_v23, %v4500_v43 }
 0x3d7   : > { %v4667_v22 = vadd.f32 %v4662_v9, %v4585_v21  ;;  %v4668_v59 = vadd.f32 %v4662_v9, %v4586_v38 }
 0x3d8   : > { %v4665_v2 = vadd.f32 %v4662_v9, %v4583_v51  ;;  %v4666_v19 = vadd.f32 %v4662_v9, %v4584_v28 }
 0x3da   : > { %4645 = vrot.lane.b32.xlu1 %v4630_v18, %s5324_s25  ;;  %4643 = vrot.lane.b32.xlu0 %v4629_v40, %s5324_s25 }
 0x3de   : > { %4649 = vrot.lane.b32.xlu1 %v4632_v36, %s5324_s25  ;;  %4647 = vrot.lane.b32.xlu0 %v4631_v26, %s5324_s25 }
 0x3e2   : > { %4677 = vrot.lane.b32.xlu1 %v4664_v7, %s5324_s25  ;;  %4675 = vrot.lane.b32.xlu0 %v4663_v8, %s5324_s25 }
 0x3e6   : > { %4681 = vrot.lane.b32.xlu1 %v4666_v19, %s5324_s25  ;;  %4679 = vrot.lane.b32.xlu0 %v4665_v2, %s5324_s25 }
 0x3ea   : > { %4685 = vrot.lane.b32.xlu1 %v4668_v59, %s5324_s25  ;;  %4683 = vrot.lane.b32.xlu0 %v4667_v22, %s5324_s25 }
 0x43b   : > { %v4604_v15 = vpop.permute.xlu1 %4603  ;;  %v4602_v50 = vpop.permute.xlu0 %4601 }
 0x43c   : > { %v4614_v29 = vsel %vm4613_vm3, %v4602_v50, %v4604_v15 }
 0x43d   : > { %4621 = vst.msk [vmem:[%s11673_s6 - $0x7] sm:$0x80] %vm4620_vm4, %v4614_v29 }
 0x440   : > { %v4608_v62 = vpop.permute.xlu1 %4607  ;;  %v4606_v48 = vpop.permute.xlu0 %4605 }
 0x441   : > { %v4615_v41 = vsel %vm4613_vm3, %v4606_v48, %v4608_v62 }
 0x442   : > { %4622 = vst.msk [vmem:[%s11673_s6 + $0x1] sm:$0xff] %vm285_vm0, %v4615_v41 }
 0x444   : > { %v4612_v34 = vpop.permute.xlu1 %4611  ;;  %v4610_v10 = vpop.permute.xlu0 %4609 }
 0x445   : > { %v4616_v5 = vsel %vm4613_vm3, %v4610_v10, %v4612_v34 }
 0x446   : > { %4624 = vst.msk [vmem:[%s11673_s6 + $0x9] sm:$0x7f] %vm4623_vm5, %v4616_v5 }
 0x448   : > { %v4642_v42 = vpop.permute.xlu1 %4641  ;;  %v4640_v57 = vpop.permute.xlu0 %4639 }
 0x449   : > { %v4651_v60 = vsel %vm4613_vm3, %v4640_v57, %v4642_v42 }
 0x44a   : > { %5008 = vst.msk [vmem:[%s11673_s6 + $0x9] sm:$0x80] %vm4620_vm4, %v4651_v60 }
 0x44c   : > { %v4646_v11 = vpop.permute.xlu1 %4645  ;;  %v4644_v32 = vpop.permute.xlu0 %4643 }
 0x44d   : > { %v4652_v61 = vsel %vm4613_vm3, %v4644_v32, %v4646_v11 }
 0x44e   : > { %5009 = vst.msk [vmem:[%s11673_s6 + $0x11] sm:$0xff] %vm285_vm0, %v4652_v61 }
 0x450   : > { %v4650_v58 = vpop.permute.xlu1 %4649  ;;  %v4648_v14 = vpop.permute.xlu0 %4647 }
 0x451   : > { %v4653_v30 = vsel %vm4613_vm3, %v4648_v14, %v4650_v58 }
 0x452   : > { %5010 = vst.msk [vmem:[%s11673_s6 + $0x19] sm:$0x7f] %vm4623_vm5, %v4653_v30 }
 0x454   : > { %v4678_v46 = vpop.permute.xlu1 %4677  ;;  %v4676_v0 = vpop.permute.xlu0 %4675 }
 0x455   : > { %v4687_v37 = vsel %vm4613_vm3, %v4676_v0, %v4678_v46 }
 0x456   : > { %5012 = vst.msk [vmem:[%s11673_s6 + $0x19] sm:$0x80] %vm4620_vm4, %v4687_v37 }
 0x458   : > { %v4682_v1 = vpop.permute.xlu1 %4681  ;;  %v4680_v52 = vpop.permute.xlu0 %4679 }
 0x459   : > { %v4688_v63 = vsel %vm4613_vm3, %v4680_v52, %v4682_v1 }
 0x45a   : > { %5013 = vst.msk [vmem:[%s11673_s6 + $0x21] sm:$0xff] %vm285_vm0, %v4688_v63 }
 0x45c   : > { %v4686_v20 = vpop.permute.xlu1 %4685  ;;  %v4684_v4 = vpop.permute.xlu0 %4683 }
 0x45d   : > { %v4689_v27 = vsel %vm4613_vm3, %v4684_v4, %v4686_v20 }
 0x45e   : > { %5014 = vst.msk [vmem:[%s11673_s6 + $0x29] sm:$0x7f] %vm4623_vm5, %v4689_v27 }
 0x45f   : > { %5248 = shalt.err (!%p5245_p2)
}
 0x460   : > { %s5249_s5 = scalar_lea.hbm %s11703_s14, 768  ;;  %s5253_s13 = scalar_lea.hbm %s11756_s4, 1536 }
 0x461   : > { %p5250_p11 = scmp.ne.s32.totalorder %s11703_s14, %s5249_s5  ;;  %p5254_p8 = scmp.lt.u32.totalorder %s11703_s14, %s11756_s4 }
 0x462   : > { %p5255_p10 = scmp.lt.u32.totalorder %s5253_s13, %s5249_s5  ;;  %p5257_p6 = scmp.lt.u32.totalorder %s5249_s5, %s11703_s14 }
 0x463   : > { %p5251_p1 = pnand %p5250_p11, %p13389_p12 }
 0x464   : > { %p5256_p4 = por %p5255_p10, %p5254_p8 }
 0x465   : > { %p5252_p3 = pneg %p5251_p1 }
 0x466   : > { %p5258_p0 = por %p5257_p6, %p5256_p4 }
 0x468   : > { %p5259_p7 = pnand %p5258_p0, %p5252_p3 }
 0x46a   : > { %5262 = shalt.err (!%p5259_p7)
}
 0x46b   : > { %s5326_s8 = smov 128   ;;  %s5327_s6 = smov 8  }
 0x46c   : > { %5035 = dma.vmem_to_hbm [thread:$0]  (%p13389_p12), %s11705_s11, 768, %s11703_s14, %s4698_s19, %s5326_s8, %s5326_s8, %s5327_s6  }
 0x46d PF: > { %s4726_s9 = sand.u32 1, %s5301_s15   ;;  %p13390_p13 = scmp.ne.s32.totalorder %s12102_s28, 0 }
 0x46e   : > { %p13391_p9 = scmp.ge.s32.totalorder %s5313_s18, 2  ;;  %s4727_s7 = scalar_lea.sflag [#allocation5], %s4726_s9 }
 0x470   : > { %p5052_p5 = pnand %p13391_p9, %p13390_p13 }
 0x472   : > { %5296 = dma.done.wait (!%p5052_p5), %s4727_s7, 768  }
 0x473   : > { %5298 = vsyncadd (!%p5052_p5), %s4727_s7, 4294966528  ;;  %p22_p2 = scmp.ge.s32.totalorder %s5378_s21, 4   ;;  %s13392_s15 = smov %s5305_s16 }
 0x474   : > { %s13393_s16 = smov %s5309_s17  ;;  %s13394_s17 = smov %s5390_s24 }
 0x475   : > { %s13395_s18 = smov %s5378_s21  ;;  %24 = sbr.rel (!%p22_p2) target bundleno = 11 (0xb), region = 112 }
 0x47c   :  { %4732 = vsyncpa [#allocation4], 1 }
 0x47d   :  { %4734 = vsyncpa [#allocation4 + $0x1], 1 }
 0x47e   :  { %4735 = vsyncpa [#allocation8], 1 }
 0x47f   :  { %4737 = vsyncpa [#allocation8 + $0x1], 1 }
 0x480   :  { %4738 = vsyncpa [#allocation5], 1 }
 0x481   :  { %4740 = vsyncpa [#allocation5 + $0x1], 1 }
 0x482   :  { %4741 = vsyncpa [#allocation6], 1 }
 0x483   :  { %4743 = vsyncpa [#allocation6 + $0x1], 1 }
 0x484   :  { %4744 = vsyncpa [#allocation11], 1 }

</bundles_post_ra>
